<compile_context>
chip_gen: v5e
topology: v5e:2x2
jax: 0.10.0
libtpu: 0.0.40
codegen_flags: <defaults>
</compile_context>

<pallas_src>
import functools
import math

import jax
import jax.numpy as jnp
from jax.experimental import pallas as pl
from jax.experimental.pallas import tpu as pltpu

SQRT2 = math.sqrt(2.0)
BN_EPS = 1e-5
VMEM_LIMIT = 32 * 1024 * 1024      # safe on v5e / v6e / v7x


# ----------------------------------------------------------------------------
# helpers
# ----------------------------------------------------------------------------
def _round_up(x, m):
    return (x + m - 1) // m * m


def _gelu_f32(z):
    # exact GELU (PyTorch nn.GELU(approximate='none')), f32 math
    return 0.5 * z * (1.0 + jax.lax.erf(z * (1.0 / SQRT2)))


# ----------------------------------------------------------------------------
# Pallas kernels
# ----------------------------------------------------------------------------
def _conv_bn_stats_kernel(x_ref, w_ref, y_ref, s_ref, ss_ref, *, H, W, Cin, KH, KW):
    """Fused 3x3 conv (in-kernel tap gather) + per-block BN partial sums.

    grid = (batch, Cout tiles)
      x_ref : (1, H+KH-1, W+KW-1, Cin) bf16  -- one zero-padded NHWC image
      w_ref : (KH*KW*Cin, tn)          bf16  -- tap-major / channel-minor K
      y_ref : (1, H*W, tn)             bf16  -- pre-BN conv output
      s_ref, ss_ref : (1, 1, tn)       f32   -- per-image sum(y), sum(y^2)
    """
    tn = w_ref.shape[1]
    acc = jnp.zeros((H * W, tn), jnp.float32)
    taps = [(dy, dx) for dy in range(KH) for dx in range(KW)]
    for t, (dy, dx) in enumerate(taps):
        # shifted window gathered from VMEM (no HBM im2col slab)
        win = x_ref[0, dy:dy + H, dx:dx + W, :].reshape(H * W, Cin)
        acc = acc + jnp.dot(win, w_ref[t * Cin:(t + 1) * Cin, :],
                            preferred_element_type=jnp.float32)
    # store y in bf16; BN partials from the f32 accumulator (pre-cast)
    y_ref[0] = acc.astype(y_ref.dtype)
    s_ref[0] = jnp.sum(acc, axis=0, keepdims=True)
    ss_ref[0] = jnp.sum(acc * acc, axis=0, keepdims=True)


def _bn_gelu_kernel(y_ref, scale_ref, shift_ref, o_ref):
    """Per-element y*scale + shift followed by exact GELU (all math f32)."""
    z = y_ref[...].astype(jnp.float32) * scale_ref[...] + shift_ref[...]
    o_ref[...] = _gelu_f32(z).astype(o_ref.dtype)


# ----------------------------------------------------------------------------
# one Conv layer: Conv2d(3x3,s=1,p=1) + BatchNorm2d(train stats) + GELU
# ----------------------------------------------------------------------------
def conv3x3_bn_gelu(x, p, *, out_dtype=jnp.float32):
    """x: (B, H, W, Cin) float; returns (B, H, W, Cout) in out_dtype.

    The conv bias is intentionally not applied: with training-mode BatchNorm
    it cancels exactly, so the forward output is mathematically identical.
    """
    B, H, W, Cin = x.shape
    w_mat = p["w_mat"]                         # (9*Cin, Cout) bf16
    N = w_mat.shape[1]
    HW = H * W
    M = B * HW

    # lane-align Cout; sublane-align Cin (keeps per-tap weight slices aligned)
    Np = _round_up(N, 128)
    Cp = _round_up(Cin, 8)
    tn = min(512, Np)
    nn = Np // tn

    # parameter-sized weight / affine padding
    w3 = w_mat.reshape(9, Cin, N)
    w3 = jnp.pad(w3, ((0, 0), (0, Cp - Cin), (0, Np - N)))
    w_p = w3.reshape(9 * Cp, Np)
    gamma_p = jnp.pad(p["gamma"].reshape(1, N), ((0, 0), (0, Np - N)))
    beta_p = jnp.pad(p["beta"].reshape(1, N), ((0, 0), (0, Np - N)))

    # single fused pad: 1-pixel spatial halo + channel alignment, bf16 NHWC
    xp = jnp.pad(x.astype(jnp.bfloat16),
                 ((0, 0), (1, 1), (1, 1), (0, Cp - Cin)))

    cparams = pltpu.CompilerParams(
        dimension_semantics=("parallel", "parallel"),
        vmem_limit_bytes=VMEM_LIMIT)

    # ---- pass 1: conv matmul (in-kernel tap gather) + BN partial stats ----
    kern = functools.partial(_conv_bn_stats_kernel,
                             H=H, W=W, Cin=Cp, KH=3, KW=3)
    y, psum, psumsq = pl.pallas_call(
        kern,
        out_shape=(
            jax.ShapeDtypeStruct((B, HW, Np), jnp.bfloat16),   # pre-BN conv out
            jax.ShapeDtypeStruct((B, 1, Np), jnp.float32),     # sum(y)
            jax.ShapeDtypeStruct((B, 1, Np), jnp.float32),     # sum(y^2)
        ),
        grid=(B, nn),
        in_specs=[
            pl.BlockSpec((1, H + 2, W + 2, Cp), lambda b, j: (b, 0, 0, 0)),
            pl.BlockSpec((9 * Cp, tn), lambda b, j: (0, j)),
        ],
        out_specs=(
            pl.BlockSpec((1, HW, tn), lambda b, j: (b, 0, j)),
            pl.BlockSpec((1, 1, tn), lambda b, j: (b, 0, j)),
            pl.BlockSpec((1, 1, tn), lambda b, j: (b, 0, j)),
        ),
        compiler_params=cparams,
    )(xp, w_p)

    # ---- parameter-sized BN statistics (biased variance over N*H*W) ----
    inv_m = 1.0 / float(M)
    mean = jnp.sum(psum, axis=0) * inv_m                         # (1, Np)
    var = jnp.maximum(jnp.sum(psumsq, axis=0) * inv_m - mean * mean, 0.0)
    rstd = jax.lax.rsqrt(var + BN_EPS)
    scale = gamma_p * rstd                                       # (1, Np)
    shift = beta_p - mean * scale                                # (1, Np)

    # ---- pass 2: lane-dense scale/shift + exact GELU epilogue ----
    out = pl.pallas_call(
        _bn_gelu_kernel,
        out_shape=jax.ShapeDtypeStruct((B, HW, Np), out_dtype),
        grid=(B, nn),
        in_specs=[
            pl.BlockSpec((1, HW, tn), lambda b, j: (b, 0, j)),
            pl.BlockSpec((1, tn), lambda b, j: (0, j)),
            pl.BlockSpec((1, tn), lambda b, j: (0, j)),
        ],
        out_specs=pl.BlockSpec((1, HW, tn), lambda b, j: (b, 0, j)),
        compiler_params=cparams,
    )(y, scale, shift)

    return out[:, :, :N].reshape(B, H, W, N)


# ----------------------------------------------------------------------------
# ConvBlock forward (NHWC in, NHWC out)
# ----------------------------------------------------------------------------
def conv_block(x_nhwc, params):
    # inter-layer activation kept bf16 (it only feeds the next bf16 MXU
    # matmul); the block output stays f32 like the PyTorch module.
    h = conv3x3_bn_gelu(x_nhwc, params["c1"], out_dtype=jnp.bfloat16)
    return conv3x3_bn_gelu(h, params["c2"], out_dtype=jnp.float32)


# ----------------------------------------------------------------------------
# deterministic parameters (PyTorch default-style init)
# ----------------------------------------------------------------------------
def make_conv_params(key, cin, cout, k=3):
    k1, k2 = jax.random.split(key)
    bound = 1.0 / math.sqrt(cin * k * k)
    w = jax.random.uniform(k1, (cout, cin, k, k), jnp.float32, -bound, bound)
    b = jax.random.uniform(k2, (cout,), jnp.float32, -bound, bound)
    # (Cout,Cin,kh,kw) -> (kh,kw,Cin,Cout) -> (kh*kw*Cin, Cout): tap-major,
    # channel-minor K layout matching the in-kernel tap gather.
    w_mat = jnp.transpose(w, (2, 3, 1, 0)).reshape(k * k * cin, cout)
    return {
        "w_mat": w_mat.astype(jnp.bfloat16),
        "b": b,                               # unused by the kernel (cancels under BN)
        "gamma": jnp.ones((cout,), jnp.float32),
        "beta": jnp.zeros((cout,), jnp.float32),
    }


def make_conv_block_params(key, cin, cout):
    k1, k2 = jax.random.split(key)
    return {"c1": make_conv_params(k1, cin, cout),
            "c2": make_conv_params(k2, cout, cout)}


# ----------------------------------------------------------------------------
# pure-JAX f32 reference (includes the bias, which BN cancels)
# ----------------------------------------------------------------------------
def _reference_conv_block(x_nchw, params):
    def one(x, p, cin):
        k = 3
        w = p["w_mat"].astype(jnp.float32).reshape(k, k, cin, -1)
        w = jnp.transpose(w, (3, 2, 0, 1))                 # (Cout, Cin, kh, kw)
        y = jax.lax.conv_general_dilated(
            x, w, window_strides=(1, 1), padding=((1, 1), (1, 1)),
            dimension_numbers=("NCHW", "OIHW", "NCHW"))
        y = y + p["b"][None, :, None, None]
        mean = jnp.mean(y, axis=(0, 2, 3), keepdims=True)
        var = jnp.mean((y - mean) ** 2, axis=(0, 2, 3), keepdims=True)
        z = (y - mean) * jax.lax.rsqrt(var + BN_EPS)
        z = z * p["gamma"][None, :, None, None] + p["beta"][None, :, None, None]
        return _gelu_f32(z)

    h = one(x_nchw, params["c1"], x_nchw.shape[1])
    return one(h, params["c2"], h.shape[1])


# ----------------------------------------------------------------------------
if __name__ == "__main__":
    key = jax.random.PRNGKey(0)
    B, Cin, Cout, H, W = 2, 4, 8, 16, 16

    kp, kx = jax.random.split(key)
    params = make_conv_block_params(kp, Cin, Cout)

    x_nchw = jax.random.normal(kx, (B, Cin, H, W), jnp.float32)   # PyTorch layout
    x_nhwc = jnp.transpose(x_nchw, (0, 2, 3, 1))                  # convert once

    fwd = jax.jit(conv_block)
    out_nhwc = jax.block_until_ready(fwd(x_nhwc, params))
    out_nchw = jnp.transpose(out_nhwc, (0, 3, 1, 2))

    assert out_nchw.shape == (B, Cout, H, W), out_nchw.shape
    assert bool(jnp.all(jnp.isfinite(out_nchw)))

    # loose check vs the f32 reference (bf16 MXU inputs / bf16 intermediates)
    ref = _reference_conv_block(x_nchw, params)
    max_err = float(jnp.max(jnp.abs(out_nchw - ref)))
    assert max_err < 1.5e-1, f"max abs error vs reference: {max_err}"

    print("KERNEL_OK")
</pallas_src>

<mosaic_0001>
module attributes {stable_mosaic.version = 11 : i64} {
  func.func @_conv_bn_stats_kernel(%arg0: i32, %arg1: i32, %arg2: memref<1x18x18x8xbf16, #tpu.memory_space<vmem>>, %arg3: memref<72x128xbf16, #tpu.memory_space<vmem>>, %arg4: memref<1x256x128xbf16, #tpu.memory_space<vmem>>, %arg5: memref<1x1x128xf32, #tpu.memory_space<vmem>>, %arg6: memref<1x1x128xf32, #tpu.memory_space<vmem>>) attributes {dimension_semantics = [#tpu.dimension_semantics<parallel>, #tpu.dimension_semantics<parallel>], iteration_bounds = array<i64: 2, 1>, scalar_prefetch = 0 : i64, scratch_operands = 0 : i64, tpu.core_type = #tpu.core_type<tc>, window_params = [{transform_indices = @transform_0, window_bounds = array<i64: 1, 18, 18, 8>}, {transform_indices = @transform_1, window_bounds = array<i64: 72, 128>}, {transform_indices = @transform_2, window_bounds = array<i64: 1, 256, 128>}, {transform_indices = @transform_3, window_bounds = array<i64: 1, 1, 128>}, {transform_indices = @transform_4, window_bounds = array<i64: 1, 1, 128>}]} {
    %cst = arith.constant 0.000000e+00 : f32
    %0 = vector.broadcast %cst : f32 to vector<256x128xf32>
    %c0 = arith.constant 0 : index
    %c0_0 = arith.constant 0 : index
    %c0_1 = arith.constant 0 : index
    %c0_2 = arith.constant 0 : index
    %1 = vector.load %arg2[%c0, %c0_0, %c0_1, %c0_2] : memref<1x18x18x8xbf16, #tpu.memory_space<vmem>>, vector<1x16x16x8xbf16>
    %2 = vector.shape_cast %1 : vector<1x16x16x8xbf16> to vector<16x16x8xbf16>
    %3 = vector.shape_cast %2 : vector<16x16x8xbf16> to vector<256x8xbf16>
    %c0_3 = arith.constant 0 : index
    %c0_4 = arith.constant 0 : index
    %4 = vector.load %arg3[%c0_3, %c0_4] : memref<72x128xbf16, #tpu.memory_space<vmem>>, vector<8x128xbf16>
    %cst_5 = arith.constant dense<0.000000e+00> : vector<256x128xf32>
    %5 = tpu.matmul %3, %4, %cst_5 {dimension_numbers = #tpu.dot_dimension_numbers<[1], [0], [0], [1], [0, 0, 1, 1], [], []>} : vector<256x8xbf16>, vector<8x128xbf16>, vector<256x128xf32> -> vector<256x128xf32>
    %6 = arith.addf %0, %5 : vector<256x128xf32>
    %c0_6 = arith.constant 0 : index
    %c0_7 = arith.constant 0 : index
    %c1 = arith.constant 1 : index
    %c0_8 = arith.constant 0 : index
    %7 = vector.load %arg2[%c0_6, %c0_7, %c1, %c0_8] : memref<1x18x18x8xbf16, #tpu.memory_space<vmem>>, vector<1x16x16x8xbf16>
    %8 = vector.shape_cast %7 : vector<1x16x16x8xbf16> to vector<16x16x8xbf16>
    %9 = vector.shape_cast %8 : vector<16x16x8xbf16> to vector<256x8xbf16>
    %c8 = arith.constant 8 : index
    %c0_9 = arith.constant 0 : index
    %10 = vector.load %arg3[%c8, %c0_9] : memref<72x128xbf16, #tpu.memory_space<vmem>>, vector<8x128xbf16>
    %cst_10 = arith.constant dense<0.000000e+00> : vector<256x128xf32>
    %11 = tpu.matmul %9, %10, %cst_10 {dimension_numbers = #tpu.dot_dimension_numbers<[1], [0], [0], [1], [0, 0, 1, 1], [], []>} : vector<256x8xbf16>, vector<8x128xbf16>, vector<256x128xf32> -> vector<256x128xf32>
    %12 = arith.addf %6, %11 : vector<256x128xf32>
    %c0_11 = arith.constant 0 : index
    %c0_12 = arith.constant 0 : index
    %c2 = arith.constant 2 : index
    %c0_13 = arith.constant 0 : index
    %13 = vector.load %arg2[%c0_11, %c0_12, %c2, %c0_13] : memref<1x18x18x8xbf16, #tpu.memory_space<vmem>>, vector<1x16x16x8xbf16>
    %14 = vector.shape_cast %13 : vector<1x16x16x8xbf16> to vector<16x16x8xbf16>
    %15 = vector.shape_cast %14 : vector<16x16x8xbf16> to vector<256x8xbf16>
    %c16 = arith.constant 16 : index
    %c0_14 = arith.constant 0 : index
    %16 = vector.load %arg3[%c16, %c0_14] : memref<72x128xbf16, #tpu.memory_space<vmem>>, vector<8x128xbf16>
    %cst_15 = arith.constant dense<0.000000e+00> : vector<256x128xf32>
    %17 = tpu.matmul %15, %16, %cst_15 {dimension_numbers = #tpu.dot_dimension_numbers<[1], [0], [0], [1], [0, 0, 1, 1], [], []>} : vector<256x8xbf16>, vector<8x128xbf16>, vector<256x128xf32> -> vector<256x128xf32>
    %18 = arith.addf %12, %17 : vector<256x128xf32>
    %c0_16 = arith.constant 0 : index
    %c1_17 = arith.constant 1 : index
    %c0_18 = arith.constant 0 : index
    %c0_19 = arith.constant 0 : index
    %19 = vector.load %arg2[%c0_16, %c1_17, %c0_18, %c0_19] : memref<1x18x18x8xbf16, #tpu.memory_space<vmem>>, vector<1x16x16x8xbf16>
    %20 = vector.shape_cast %19 : vector<1x16x16x8xbf16> to vector<16x16x8xbf16>
    %21 = vector.shape_cast %20 : vector<16x16x8xbf16> to vector<256x8xbf16>
    %c24 = arith.constant 24 : index
    %c0_20 = arith.constant 0 : index
    %22 = vector.load %arg3[%c24, %c0_20] : memref<72x128xbf16, #tpu.memory_space<vmem>>, vector<8x128xbf16>
    %cst_21 = arith.constant dense<0.000000e+00> : vector<256x128xf32>
    %23 = tpu.matmul %21, %22, %cst_21 {dimension_numbers = #tpu.dot_dimension_numbers<[1], [0], [0], [1], [0, 0, 1, 1], [], []>} : vector<256x8xbf16>, vector<8x128xbf16>, vector<256x128xf32> -> vector<256x128xf32>
    %24 = arith.addf %18, %23 : vector<256x128xf32>
    %c0_22 = arith.constant 0 : index
    %c1_23 = arith.constant 1 : index
    %c1_24 = arith.constant 1 : index
    %c0_25 = arith.constant 0 : index
    %25 = vector.load %arg2[%c0_22, %c1_23, %c1_24, %c0_25] : memref<1x18x18x8xbf16, #tpu.memory_space<vmem>>, vector<1x16x16x8xbf16>
    %26 = vector.shape_cast %25 : vector<1x16x16x8xbf16> to vector<16x16x8xbf16>
    %27 = vector.shape_cast %26 : vector<16x16x8xbf16> to vector<256x8xbf16>
    %c32 = arith.constant 32 : index
    %c0_26 = arith.constant 0 : index
    %28 = vector.load %arg3[%c32, %c0_26] : memref<72x128xbf16, #tpu.memory_space<vmem>>, vector<8x128xbf16>
    %cst_27 = arith.constant dense<0.000000e+00> : vector<256x128xf32>
    %29 = tpu.matmul %27, %28, %cst_27 {dimension_numbers = #tpu.dot_dimension_numbers<[1], [0], [0], [1], [0, 0, 1, 1], [], []>} : vector<256x8xbf16>, vector<8x128xbf16>, vector<256x128xf32> -> vector<256x128xf32>
    %30 = arith.addf %24, %29 : vector<256x128xf32>
    %c0_28 = arith.constant 0 : index
    %c1_29 = arith.constant 1 : index
    %c2_30 = arith.constant 2 : index
    %c0_31 = arith.constant 0 : index
    %31 = vector.load %arg2[%c0_28, %c1_29, %c2_30, %c0_31] : memref<1x18x18x8xbf16, #tpu.memory_space<vmem>>, vector<1x16x16x8xbf16>
    %32 = vector.shape_cast %31 : vector<1x16x16x8xbf16> to vector<16x16x8xbf16>
    %33 = vector.shape_cast %32 : vector<16x16x8xbf16> to vector<256x8xbf16>
    %c40 = arith.constant 40 : index
    %c0_32 = arith.constant 0 : index
    %34 = vector.load %arg3[%c40, %c0_32] : memref<72x128xbf16, #tpu.memory_space<vmem>>, vector<8x128xbf16>
    %cst_33 = arith.constant dense<0.000000e+00> : vector<256x128xf32>
    %35 = tpu.matmul %33, %34, %cst_33 {dimension_numbers = #tpu.dot_dimension_numbers<[1], [0], [0], [1], [0, 0, 1, 1], [], []>} : vector<256x8xbf16>, vector<8x128xbf16>, vector<256x128xf32> -> vector<256x128xf32>
    %36 = arith.addf %30, %35 : vector<256x128xf32>
    %c0_34 = arith.constant 0 : index
    %c2_35 = arith.constant 2 : index
    %c0_36 = arith.constant 0 : index
    %c0_37 = arith.constant 0 : index
    %37 = vector.load %arg2[%c0_34, %c2_35, %c0_36, %c0_37] : memref<1x18x18x8xbf16, #tpu.memory_space<vmem>>, vector<1x16x16x8xbf16>
    %38 = vector.shape_cast %37 : vector<1x16x16x8xbf16> to vector<16x16x8xbf16>
    %39 = vector.shape_cast %38 : vector<16x16x8xbf16> to vector<256x8xbf16>
    %c48 = arith.constant 48 : index
    %c0_38 = arith.constant 0 : index
    %40 = vector.load %arg3[%c48, %c0_38] : memref<72x128xbf16, #tpu.memory_space<vmem>>, vector<8x128xbf16>
    %cst_39 = arith.constant dense<0.000000e+00> : vector<256x128xf32>
    %41 = tpu.matmul %39, %40, %cst_39 {dimension_numbers = #tpu.dot_dimension_numbers<[1], [0], [0], [1], [0, 0, 1, 1], [], []>} : vector<256x8xbf16>, vector<8x128xbf16>, vector<256x128xf32> -> vector<256x128xf32>
    %42 = arith.addf %36, %41 : vector<256x128xf32>
    %c0_40 = arith.constant 0 : index
    %c2_41 = arith.constant 2 : index
    %c1_42 = arith.constant 1 : index
    %c0_43 = arith.constant 0 : index
    %43 = vector.load %arg2[%c0_40, %c2_41, %c1_42, %c0_43] : memref<1x18x18x8xbf16, #tpu.memory_space<vmem>>, vector<1x16x16x8xbf16>
    %44 = vector.shape_cast %43 : vector<1x16x16x8xbf16> to vector<16x16x8xbf16>
    %45 = vector.shape_cast %44 : vector<16x16x8xbf16> to vector<256x8xbf16>
    %c56 = arith.constant 56 : index
    %c0_44 = arith.constant 0 : index
    %46 = vector.load %arg3[%c56, %c0_44] : memref<72x128xbf16, #tpu.memory_space<vmem>>, vector<8x128xbf16>
    %cst_45 = arith.constant dense<0.000000e+00> : vector<256x128xf32>
    %47 = tpu.matmul %45, %46, %cst_45 {dimension_numbers = #tpu.dot_dimension_numbers<[1], [0], [0], [1], [0, 0, 1, 1], [], []>} : vector<256x8xbf16>, vector<8x128xbf16>, vector<256x128xf32> -> vector<256x128xf32>
    %48 = arith.addf %42, %47 : vector<256x128xf32>
    %c0_46 = arith.constant 0 : index
    %c2_47 = arith.constant 2 : index
    %c2_48 = arith.constant 2 : index
    %c0_49 = arith.constant 0 : index
    %49 = vector.load %arg2[%c0_46, %c2_47, %c2_48, %c0_49] : memref<1x18x18x8xbf16, #tpu.memory_space<vmem>>, vector<1x16x16x8xbf16>
    %50 = vector.shape_cast %49 : vector<1x16x16x8xbf16> to vector<16x16x8xbf16>
    %51 = vector.shape_cast %50 : vector<16x16x8xbf16> to vector<256x8xbf16>
    %c64 = arith.constant 64 : index
    %c0_50 = arith.constant 0 : index
    %52 = vector.load %arg3[%c64, %c0_50] : memref<72x128xbf16, #tpu.memory_space<vmem>>, vector<8x128xbf16>
    %cst_51 = arith.constant dense<0.000000e+00> : vector<256x128xf32>
    %53 = tpu.matmul %51, %52, %cst_51 {dimension_numbers = #tpu.dot_dimension_numbers<[1], [0], [0], [1], [0, 0, 1, 1], [], []>} : vector<256x8xbf16>, vector<8x128xbf16>, vector<256x128xf32> -> vector<256x128xf32>
    %54 = arith.addf %48, %53 : vector<256x128xf32>
    %55 = arith.truncf %54 : vector<256x128xf32> to vector<256x128xbf16>
    %c0_52 = arith.constant 0 : index
    %c0_53 = arith.constant 0 : index
    %c0_54 = arith.constant 0 : index
    %56 = vector.load %arg4[%c0_52, %c0_53, %c0_54] : memref<1x256x128xbf16, #tpu.memory_space<vmem>>, vector<1x256x128xbf16>
    %57 = vector.shape_cast %56 : vector<1x256x128xbf16> to vector<256x128xbf16>
    %58 = vector.shape_cast %55 : vector<256x128xbf16> to vector<1x256x128xbf16>
    tpu.vector_store %arg4[%c0_52, %c0_53, %c0_54], %58 {strides = array<i32>} : memref<1x256x128xbf16, #tpu.memory_space<vmem>>, vector<1x256x128xbf16>,
    %cst_55 = arith.constant dense<0.000000e+00> : vector<128xf32>
    %59 = vector.multi_reduction <add>, %54, %cst_55 [0] : vector<256x128xf32> to vector<128xf32>
    %60 = vector.shape_cast %59 : vector<128xf32> to vector<1x128xf32>
    %c0_56 = arith.constant 0 : index
    %c0_57 = arith.constant 0 : index
    %c0_58 = arith.constant 0 : index
    %61 = vector.load %arg5[%c0_56, %c0_57, %c0_58] : memref<1x1x128xf32, #tpu.memory_space<vmem>>, vector<1x1x128xf32>
    %62 = vector.shape_cast %61 : vector<1x1x128xf32> to vector<1x128xf32>
    %63 = vector.shape_cast %60 : vector<1x128xf32> to vector<1x1x128xf32>
    tpu.vector_store %arg5[%c0_56, %c0_57, %c0_58], %63 {strides = array<i32>} : memref<1x1x128xf32, #tpu.memory_space<vmem>>, vector<1x1x128xf32>,
    %64 = arith.mulf %54, %54 : vector<256x128xf32>
    %cst_59 = arith.constant dense<0.000000e+00> : vector<128xf32>
    %65 = vector.multi_reduction <add>, %64, %cst_59 [0] : vector<256x128xf32> to vector<128xf32>
    %66 = vector.shape_cast %65 : vector<128xf32> to vector<1x128xf32>
    %c0_60 = arith.constant 0 : index
    %c0_61 = arith.constant 0 : index
    %c0_62 = arith.constant 0 : index
    %67 = vector.load %arg6[%c0_60, %c0_61, %c0_62] : memref<1x1x128xf32, #tpu.memory_space<vmem>>, vector<1x1x128xf32>
    %68 = vector.shape_cast %67 : vector<1x1x128xf32> to vector<1x128xf32>
    %69 = vector.shape_cast %66 : vector<1x128xf32> to vector<1x1x128xf32>
    tpu.vector_store %arg6[%c0_60, %c0_61, %c0_62], %69 {strides = array<i32>} : memref<1x1x128xf32, #tpu.memory_space<vmem>>, vector<1x1x128xf32>,
    return
  }
  func.func @transform_0(%arg0: i32, %arg1: i32) -> (i32, i32, i32, i32) {
    %c0_i32 = arith.constant 0 : i32
    %c0_i32_0 = arith.constant 0 : i32
    %c0_i32_1 = arith.constant 0 : i32
    %c0_i32_2 = arith.constant 0 : i32
    return %arg0, %c0_i32, %c0_i32_0, %c0_i32_1 : i32, i32, i32, i32
  }
  func.func @transform_1(%arg0: i32, %arg1: i32) -> (i32, i32) {
    %c0_i32 = arith.constant 0 : i32
    %c0_i32_0 = arith.constant 0 : i32
    return %c0_i32, %arg1 : i32, i32
  }
  func.func @transform_2(%arg0: i32, %arg1: i32) -> (i32, i32, i32) {
    %c0_i32 = arith.constant 0 : i32
    %c0_i32_0 = arith.constant 0 : i32
    return %arg0, %c0_i32, %arg1 : i32, i32, i32
  }
  func.func @transform_3(%arg0: i32, %arg1: i32) -> (i32, i32, i32) {
    %c0_i32 = arith.constant 0 : i32
    %c0_i32_0 = arith.constant 0 : i32
    return %arg0, %c0_i32, %arg1 : i32, i32, i32
  }
  func.func @transform_4(%arg0: i32, %arg1: i32) -> (i32, i32, i32) {
    %c0_i32 = arith.constant 0 : i32
    %c0_i32_0 = arith.constant 0 : i32
    return %arg0, %c0_i32, %arg1 : i32, i32, i32
  }
}

module attributes {stable_mosaic.version = 11 : i64} {
  func.func @_bn_gelu_kernel(%arg0: i32, %arg1: i32, %arg2: memref<1x256x128xbf16, #tpu.memory_space<vmem>>, %arg3: memref<1x128xf32, #tpu.memory_space<vmem>>, %arg4: memref<1x128xf32, #tpu.memory_space<vmem>>, %arg5: memref<1x256x128xbf16, #tpu.memory_space<vmem>>) attributes {dimension_semantics = [#tpu.dimension_semantics<parallel>, #tpu.dimension_semantics<parallel>], iteration_bounds = array<i64: 2, 1>, scalar_prefetch = 0 : i64, scratch_operands = 0 : i64, tpu.core_type = #tpu.core_type<tc>, window_params = [{transform_indices = @transform_0, window_bounds = array<i64: 1, 256, 128>}, {transform_indices = @transform_1, window_bounds = array<i64: 1, 128>}, {transform_indices = @transform_2, window_bounds = array<i64: 1, 128>}, {transform_indices = @transform_3, window_bounds = array<i64: 1, 256, 128>}]} {
    %c0 = arith.constant 0 : index
    %c0_0 = arith.constant 0 : index
    %c0_1 = arith.constant 0 : index
    %0 = vector.load %arg2[%c0, %c0_0, %c0_1] : memref<1x256x128xbf16, #tpu.memory_space<vmem>>, vector<1x256x128xbf16>
    %1 = arith.extf %0 : vector<1x256x128xbf16> to vector<1x256x128xf32>
    %c0_2 = arith.constant 0 : index
    %c0_3 = arith.constant 0 : index
    %2 = vector.load %arg3[%c0_2, %c0_3] : memref<1x128xf32, #tpu.memory_space<vmem>>, vector<1x128xf32>
    %3 = vector.shape_cast %2 : vector<1x128xf32> to vector<1x1x128xf32>
    %4 = vector.broadcast %3 : vector<1x1x128xf32> to vector<1x256x128xf32>
    %5 = arith.mulf %1, %4 : vector<1x256x128xf32>
    %c0_4 = arith.constant 0 : index
    %c0_5 = arith.constant 0 : index
    %6 = vector.load %arg4[%c0_4, %c0_5] : memref<1x128xf32, #tpu.memory_space<vmem>>, vector<1x128xf32>
    %7 = vector.shape_cast %6 : vector<1x128xf32> to vector<1x1x128xf32>
    %8 = vector.broadcast %7 : vector<1x1x128xf32> to vector<1x256x128xf32>
    %9 = arith.addf %5, %8 : vector<1x256x128xf32>
    %cst = arith.constant 5.000000e-01 : f32
    %10 = vector.broadcast %cst : f32 to vector<1x256x128xf32>
    %11 = arith.mulf %10, %9 : vector<1x256x128xf32>
    %cst_6 = arith.constant 0.707106769 : f32
    %12 = vector.broadcast %cst_6 : f32 to vector<1x256x128xf32>
    %13 = arith.mulf %9, %12 : vector<1x256x128xf32>
    %14 = math.erf %13 : vector<1x256x128xf32>
    %cst_7 = arith.constant 1.000000e+00 : f32
    %15 = vector.broadcast %cst_7 : f32 to vector<1x256x128xf32>
    %16 = arith.addf %15, %14 : vector<1x256x128xf32>
    %17 = arith.mulf %11, %16 : vector<1x256x128xf32>
    %18 = arith.truncf %17 : vector<1x256x128xf32> to vector<1x256x128xbf16>
    %c0_8 = arith.constant 0 : index
    %c0_9 = arith.constant 0 : index
    %c0_10 = arith.constant 0 : index
    %19 = vector.load %arg5[%c0_8, %c0_9, %c0_10] : memref<1x256x128xbf16, #tpu.memory_space<vmem>>, vector<1x256x128xbf16>
    tpu.vector_store %arg5[%c0_8, %c0_9, %c0_10], %18 {strides = array<i32>} : memref<1x256x128xbf16, #tpu.memory_space<vmem>>, vector<1x256x128xbf16>,
    return
  }
  func.func @transform_0(%arg0: i32, %arg1: i32) -> (i32, i32, i32) {
    %c0_i32 = arith.constant 0 : i32
    %c0_i32_0 = arith.constant 0 : i32
    return %arg0, %c0_i32, %arg1 : i32, i32, i32
  }
  func.func @transform_1(%arg0: i32, %arg1: i32) -> (i32, i32) {
    %c0_i32 = arith.constant 0 : i32
    %c0_i32_0 = arith.constant 0 : i32
    return %c0_i32, %arg1 : i32, i32
  }
  func.func @transform_2(%arg0: i32, %arg1: i32) -> (i32, i32) {
    %c0_i32 = arith.constant 0 : i32
    %c0_i32_0 = arith.constant 0 : i32
    return %c0_i32, %arg1 : i32, i32
  }
  func.func @transform_3(%arg0: i32, %arg1: i32) -> (i32, i32, i32) {
    %c0_i32 = arith.constant 0 : i32
    %c0_i32_0 = arith.constant 0 : i32
    return %arg0, %c0_i32, %arg1 : i32, i32, i32
  }
}

module attributes {stable_mosaic.version = 11 : i64} {
  func.func @_bn_gelu_kernel(%arg0: i32, %arg1: i32, %arg2: memref<1x256x128xbf16, #tpu.memory_space<vmem>>, %arg3: memref<1x128xf32, #tpu.memory_space<vmem>>, %arg4: memref<1x128xf32, #tpu.memory_space<vmem>>, %arg5: memref<1x256x128xf32, #tpu.memory_space<vmem>>) attributes {dimension_semantics = [#tpu.dimension_semantics<parallel>, #tpu.dimension_semantics<parallel>], iteration_bounds = array<i64: 2, 1>, scalar_prefetch = 0 : i64, scratch_operands = 0 : i64, tpu.core_type = #tpu.core_type<tc>, window_params = [{transform_indices = @transform_0, window_bounds = array<i64: 1, 256, 128>}, {transform_indices = @transform_1, window_bounds = array<i64: 1, 128>}, {transform_indices = @transform_2, window_bounds = array<i64: 1, 128>}, {transform_indices = @transform_3, window_bounds = array<i64: 1, 256, 128>}]} {
    %c0 = arith.constant 0 : index
    %c0_0 = arith.constant 0 : index
    %c0_1 = arith.constant 0 : index
    %0 = vector.load %arg2[%c0, %c0_0, %c0_1] : memref<1x256x128xbf16, #tpu.memory_space<vmem>>, vector<1x256x128xbf16>
    %1 = arith.extf %0 : vector<1x256x128xbf16> to vector<1x256x128xf32>
    %c0_2 = arith.constant 0 : index
    %c0_3 = arith.constant 0 : index
    %2 = vector.load %arg3[%c0_2, %c0_3] : memref<1x128xf32, #tpu.memory_space<vmem>>, vector<1x128xf32>
    %3 = vector.shape_cast %2 : vector<1x128xf32> to vector<1x1x128xf32>
    %4 = vector.broadcast %3 : vector<1x1x128xf32> to vector<1x256x128xf32>
    %5 = arith.mulf %1, %4 : vector<1x256x128xf32>
    %c0_4 = arith.constant 0 : index
    %c0_5 = arith.constant 0 : index
    %6 = vector.load %arg4[%c0_4, %c0_5] : memref<1x128xf32, #tpu.memory_space<vmem>>, vector<1x128xf32>
    %7 = vector.shape_cast %6 : vector<1x128xf32> to vector<1x1x128xf32>
    %8 = vector.broadcast %7 : vector<1x1x128xf32> to vector<1x256x128xf32>
    %9 = arith.addf %5, %8 : vector<1x256x128xf32>
    %cst = arith.constant 5.000000e-01 : f32
    %10 = vector.broadcast %cst : f32 to vector<1x256x128xf32>
    %11 = arith.mulf %10, %9 : vector<1x256x128xf32>
    %cst_6 = arith.constant 0.707106769 : f32
    %12 = vector.broadcast %cst_6 : f32 to vector<1x256x128xf32>
    %13 = arith.mulf %9, %12 : vector<1x256x128xf32>
    %14 = math.erf %13 : vector<1x256x128xf32>
    %cst_7 = arith.constant 1.000000e+00 : f32
    %15 = vector.broadcast %cst_7 : f32 to vector<1x256x128xf32>
    %16 = arith.addf %15, %14 : vector<1x256x128xf32>
    %17 = arith.mulf %11, %16 : vector<1x256x128xf32>
    %c0_8 = arith.constant 0 : index
    %c0_9 = arith.constant 0 : index
    %c0_10 = arith.constant 0 : index
    %18 = vector.load %arg5[%c0_8, %c0_9, %c0_10] : memref<1x256x128xf32, #tpu.memory_space<vmem>>, vector<1x256x128xf32>
    tpu.vector_store %arg5[%c0_8, %c0_9, %c0_10], %17 {strides = array<i32>} : memref<1x256x128xf32, #tpu.memory_space<vmem>>, vector<1x256x128xf32>,
    return
  }
  func.func @transform_0(%arg0: i32, %arg1: i32) -> (i32, i32, i32) {
    %c0_i32 = arith.constant 0 : i32
    %c0_i32_0 = arith.constant 0 : i32
    return %arg0, %c0_i32, %arg1 : i32, i32, i32
  }
  func.func @transform_1(%arg0: i32, %arg1: i32) -> (i32, i32) {
    %c0_i32 = arith.constant 0 : i32
    %c0_i32_0 = arith.constant 0 : i32
    return %c0_i32, %arg1 : i32, i32
  }
  func.func @transform_2(%arg0: i32, %arg1: i32) -> (i32, i32) {
    %c0_i32 = arith.constant 0 : i32
    %c0_i32_0 = arith.constant 0 : i32
    return %c0_i32, %arg1 : i32, i32
  }
  func.func @transform_3(%arg0: i32, %arg1: i32) -> (i32, i32, i32) {
    %c0_i32 = arith.constant 0 : i32
    %c0_i32_0 = arith.constant 0 : i32
    return %arg0, %c0_i32, %arg1 : i32, i32, i32
  }
}

</mosaic_0001>

<bundles_post_ra>
// kernel: conv_block.5
= control target key start
LH: loop header
LB: loop body
LE: loop exit
PB: predicated region body
PF: predicated region fallthrough
CT: control target
= control target key end

     0   :  { %s2301_s12 = smov 0   ;;  %s2303_s13 = smov 0   ;;  %s4298_s0 = inlined_call_operand.vmem [shape: bf16[2,256,128], index: 0, kind: input, shape index: {}]   ;;  %s4299_s1 = inlined_call_operand.vmem [shape: f32[1,128], index: 1, kind: input, shape index: {}]   ;;  %s4300_s2 = inlined_call_operand.vmem [shape: f32[1,128], index: 2, kind: input, shape index: {}]   ;;  %s4301_s3 = inlined_call_operand.vmem [shape: bf16[2,256,128], index: 3, kind: output, shape index: {}]  }
   0x1   :  { %s2305_s14 = smov 0  }
   0x2 LB: > { %s25_s15 = sadd.s32 1, %s2275_s13  ;;  %p1952_p0 = scmp.ge.s32.totalorder %s2279_s14, 1  ;;  %s2279_s14 = sphi %s2305_s14, %s13_s14   ;;  %s2275_s13 = sphi %s2303_s13, %s4538_s13   ;;  %s2271_s12 = sphi %s2301_s12, %s4537_s12  }
   0x3   : > { %p27_p1 = scmp.ge.s32.totalorder %s25_s15, 2  ;;  %p172_p2 = scmp.lt.s32.totalorder %s2279_s14, 3 }
   0x5   : > { %s4540_s15 = smov (%p27_p1, %s25_s15), 0  ;;  %p173_p3 = pnand %p1952_p0, %p172_p2 }
   0x7   : > { %176 = sbr.rel (%p173_p3) target bundleno = 404 (0x194), region = 32 }
   0xc   : > { %p208_p4 = scmp.lt.s32.totalorder %s2271_s12, 1  ;;  %v2346_v30 = vld [vmem:[%s4299_s1] ss:$0 sm:$0xff] }
   0xe   : > { %s4542_s12 = smov (!%p208_p4, %s2271_s12), 1 }
   0xf   : > { %s1991_s16 = sshll.u32 %s4542_s12, 7 }
  0x10   : > { %s2327_s19 = scalar_lea.vmem %s4298_s0, %s1991_s16  ;;  %s4246_s26 = scalar_lea.vmem %s4301_s3, %s1991_s16 }
  0x11   : > { %v1994_v0 = vld [vmem:[%s2327_s19] sm:$0xff]   ;;  %v2137_v1 = vld [vmem:[%s2327_s19 + $0x8] sm:$0xff]   ;;  %v2138_v2 = vld [vmem:[%s2327_s19 + $0x10] sm:$0xff]  }
  0x12   : > { %v2139_v3 = vld [vmem:[%s2327_s19 + $0x18] sm:$0xff]   ;;  %v2140_v4 = vld [vmem:[%s2327_s19 + $0x20] sm:$0xff]   ;;  %v2141_v5 = vld [vmem:[%s2327_s19 + $0x28] sm:$0xff]   ;;  %v1995_v6 = vunpack.c.l.bf16 %v1994_v0  ;;  %v1996_v7 = vunpack.c.h.bf16 %v1994_v0  ;;  %v1999_v8 = vunpack.c.l.bf16 %v2137_v1  ;;  %v2000_v9 = vunpack.c.h.bf16 %v2137_v1 }
  0x13   : > { %v2142_v10 = vld [vmem:[%s2327_s19 + $0x30] sm:$0xff]   ;;  %v2143_v11 = vld [vmem:[%s2327_s19 + $0x38] sm:$0xff]   ;;  %v2003_v12 = vunpack.c.l.bf16 %v2138_v2  ;;  %v2004_v13 = vunpack.c.h.bf16 %v2138_v2  ;;  %v2007_v14 = vunpack.c.l.bf16 %v2139_v3  ;;  %v2008_v15 = vunpack.c.h.bf16 %v2139_v3  ;;  %v2144_v16 = vld [vmem:[%s2327_s19 + $0x40] sm:$0xff]  }
  0x14   : > { %v2145_v17 = vld [vmem:[%s2327_s19 + $0x48] sm:$0xff]   ;;  %v2011_v18 = vunpack.c.l.bf16 %v2140_v4  ;;  %v2012_v19 = vunpack.c.h.bf16 %v2140_v4  ;;  %v2015_v20 = vunpack.c.l.bf16 %v2141_v5  ;;  %v2016_v21 = vunpack.c.h.bf16 %v2141_v5  ;;  %v2146_v22 = vld [vmem:[%s2327_s19 + $0x50] sm:$0xff]   ;;  %v2147_v23 = vld [vmem:[%s2327_s19 + $0x58] sm:$0xff]  }
  0x15   : > { %v2019_v24 = vunpack.c.l.bf16 %v2142_v10  ;;  %v2020_v25 = vunpack.c.h.bf16 %v2142_v10  ;;  %v2023_v26 = vunpack.c.l.bf16 %v2143_v11  ;;  %v2024_v27 = vunpack.c.h.bf16 %v2143_v11  ;;  %v2148_v28 = vld [vmem:[%s2327_s19 + $0x60] sm:$0xff]   ;;  %v2149_v29 = vld [vmem:[%s2327_s19 + $0x68] sm:$0xff]   ;;  %v2150_v35 = vld [vmem:[%s2327_s19 + $0x70] sm:$0xff]  }
  0x16   : > { %v2027_v31 = vunpack.c.l.bf16 %v2144_v16  ;;  %v2028_v32 = vunpack.c.h.bf16 %v2144_v16  ;;  %v2031_v33 = vunpack.c.l.bf16 %v2145_v17  ;;  %v2032_v34 = vunpack.c.h.bf16 %v2145_v17  ;;  %v2350_v36 = vld [vmem:[%s2327_s19 + $0x78] sm:$0xff]   ;;  %v2373_v1 = vld [vmem:[%s4300_s2] ss:$0 sm:$0xff] }
  0x17   : > { %v2035_v37 = vunpack.c.l.bf16 %v2146_v22  ;;  %v2036_v38 = vunpack.c.h.bf16 %v2146_v22  ;;  %v2039_v39 = vunpack.c.l.bf16 %v2147_v23  ;;  %v2040_v40 = vunpack.c.h.bf16 %v2147_v23 }
  0x18   : > { %v2043_v41 = vunpack.c.l.bf16 %v2148_v28  ;;  %v2044_v42 = vunpack.c.h.bf16 %v2148_v28  ;;  %v2047_v43 = vunpack.c.l.bf16 %v2149_v29  ;;  %v2048_v44 = vunpack.c.h.bf16 %v2149_v29 }
  0x19   : > { %v2051_v45 = vunpack.c.l.bf16 %v2150_v35  ;;  %v2052_v46 = vunpack.c.h.bf16 %v2150_v35  ;;  %v2055_v47 = vunpack.c.l.bf16 %v2350_v36  ;;  %v298_v48 = vmul.f32 %v2346_v30, %v1995_v6 }
  0x1a   : > { %v299_v49 = vmul.f32 %v2346_v30, %v1996_v7  ;;  %v300_v50 = vmul.f32 %v2346_v30, %v1999_v8  ;;  %v301_v51 = vmul.f32 %v2346_v30, %v2000_v9  ;;  %v302_v52 = vmul.f32 %v2346_v30, %v2003_v12 }
  0x1b   : > { %v303_v53 = vmul.f32 %v2346_v30, %v2004_v13  ;;  %v304_v54 = vmul.f32 %v2346_v30, %v2007_v14  ;;  %v305_v55 = vmul.f32 %v2346_v30, %v2008_v15  ;;  %v306_v56 = vmul.f32 %v2346_v30, %v2011_v18 }
  0x1c   : > { %v307_v57 = vmul.f32 %v2346_v30, %v2012_v19  ;;  %v308_v58 = vmul.f32 %v2346_v30, %v2015_v20  ;;  %v309_v59 = vmul.f32 %v2346_v30, %v2016_v21  ;;  %v310_v60 = vmul.f32 %v2346_v30, %v2019_v24 }
  0x1d   : > { %v311_v61 = vmul.f32 %v2346_v30, %v2020_v25  ;;  %v312_v62 = vmul.f32 %v2346_v30, %v2023_v26  ;;  %v313_v63 = vmul.f32 %v2346_v30, %v2024_v27  ;;  %v314_v0 = vmul.f32 %v2346_v30, %v2027_v31 }
  0x1e   : > { %v315_v2 = vmul.f32 %v2346_v30, %v2028_v32  ;;  %v316_v3 = vmul.f32 %v2346_v30, %v2031_v33  ;;  %v317_v4 = vmul.f32 %v2346_v30, %v2032_v34  ;;  %v318_v5 = vmul.f32 %v2346_v30, %v2035_v37 }
  0x1f   : > { %v319_v6 = vmul.f32 %v2346_v30, %v2036_v38  ;;  %v320_v7 = vmul.f32 %v2346_v30, %v2039_v39  ;;  %v321_v8 = vmul.f32 %v2346_v30, %v2040_v40  ;;  %v322_v9 = vmul.f32 %v2346_v30, %v2043_v41 }
  0x20   : > { %v323_v10 = vmul.f32 %v2346_v30, %v2044_v42  ;;  %v324_v11 = vmul.f32 %v2346_v30, %v2047_v43  ;;  %v2386_v12 = vmul.f32 %v2346_v30, %v2048_v44  ;;  %v2389_v13 = vmul.f32 %v2346_v30, %v2051_v45 }
  0x21   : > { %v2392_v14 = vmul.f32 %v2346_v30, %v2052_v46  ;;  %v2395_v15 = vmul.f32 %v2346_v30, %v2055_v47  ;;  %v334_v16 = vadd.f32 %v2373_v1, %v298_v48  ;;  %v335_v17 = vadd.f32 %v2373_v1, %v299_v49 }
  0x22   : > { %v336_v18 = vadd.f32 %v2373_v1, %v300_v50  ;;  %v337_v19 = vadd.f32 %v2373_v1, %v301_v51  ;;  %v2402_v20 = vadd.f32 %v2373_v1, %v302_v52  ;;  %v2405_v21 = vadd.f32 %v2373_v1, %v303_v53 }
  0x23   : > { %v2408_v22 = vadd.f32 %v2373_v1, %v304_v54  ;;  %v2411_v23 = vadd.f32 %v2373_v1, %v305_v55  ;;  %v2414_v24 = vadd.f32 %v2373_v1, %v306_v56  ;;  %v2417_v25 = vadd.f32 %v2373_v1, %v307_v57 }
  0x24   : > { %v2420_v26 = vadd.f32 %v2373_v1, %v308_v58  ;;  %v2423_v27 = vadd.f32 %v2373_v1, %v309_v59  ;;  %v2426_v28 = vadd.f32 %v2373_v1, %v310_v60  ;;  %v2429_v29 = vadd.f32 %v2373_v1, %v311_v61 }
  0x25   : > { %v2432_v31 = vadd.f32 %v2373_v1, %v312_v62  ;;  %v2435_v32 = vadd.f32 %v2373_v1, %v313_v63  ;;  %v2438_v33 = vadd.f32 %v2373_v1, %v314_v0  ;;  %v2441_v34 = vadd.f32 %v2373_v1, %v315_v2 }
  0x26   : > { %v2444_v35 = vadd.f32 %v2373_v1, %v316_v3  ;;  %v2447_v37 = vadd.f32 %v2373_v1, %v317_v4  ;;  %v2450_v38 = vadd.f32 %v2373_v1, %v318_v5  ;;  %v2453_v39 = vadd.f32 %v2373_v1, %v319_v6 }
  0x27   : > { %v2456_v40 = vadd.f32 %v2373_v1, %v320_v7  ;;  %v2459_v41 = vadd.f32 %v2373_v1, %v321_v8  ;;  %v2462_v42 = vadd.f32 %v2373_v1, %v322_v9  ;;  %v2465_v43 = vadd.f32 %v2373_v1, %v323_v10 }
  0x28   : > { %v2468_v44 = vadd.f32 %v2373_v1, %v324_v11  ;;  %v2470_v45 = vmul.f32 0.5, %v334_v16  ;;  %v2472_v46 = vmul.f32 0.70710677, %v334_v16  ;;  %v2474_v47 = vmul.f32 0.70710677, %v335_v17 }
  0x29   : > { %v2476_v48 = vmul.f32 0.5, %v335_v17  ;;  %v2478_v49 = vmul.f32 0.5, %v336_v18  ;;  %v2480_v50 = vmul.f32 0.70710677, %v336_v18  ;;  %v2482_v51 = vmul.f32 0.70710677, %v337_v19 }
  0x2a   : > { %4310 = vst [vmem:[#allocation2_spill] sm:$0xff] %v2470_v45  ;;  %v2484_v52 = vmul.f32 0.5, %v337_v19  ;;  %v2487_v53 = vmul.f32 0.5, %v2402_v20  ;;  %v2490_v54 = vmul.f32 0.5, %v2405_v21  ;;  %v2493_v55 = vmul.f32 0.5, %v2408_v22 }
  0x2b   : > { %4311 = vst [vmem:[#allocation3_spill] sm:$0xff] %v2476_v48  ;;  %v2496_v56 = vmul.f32 0.5, %v2411_v23  ;;  %v2499_v57 = vmul.f32 0.5, %v2414_v24  ;;  %v2502_v58 = vmul.f32 0.5, %v2417_v25  ;;  %v2505_v59 = vmul.f32 0.5, %v2420_v26 }
  0x2c   : > { %4312 = vst [vmem:[#allocation4_spill] sm:$0xff] %v2478_v49  ;;  %v2508_v60 = vmul.f32 0.5, %v2423_v27  ;;  %v2511_v61 = vmul.f32 0.5, %v2426_v28  ;;  %v430_v62 = vmul.f32 %v2472_v46, %v2472_v46  ;;  %v470_v63 = vmul.f32 %v2474_v47, %v2474_v47 }
  0x2d   : > { %4313 = vst [vmem:[#allocation5_spill] sm:$0xff] %v2484_v52  ;;  %v2518_v0 = vmul.f32 0.5, %v2429_v29  ;;  %v2521_v2 = vmul.f32 0.5, %v2432_v31  ;;  %v510_v3 = vmul.f32 %v2480_v50, %v2480_v50  ;;  %v550_v4 = vmul.f32 %v2482_v51, %v2482_v51 }
  0x2e   : > { %4314 = vst [vmem:[#allocation6_spill] sm:$0xff] %v2487_v53  ;;  %v2528_v5 = vmul.f32 0.5, %v2435_v32  ;;  %v2531_v6 = vmul.f32 0.5, %v2438_v33  ;;  %v2534_v7 = vmul.f32 0.5, %v2441_v34  ;;  %v2537_v8 = vmul.f32 0.5, %v2444_v35 }
  0x2f   : > { %4315 = vst [vmem:[#allocation7_spill] sm:$0xff] %v2490_v54  ;;  %v2540_v9 = vmul.f32 0.5, %v2447_v37  ;;  %v2543_v10 = vmul.f32 0.5, %v2450_v38  ;;  %v2546_v11 = vmul.f32 0.5, %v2453_v39  ;;  %v2549_v16 = vmul.f32 0.5, %v2456_v40 }
  0x30   : > { %4316 = vst [vmem:[#allocation8_spill] sm:$0xff] %v2493_v55  ;;  %v2552_v17 = vmul.f32 0.5, %v2459_v41  ;;  %v2555_v18 = vmul.f32 0.5, %v2462_v42  ;;  %v2557_v19 = vmin.f32 %v430_v62, 16.0 }
  0x31   : > { %4317 = vst [vmem:[#allocation9_spill] sm:$0xff] %v2496_v56 }
  0x32   : > { %4318 = vst [vmem:[#allocation10_spill] sm:$0xff] %v2499_v57  ;;  %v443_v62 = vmul.f32 3.8918573e-05, %v2557_v19 }
  0x33   : > { %4319 = vst [vmem:[#allocation11_spill] sm:$0xff] %v2502_v58 }
  0x34   : > { %4320 = vst [vmem:[#allocation12_spill] sm:$0xff] %v2505_v59 }
  0x35   : > { %4321 = vst [vmem:[#allocation13_spill] sm:$0xff] %v2508_v60 }
  0x36   : > { %4322 = vst [vmem:[#allocation14_spill] sm:$0xff] %v2511_v61 }
  0x37   : > { %4323 = vst [vmem:[#allocation15_spill] sm:$0xff] %v2518_v0 }
  0x38   : > { %4324 = vst [vmem:[#allocation16_spill] sm:$0xff] %v2521_v2  ;;  %v2591_v2 = vadd.f32 %v2373_v1, %v2395_v15 }
  0x39   : > { %4325 = vst [vmem:[#allocation17_spill] sm:$0xff] %v2528_v5 }
  0x3a   : > { %4326 = vst [vmem:[#allocation18_spill] sm:$0xff] %v2531_v6  ;;  %v444_v6 = vadd.f32 0.001143296, %v443_v62 }
  0x3b   : > { %4327 = vst [vmem:[#allocation19_spill] sm:$0xff] %v2534_v7  ;;  %v2569_v7 = vmin.f32 %v550_v4, 16.0 }
  0x3c   : > { %4328 = vst [vmem:[#allocation20_spill] sm:$0xff] %v2537_v8  ;;  %v2559_v8 = vmin.f32 %v470_v63, 16.0  ;;  %v445_v58 = vmul.f32 %v444_v6, %v2557_v19 }
  0x3d   : > { %4329 = vst [vmem:[#allocation21_spill] sm:$0xff] %v2540_v9  ;;  %v2562_v9 = vmul.f32 0.5, %v2465_v43  ;;  %v563_v15 = vmul.f32 3.8918573e-05, %v2569_v7 }
  0x3e   : > { %4330 = vst [vmem:[#allocation22_spill] sm:$0xff] %v2543_v10  ;;  %v2565_v10 = vmul.f32 0.5, %v2468_v44  ;;  %v472_v63 = vmul.f32 2.1237322e-06, %v2559_v8 }
  0x3f   : > { %4331 = vst [vmem:[#allocation23_spill] sm:$0xff] %v2546_v11  ;;  %v2567_v11 = vmin.f32 %v510_v3, 16.0 }
  0x40   : > { %4332 = vst [vmem:[#allocation24_spill] sm:$0xff] %v2549_v16  ;;  %v473_v5 = vadd.f32 0.00028619796, %v472_v63 }
  0x41   : > { %4333 = vst [vmem:[#allocation25_spill] sm:$0xff] %v2552_v17  ;;  %v2573_v17 = vadd.f32 %v2373_v1, %v2386_v12  ;;  %v512_v3 = vmul.f32 2.1237322e-06, %v2567_v11  ;;  %v523_v4 = vmul.f32 3.8918573e-05, %v2567_v11  ;;  %v2587_v12 = vadd.f32 %v2373_v1, %v2392_v14 }
  0x42   : > { %4334 = vst [vmem:[#allocation26_spill] sm:$0xff] %v2555_v18  ;;  %v432_v18 = vmul.f32 2.1237322e-06, %v2557_v19  ;;  %v474_v14 = vmul.f32 %v473_v5, %v2559_v8  ;;  %v2610_v5 = vmul.f32 0.5, %v2591_v2 }
  0x43   : > { %4335 = vst [vmem:[#allocation27_spill] sm:$0xff] %v2562_v9  ;;  %v2580_v9 = vadd.f32 %v2373_v1, %v2389_v13  ;;  %v513_v13 = vadd.f32 0.00028619796, %v512_v3  ;;  %v524_v61 = vadd.f32 0.001143296, %v523_v4  ;;  %v2594_v60 = vmul.f32 0.5, %v2573_v17 }
  0x44   : > { %4336 = vst [vmem:[#allocation28_spill] sm:$0xff] %v2565_v10  ;;  %v483_v10 = vmul.f32 3.8918573e-05, %v2559_v8  ;;  %v433_v16 = vadd.f32 0.00028619796, %v432_v18  ;;  %v2607_v3 = vmul.f32 0.5, %v2587_v12 }
  0x45   : > { %4337 = vst [vmem:[#allocation29_spill] sm:$0xff] %v2594_v60  ;;  %v514_v62 = vmul.f32 %v513_v13, %v2567_v11  ;;  %v525_v63 = vmul.f32 %v524_v61, %v2567_v11  ;;  %v475_v60 = vadd.f32 0.0036580483, %v474_v14  ;;  %v552_v61 = vmul.f32 2.1237322e-06, %v2569_v7 }
  0x46   : > { %v484_v0 = vadd.f32 0.001143296, %v483_v10  ;;  %v434_v59 = vmul.f32 %v433_v16, %v2557_v19  ;;  %v2604_v10 = vmul.f32 0.5, %v2580_v9  ;;  %4339 = vst [vmem:[#allocation31_spill] sm:$0xff] %v2607_v3  ;;  %v446_v16 = vadd.f32 0.014752088, %v445_v58 }
  0x47   : > { %v526_v57 = vadd.f32 0.014752088, %v525_v63  ;;  %4340 = vst [vmem:[#allocation32_spill] sm:$0xff] %v2610_v5  ;;  %v515_v13 = vadd.f32 0.0036580483, %v514_v62  ;;  %v2056_v58 = vunpack.c.h.bf16 %v2350_v36  ;;  %v476_v62 = vmul.f32 %v475_v60, %v2559_v8 }
  0x48   : > { %v485_v18 = vmul.f32 %v484_v0, %v2559_v8  ;;  %4338 = vst [vmem:[#allocation30_spill] sm:$0xff] %v2604_v10  ;;  %v435_v4 = vadd.f32 0.0036580483, %v434_v59  ;;  %v447_v0 = vmul.f32 %v446_v16, %v2557_v19  ;;  %v564_v3 = vadd.f32 0.001143296, %v563_v15 }
  0x49   : > { %v527_v55 = vmul.f32 %v526_v57, %v2567_v11  ;;  %v2619_v59 = vmul.f32 0.70710677, %v2402_v20  ;;  %v2622_v14 = vmul.f32 0.70710677, %v2405_v21  ;;  %v516_v36 = vmul.f32 %v515_v13, %v2567_v11 }
  0x4a   : > { %v486_v6 = vadd.f32 0.014752088, %v485_v18  ;;  %v436_v56 = vmul.f32 %v435_v4, %v2557_v19  ;;  %v448_v18 = vadd.f32 0.112945676, %v447_v0  ;;  %v565_v4 = vmul.f32 %v564_v3, %v2569_v7 }
  0x4b   : > { %v528_v16 = vadd.f32 0.112945676, %v527_v55  ;;  %v553_v15 = vadd.f32 0.00028619796, %v552_v61  ;;  %v329_v60 = vmul.f32 %v2346_v30, %v2056_v58  ;;  %v2635_v55 = vmul.f32 0.70710677, %v2411_v23 }
  0x4c   : > { %v487_v10 = vmul.f32 %v486_v6, %v2559_v8  ;;  %v2627_v6 = vmul.f32 0.70710677, %v2408_v22  ;;  %v449_v57 = vmul.f32 %v448_v18, %v2557_v19  ;;  %v437_v20 = vadd.f32 0.05243302, %v436_v56 }
  0x4d   : > { %v529_v21 = vmul.f32 %v528_v16, %v2567_v11  ;;  %v566_v0 = vadd.f32 0.014752088, %v565_v4  ;;  %v2641_v3 = vmul.f32 0.70710677, %v2417_v25  ;;  %v477_v13 = vadd.f32 0.05243302, %v476_v62 }
  0x4e   : > { %v488_v63 = vadd.f32 0.112945676, %v487_v10  ;;  %v2638_v10 = vmul.f32 0.70710677, %v2414_v24  ;;  %v450_v22 = vadd.f32 0.4994258, %v449_v57  ;;  %v554_v23 = vmul.f32 %v553_v15, %v2569_v7 }
  0x4f   : > { %v567_v56 = vmul.f32 %v566_v0, %v2569_v7  ;;  %v2645_v18 = vmul.f32 0.70710677, %v2420_v26  ;;  %v530_v30 = vadd.f32 0.4994258, %v529_v21  ;;  %v438_v24 = vmul.f32 %v437_v20, %v2557_v19 }
  0x50   : > { %v489_v5 = vmul.f32 %v488_v63, %v2559_v8  ;;  %v2648_v63 = vmul.f32 0.70710677, %v2423_v27  ;;  %v451_v58 = vmul.f32 %v450_v22, %v2557_v19  ;;  %v517_v16 = vadd.f32 0.05243302, %v516_v36 }
  0x51   : > { %v568_v25 = vadd.f32 0.112945676, %v567_v56  ;;  %v2654_v62 = vmul.f32 0.70710677, %v2426_v28  ;;  %v590_v27 = vmul.f32 %v2619_v59, %v2619_v59  ;;  %v2663_v4 = vmul.f32 0.70710677, %v2432_v31 }
  0x52   : > { %v490_v61 = vadd.f32 0.4994258, %v489_v5  ;;  %v2657_v5 = vmul.f32 0.70710677, %v2429_v29  ;;  %v2666_v57 = vmul.f32 0.70710677, %v2435_v32  ;;  %v478_v28 = vmul.f32 %v477_v13, %v2559_v8 }
  0x53   : > { %v2669_v36 = vmul.f32 0.70710677, %v2438_v33  ;;  %v2673_v15 = vmul.f32 0.70710677, %v2441_v34  ;;  %v2676_v29 = vmul.f32 0.70710677, %v2444_v35  ;;  %v531_v20 = vmul.f32 %v530_v30, %v2567_v11 }
  0x54   : > { %v491_v26 = vmul.f32 %v490_v61, %v2559_v8  ;;  %v555_v21 = vadd.f32 0.0036580483, %v554_v23  ;;  %v439_v0 = vadd.f32 0.18741608, %v438_v24  ;;  %v2679_v31 = vadd.f32 1.0, %v451_v58 }
  0x55   : > { %v518_v32 = vmul.f32 %v517_v16, %v2567_v11  ;;  %v569_v22 = vmul.f32 %v568_v25, %v2569_v7  ;;  %v2684_v33 = vmul.f32 0.70710677, %v2447_v37  ;;  %v2687_v13 = vmul.f32 0.70710677, %v2450_v38 }
  0x56   : > { %v2689_v34 = vadd.f32 1.0, %v491_v26  ;;  %v2691_v35 = vmin.f32 %v590_v27, 16.0  ;;  %v365_v61 = vadd.f32 %v2373_v1, %v329_v60  ;;  %v2695_v56 = vmul.f32 0.70710677, %v2453_v39 }
  0x57   : > { %v2698_v30 = vmul.f32 0.70710677, %v2456_v40  ;;  %v479_v23 = vadd.f32 0.18741608, %v478_v28  ;;  %v2701_v24 = vmul.f32 0.70710677, %v2459_v41  ;;  %v556_v38 = vmul.f32 %v555_v21, %v2569_v7 }
  0x58   : > { %v2703_v37 = vadd.f32 1.0, %v531_v20  ;;  %v630_v58 = vmul.f32 %v2622_v14, %v2622_v14  ;;  %v440_v16 = vmul.f32 %v439_v0, %v2557_v19  ;;  %2193 = vrcp.f32 %v2679_v31 }
  0x59   : > { %v519_v1 = vadd.f32 0.18741608, %v518_v32  ;;  %v570_v39 = vadd.f32 0.4994258, %v569_v22  ;;  %v2711_v40 = vmul.f32 0.70710677, %v2462_v42  ;;  %2195 = vrcp.f32 %v2689_v34 }
  0x5a   : > { %v592_v41 = vmul.f32 2.1237322e-06, %v2691_v35  ;;  %v603_v60 = vmul.f32 3.8918573e-05, %v2691_v35  ;;  %v2717_v25 = vmul.f32 0.70710677, %v2465_v43  ;;  %v480_v19 = vmul.f32 %v479_v23, %v2559_v8 }
  0x5b   : > { %v2720_v26 = vmul.f32 0.70710677, %v2468_v44  ;;  %v571_v27 = vmul.f32 %v570_v39, %v2569_v7  ;;  %v2725_v28 = vmul.f32 0.70710677, %v2573_v17  ;;  %2197 = vrcp.f32 %v2703_v37 }
  0x5c   : > { %4341 = vst [vmem:[#allocation33_spill] sm:$0xff] %v2717_v25  ;;  %v557_v42 = vadd.f32 0.05243302, %v556_v38  ;;  %v2728_v20 = vmin.f32 %v630_v58, 16.0  ;;  %v2731_v21 = vmul.f32 0.70710677, %v2580_v9  ;;  %v520_v0 = vmul.f32 %v519_v1, %v2567_v11 }
  0x5d   : > { %4342 = vst [vmem:[#allocation34_spill] sm:$0xff] %v2720_v26  ;;  %v441_v43 = vadd.f32 1.1283791, %v440_v16  ;;  %v604_v44 = vadd.f32 0.001143296, %v603_v60  ;;  %v2740_v23 = vmul.f32 0.5, %v365_v61  ;;  %v670_v1 = vmul.f32 %v2627_v6, %v2627_v6 }
  0x5e   : > { %4343 = vst [vmem:[#allocation35_spill] sm:$0xff] %v2725_v28  ;;  %v2735_v32 = vmul.f32 0.70710677, %v2587_v12  ;;  %v593_v8 = vadd.f32 0.00028619796, %v592_v41  ;;  %v2738_v17 = vpop.eup %2193  ;;  %v2745_v9 = vadd.f32 1.0, %v571_v27  ;;  %v558_v12 = vmul.f32 %v557_v42, %v2569_v7 }
  0x5f   : > { %4344 = vst [vmem:[#allocation36_spill] sm:$0xff] %v2731_v21  ;;  %v632_v22 = vmul.f32 2.1237322e-06, %v2728_v20  ;;  %v2743_v38 = vmul.f32 0.70710677, %v2591_v2  ;;  %v2747_v16 = vpop.eup %2195  ;;  %v2756_v39 = vmul.f32 %v2635_v55, %v2635_v55  ;;  %v2759_v41 = vmul.f32 %v441_v43, %v2472_v46 }
  0x60   : > { %4345 = vst [vmem:[#allocation37_spill] sm:$0xff] %v2735_v32  ;;  %v481_v58 = vadd.f32 1.1283791, %v480_v19  ;;  %v2749_v11 = vmul.f32 0.70710677, %v365_v61  ;;  %v605_v19 = vmul.f32 %v604_v44, %v2691_v35  ;;  %v454_v61 = vmul.f32 %v2738_v17, %v2679_v31 }
  0x61   : > { %4346 = vst [vmem:[#allocation38_spill] sm:$0xff] %v2740_v23  ;;  %v462_v2 = vand.u32 2147483647, %v2679_v31  ;;  %v521_v60 = vadd.f32 1.1283791, %v520_v0  ;;  %v2763_v27 = vpop.eup %2197  ;;  %v464_v42 = vand.u32 2147483648, %v2679_v31  ;;  %v594_v23 = vmul.f32 %v593_v8, %v2691_v35 }
  0x62   : > { %4347 = vst [vmem:[#allocation39_spill] sm:$0xff] %v2743_v38  ;;  %v633_v54 = vadd.f32 0.00028619796, %v632_v22  ;;  %v2770_v53 = vmul.f32 %v481_v58, %v2474_v47  ;;  %v494_v46 = vmul.f32 %v2747_v16, %v2689_v34  ;;  %2199 = vrcp.f32 %v2745_v9 }
  0x63   : > { %4348 = vst [vmem:[#allocation40_spill] sm:$0xff] %v2749_v11  ;;  %v606_v43 = vadd.f32 0.014752088, %v605_v19  ;;  %vm458_vm0 = vweird.f32 %v2679_v31  ;;  %v502_v0 = vand.u32 2147483647, %v2689_v34  ;;  %v504_v44 = vand.u32 2147483648, %v2689_v34 }
  0x64   : > { %v544_v52 = vand.u32 2147483648, %v2703_v37  ;;  %v559_v49 = vadd.f32 0.18741608, %v558_v12  ;;  %vm498_vm1 = vweird.f32 %v2689_v34  ;;  %v2781_v47 = vmul.f32 %v521_v60, %v2480_v50 }
  0x65   : > { %v534_v8 = vmul.f32 %v2763_v27, %v2703_v37  ;;  %v607_v22 = vmul.f32 %v606_v43, %v2691_v35  ;;  %v643_v58 = vmul.f32 3.8918573e-05, %v2728_v20  ;;  %v455_v19 = vsub.f32 1.0, %v454_v61 }
  0x66   : > { %v595_v48 = vadd.f32 0.0036580483, %v594_v23  ;;  %v634_v45 = vmul.f32 %v633_v54, %v2728_v20  ;;  %v2788_v11 = vmin.f32 %v670_v1, 16.0  ;;  %v2790_v38 = vor.u32 1.1754944e-38, %v464_v42 }
  0x67   : > { %v495_v12 = vsub.f32 1.0, %v494_v46  ;;  %vm538_vm2 = vweird.f32 %v2703_v37  ;;  %v608_v50 = vadd.f32 0.112945676, %v607_v22  ;;  %v2793_v60 = vor.u32 1.1754944e-38, %v504_v44 }
  0x68   : > { %v542_v32 = vand.u32 2147483647, %v2703_v37  ;;  %v2796_v21 = vor.u32 1.1754944e-38, %v544_v52  ;;  %v560_v43 = vmul.f32 %v559_v49, %v2569_v7  ;;  %v2799_v61 = vpop.eup %2199  ;;  %v535_v23 = vsub.f32 1.0, %v534_v8 }
  0x69   : > { %v609_v54 = vmul.f32 %v608_v50, %v2691_v35  ;;  %v644_v1 = vadd.f32 0.001143296, %v643_v58  ;;  %v672_v42 = vmul.f32 2.1237322e-06, %v2788_v11  ;;  %v456_v46 = vmul.f32 %v2738_v17, %v455_v19 }
  0x6a   : > { %v596_v22 = vmul.f32 %v595_v48, %v2691_v35  ;;  %v635_v44 = vadd.f32 0.0036580483, %v634_v45  ;;  %v683_v28 = vmul.f32 3.8918573e-05, %v2788_v11  ;;  %vm459_vm3 = vweird.f32 %v2738_v17 }
  0x6b   : > { %v496_v52 = vmul.f32 %v2747_v16, %v495_v12  ;;  %v610_v49 = vadd.f32 0.4994258, %v609_v54  ;;  %v645_v7 = vmul.f32 %v644_v1, %v2728_v20  ;;  %vm2809_vm4 = vcmp.eq.f32.partialorder %v462_v2, 8.507059e+37  ;;  %vm2834_vm9 = vmor %vm458_vm0, %vm459_vm3 }
  0x6c   : > { %vm499_vm5 = vweird.f32 %v2747_v16  ;;  %vm2814_vm6 = vcmp.eq.f32.partialorder %v502_v0, 8.507059e+37  ;;  %v574_v45 = vmul.f32 %v2799_v61, %v2745_v9  ;;  %v673_v48 = vadd.f32 0.00028619796, %v672_v42 }
  0x6d   : > { %v684_v19 = vadd.f32 0.001143296, %v683_v28  ;;  %v536_v12 = vmul.f32 %v2763_v27, %v535_v23  ;;  %vm539_vm7 = vweird.f32 %v2763_v27  ;;  %vm2822_vm8 = vcmp.eq.f32.partialorder %v542_v32, 8.507059e+37  ;;  %vm2847_vm10 = vmor %vm498_vm1, %vm499_vm5 }
  0x6e   : > { %v611_v50 = vmul.f32 %v610_v49, %v2691_v35  ;;  %v646_v54 = vadd.f32 0.014752088, %v645_v7  ;;  %v457_v0 = vadd.f32 %v2738_v17, %v456_v46  ;;  %v597_v1 = vadd.f32 0.05243302, %v596_v22  ;;  %vm2865_vm12 = vmor %vm538_vm2, %vm539_vm7 }
  0x6f   : > { %v636_v26 = vmul.f32 %v635_v44, %v2728_v20  ;;  %v685_v25 = vmul.f32 %v684_v19, %v2788_v11  ;;  %v497_v32 = vadd.f32 %v2747_v16, %v496_v52  ;;  %v582_v23 = vand.u32 2147483647, %v2745_v9 }
  0x70   : > { %v2840_v42 = vadd.f32 1.0, %v611_v50  ;;  %v647_v46 = vmul.f32 %v646_v54, %v2728_v20  ;;  %v575_v31 = vsub.f32 1.0, %v574_v45  ;;  %v674_v44 = vmul.f32 %v673_v48, %v2788_v11 }
  0x71   : > { %v686_v49 = vadd.f32 0.014752088, %v685_v25  ;;  %v2853_v52 = vmin.f32 %v2756_v39, 16.0  ;;  %v537_v7 = vadd.f32 %v2763_v27, %v536_v12  ;;  %v561_v19 = vadd.f32 1.1283791, %v560_v43 }
  0x72   : > { %vm578_vm11 = vweird.f32 %v2745_v9  ;;  %v584_v50 = vand.u32 2147483648, %v2745_v9  ;;  %v461_v34 = vsel %vm2834_vm9, %v2738_v17, %v457_v0  ;;  %v598_v39 = vmul.f32 %v597_v1, %v2691_v35 }
  0x73   : > { %v637_v45 = vadd.f32 0.05243302, %v636_v26  ;;  %v648_v43 = vadd.f32 0.112945676, %v647_v46  ;;  %v501_v48 = vsel %vm2847_vm10, %v2747_v16, %v497_v32  ;;  %2201 = vrcp.f32 %v2840_v42 }
  0x74   : > { %v687_v17 = vmul.f32 %v686_v49, %v2788_v11  ;;  %v712_v12 = vmul.f32 2.1237322e-06, %v2853_v52  ;;  %v576_v37 = vmul.f32 %v2799_v61, %v575_v31  ;;  %vm2877_vm13 = vcmp.eq.f32.partialorder %v582_v23, 8.507059e+37 }
  0x75   : > { %v649_v0 = vmul.f32 %v648_v43, %v2728_v20  ;;  %v675_v26 = vadd.f32 0.0036580483, %v674_v44  ;;  %v723_v1 = vmul.f32 3.8918573e-05, %v2853_v52  ;;  %v541_v16 = vsel %vm2865_vm12, %v2763_v27, %v537_v7 }
  0x76   : > { %vm579_vm14 = vweird.f32 %v2799_v61  ;;  %v688_v28 = vadd.f32 0.112945676, %v687_v17  ;;  %v750_v32 = vmul.f32 %v2638_v10, %v2638_v10  ;;  %v599_v46 = vadd.f32 0.18741608, %v598_v39 }
  0x77   : > { %v638_v23 = vmul.f32 %v637_v45, %v2728_v20  ;;  %v650_v22 = vadd.f32 0.4994258, %v649_v0  ;;  %v724_v31 = vadd.f32 0.001143296, %v723_v1  ;;  %v466_v44 = vsel %vm2809_vm4, %v2790_v38, %v461_v34  ;;  %vm2909_vm15 = vmor %vm578_vm11, %vm579_vm14 }
  0x78   : > { %v506_v49 = vsel %vm2814_vm6, %v2793_v60, %v501_v48  ;;  %v689_v27 = vmul.f32 %v688_v28, %v2788_v11  ;;  %v713_v7 = vadd.f32 0.00028619796, %v712_v12  ;;  %v546_v25 = vsel %vm2822_vm8, %v2796_v21, %v541_v16 }
  0x79   : > { %v577_v39 = vadd.f32 %v2799_v61, %v576_v37  ;;  %v651_v45 = vmul.f32 %v650_v22, %v2728_v20  ;;  %v676_v43 = vmul.f32 %v675_v26, %v2788_v11  ;;  %v2903_v17 = vpop.eup %2201  ;;  %v585_v60 = vor.u32 1.1754944e-38, %v584_v50 }
  0x7a   : > { %v690_v8 = vadd.f32 0.4994258, %v689_v27  ;;  %v725_v21 = vmul.f32 %v724_v31, %v2853_v52  ;;  %v2914_v58 = vmin.f32 %v750_v32, 16.0  ;;  %v2917_v2 = vmul.f32 %v466_v44, %v2759_v41 }
  0x7b   : > { %v600_v34 = vmul.f32 %v599_v46, %v2691_v35  ;;  %v639_v48 = vadd.f32 0.18741608, %v638_v23  ;;  %v2920_v12 = vadd.f32 1.0, %v651_v45  ;;  %v2923_v9 = vmul.f32 %v506_v49, %v2770_v53 }
  0x7c   : > { %v2926_v37 = vmul.f32 %v546_v25, %v2781_v47  ;;  %v714_v50 = vmul.f32 %v713_v7, %v2853_v52  ;;  %v726_v0 = vadd.f32 0.014752088, %v725_v21  ;;  %v581_v26 = vsel %vm2909_vm15, %v2799_v61, %v577_v39 }
  0x7d   : > { %v614_v41 = vmul.f32 %v2903_v17, %v2840_v42  ;;  %v677_v35 = vadd.f32 0.05243302, %v676_v43  ;;  %v691_v1 = vmul.f32 %v690_v8, %v2788_v11  ;;  %v562_v16 = vmul.f32 %v561_v19, %v2482_v51 }
  0x7e   : > { %2203 = vrcp.f32 %v2920_v12  ;;  %v752_v53 = vmul.f32 2.1237322e-06, %v2914_v58  ;;  %v763_v47 = vmul.f32 3.8918573e-05, %v2914_v58  ;;  %v601_v32 = vadd.f32 1.1283791, %v600_v34 }
  0x7f   : > { %v640_v46 = vmul.f32 %v639_v48, %v2728_v20  ;;  %v727_v61 = vmul.f32 %v726_v0, %v2853_v52  ;;  %v586_v22 = vsel %vm2877_vm13, %v585_v60, %v581_v26  ;;  %v715_v31 = vadd.f32 0.0036580483, %v714_v50 }
  0x80   : > { %v790_v51 = vmul.f32 %v2641_v3, %v2641_v3  ;;  %v615_v44 = vsub.f32 1.0, %v614_v41  ;;  %v678_v49 = vmul.f32 %v677_v35, %v2788_v11  ;;  %v2949_v27 = vadd.f32 1.0, %v691_v1 }
  0x81   : > { %v728_v7 = vadd.f32 0.112945676, %v727_v61  ;;  %v753_v20 = vadd.f32 0.00028619796, %v752_v53  ;;  %v764_v25 = vadd.f32 0.001143296, %v763_v47  ;;  %v2951_v39 = vmul.f32 %v586_v22, %v562_v16 }
  0x82   : > { %v2954_v45 = vmul.f32 %v601_v32, %v2619_v59  ;;  %vm618_vm0 = vweird.f32 %v2840_v42  ;;  %v641_v54 = vadd.f32 1.1283791, %v640_v46  ;;  %v622_v38 = vand.u32 2147483647, %v2840_v42 }
  0x83   : > { %v716_v60 = vmul.f32 %v715_v31, %v2853_v52  ;;  %v729_v8 = vmul.f32 %v728_v7, %v2853_v52  ;;  %v2962_v21 = vmin.f32 %v790_v51, 16.0  ;;  %v616_v34 = vmul.f32 %v2903_v17, %v615_v44 }
  0x84   : > { %v2957_v43 = vpop.eup %2203  ;;  %v679_v48 = vadd.f32 0.18741608, %v678_v49  ;;  %2205 = vrcp.f32 %v2949_v27  ;;  %v765_v59 = vmul.f32 %v764_v25, %v2914_v58  ;;  %v624_v50 = vand.u32 2147483648, %v2840_v42 }
  0x85   : > { %v730_v0 = vadd.f32 0.4994258, %v729_v8  ;;  %v754_v26 = vmul.f32 %v753_v20, %v2914_v58  ;;  %v792_v41 = vmul.f32 2.1237322e-06, %v2962_v21  ;;  %vm619_vm1 = vweird.f32 %v2903_v17 }
  0x86   : > { %v654_v1 = vmul.f32 %v2957_v43, %v2920_v12  ;;  %v766_v16 = vadd.f32 0.014752088, %v765_v59  ;;  %vm2974_vm2 = vcmp.eq.f32.partialorder %v622_v38, 8.507059e+37  ;;  %v717_v47 = vadd.f32 0.05243302, %v716_v60  ;;  %vm2987_vm3 = vmor %vm618_vm0, %vm619_vm1 }
  0x87   : > { %v731_v32 = vmul.f32 %v730_v0, %v2853_v52  ;;  %v830_v46 = vmul.f32 %v2645_v18, %v2645_v18  ;;  %v617_v61 = vadd.f32 %v2903_v17, %v616_v34  ;;  %v680_v22 = vmul.f32 %v679_v48, %v2788_v11 }
  0x88   : > { %v767_v31 = vmul.f32 %v766_v16, %v2914_v58  ;;  %v803_v51 = vmul.f32 3.8918573e-05, %v2962_v21  ;;  %v2992_v49 = vmul.f32 %v641_v54, %v2622_v14  ;;  %v662_v7 = vand.u32 2147483647, %v2920_v12 }
  0x89   : > { %v755_v20 = vadd.f32 0.0036580483, %v754_v26  ;;  %v793_v25 = vadd.f32 0.00028619796, %v792_v41  ;;  %v655_v11 = vsub.f32 1.0, %v654_v1  ;;  %v2997_v60 = vadd.f32 1.0, %v731_v32 }
  0x8a   : > { %v2995_v38 = vpop.eup %2205  ;;  %v768_v8 = vadd.f32 0.112945676, %v767_v31  ;;  %v804_v34 = vadd.f32 0.001143296, %v803_v51  ;;  %v625_v48 = vor.u32 1.1754944e-38, %v624_v50  ;;  %v664_v42 = vand.u32 2147483648, %v2920_v12 }
  0x8b   : > { %v718_v59 = vmul.f32 %v717_v47, %v2853_v52  ;;  %v3001_v0 = vmin.f32 %v830_v46, 16.0  ;;  %v621_v14 = vsel %vm2987_vm3, %v2903_v17, %v617_v61  ;;  %vm658_vm4 = vweird.f32 %v2920_v12 }
  0x8c   : > { %v681_v54 = vadd.f32 1.1283791, %v680_v22  ;;  %v702_v26 = vand.u32 2147483647, %v2949_v27  ;;  %v694_v41 = vmul.f32 %v2995_v38, %v2949_v27  ;;  %v756_v50 = vmul.f32 %v755_v20, %v2914_v58 }
  0x8d   : > { %v769_v1 = vmul.f32 %v768_v8, %v2914_v58  ;;  %v870_v16 = vmul.f32 %v2648_v63, %v2648_v63  ;;  %v656_v47 = vmul.f32 %v2957_v43, %v655_v11  ;;  %vm3015_vm5 = vcmp.eq.f32.partialorder %v662_v7, 8.507059e+37 }
  0x8e   : > { %2207 = vrcp.f32 %v2997_v60  ;;  %v794_v17 = vmul.f32 %v793_v25, %v2962_v21  ;;  %v805_v46 = vmul.f32 %v804_v34, %v2962_v21  ;;  %v665_v61 = vor.u32 1.1754944e-38, %v664_v42 }
  0x8f   : > { %v704_v22 = vand.u32 2147483648, %v2949_v27  ;;  %v719_v31 = vadd.f32 0.18741608, %v718_v59  ;;  %v770_v51 = vadd.f32 0.4994258, %v769_v1  ;;  %v626_v44 = vsel %vm2974_vm2, %v625_v48, %v621_v14 }
  0x90   : > { %vm659_vm6 = vweird.f32 %v2957_v43  ;;  %v806_v7 = vadd.f32 0.014752088, %v805_v46  ;;  %v832_v20 = vmul.f32 2.1237322e-06, %v3001_v0  ;;  %v695_v11 = vsub.f32 1.0, %v694_v41 }
  0x91   : > { %v757_v8 = vadd.f32 0.05243302, %v756_v50  ;;  %v771_v35 = vmul.f32 %v770_v51, %v2914_v58  ;;  %v843_v25 = vmul.f32 3.8918573e-05, %v3001_v0  ;;  %v657_v34 = vadd.f32 %v2957_v43, %v656_v47  ;;  %vm3038_vm7 = vmor %vm658_vm4, %vm659_vm6 }
  0x92   : > { %v795_v42 = vadd.f32 0.0036580483, %v794_v17  ;;  %v807_v59 = vmul.f32 %v806_v7, %v2962_v21  ;;  %v3031_v1 = vmin.f32 %v870_v16, 16.0  ;;  %v3034_v53 = vmul.f32 %v626_v44, %v2954_v45 }
  0x93   : > { %v720_v14 = vmul.f32 %v719_v31, %v2853_v52  ;;  %v3043_v41 = vadd.f32 1.0, %v771_v35  ;;  %v844_v50 = vadd.f32 0.001143296, %v843_v25  ;;  %v3048_v17 = vmul.f32 %v681_v54, %v2627_v6 }
  0x94   : > { %v3045_v47 = vpop.eup %2207  ;;  %v808_v16 = vadd.f32 0.112945676, %v807_v59  ;;  %v833_v46 = vadd.f32 0.00028619796, %v832_v20  ;;  %v872_v45 = vmul.f32 2.1237322e-06, %v3031_v1  ;;  %vm698_vm8 = vweird.f32 %v2949_v27 }
  0x95   : > { %v705_v12 = vor.u32 1.1754944e-38, %v704_v22  ;;  %v758_v51 = vmul.f32 %v757_v8, %v2914_v58  ;;  %2209 = vrcp.f32 %v3043_v41  ;;  %v661_v52 = vsel %vm3038_vm7, %v2957_v43, %v657_v34 }
  0x96   : > { %v696_v35 = vmul.f32 %v2995_v38, %v695_v11  ;;  %v796_v6 = vmul.f32 %v795_v42, %v2962_v21  ;;  %v809_v54 = vmul.f32 %v808_v16, %v2962_v21  ;;  %vm3061_vm9 = vcmp.eq.f32.partialorder %v702_v26, 8.507059e+37 }
  0x97   : > { %v721_v22 = vadd.f32 1.1283791, %v720_v14  ;;  %v734_v7 = vmul.f32 %v3045_v47, %v2997_v60  ;;  %v845_v20 = vmul.f32 %v844_v50, %v3001_v0  ;;  %vm699_vm10 = vweird.f32 %v2995_v38 }
  0x98   : > { %v810_v43 = vadd.f32 0.4994258, %v809_v54  ;;  %v834_v11 = vmul.f32 %v833_v46, %v3001_v0  ;;  %v873_v8 = vadd.f32 0.00028619796, %v872_v45  ;;  %v666_v25 = vsel %vm3015_vm5, %v665_v61, %v661_v52  ;;  %vm3080_vm11 = vmor %vm698_vm8, %vm699_vm10 }
  0x99   : > { %v759_v34 = vadd.f32 0.18741608, %v758_v51  ;;  %v846_v26 = vadd.f32 0.014752088, %v845_v20  ;;  %v883_v42 = vmul.f32 3.8918573e-05, %v3031_v1  ;;  %v697_v59 = vadd.f32 %v2995_v38, %v696_v35 }
  0x9a   : > { %v744_v48 = vand.u32 2147483648, %v2997_v60  ;;  %v797_v14 = vadd.f32 0.05243302, %v796_v6  ;;  %v811_v50 = vmul.f32 %v810_v43, %v2962_v21  ;;  %v735_v32 = vsub.f32 1.0, %v734_v7 }
  0x9b   : > { %v3076_v16 = vpop.eup %2209  ;;  %v847_v61 = vmul.f32 %v846_v26, %v3001_v0  ;;  %v884_v45 = vadd.f32 0.001143296, %v883_v42  ;;  %v910_v51 = vmul.f32 %v2654_v62, %v2654_v62  ;;  %v3088_v52 = vmul.f32 %v721_v22, %v2635_v55 }
  0x9c   : > { %v774_v35 = vmul.f32 %v3076_v16, %v3043_v41  ;;  %v835_v6 = vadd.f32 0.0036580483, %v834_v11  ;;  %v874_v27 = vmul.f32 %v873_v8, %v3031_v1  ;;  %v742_v54 = vand.u32 2147483647, %v2997_v60 }
  0x9d   : > { %v760_v20 = vmul.f32 %v759_v34, %v2914_v58  ;;  %v3095_v7 = vadd.f32 1.0, %v811_v50  ;;  %v848_v43 = vadd.f32 0.112945676, %v847_v61  ;;  %v3098_v26 = vmul.f32 %v666_v25, %v2992_v49 }
  0x9e   : > { %v701_v55 = vsel %vm3080_vm11, %v2995_v38, %v697_v59  ;;  %v745_v22 = vor.u32 1.1754944e-38, %v744_v48  ;;  %v885_v42 = vmul.f32 %v884_v45, %v3031_v1  ;;  %v736_v11 = vmul.f32 %v3045_v47, %v735_v32 }
  0x9f   : > { %v798_v8 = vmul.f32 %v797_v14, %v2962_v21  ;;  %2211 = vrcp.f32 %v3095_v7  ;;  %v3107_v58 = vmin.f32 %v910_v51, 16.0  ;;  %v775_v34 = vsub.f32 1.0, %v774_v35 }
  0xa0   : > { %v836_v50 = vmul.f32 %v835_v6, %v3001_v0  ;;  %v849_v49 = vmul.f32 %v848_v43, %v3001_v0  ;;  %v875_v25 = vadd.f32 0.0036580483, %v874_v27  ;;  %vm738_vm12 = vweird.f32 %v2997_v60 }
  0xa1   : > { %vm3112_vm13 = vcmp.eq.f32.partialorder %v742_v54, 8.507059e+37  ;;  %v761_v59 = vadd.f32 1.1283791, %v760_v20  ;;  %v886_v48 = vadd.f32 0.014752088, %v885_v42  ;;  %v706_v32 = vsel %vm3061_vm9, %v705_v12, %v701_v55 }
  0xa2   : > { %v912_v14 = vmul.f32 2.1237322e-06, %v3107_v58  ;;  %vm739_vm14 = vweird.f32 %v3045_v47  ;;  %v850_v61 = vadd.f32 0.4994258, %v849_v49  ;;  %v737_v45 = vadd.f32 %v3045_v47, %v736_v11 }
  0xa3   : > { %v799_v51 = vadd.f32 0.18741608, %v798_v8  ;;  %v887_v35 = vmul.f32 %v886_v48, %v3031_v1  ;;  %v923_v6 = vmul.f32 3.8918573e-05, %v3107_v58  ;;  %v776_v27 = vmul.f32 %v3076_v16, %v775_v34  ;;  %vm3131_vm15 = vmor %vm738_vm12, %vm739_vm14 }
  0xa4   : > { %v837_v54 = vadd.f32 0.05243302, %v836_v50  ;;  %v851_v20 = vmul.f32 %v850_v61, %v3001_v0  ;;  %v876_v43 = vmul.f32 %v875_v25, %v3031_v1  ;;  %v913_v55 = vadd.f32 0.00028619796, %v912_v14 }
  0xa5   : > { %v3127_v42 = vpop.eup %2211  ;;  %v888_v44 = vadd.f32 0.112945676, %v887_v35  ;;  %v924_v11 = vadd.f32 0.001143296, %v923_v6  ;;  %v950_v8 = vmul.f32 %v2657_v5, %v2657_v5  ;;  %v3138_v34 = vmul.f32 %v706_v32, %v3048_v17 }
  0xa6   : > { %vm778_vm0 = vweird.f32 %v3043_v41  ;;  %v814_v50 = vmul.f32 %v3127_v42, %v3095_v7  ;;  %v3143_v49 = vadd.f32 1.0, %v851_v20  ;;  %vm779_vm1 = vweird.f32 %v3076_v16 }
  0xa7   : > { %v800_v60 = vmul.f32 %v799_v51, %v2962_v21  ;;  %v889_v25 = vmul.f32 %v888_v44, %v3031_v1  ;;  %v925_v48 = vmul.f32 %v924_v11, %v3107_v58  ;;  %v741_v17 = vsel %vm3131_vm15, %v3045_v47, %v737_v45  ;;  %vm3161_vm2 = vmor %vm778_vm0, %vm779_vm1 }
  0xa8   : > { %v782_v14 = vand.u32 2147483647, %v3043_v41  ;;  %v784_v32 = vand.u32 2147483648, %v3043_v41  ;;  %v838_v61 = vmul.f32 %v837_v54, %v3001_v0  ;;  %v777_v35 = vadd.f32 %v3076_v16, %v776_v27 }
  0xa9   : > { %v877_v6 = vadd.f32 0.05243302, %v876_v43  ;;  %v914_v20 = vmul.f32 %v913_v55, %v3107_v58  ;;  %v3157_v21 = vmin.f32 %v950_v8, 16.0  ;;  %v815_v47 = vsub.f32 1.0, %v814_v50 }
  0xaa   : > { %2213 = vrcp.f32 %v3143_v49  ;;  %v890_v45 = vadd.f32 0.4994258, %v889_v25  ;;  %v926_v12 = vadd.f32 0.014752088, %v925_v48  ;;  %v762_v27 = vmul.f32 %v761_v59, %v2638_v10 }
  0xab   : > { %v801_v43 = vadd.f32 1.1283791, %v800_v60  ;;  %v952_v44 = vmul.f32 2.1237322e-06, %v3157_v21  ;;  %v746_v55 = vsel %vm3112_vm13, %v745_v22, %v741_v17  ;;  %v839_v41 = vadd.f32 0.18741608, %v838_v61 }
  0xac   : > { %v891_v11 = vmul.f32 %v890_v45, %v3031_v1  ;;  %v927_v8 = vmul.f32 %v926_v12, %v3107_v58  ;;  %v781_v50 = vsel %vm3161_vm2, %v3076_v16, %v777_v35  ;;  %vm3176_vm3 = vcmp.eq.f32.partialorder %v782_v14, 8.507059e+37 }
  0xad   : > { %v785_v10 = vor.u32 1.1754944e-38, %v784_v32  ;;  %v878_v59 = vmul.f32 %v877_v6, %v3031_v1  ;;  %v816_v60 = vmul.f32 %v3127_v42, %v815_v47  ;;  %v915_v38 = vadd.f32 0.0036580483, %v914_v20 }
  0xae   : > { %v928_v22 = vadd.f32 0.112945676, %v927_v8  ;;  %v963_v48 = vmul.f32 3.8918573e-05, %v3157_v21  ;;  %v3184_v17 = vmul.f32 %v746_v55, %v3088_v52  ;;  %v3187_v61 = vmul.f32 %v801_v43, %v2641_v3 }
  0xaf   : > { %v3189_v16 = vadd.f32 1.0, %v891_v11  ;;  %v953_v14 = vadd.f32 0.00028619796, %v952_v44  ;;  %vm818_vm4 = vweird.f32 %v3095_v7  ;;  %v822_v32 = vand.u32 2147483647, %v3095_v7 }
  0xb0   : > { %v3191_v35 = vpop.eup %2213  ;;  %v824_v6 = vand.u32 2147483648, %v3095_v7  ;;  %v840_v20 = vmul.f32 %v839_v41, %v3001_v0  ;;  %v786_v52 = vsel %vm3176_vm3, %v785_v10, %v781_v50  ;;  %vm819_vm5 = vweird.f32 %v3127_v42 }
  0xb1   : > { %v879_v3 = vadd.f32 0.18741608, %v878_v59  ;;  %v929_v51 = vmul.f32 %v928_v22, %v3107_v58  ;;  %v817_v47 = vadd.f32 %v3127_v42, %v816_v60  ;;  %v916_v45 = vmul.f32 %v915_v38, %v3107_v58  ;;  %vm3212_vm6 = vmor %vm818_vm4, %vm819_vm5 }
  0xb2   : > { %v964_v12 = vadd.f32 0.001143296, %v963_v48  ;;  %v990_v43 = vmul.f32 %v2663_v4, %v2663_v4  ;;  %v854_v44 = vmul.f32 %v3191_v35, %v3143_v49  ;;  %2215 = vrcp.f32 %v3189_v16 }
  0xb3   : > { %v930_v0 = vadd.f32 0.4994258, %v929_v51  ;;  %v954_v55 = vmul.f32 %v953_v14, %v3157_v21  ;;  %v825_v8 = vor.u32 1.1754944e-38, %v824_v6  ;;  %v841_v50 = vadd.f32 1.1283791, %v840_v20 }
  0xb4   : > { %v965_v25 = vmul.f32 %v964_v12, %v3157_v21  ;;  %v3217_v10 = vmul.f32 %v786_v52, %v762_v27  ;;  %v864_v59 = vand.u32 2147483648, %v3143_v49  ;;  %v880_v60 = vmul.f32 %v879_v3, %v3031_v1 }
  0xb5   : > { %v931_v38 = vmul.f32 %v930_v0, %v3107_v58  ;;  %v917_v22 = vadd.f32 0.05243302, %v916_v45  ;;  %v3222_v14 = vmin.f32 %v990_v43, 16.0  ;;  %v1030_v7 = vmul.f32 %v2666_v57, %v2666_v57 }
  0xb6   : > { %v966_v48 = vadd.f32 0.014752088, %v965_v25  ;;  %v821_v6 = vsel %vm3212_vm6, %v3127_v42, %v817_v47  ;;  %vm823_vm7 = vcmp.eq.f32.partialorder %v822_v32, 8.507059e+37  ;;  %v855_v27 = vsub.f32 1.0, %v854_v44 }
  0xb7   : > { %v955_v20 = vadd.f32 0.0036580483, %v954_v55  ;;  %v862_v52 = vand.u32 2147483647, %v3143_v49  ;;  %v3230_v51 = vadd.f32 1.0, %v931_v38  ;;  %v3238_v43 = vmul.f32 %v841_v50, %v2645_v18 }
  0xb8   : > { %v967_v1 = vmul.f32 %v966_v48, %v3157_v21  ;;  %v992_v3 = vmul.f32 2.1237322e-06, %v3222_v14  ;;  %v3234_v45 = vpop.eup %2215  ;;  %vm858_vm8 = vweird.f32 %v3143_v49  ;;  %v881_v42 = vadd.f32 1.1283791, %v880_v60 }
  0xb9   : > { %v826_v32 = vsel %vm823_vm7, %v825_v8, %v821_v6  ;;  %v865_v47 = vor.u32 1.1754944e-38, %v864_v59  ;;  %v918_v44 = vmul.f32 %v917_v22, %v3107_v58  ;;  %v3242_v0 = vmin.f32 %v1030_v7, 16.0 }
  0xba   : > { %v856_v55 = vmul.f32 %v3191_v35, %v855_v27  ;;  %v956_v11 = vmul.f32 %v955_v20, %v3157_v21  ;;  %v968_v25 = vadd.f32 0.112945676, %v967_v1  ;;  %v1003_v38 = vmul.f32 3.8918573e-05, %v3222_v14 }
  0xbb   : > { %vm3247_vm9 = vcmp.eq.f32.partialorder %v862_v52, 8.507059e+37  ;;  %v894_v18 = vmul.f32 %v3234_v45, %v3189_v16  ;;  %2217 = vrcp.f32 %v3230_v51  ;;  %v993_v8 = vadd.f32 0.00028619796, %v992_v3 }
  0xbc   : > { %v1070_v50 = vmul.f32 %v2669_v36, %v2669_v36  ;;  %vm859_vm10 = vweird.f32 %v3191_v35  ;;  %v969_v59 = vmul.f32 %v968_v25, %v3157_v21  ;;  %v1004_v60 = vadd.f32 0.001143296, %v1003_v38 }
  0xbd   : > { %v1032_v22 = vmul.f32 2.1237322e-06, %v3242_v0  ;;  %v3260_v7 = vmul.f32 %v826_v32, %v3187_v61  ;;  %v3263_v6 = vmul.f32 %v881_v42, %v2648_v63  ;;  %v919_v27 = vadd.f32 0.18741608, %v918_v44  ;;  %vm3270_vm11 = vmor %vm858_vm8, %vm859_vm10 }
  0xbe   : > { %v1043_v20 = vmul.f32 3.8918573e-05, %v3242_v0  ;;  %v857_v52 = vadd.f32 %v3191_v35, %v856_v55  ;;  %v970_v1 = vadd.f32 0.4994258, %v969_v59  ;;  %v1005_v3 = vmul.f32 %v1004_v60, %v3222_v14 }
  0xbf   : > { %v1033_v12 = vadd.f32 0.00028619796, %v1032_v22  ;;  %v895_v61 = vsub.f32 1.0, %v894_v18  ;;  %v957_v32 = vadd.f32 0.05243302, %v956_v11  ;;  %v994_v63 = vmul.f32 %v993_v8, %v3222_v14 }
  0xc0   : > { %v3275_v42 = vmin.f32 %v1070_v50, 16.0  ;;  %vm898_vm12 = vweird.f32 %v3189_v16  ;;  %v902_v44 = vand.u32 2147483647, %v3189_v16  ;;  %v971_v55 = vmul.f32 %v970_v1, %v3157_v21 }
  0xc1   : > { %v1006_v38 = vadd.f32 0.014752088, %v1005_v3  ;;  %v3280_v59 = vpop.eup %2217  ;;  %v920_v49 = vmul.f32 %v919_v27, %v3107_v58  ;;  %v1034_v60 = vmul.f32 %v1033_v12, %v3242_v0  ;;  %v1044_v22 = vadd.f32 0.001143296, %v1043_v20 }
  0xc2   : > { %v1072_v11 = vmul.f32 2.1237322e-06, %v3275_v42  ;;  %v861_v18 = vsel %vm3270_vm11, %v3191_v35, %v857_v52  ;;  %v904_v8 = vand.u32 2147483648, %v3189_v16  ;;  %v3289_v50 = vadd.f32 1.0, %v971_v55 }
  0xc3   : > { %v1007_v1 = vmul.f32 %v1006_v38, %v3222_v14  ;;  %v896_v3 = vmul.f32 %v3234_v45, %v895_v61  ;;  %v958_v41 = vmul.f32 %v957_v32, %v3157_v21  ;;  %v995_v58 = vadd.f32 0.0036580483, %v994_v63 }
  0xc4   : > { %v1045_v12 = vmul.f32 %v1044_v22, %v3242_v0  ;;  %v934_v20 = vmul.f32 %v3280_v59, %v3230_v51  ;;  %2219 = vrcp.f32 %v3289_v50  ;;  %v1073_v35 = vadd.f32 0.00028619796, %v1072_v11 }
  0xc5   : > { %vm899_vm13 = vweird.f32 %v3234_v45  ;;  %v921_v52 = vadd.f32 1.1283791, %v920_v49  ;;  %v1008_v25 = vadd.f32 0.112945676, %v1007_v1  ;;  %v1035_v55 = vadd.f32 0.0036580483, %v1034_v60 }
  0xc6   : > { %v866_v61 = vsel %vm3247_vm9, %v865_v47, %v861_v18  ;;  %vm3302_vm14 = vcmp.eq.f32.partialorder %v902_v44, 8.507059e+37  ;;  %v1046_v63 = vadd.f32 0.014752088, %v1045_v12  ;;  %v1110_v38 = vmul.f32 %v2673_v15, %v2673_v15  ;;  %vm3313_vm15 = vmor %vm898_vm12, %vm899_vm13 }
  0xc7   : > { %v897_v22 = vadd.f32 %v3234_v45, %v896_v3  ;;  %v959_v27 = vadd.f32 0.18741608, %v958_v41  ;;  %v996_v11 = vmul.f32 %v995_v58, %v3222_v14  ;;  %v1009_v49 = vmul.f32 %v1008_v25, %v3222_v14 }
  0xc8   : > { %v935_v47 = vsub.f32 1.0, %v934_v20  ;;  %v1047_v44 = vmul.f32 %v1046_v63, %v3242_v0  ;;  %v1074_v60 = vmul.f32 %v1073_v35, %v3275_v42  ;;  %v1083_v18 = vmul.f32 3.8918573e-05, %v3275_v42 }
  0xc9   : > { %v905_v1 = vor.u32 1.1754944e-38, %v904_v8  ;;  %v3321_v41 = vmul.f32 %v921_v52, %v2654_v62  ;;  %v1010_v3 = vadd.f32 0.4994258, %v1009_v49  ;;  %v1036_v58 = vmul.f32 %v1035_v55, %v3242_v0 }
  0xca   : > { %v3324_v12 = vpop.eup %2219  ;;  %v3327_v16 = vmul.f32 %v866_v61, %v3238_v43  ;;  %v1048_v25 = vadd.f32 0.112945676, %v1047_v44  ;;  %v1084_v20 = vadd.f32 0.001143296, %v1083_v18  ;;  %v3329_v54 = vmin.f32 %v1110_v38, 16.0 }
  0xcb   : > { %v901_v35 = vsel %vm3313_vm15, %v3234_v45, %v897_v22  ;;  %v942_v8 = vand.u32 2147483647, %v3230_v51  ;;  %v960_v62 = vmul.f32 %v959_v27, %v3157_v21  ;;  %v997_v52 = vadd.f32 0.05243302, %v996_v11 }
  0xcc   : > { %v936_v55 = vmul.f32 %v3280_v59, %v935_v47  ;;  %v1011_v63 = vmul.f32 %v1010_v3, %v3222_v14  ;;  %v1049_v43 = vmul.f32 %v1048_v25, %v3242_v0  ;;  %v1075_v61 = vadd.f32 0.0036580483, %v1074_v60 }
  0xcd   : > { %v974_v38 = vmul.f32 %v3324_v12, %v3289_v50  ;;  %v1037_v49 = vadd.f32 0.05243302, %v1036_v58  ;;  %v1085_v44 = vmul.f32 %v1084_v20, %v3275_v42  ;;  %v1123_v45 = vmul.f32 3.8918573e-05, %v3329_v54 }
  0xce   : > { %vm938_vm0 = vweird.f32 %v3230_v51  ;;  %v3344_v22 = vadd.f32 1.0, %v1011_v63  ;;  %v1050_v21 = vadd.f32 0.4994258, %v1049_v43  ;;  %v1112_v27 = vmul.f32 2.1237322e-06, %v3329_v54 }
  0xcf   : > { %vm939_vm1 = vweird.f32 %v3280_v59  ;;  %v944_v48 = vand.u32 2147483648, %v3230_v51  ;;  %v1086_v47 = vadd.f32 0.014752088, %v1085_v44  ;;  %v906_v60 = vsel %vm3302_vm14, %v905_v1, %v901_v35 }
  0xd0   : > { %v961_v18 = vadd.f32 1.1283791, %v960_v62  ;;  %v998_v3 = vmul.f32 %v997_v52, %v3222_v14  ;;  %v1076_v58 = vmul.f32 %v1075_v61, %v3275_v42  ;;  %v937_v25 = vadd.f32 %v3280_v59, %v936_v55  ;;  %vm3358_vm2 = vmor %vm938_vm0, %vm939_vm1 }
  0xd1   : > { %v975_v20 = vsub.f32 1.0, %v974_v38  ;;  %v1038_v63 = vmul.f32 %v1037_v49, %v3242_v0  ;;  %v1124_v43 = vadd.f32 0.001143296, %v1123_v45  ;;  %2221 = vrcp.f32 %v3344_v22 }
  0xd2   : > { %v1051_v32 = vmul.f32 %v1050_v21, %v3242_v0  ;;  %v1087_v1 = vmul.f32 %v1086_v47, %v3275_v42  ;;  %v1113_v35 = vadd.f32 0.00028619796, %v1112_v27  ;;  %v3366_v62 = vmul.f32 %v906_v60, %v3263_v6 }
  0xd3   : > { %vm3368_vm3 = vcmp.eq.f32.partialorder %v942_v8, 8.507059e+37  ;;  %v945_v55 = vor.u32 1.1754944e-38, %v944_v48  ;;  %v982_v51 = vand.u32 2147483647, %v3289_v50  ;;  %v3374_v61 = vmul.f32 %v961_v18, %v2657_v5 }
  0xd4   : > { %v999_v38 = vadd.f32 0.18741608, %v998_v3  ;;  %v1077_v49 = vadd.f32 0.05243302, %v1076_v58  ;;  %v1088_v44 = vadd.f32 0.112945676, %v1087_v1  ;;  %v941_v45 = vsel %vm3358_vm2, %v3280_v59, %v937_v25 }
  0xd5   : > { %v976_v6 = vmul.f32 %v3324_v12, %v975_v20  ;;  %v984_v8 = vand.u32 2147483648, %v3289_v50  ;;  %v1125_v21 = vmul.f32 %v1124_v43, %v3329_v54  ;;  %v1039_v27 = vadd.f32 0.18741608, %v1038_v63 }
  0xd6   : > { %v3382_v48 = vadd.f32 1.0, %v1051_v32  ;;  %v1089_v47 = vmul.f32 %v1088_v44, %v3275_v42  ;;  %v1114_v5 = vmul.f32 %v1113_v35, %v3329_v54  ;;  %vm978_vm4 = vweird.f32 %v3289_v50 }
  0xd7   : > { %vm979_vm5 = vweird.f32 %v3324_v12  ;;  %vm3389_vm6 = vcmp.eq.f32.partialorder %v982_v51, 8.507059e+37  ;;  %v3393_v11 = vpop.eup %2221  ;;  %v946_v18 = vsel %vm3368_vm3, %v945_v55, %v941_v45  ;;  %v1000_v3 = vmul.f32 %v999_v38, %v3222_v14 }
  0xd8   : > { %v1078_v58 = vmul.f32 %v1077_v49, %v3275_v42  ;;  %v1090_v25 = vadd.f32 0.4994258, %v1089_v47  ;;  %v977_v20 = vadd.f32 %v3324_v12, %v976_v6  ;;  %v985_v63 = vor.u32 1.1754944e-38, %v984_v8  ;;  %vm3402_vm7 = vmor %vm978_vm4, %vm979_vm5 }
  0xd9   : > { %v1126_v50 = vadd.f32 0.014752088, %v1125_v21  ;;  %v1150_v43 = vmul.f32 %v2676_v29, %v2676_v29  ;;  %v1040_v1 = vmul.f32 %v1039_v27, %v3242_v0  ;;  %2223 = vrcp.f32 %v3382_v48 }
  0xda   : > { %v1091_v14 = vmul.f32 %v1090_v25, %v3275_v42  ;;  %v1115_v35 = vadd.f32 0.0036580483, %v1114_v5  ;;  %v3410_v52 = vmul.f32 %v946_v18, %v3321_v41  ;;  %v1014_v55 = vmul.f32 %v3393_v11, %v3344_v22 }
  0xdb   : > { %v1127_v51 = vmul.f32 %v1126_v50, %v3329_v54  ;;  %v3415_v38 = vmin.f32 %v1150_v43, 16.0  ;;  %v1001_v49 = vadd.f32 1.1283791, %v1000_v3  ;;  %v1079_v44 = vadd.f32 0.18741608, %v1078_v58 }
  0xdc   : > { %v3417_v45 = vadd.f32 1.0, %v1091_v14  ;;  %v1190_v0 = vmul.f32 %v2684_v33, %v2684_v33  ;;  %v981_v6 = vsel %vm3402_vm7, %v3324_v12, %v977_v20  ;;  %v1024_v41 = vand.u32 2147483648, %v3344_v22 }
  0xdd   : > { %v1128_v8 = vadd.f32 0.112945676, %v1127_v51  ;;  %v1152_v21 = vmul.f32 2.1237322e-06, %v3415_v38  ;;  %v1041_v27 = vadd.f32 1.1283791, %v1040_v1  ;;  %v1116_v47 = vmul.f32 %v1115_v35, %v3329_v54 }
  0xde   : > { %2225 = vrcp.f32 %v3417_v45  ;;  %v1163_v5 = vmul.f32 3.8918573e-05, %v3415_v38  ;;  %v1015_v3 = vsub.f32 1.0, %v1014_v55  ;;  %v1022_v58 = vand.u32 2147483647, %v3344_v22 }
  0xdf   : > { %v1129_v25 = vmul.f32 %v1128_v8, %v3329_v54  ;;  %v3432_v12 = vpop.eup %2223  ;;  %v986_v20 = vsel %vm3389_vm6, %v985_v63, %v981_v6  ;;  %v1080_v50 = vmul.f32 %v1079_v44, %v3275_v42  ;;  %v1153_v43 = vadd.f32 0.00028619796, %v1152_v21 }
  0xe0   : > { %v3437_v32 = vmin.f32 %v1190_v0, 16.0  ;;  %v3440_v1 = vmul.f32 %v1001_v49, %v2663_v4  ;;  %vm1018_vm8 = vweird.f32 %v3344_v22  ;;  %v1025_v14 = vor.u32 1.1754944e-38, %v1024_v41 }
  0xe1   : > { %v1130_v35 = vadd.f32 0.4994258, %v1129_v25  ;;  %v3444_v55 = vmul.f32 %v1041_v27, %v2666_v57  ;;  %v1117_v51 = vadd.f32 0.05243302, %v1116_v47  ;;  %v1164_v8 = vadd.f32 0.001143296, %v1163_v5 }
  0xe2   : > { %v1192_v59 = vmul.f32 2.1237322e-06, %v3437_v32  ;;  %v3448_v63 = vmul.f32 %v986_v20, %v3374_v61  ;;  %v1016_v42 = vmul.f32 %v3393_v11, %v1015_v3  ;;  %vm3451_vm9 = vcmp.eq.f32.partialorder %v1022_v58, 8.507059e+37 }
  0xe3   : > { %v1054_v4 = vmul.f32 %v3432_v12, %v3382_v48  ;;  %v1131_v49 = vmul.f32 %v1130_v35, %v3329_v54  ;;  %v1064_v0 = vand.u32 2147483648, %v3382_v48  ;;  %v1081_v6 = vadd.f32 1.1283791, %v1080_v50 }
  0xe4   : > { %v3458_v57 = vpop.eup %2225  ;;  %v1154_v41 = vmul.f32 %v1153_v43, %v3415_v38  ;;  %v1165_v61 = vmul.f32 %v1164_v8, %v3415_v38  ;;  %vm1019_vm10 = vweird.f32 %v3393_v11  ;;  %v1193_v27 = vadd.f32 0.00028619796, %v1192_v59 }
  0xe5   : > { %v3464_v21 = vadd.f32 1.0, %v1131_v49  ;;  %v1203_v47 = vmul.f32 3.8918573e-05, %v3437_v32  ;;  %vm1058_vm11 = vweird.f32 %v3382_v48  ;;  %v1118_v5 = vmul.f32 %v1117_v51, %v3329_v54  ;;  %vm3478_vm12 = vmor %vm1018_vm8, %vm1019_vm10 }
  0xe6   : > { %v1166_v3 = vadd.f32 0.014752088, %v1165_v61  ;;  %v1230_v58 = vmul.f32 %v2687_v13, %v2687_v13  ;;  %v1017_v25 = vadd.f32 %v3393_v11, %v1016_v42  ;;  %v1055_v20 = vsub.f32 1.0, %v1054_v4 }
  0xe7   : > { %v1062_v50 = vand.u32 2147483647, %v3382_v48  ;;  %v1094_v43 = vmul.f32 %v3458_v57, %v3417_v45  ;;  %v3482_v51 = vor.u32 1.1754944e-38, %v1064_v0  ;;  %v1155_v59 = vadd.f32 0.0036580483, %v1154_v41 }
  0xe8   : > { %v1167_v49 = vmul.f32 %v1166_v3, %v3415_v38  ;;  %v3486_v42 = vmul.f32 %v1081_v6, %v2669_v36  ;;  %2227 = vrcp.f32 %v3464_v21  ;;  %v1194_v4 = vmul.f32 %v1193_v27, %v3437_v32 }
  0xe9   : > { %v1204_v61 = vadd.f32 0.001143296, %v1203_v47  ;;  %v1119_v35 = vadd.f32 0.18741608, %v1118_v5  ;;  %v3490_v22 = vmin.f32 %v1230_v58, 16.0  ;;  %v1270_v60 = vmul.f32 %v2695_v56, %v2695_v56 }
  0xea   : > { %v1168_v18 = vadd.f32 0.112945676, %v1167_v49  ;;  %v1021_v0 = vsel %vm3478_vm12, %v3393_v11, %v1017_v25  ;;  %v1056_v41 = vmul.f32 %v3432_v12, %v1055_v20  ;;  %v1095_v36 = vsub.f32 1.0, %v1094_v43 }
  0xeb   : > { %v1205_v6 = vmul.f32 %v1204_v61, %v3437_v32  ;;  %vm3499_vm13 = vcmp.eq.f32.partialorder %v1062_v50, 8.507059e+37  ;;  %v1102_v27 = vand.u32 2147483647, %v3417_v45  ;;  %v1156_v47 = vmul.f32 %v1155_v59, %v3415_v38 }
  0xec   : > { %v1169_v5 = vmul.f32 %v1168_v18, %v3415_v38  ;;  %v1232_v58 = vmul.f32 2.1237322e-06, %v3490_v22  ;;  %vm1059_vm14 = vweird.f32 %v3432_v12  ;;  %vm1098_vm15 = vweird.f32 %v3417_v45 }
  0xed   : > { %v1195_v11 = vadd.f32 0.0036580483, %v1194_v4  ;;  %v1206_v25 = vadd.f32 0.014752088, %v1205_v6  ;;  %v1026_v20 = vsel %vm3451_vm9, %v1025_v14, %v1021_v0  ;;  %v1104_v50 = vand.u32 2147483648, %v3417_v45  ;;  %vm3521_vm0 = vmor %vm1058_vm11, %vm1059_vm14 }
  0xee   : > { %v1120_v43 = vmul.f32 %v1119_v35, %v3329_v54  ;;  %v1243_v8 = vmul.f32 3.8918573e-05, %v3490_v22  ;;  %v3514_v59 = vpop.eup %2227  ;;  %v1057_v18 = vadd.f32 %v3432_v12, %v1056_v41  ;;  %v1096_v49 = vmul.f32 %v3458_v57, %v1095_v36 }
  0xef   : > { %v1170_v61 = vadd.f32 0.4994258, %v1169_v5  ;;  %v1207_v46 = vmul.f32 %v1206_v25, %v3437_v32  ;;  %vm1099_vm1 = vweird.f32 %v3458_v57  ;;  %vm3526_vm2 = vcmp.eq.f32.partialorder %v1102_v27, 8.507059e+37 }
  0xf0   : > { %v1157_v14 = vadd.f32 0.05243302, %v1156_v47  ;;  %v1233_v35 = vadd.f32 0.00028619796, %v1232_v58  ;;  %v1196_v0 = vmul.f32 %v1195_v11, %v3437_v32  ;;  %v3532_v36 = vmin.f32 %v1270_v60, 16.0  ;;  %vm3550_vm3 = vmor %vm1098_vm15, %vm1099_vm1 }
  0xf1   : > { %v1171_v4 = vmul.f32 %v1170_v61, %v3415_v38  ;;  %v1208_v41 = vadd.f32 0.112945676, %v1207_v46  ;;  %v3535_v48 = vmul.f32 %v1026_v20, %v3440_v1  ;;  %v1121_v6 = vadd.f32 1.1283791, %v1120_v43 }
  0xf2   : > { %v1134_v5 = vmul.f32 %v3514_v59, %v3464_v21  ;;  %v1244_v27 = vadd.f32 0.001143296, %v1243_v8  ;;  %v1061_v47 = vsel %vm3521_vm0, %v3432_v12, %v1057_v18  ;;  %v1097_v58 = vadd.f32 %v3458_v57, %v1096_v49 }
  0xf3   : > { %v3543_v25 = vadd.f32 1.0, %v1171_v4  ;;  %v1209_v46 = vmul.f32 %v1208_v41, %v3437_v32  ;;  %v1158_v1 = vmul.f32 %v1157_v14, %v3415_v38  ;;  %v1234_v11 = vmul.f32 %v1233_v35, %v3490_v22 }
  0xf4   : > { %v1245_v12 = vmul.f32 %v1244_v27, %v3490_v22  ;;  %v1272_v20 = vmul.f32 2.1237322e-06, %v3532_v36  ;;  %v1105_v43 = vor.u32 1.1754944e-38, %v1104_v50  ;;  %v1197_v8 = vadd.f32 0.05243302, %v1196_v0 }
  0xf5   : > { %2229 = vrcp.f32 %v3543_v25  ;;  %v1283_v18 = vmul.f32 3.8918573e-05, %v3532_v36  ;;  %v3562_v49 = vmul.f32 %v1121_v6, %v2673_v15  ;;  %v1135_v61 = vsub.f32 1.0, %v1134_v5 }
  0xf6   : > { %v1210_v44 = vadd.f32 0.4994258, %v1209_v46  ;;  %v1066_v14 = vsel %vm3499_vm13, %v3482_v51, %v1061_v47  ;;  %v1101_v50 = vsel %vm3550_vm3, %v3458_v57, %v1097_v58  ;;  %v1246_v35 = vadd.f32 0.014752088, %v1245_v12 }
  0xf7   : > { %v1310_v4 = vmul.f32 %v2698_v30, %v2698_v30  ;;  %vm1138_vm4 = vweird.f32 %v3464_v21  ;;  %v1159_v0 = vadd.f32 0.18741608, %v1158_v1  ;;  %v1235_v41 = vadd.f32 0.0036580483, %v1234_v11 }
  0xf8   : > { %v1273_v15 = vadd.f32 0.00028619796, %v1272_v20  ;;  %v1198_v6 = vmul.f32 %v1197_v8, %v3437_v32  ;;  %v1211_v5 = vmul.f32 %v1210_v44, %v3437_v32  ;;  %v1247_v3 = vmul.f32 %v1246_v35, %v3490_v22 }
  0xf9   : > { %v1284_v51 = vadd.f32 0.001143296, %v1283_v18  ;;  %v1106_v27 = vsel %vm3526_vm2, %v1105_v43, %v1101_v50  ;;  %v1136_v57 = vmul.f32 %v3514_v59, %v1135_v61  ;;  %v1142_v47 = vand.u32 2147483647, %v3464_v21 }
  0xfa   : > { %v1144_v58 = vand.u32 2147483648, %v3464_v21  ;;  %vm1139_vm5 = vweird.f32 %v3514_v59  ;;  %v1248_v60 = vadd.f32 0.112945676, %v1247_v3  ;;  %v3585_v11 = vmin.f32 %v1310_v4, 16.0 }
  0xfb   : > { %v3581_v46 = vpop.eup %2229  ;;  %v1285_v1 = vmul.f32 %v1284_v51, %v3532_v36  ;;  %v1160_v12 = vmul.f32 %v1159_v0, %v3415_v38  ;;  %v1236_v20 = vmul.f32 %v1235_v41, %v3490_v22  ;;  %v1274_v43 = vmul.f32 %v1273_v15, %v3532_v36  ;;  %vm3611_vm7 = vmor %vm1138_vm4, %vm1139_vm5 }
  0xfc   : > { %v1174_v54 = vmul.f32 %v3581_v46, %v3543_v25  ;;  %v1199_v8 = vadd.f32 0.18741608, %v1198_v6  ;;  %v3592_v18 = vadd.f32 1.0, %v1211_v5  ;;  %v1249_v61 = vmul.f32 %v1248_v60, %v3490_v22 }
  0xfd   : > { %v1312_v44 = vmul.f32 2.1237322e-06, %v3585_v11  ;;  %v3597_v50 = vmul.f32 %v1066_v14, %v3444_v55  ;;  %v1137_v35 = vadd.f32 %v3514_v59, %v1136_v57  ;;  %vm3600_vm6 = vcmp.eq.f32.partialorder %v1142_v47, 8.507059e+37 }
  0xfe   : > { %v1286_v4 = vadd.f32 0.014752088, %v1285_v1  ;;  %v3605_v0 = vmul.f32 %v1106_v27, %v3486_v42  ;;  %v1145_v55 = vor.u32 1.1754944e-38, %v1144_v58  ;;  %v1175_v14 = vsub.f32 1.0, %v1174_v54 }
  0xff   : > { %v1250_v15 = vadd.f32 0.4994258, %v1249_v61  ;;  %v1161_v6 = vadd.f32 1.1283791, %v1160_v12  ;;  %v1237_v5 = vadd.f32 0.05243302, %v1236_v20  ;;  %v1200_v57 = vmul.f32 %v1199_v8, %v3437_v32 }
 0x100   : > { %v1275_v3 = vadd.f32 0.0036580483, %v1274_v43  ;;  %v1287_v51 = vmul.f32 %v1286_v4, %v3532_v36  ;;  %2231 = vrcp.f32 %v3592_v18  ;;  %v1313_v27 = vadd.f32 0.00028619796, %v1312_v44 }
 0x101   : > { %v1251_v42 = vmul.f32 %v1250_v15, %v3490_v22  ;;  %v1141_v21 = vsel %vm3611_vm7, %v3514_v59, %v1137_v35  ;;  %vm1178_vm8 = vweird.f32 %v3543_v25  ;;  %v1182_v47 = vand.u32 2147483647, %v3543_v25 }
 0x102   : > { %v1288_v58 = vadd.f32 0.112945676, %v1287_v51  ;;  %v1176_v60 = vmul.f32 %v3581_v46, %v1175_v14  ;;  %v1323_v32 = vmul.f32 3.8918573e-05, %v3585_v11  ;;  %v1350_v12 = vmul.f32 %v2701_v24, %v2701_v24 }
 0x103   : > { %v3625_v1 = vadd.f32 1.0, %v1251_v42  ;;  %v1184_v54 = vand.u32 2147483648, %v3543_v25  ;;  %v1238_v20 = vmul.f32 %v1237_v5, %v3490_v22  ;;  %v1276_v59 = vmul.f32 %v1275_v3, %v3532_v36 }
 0x104   : > { %v1289_v43 = vmul.f32 %v1288_v58, %v3532_v36  ;;  %v1146_v8 = vsel %vm3600_vm6, %v1145_v55, %v1141_v21  ;;  %vm1179_vm9 = vweird.f32 %v3581_v46  ;;  %v1314_v61 = vmul.f32 %v1313_v27, %v3585_v11 }
 0x105   : > { %2233 = vrcp.f32 %v3625_v1  ;;  %v1162_v4 = vmul.f32 %v1161_v6, %v2676_v29  ;;  %v1201_v41 = vadd.f32 1.1283791, %v1200_v57  ;;  %v1177_v15 = vadd.f32 %v3581_v46, %v1176_v60  ;;  %vm3652_vm10 = vmor %vm1178_vm8, %vm1179_vm9 }
 0x106   : > { %v3642_v14 = vpop.eup %2231  ;;  %v1290_v5 = vadd.f32 0.4994258, %v1289_v43  ;;  %v1324_v38 = vadd.f32 0.001143296, %v1323_v32  ;;  %v3645_v55 = vmin.f32 %v1350_v12, 16.0  ;;  %v3648_v3 = vmul.f32 %v1146_v8, %v3562_v49 }
 0x107   : > { %vm3656_vm11 = vcmp.eq.f32.partialorder %v1182_v47, 8.507059e+37  ;;  %v1239_v6 = vadd.f32 0.18741608, %v1238_v20  ;;  %v1277_v57 = vadd.f32 0.05243302, %v1276_v59  ;;  %v1185_v42 = vor.u32 1.1754944e-38, %v1184_v54 }
 0x108   : > { %v1291_v27 = vmul.f32 %v1290_v5, %v3532_v36  ;;  %v1315_v21 = vadd.f32 0.0036580483, %v1314_v61  ;;  %v1325_v58 = vmul.f32 %v1324_v38, %v3585_v11  ;;  %v3663_v49 = vmul.f32 %v1201_v41, %v2684_v33 }
 0x109   : > { %v1214_v25 = vmul.f32 %v3642_v14, %v3592_v18  ;;  %v1224_v60 = vand.u32 2147483648, %v3592_v18  ;;  %v1352_v47 = vmul.f32 2.1237322e-06, %v3645_v55  ;;  %v1181_v12 = vsel %vm3652_vm10, %v3581_v46, %v1177_v15 }
 0x10a   : > { %v3674_v54 = vadd.f32 1.0, %v1291_v27  ;;  %v1326_v20 = vadd.f32 0.014752088, %v1325_v58  ;;  %v1363_v59 = vmul.f32 3.8918573e-05, %v3645_v55  ;;  %v1240_v43 = vmul.f32 %v1239_v6, %v3490_v22 }
 0x10b   : > { %v3669_v32 = vpop.eup %2233  ;;  %v1278_v8 = vmul.f32 %v1277_v57, %v3532_v36  ;;  %v1353_v61 = vadd.f32 0.00028619796, %v1352_v47  ;;  %vm1218_vm12 = vweird.f32 %v3592_v18  ;;  %v1316_v41 = vmul.f32 %v1315_v21, %v3585_v11 }
 0x10c   : > { %2235 = vrcp.f32 %v3674_v54  ;;  %v1390_v46 = vmul.f32 %v2711_v40, %v2711_v40  ;;  %v1186_v15 = vsel %vm3656_vm11, %v1185_v42, %v1181_v12  ;;  %v1215_v5 = vsub.f32 1.0, %v1214_v25 }
 0x10d   : > { %v1254_v38 = vmul.f32 %v3669_v32, %v3625_v1  ;;  %v1327_v22 = vmul.f32 %v1326_v20, %v3585_v11  ;;  %v1222_v51 = vand.u32 2147483647, %v3592_v18  ;;  %v3691_v6 = vor.u32 1.1754944e-38, %v1224_v60 }
 0x10e   : > { %v1354_v57 = vmul.f32 %v1353_v61, %v3645_v55  ;;  %v1364_v27 = vadd.f32 0.001143296, %v1363_v59  ;;  %vm1219_vm13 = vweird.f32 %v3642_v14  ;;  %v1241_v21 = vadd.f32 1.1283791, %v1240_v43 }
 0x10f   : > { %v1279_v58 = vadd.f32 0.18741608, %v1278_v8  ;;  %v1328_v47 = vadd.f32 0.112945676, %v1327_v22  ;;  %v3695_v29 = vmul.f32 %v1186_v15, %v1162_v4  ;;  %vm1258_vm14 = vweird.f32 %v3625_v1  ;;  %v4425_v22 = vld [vmem:[#allocation33_spill] sm:$0xff]  ;;  %vm3731_vm0 = vmor %vm1218_vm12, %vm1219_vm13 }
 0x110   : > { %v1355_v42 = vadd.f32 0.0036580483, %v1354_v57  ;;  %v1365_v25 = vmul.f32 %v1364_v27, %v3645_v55  ;;  %v3699_v12 = vmin.f32 %v1390_v46, 16.0  ;;  %v1216_v60 = vmul.f32 %v3642_v14, %v1215_v5 }
 0x111   : > { %v1255_v20 = vsub.f32 1.0, %v1254_v38  ;;  %v1317_v33 = vadd.f32 0.05243302, %v1316_v41  ;;  %v1329_v59 = vmul.f32 %v1328_v47, %v3585_v11  ;;  %vm3705_vm15 = vcmp.eq.f32.partialorder %v1222_v51, 8.507059e+37 }
 0x112   : > { %v3703_v61 = vpop.eup %2235  ;;  %v1366_v4 = vadd.f32 0.014752088, %v1365_v25  ;;  %v1392_v8 = vmul.f32 2.1237322e-06, %v3699_v12  ;;  %v1403_v15 = vmul.f32 3.8918573e-05, %v3699_v12  ;;  %v1430_v46 = vmul.f32 %v4425_v22, %v4425_v22 }
 0x113   : > { %v1262_v5 = vand.u32 2147483647, %v3625_v1  ;;  %v1264_v41 = vand.u32 2147483648, %v3625_v1  ;;  %v1280_v38 = vmul.f32 %v1279_v58, %v3532_v36  ;;  %v1330_v57 = vadd.f32 0.4994258, %v1329_v59 }
 0x114   : > { %v1356_v27 = vmul.f32 %v1355_v42, %v3645_v55  ;;  %v1367_v47 = vmul.f32 %v1366_v4, %v3645_v55  ;;  %v1393_v25 = vadd.f32 0.00028619796, %v1392_v8  ;;  %v1217_v35 = vadd.f32 %v3642_v14, %v1216_v60 }
 0x115   : > { %v1294_v44 = vmul.f32 %v3703_v61, %v3674_v54  ;;  %v1331_v45 = vmul.f32 %v1330_v57, %v3585_v11  ;;  %v1404_v31 = vadd.f32 0.001143296, %v1403_v15  ;;  %v1256_v19 = vmul.f32 %v3669_v32, %v1255_v20 }
 0x116   : > { %v1318_v36 = vmul.f32 %v1317_v33, %v3585_v11  ;;  %v1368_v58 = vadd.f32 0.112945676, %v1367_v47  ;;  %v3725_v59 = vmin.f32 %v1430_v46, 16.0  ;;  %v1281_v60 = vadd.f32 1.1283791, %v1280_v38 }
 0x117   : > { %v3735_v4 = vadd.f32 1.0, %v1331_v45  ;;  %v1394_v8 = vmul.f32 %v1393_v25, %v3699_v12  ;;  %v1405_v20 = vmul.f32 %v1404_v31, %v3699_v12  ;;  %vm1259_vm1 = vweird.f32 %v3669_v32 }
 0x118   : > { %v1357_v33 = vadd.f32 0.05243302, %v1356_v27  ;;  %v1369_v15 = vmul.f32 %v1368_v58, %v3645_v55  ;;  %v1432_v46 = vmul.f32 2.1237322e-06, %v3725_v59  ;;  %vm3742_vm2 = vcmp.eq.f32.partialorder %v1262_v5, 8.507059e+37  ;;  %vm3754_vm3 = vmor %vm1258_vm14, %vm1259_vm1 }
 0x119   : > { %v1265_v57 = vor.u32 1.1754944e-38, %v1264_v41  ;;  %v1295_v47 = vsub.f32 1.0, %v1294_v44  ;;  %2237 = vrcp.f32 %v3735_v4  ;;  %v1221_v45 = vsel %vm3731_vm0, %v3642_v14, %v1217_v35  ;;  %v4432_v14 = vld [vmem:[#allocation34_spill] sm:$0xff] }
 0x11a   : > { %v1257_v31 = vadd.f32 %v3669_v32, %v1256_v19  ;;  %v1319_v38 = vadd.f32 0.18741608, %v1318_v36  ;;  %v1370_v27 = vadd.f32 0.4994258, %v1369_v15  ;;  %v1242_v25 = vmul.f32 %v1241_v21, %v2687_v13 }
 0x11b   : > { %v1395_v41 = vadd.f32 0.0036580483, %v1394_v8  ;;  %v1406_v44 = vadd.f32 0.014752088, %v1405_v20  ;;  %v1433_v58 = vadd.f32 0.00028619796, %v1432_v46  ;;  %v3759_v51 = vmul.f32 %v1281_v60, %v2695_v56 }
 0x11c   : > { %v1358_v35 = vmul.f32 %v1357_v33, %v3645_v55  ;;  %v1371_v19 = vmul.f32 %v1370_v27, %v3645_v55  ;;  %v1470_v36 = vmul.f32 %v4432_v14, %v4432_v14  ;;  %v1226_v13 = vsel %vm3705_vm15, %v3691_v6, %v1221_v45 }
 0x11d   : > { %v1296_v1 = vmul.f32 %v3703_v61, %v1295_v47  ;;  %v1407_v21 = vmul.f32 %v1406_v44, %v3699_v12  ;;  %v1434_v42 = vmul.f32 %v1433_v58, %v3725_v59  ;;  %v1261_v56 = vsel %vm3754_vm3, %v3669_v32, %v1257_v31 }
 0x11e   : > { %vm1298_vm4 = vweird.f32 %v3674_v54  ;;  %v1320_v60 = vmul.f32 %v1319_v38, %v3585_v11  ;;  %v1443_v8 = vmul.f32 3.8918573e-05, %v3725_v59  ;;  %vm1299_vm5 = vweird.f32 %v3703_v61 }
 0x11f   : > { %v3777_v20 = vpop.eup %2237  ;;  %v3780_v6 = vadd.f32 1.0, %v1371_v19  ;;  %v1396_v43 = vmul.f32 %v1395_v41, %v3699_v12  ;;  %v1408_v33 = vadd.f32 0.112945676, %v1407_v21  ;;  %v1302_v15 = vand.u32 2147483647, %v3674_v54  ;;  %vm3796_vm6 = vmor %vm1298_vm4, %vm1299_vm5 }
 0x120   : > { %v1304_v46 = vand.u32 2147483648, %v3674_v54  ;;  %v1359_v32 = vadd.f32 0.18741608, %v1358_v35  ;;  %v3785_v47 = vmin.f32 %v1470_v36, 16.0  ;;  %v3788_v11 = vmul.f32 %v1226_v13, %v3663_v49 }
 0x121   : > { %v1297_v45 = vadd.f32 %v3703_v61, %v1296_v1  ;;  %v1409_v31 = vmul.f32 %v1408_v33, %v3699_v12  ;;  %v1435_v38 = vadd.f32 0.0036580483, %v1434_v42  ;;  %v1266_v27 = vsel %vm3742_vm2, %v1265_v57, %v1261_v56 }
 0x122   : > { %v1334_v41 = vmul.f32 %v3777_v20, %v3735_v4  ;;  %v1444_v44 = vadd.f32 0.001143296, %v1443_v8  ;;  %v1472_v49 = vmul.f32 2.1237322e-06, %v3785_v47  ;;  %v1321_v58 = vadd.f32 1.1283791, %v1320_v60 }
 0x123   : > { %2239 = vrcp.f32 %v3780_v6  ;;  %v1397_v35 = vadd.f32 0.05243302, %v1396_v43  ;;  %v1410_v19 = vadd.f32 0.4994258, %v1409_v31  ;;  %vm3804_vm7 = vcmp.eq.f32.partialorder %v1302_v15, 8.507059e+37 }
 0x124   : > { %v1305_v54 = vor.u32 1.1754944e-38, %v1304_v46  ;;  %v1360_v57 = vmul.f32 %v1359_v32, %v3645_v55  ;;  %v1445_v36 = vmul.f32 %v1444_v44, %v3725_v59  ;;  %v3810_v13 = vmul.f32 %v1266_v27, %v1242_v25 }
 0x125   : > { %v1301_v1 = vsel %vm3796_vm6, %v3703_v61, %v1297_v45  ;;  %v1436_v21 = vmul.f32 %v1435_v38, %v3725_v59  ;;  %v1473_v42 = vadd.f32 0.00028619796, %v1472_v49  ;;  %v1335_v56 = vsub.f32 1.0, %v1334_v41  ;;  %v4439_v49 = vld [vmem:[#allocation35_spill] sm:$0xff] }
 0x126   : > { %v1342_v60 = vand.u32 2147483647, %v3735_v4  ;;  %v1411_v8 = vmul.f32 %v1410_v19, %v3699_v12  ;;  %v1446_v43 = vadd.f32 0.014752088, %v1445_v36  ;;  %v3820_v55 = vmul.f32 %v1321_v58, %v2698_v30 }
 0x127   : > { %v1398_v25 = vmul.f32 %v1397_v35, %v3699_v12  ;;  %v1483_v15 = vmul.f32 3.8918573e-05, %v3785_v47  ;;  %v1306_v61 = vsel %vm3804_vm7, %v1305_v54, %v1301_v1  ;;  %v1344_v46 = vand.u32 2147483648, %v3735_v4 }
 0x128   : > { %v1361_v32 = vadd.f32 1.1283791, %v1360_v57  ;;  %v1447_v45 = vmul.f32 %v1446_v43, %v3725_v59  ;;  %vm1338_vm8 = vweird.f32 %v3735_v4  ;;  %v1437_v30 = vadd.f32 0.05243302, %v1436_v21  ;;  %v4440_v43 = vld [vmem:[#allocation36_spill] sm:$0xff] }
 0x129   : > { %v3828_v31 = vpop.eup %2239  ;;  %v1474_v27 = vmul.f32 %v1473_v42, %v3785_v47  ;;  %v1336_v5 = vmul.f32 %v3777_v20, %v1335_v56  ;;  %vm3834_vm9 = vcmp.eq.f32.partialorder %v1342_v60, 8.507059e+37  ;;  %v3838_v44 = vadd.f32 1.0, %v1411_v8 }
 0x12a   : > { %v1510_v58 = vmul.f32 %v4439_v49, %v4439_v49  ;;  %v3843_v35 = vmul.f32 %v1306_v61, %v3759_v51  ;;  %v1399_v19 = vadd.f32 0.18741608, %v1398_v25  ;;  %v1448_v18 = vadd.f32 0.112945676, %v1447_v45 }
 0x12b   : > { %v1484_v54 = vadd.f32 0.001143296, %v1483_v15  ;;  %vm1339_vm10 = vweird.f32 %v3777_v20  ;;  %v1345_v57 = vor.u32 1.1754944e-38, %v1344_v46  ;;  %v3847_v36 = vmul.f32 %v1361_v32, %v2701_v24 }
 0x12c   : > { %v1374_v1 = vmul.f32 %v3828_v31, %v3780_v6  ;;  %v1438_v21 = vmul.f32 %v1437_v30, %v3725_v59  ;;  %v1449_v42 = vmul.f32 %v1448_v18, %v3725_v59  ;;  %v1475_v56 = vadd.f32 0.0036580483, %v1474_v27  ;;  %vm3863_vm11 = vmor %vm1338_vm8, %vm1339_vm10 }
 0x12d   : > { %v1485_v51 = vmul.f32 %v1484_v54, %v3785_v47  ;;  %v1337_v60 = vadd.f32 %v3777_v20, %v1336_v5  ;;  %2241 = vrcp.f32 %v3838_v44  ;;  %v3856_v8 = vmin.f32 %v1510_v58, 16.0 }
 0x12e   : > { %v1550_v24 = vmul.f32 %v4440_v43, %v4440_v43  ;;  %v1400_v61 = vmul.f32 %v1399_v19, %v3699_v12  ;;  %v1450_v46 = vadd.f32 0.4994258, %v1449_v42  ;;  %v1375_v45 = vsub.f32 1.0, %v1374_v1 }
 0x12f   : > { %v1486_v32 = vadd.f32 0.014752088, %v1485_v51  ;;  %v1382_v30 = vand.u32 2147483647, %v3780_v6  ;;  %v1384_v27 = vand.u32 2147483648, %v3780_v6  ;;  %v1476_v4 = vmul.f32 %v1475_v56, %v3785_v47 }
 0x130   : > { %v1512_v5 = vmul.f32 2.1237322e-06, %v3856_v8  ;;  %v1439_v58 = vadd.f32 0.18741608, %v1438_v21  ;;  %v1451_v18 = vmul.f32 %v1450_v46, %v3725_v59  ;;  %v1341_v12 = vsel %vm3863_vm11, %v3777_v20, %v1337_v60 }
 0x131   : > { %v1487_v54 = vmul.f32 %v1486_v32, %v3785_v47  ;;  %v1523_v1 = vmul.f32 3.8918573e-05, %v3856_v8  ;;  %v3878_v42 = vmin.f32 %v1550_v24, 16.0  ;;  %vm1378_vm12 = vweird.f32 %v3780_v6 }
 0x132   : > { %v1513_v19 = vadd.f32 0.00028619796, %v1512_v5  ;;  %v1401_v51 = vadd.f32 1.1283791, %v1400_v61  ;;  %v3881_v25 = vadd.f32 1.0, %v1451_v18  ;;  %v1376_v56 = vmul.f32 %v3828_v31, %v1375_v45 }
 0x133   : > { %v1488_v21 = vadd.f32 0.112945676, %v1487_v54  ;;  %v3883_v46 = vpop.eup %2241  ;;  %v1524_v38 = vadd.f32 0.001143296, %v1523_v1  ;;  %v1552_v20 = vmul.f32 2.1237322e-06, %v3878_v42  ;;  %v1346_v60 = vsel %vm3834_vm9, %v1345_v57, %v1341_v12 }
 0x134   : > { %v1514_v32 = vmul.f32 %v1513_v19, %v3856_v8  ;;  %vm3890_vm13 = vcmp.eq.f32.partialorder %v1382_v30, 8.507059e+37  ;;  %v1385_v15 = vor.u32 1.1754944e-38, %v1384_v27  ;;  %v1477_v61 = vadd.f32 0.05243302, %v1476_v4 }
 0x135   : > { %vm1379_vm14 = vweird.f32 %v3828_v31  ;;  %v1440_v5 = vmul.f32 %v1439_v58, %v3725_v59  ;;  %2243 = vrcp.f32 %v3881_v25  ;;  %v1489_v45 = vmul.f32 %v1488_v21, %v3785_v47  ;;  %v4448_v21 = vld [vmem:[#allocation37_spill] sm:$0xff] }
 0x136   : > { %v3899_v18 = vmul.f32 %v1401_v51, %v2711_v40  ;;  %v1414_v41 = vmul.f32 %v3883_v46, %v3838_v44  ;;  %v1525_v57 = vmul.f32 %v1524_v38, %v3856_v8  ;;  %v1553_v30 = vadd.f32 0.00028619796, %v1552_v20  ;;  %vm3910_vm15 = vmor %vm1378_vm12, %vm1379_vm14 }
 0x137   : > { %v3905_v27 = vmul.f32 %v1346_v60, %v3820_v55  ;;  %v1377_v4 = vadd.f32 %v3828_v31, %v1376_v56  ;;  %v1490_v54 = vadd.f32 0.4994258, %v1489_v45  ;;  %v1515_v59 = vadd.f32 0.0036580483, %v1514_v32 }
 0x138   : > { %vm1418_vm0 = vweird.f32 %v3838_v44  ;;  %v1478_v40 = vmul.f32 %v1477_v61, %v3785_v47  ;;  %v1526_v12 = vadd.f32 0.014752088, %v1525_v57  ;;  %v1554_v38 = vmul.f32 %v1553_v30, %v3878_v42 }
 0x139   : > { %4445 = vst [vmem:[#allocation33_spill] sm:$0xff] %v3905_v27  ;;  %v1563_v55 = vmul.f32 3.8918573e-05, %v3878_v42  ;;  %v1424_v19 = vand.u32 2147483648, %v3838_v44  ;;  %v1441_v1 = vadd.f32 1.1283791, %v1440_v5  ;;  %v1491_v51 = vmul.f32 %v1490_v54, %v3785_v47 }
 0x13a   : > { %v1590_v6 = vmul.f32 %v4448_v21, %v4448_v21  ;;  %v1415_v56 = vsub.f32 1.0, %v1414_v41  ;;  %v1422_v32 = vand.u32 2147483647, %v3838_v44  ;;  %v1527_v20 = vmul.f32 %v1526_v12, %v3856_v8 }
 0x13b   : > { %v1564_v60 = vadd.f32 0.001143296, %v1563_v55  ;;  %v3924_v61 = vpop.eup %2243  ;;  %v1381_v45 = vsel %vm3910_vm15, %v3828_v31, %v1377_v4  ;;  %v3929_v57 = vadd.f32 1.0, %v1491_v51  ;;  %v1516_v5 = vmul.f32 %v1515_v59, %v3856_v8  ;;  %v4451_v51 = vld [vmem:[#allocation39_spill] sm:$0xff] }
 0x13c   : > { %v1555_v30 = vadd.f32 0.0036580483, %v1554_v38  ;;  %v1479_v33 = vadd.f32 0.18741608, %v1478_v40  ;;  %v1528_v41 = vadd.f32 0.112945676, %v1527_v20  ;;  %v3935_v12 = vmul.f32 %v1441_v1, %v4425_v22 }
 0x13d   : > { %v1565_v23 = vmul.f32 %v1564_v60, %v3878_v42  ;;  %v1425_v28 = vor.u32 1.1754944e-38, %v1424_v19  ;;  %2245 = vrcp.f32 %v3929_v57  ;;  %v3938_v55 = vmin.f32 %v1590_v6, 16.0 }
 0x13e   : > { %v1386_v31 = vsel %vm3890_vm13, %v1385_v15, %v1381_v45  ;;  %v1416_v4 = vmul.f32 %v3883_v46, %v1415_v56  ;;  %vm3943_vm1 = vcmp.eq.f32.partialorder %v1422_v32, 8.507059e+37  ;;  %v1454_v58 = vmul.f32 %v3924_v61, %v3881_v25 }
 0x13f   : > { %v1529_v40 = vmul.f32 %v1528_v41, %v3856_v8  ;;  %v1517_v22 = vadd.f32 0.05243302, %v1516_v5  ;;  %v1556_v38 = vmul.f32 %v1555_v30, %v3878_v42  ;;  %v1566_v19 = vadd.f32 0.014752088, %v1565_v23 }
 0x140   : > { %v1592_v1 = vmul.f32 2.1237322e-06, %v3938_v55  ;;  %vm1419_vm2 = vweird.f32 %v3883_v46  ;;  %v1480_v24 = vmul.f32 %v1479_v33, %v3785_v47  ;;  %v1630_v6 = vmul.f32 %v4451_v51, %v4451_v51 }
 0x141   : > { %v1530_v15 = vadd.f32 0.4994258, %v1529_v40  ;;  %v1462_v56 = vand.u32 2147483647, %v3881_v25  ;;  %v1567_v32 = vmul.f32 %v1566_v19, %v3878_v42  ;;  %v1603_v60 = vmul.f32 3.8918573e-05, %v3938_v55  ;;  %vm3966_vm3 = vmor %vm1418_vm0, %vm1419_vm2 }
 0x142   : > { %v1593_v20 = vadd.f32 0.00028619796, %v1592_v1  ;;  %v1417_v45 = vadd.f32 %v3883_v46, %v1416_v4  ;;  %v1455_v23 = vsub.f32 1.0, %v1454_v58  ;;  %v1464_v5 = vand.u32 2147483648, %v3881_v25 }
 0x143   : > { %v1531_v30 = vmul.f32 %v1530_v15, %v3856_v8  ;;  %v3962_v41 = vpop.eup %2245  ;;  %v1518_v33 = vmul.f32 %v1517_v22, %v3856_v8  ;;  %v1557_v40 = vadd.f32 0.05243302, %v1556_v38  ;;  %v1568_v19 = vadd.f32 0.112945676, %v1567_v32 }
 0x144   : > { %v1604_v1 = vadd.f32 0.001143296, %v1603_v60  ;;  %v3972_v4 = vmul.f32 %v1386_v31, %v3847_v36  ;;  %vm1458_vm4 = vweird.f32 %v3881_v25  ;;  %v1594_v58 = vmul.f32 %v1593_v20, %v3938_v55 }
 0x145   : > { %v3976_v15 = vmin.f32 %v1630_v6, 16.0  ;;  %v1481_v54 = vadd.f32 1.1283791, %v1480_v24  ;;  %v1494_v44 = vmul.f32 %v3962_v41, %v3929_v57  ;;  %v3980_v27 = vadd.f32 1.0, %v1531_v30 }
 0x146   : > { %v1569_v22 = vmul.f32 %v1568_v19, %v3878_v42  ;;  %v1421_v38 = vsel %vm3966_vm3, %v3883_v46, %v1417_v45  ;;  %v1456_v36 = vmul.f32 %v3924_v61, %v1455_v23  ;;  %vm3987_vm5 = vcmp.eq.f32.partialorder %v1462_v56, 8.507059e+37 }
 0x147   : > { %v1605_v6 = vmul.f32 %v1604_v1, %v3938_v55  ;;  %v1632_v24 = vmul.f32 2.1237322e-06, %v3976_v15  ;;  %v1465_v32 = vor.u32 1.1754944e-38, %v1464_v5  ;;  %v1519_v20 = vadd.f32 0.18741608, %v1518_v33 }
 0x148   : > { %2247 = vrcp.f32 %v3980_v27  ;;  %v1558_v60 = vmul.f32 %v1557_v40, %v3878_v42  ;;  %vm1459_vm6 = vweird.f32 %v3924_v61  ;;  %v1502_v46 = vand.u32 2147483647, %v3929_v57 }
 0x149   : > { %v1570_v45 = vadd.f32 0.4994258, %v1569_v22  ;;  %v1595_v23 = vadd.f32 0.0036580483, %v1594_v58  ;;  %v1426_v56 = vsel %vm3943_vm1, %v1425_v28, %v1421_v38  ;;  %v1495_v30 = vsub.f32 1.0, %v1494_v44  ;;  %vm4007_vm7 = vmor %vm1458_vm4, %vm1459_vm6 }
 0x14a   : > { %v1606_v47 = vadd.f32 0.014752088, %v1605_v6  ;;  %v1633_v19 = vadd.f32 0.00028619796, %v1632_v24  ;;  %v1457_v1 = vadd.f32 %v3924_v61, %v1456_v36  ;;  %v4001_v5 = vmul.f32 %v1481_v54, %v4432_v14 }
 0x14b   : > { %v1504_v33 = vand.u32 2147483648, %v3929_v57  ;;  %v1571_v40 = vmul.f32 %v1570_v45, %v3878_v42  ;;  %v1520_v28 = vmul.f32 %v1519_v20, %v3856_v8  ;;  %v1559_v59 = vadd.f32 0.18741608, %v1558_v60  ;;  %v4460_v45 = vld [vmem:[#allocation40_spill] sm:$0xff] }
 0x14c   : > { %v1607_v58 = vmul.f32 %v1606_v47, %v3938_v55  ;;  %v1634_v44 = vmul.f32 %v1633_v19, %v3976_v15  ;;  %v4015_v14 = vmul.f32 %v1426_v56, %v3899_v18  ;;  %vm1498_vm8 = vweird.f32 %v3929_v57 }
 0x14d   : > { %v4018_v54 = vadd.f32 1.0, %v1571_v40  ;;  %v1596_v25 = vmul.f32 %v1595_v23, %v3938_v55  ;;  %v1496_v36 = vmul.f32 %v3962_v41, %v1495_v30  ;;  %vm4024_vm9 = vcmp.eq.f32.partialorder %v1502_v46, 8.507059e+37 }
 0x14e   : > { %v4021_v38 = vpop.eup %2247  ;;  %v1608_v6 = vadd.f32 0.112945676, %v1607_v58  ;;  %v1635_v24 = vadd.f32 0.0036580483, %v1634_v44  ;;  %v1643_v20 = vmul.f32 3.8918573e-05, %v3976_v15  ;;  %v1461_v18 = vsel %vm4007_vm7, %v3924_v61, %v1457_v1 }
 0x14f   : > { %v1534_v60 = vmul.f32 %v4021_v38, %v3980_v27  ;;  %2249 = vrcp.f32 %v4018_v54  ;;  %v1670_v23 = vmul.f32 %v4460_v45, %v4460_v45  ;;  %vm1499_vm10 = vweird.f32 %v3962_v41 }
 0x150   : > { %v1505_v46 = vor.u32 1.1754944e-38, %v1504_v33  ;;  %v1521_v56 = vadd.f32 1.1283791, %v1520_v28  ;;  %v1560_v30 = vmul.f32 %v1559_v59, %v3878_v42  ;;  %v1597_v19 = vadd.f32 0.05243302, %v1596_v25  ;;  %vm4047_vm11 = vmor %vm1498_vm8, %vm1499_vm10 }
 0x151   : > { %v1535_v47 = vsub.f32 1.0, %v1534_v60  ;;  %v1609_v40 = vmul.f32 %v1608_v6, %v3938_v55  ;;  %v1636_v61 = vmul.f32 %v1635_v24, %v3976_v15  ;;  %v1466_v1 = vsel %vm3987_vm5, %v1465_v32, %v1461_v18 }
 0x152   : > { %v1497_v22 = vadd.f32 %v3962_v41, %v1496_v36  ;;  %v1542_v58 = vand.u32 2147483647, %v3980_v27  ;;  %v1644_v44 = vadd.f32 0.001143296, %v1643_v20  ;;  %v1544_v28 = vand.u32 2147483648, %v3980_v27 }
 0x153   : > { %v1536_v42 = vmul.f32 %v4021_v38, %v1535_v47  ;;  %v1610_v59 = vadd.f32 0.4994258, %v1609_v40  ;;  %v4053_v25 = vmin.f32 %v1670_v23, 16.0  ;;  %vm1538_vm12 = vweird.f32 %v3980_v27 }
 0x154   : > { %v1561_v31 = vadd.f32 1.1283791, %v1560_v30  ;;  %v1637_v32 = vadd.f32 0.05243302, %v1636_v61  ;;  %v1645_v36 = vmul.f32 %v1644_v44, %v3976_v15  ;;  %vm1539_vm13 = vweird.f32 %v4021_v38 }
 0x155   : > { %v2250_v6 = vpop.eup %2249  ;;  %v1598_v57 = vmul.f32 %v1597_v19, %v3938_v55  ;;  %v1611_v24 = vmul.f32 %v1610_v59, %v3938_v55  ;;  %v1672_v20 = vmul.f32 2.1237322e-06, %v4053_v25  ;;  %v1501_v18 = vsel %vm4047_vm11, %v3962_v41, %v1497_v22  ;;  %vm4074_vm15 = vmor %vm1538_vm12, %vm1539_vm13 }
 0x156   : > { %vm4064_vm14 = vcmp.eq.f32.partialorder %v1542_v58, 8.507059e+37  ;;  %v1574_v23 = vmul.f32 %v2250_v6, %v4018_v54  ;;  %v1646_v30 = vadd.f32 0.014752088, %v1645_v36  ;;  %v1537_v47 = vadd.f32 %v4021_v38, %v1536_v42 }
 0x157   : > { %v1545_v40 = vor.u32 1.1754944e-38, %v1544_v28  ;;  %v4070_v61 = vadd.f32 1.0, %v1611_v24  ;;  %v1673_v19 = vadd.f32 0.00028619796, %v1672_v20  ;;  %v1638_v22 = vmul.f32 %v1637_v32, %v3976_v15 }
 0x158   : > { %v1575_v41 = vsub.f32 1.0, %v1574_v23  ;;  %v1647_v58 = vmul.f32 %v1646_v30, %v3976_v15  ;;  %v1683_v33 = vmul.f32 3.8918573e-05, %v4053_v25  ;;  %v1506_v42 = vsel %vm4024_vm9, %v1505_v46, %v1501_v18 }
 0x159   : > { %vm1578_vm0 = vweird.f32 %v4018_v54  ;;  %v1599_v28 = vadd.f32 0.18741608, %v1598_v57  ;;  %2251 = vrcp.f32 %v4070_v61  ;;  %vm1579_vm1 = vweird.f32 %v2250_v6 }
 0x15a   : > { %v1576_v27 = vmul.f32 %v2250_v6, %v1575_v41  ;;  %v1582_v59 = vand.u32 2147483647, %v4018_v54  ;;  %v1648_v36 = vadd.f32 0.112945676, %v1647_v58  ;;  %v1541_v32 = vsel %vm4074_vm15, %v4021_v38, %v1537_v47  ;;  %vm4098_vm2 = vmor %vm1578_vm0, %vm1579_vm1 }
 0x15b   : > { %v1584_v24 = vand.u32 2147483648, %v4018_v54  ;;  %v1674_v20 = vmul.f32 %v1673_v19, %v4053_v25  ;;  %v1684_v8 = vadd.f32 0.001143296, %v1683_v33  ;;  %v1522_v46 = vmul.f32 %v1521_v56, %v4439_v49 }
 0x15c   : > { %v1577_v18 = vadd.f32 %v2250_v6, %v1576_v27  ;;  %v1639_v57 = vadd.f32 0.18741608, %v1638_v22  ;;  %v1649_v23 = vmul.f32 %v1648_v36, %v3976_v15  ;;  %v4094_v30 = vmul.f32 %v1466_v1, %v3935_v12 }
 0x15d   : > { %v1600_v38 = vmul.f32 %v1599_v28, %v3938_v55  ;;  %v1675_v47 = vadd.f32 0.0036580483, %v1674_v20  ;;  %v1685_v19 = vmul.f32 %v1684_v8, %v4053_v25  ;;  %v4105_v49 = vmul.f32 %v1506_v42, %v4001_v5 }
 0x15e   : > { %v1546_v56 = vsel %vm4064_vm14, %v1545_v40, %v1541_v32  ;;  %v1562_v12 = vmul.f32 %v1561_v31, %v4440_v43  ;;  %v1650_v1 = vadd.f32 0.4994258, %v1649_v23  ;;  %vm4110_vm3 = vcmp.eq.f32.partialorder %v1582_v59, 8.507059e+37 }
 0x15f   : > { %v2252_v44 = vpop.eup %2251  ;;  %v1585_v22 = vor.u32 1.1754944e-38, %v1584_v24  ;;  %v1676_v55 = vmul.f32 %v1675_v47, %v4053_v25  ;;  %v1686_v58 = vadd.f32 0.014752088, %v1685_v19  ;;  %v1581_v33 = vsel %vm4098_vm2, %v2250_v6, %v1577_v18 }
 0x160   : > { %v1614_v5 = vmul.f32 %v2252_v44, %v4070_v61  ;;  %v1640_v60 = vmul.f32 %v1639_v57, %v3976_v15  ;;  %v1651_v40 = vmul.f32 %v1650_v1, %v3976_v15  ;;  %v4120_v43 = vmul.f32 %v1546_v56, %v1522_v46 }
 0x161   : > { %v1601_v31 = vadd.f32 1.1283791, %v1600_v38  ;;  %v1677_v42 = vadd.f32 0.05243302, %v1676_v55  ;;  %v1687_v28 = vmul.f32 %v1686_v58, %v4053_v25  ;;  %vm1618_vm4 = vweird.f32 %v4070_v61 }
 0x162   : > { %v1615_v27 = vsub.f32 1.0, %v1614_v5  ;;  %vm1619_vm5 = vweird.f32 %v2252_v44  ;;  %v1652_v59 = vadd.f32 1.0, %v1651_v40  ;;  %v1586_v6 = vsel %vm4110_vm3, %v1585_v22, %v1581_v33 }
 0x163   : > { %v1624_v36 = vand.u32 2147483648, %v4070_v61  ;;  %v1678_v32 = vmul.f32 %v1677_v42, %v4053_v25  ;;  %v1688_v24 = vadd.f32 0.112945676, %v1687_v28  ;;  %v1622_v20 = vand.u32 2147483647, %v4070_v61  ;;  %vm4131_vm6 = vmor %vm1618_vm4, %vm1619_vm5 }
 0x164   : > { %v1616_v15 = vmul.f32 %v2252_v44, %v1615_v27  ;;  %v1641_v8 = vadd.f32 1.1283791, %v1640_v60  ;;  %2253 = vrcp.f32 %v1652_v59  ;;  %v1980_v46 = vclamps-f32 %v3972_v4, 1.0 }
 0x165   : > { %v1981_v18 = vclamps-f32 %v4015_v14, 1.0  ;;  %v1679_v23 = vadd.f32 0.18741608, %v1678_v32  ;;  %v1689_v41 = vmul.f32 %v1688_v24, %v4053_v25  ;;  %v1982_v38 = vclamps-f32 %v4094_v30, 1.0  ;;  %v4527_v30 = vld [vmem:[#allocation24_spill] sm:$0xff] }
 0x166   : > { %v1983_v47 = vclamps-f32 %v4105_v49, 1.0  ;;  %v4138_v19 = vmul.f32 %v1586_v6, %v1562_v12  ;;  %v1617_v61 = vadd.f32 %v2252_v44, %v1616_v15  ;;  %v1984_v56 = vclamps-f32 %v4120_v43, 1.0  ;;  %v4509_v49 = vld [vmem:[#allocation6_spill] sm:$0xff]  ;;  %v4510_v43 = vld [vmem:[#allocation7_spill] sm:$0xff] }
 0x167   : > { %v1602_v1 = vmul.f32 %v1601_v31, %v4448_v21  ;;  %v1625_v54 = vor.u32 1.1754944e-38, %v1624_v36  ;;  %v1690_v22 = vadd.f32 0.4994258, %v1689_v41  ;;  %vm1623_vm7 = vcmp.eq.f32.partialorder %v1622_v20, 8.507059e+37 }
 0x168   : > { %v1621_v55 = vsel %vm4131_vm6, %v2252_v44, %v1617_v61  ;;  %v1642_v58 = vmul.f32 %v1641_v8, %v4451_v51  ;;  %v1662_v33 = vand.u32 2147483647, %v1652_v59  ;;  %v1680_v5 = vmul.f32 %v1679_v23, %v4053_v25 }
 0x169   : > { %v1691_v60 = vmul.f32 %v1690_v22, %v4053_v25  ;;  %v4473_v12 = vclamps-f32 %v2917_v2, 1.0  ;;  %v4474_v42 = vclamps-f32 %v2923_v9, 1.0  ;;  %v1985_v31 = vclamps-f32 %v4138_v19, 1.0 }
 0x16a   : > { %v2254_v21 = vpop.eup %2253  ;;  %v1664_v27 = vand.u32 2147483648, %v1652_v59  ;;  %v4475_v44 = vclamps-f32 %v2926_v37, 1.0  ;;  %v4476_v51 = vclamps-f32 %v2951_v39, 1.0  ;;  %v1626_v32 = vsel %vm1623_vm7, %v1625_v54, %v1621_v55 }
 0x16b   : > { %v1710_v40 = vadd.f32 1.0, %v4473_v12  ;;  %v1711_v28 = vadd.f32 1.0, %v4474_v42  ;;  %v1654_v24 = vmul.f32 %v2254_v21, %v1652_v59  ;;  %v1692_v15 = vadd.f32 1.0, %v1691_v60 }
 0x16c   : > { %v1712_v6 = vadd.f32 1.0, %v4475_v44  ;;  %v1713_v36 = vadd.f32 1.0, %v4476_v51  ;;  %v4477_v25 = vclamps-f32 %v3034_v53, 1.0  ;;  %vm1658_vm8 = vweird.f32 %v1652_v59 }
 0x16d   : > { %vm4158_vm9 = vcmp.eq.f32.partialorder %v1662_v33, 8.507059e+37  ;;  %v4480_v20 = vclamps-f32 %v3098_v26, 1.0  ;;  %v4481_v37 = vclamps-f32 %v3138_v34, 1.0  ;;  %v1655_v23 = vsub.f32 1.0, %v1654_v24 }
 0x16e   : > { %v1714_v2 = vadd.f32 1.0, %v4477_v25  ;;  %vm1659_vm10 = vweird.f32 %v2254_v21  ;;  %v1681_v39 = vadd.f32 1.1283791, %v1680_v5  ;;  %2255 = vrcp.f32 %v1692_v15 }
 0x16f   : > { %v1715_v8 = vadd.f32 1.0, %v4480_v20  ;;  %v1716_v57 = vadd.f32 1.0, %v4481_v37  ;;  %v4166_v41 = vmul.f32 %v1626_v32, %v1602_v1  ;;  %v1665_v19 = vor.u32 1.1754944e-38, %v1664_v27  ;;  %vm4179_vm11 = vmor %vm1658_vm8, %vm1659_vm10 }
 0x170   : > { %v4482_v53 = vclamps-f32 %v3184_v17, 1.0  ;;  %v4483_v54 = vclamps-f32 %v3217_v10, 1.0  ;;  %v1656_v55 = vmul.f32 %v2254_v21, %v1655_v23  ;;  %v4484_v26 = vclamps-f32 %v3260_v7, 1.0 }
 0x171   : > { %v4485_v34 = vclamps-f32 %v3327_v16, 1.0  ;;  %v4486_v12 = vclamps-f32 %v3366_v62, 1.0  ;;  %v1702_v17 = vand.u32 2147483647, %v1692_v15  ;;  %v4489_v42 = vclamps-f32 %v3410_v52, 1.0 }
 0x172   : > { %v1717_v61 = vadd.f32 1.0, %v4482_v53  ;;  %v1718_v22 = vadd.f32 1.0, %v4483_v54  ;;  %v1719_v33 = vadd.f32 1.0, %v4484_v26  ;;  %v4490_v27 = vclamps-f32 %v3448_v63, 1.0 }
 0x173   : > { %v1720_v60 = vadd.f32 1.0, %v4485_v34  ;;  %v1721_v5 = vadd.f32 1.0, %v4486_v12  ;;  %v1722_v10 = vadd.f32 1.0, %v4489_v42  ;;  %v4491_v7 = vclamps-f32 %v3535_v48, 1.0 }
 0x174   : > { %v1723_v44 = vadd.f32 1.0, %v4490_v27  ;;  %v1657_v16 = vadd.f32 %v2254_v21, %v1656_v55  ;;  %v1682_v32 = vmul.f32 %v1681_v39, %v4460_v45  ;;  %v1704_v62 = vand.u32 2147483648, %v1692_v15  ;;  %v2256_v48 = vpop.eup %2255 }
 0x175   : > { %v1724_v51 = vadd.f32 1.0, %v4491_v7  ;;  %v4492_v59 = vclamps-f32 %v3597_v50, 1.0  ;;  %v1986_v25 = vclamps-f32 %v4166_v41, 1.0  ;;  %v4493_v20 = vclamps-f32 %v3605_v0, 1.0  ;;  %v4503_v7 = vld [vmem:[#allocation2_spill] sm:$0xff] }
 0x176   : > { %v4494_v52 = vclamps-f32 %v3648_v3, 1.0  ;;  %v4495_v63 = vclamps-f32 %v3695_v29, 1.0  ;;  %v1661_v54 = vsel %vm4179_vm11, %v2254_v21, %v1657_v16  ;;  %vm1698_vm12 = vweird.f32 %v1692_v15  ;;  %v4501_v21 = vld [vmem:[#allocation33_spill] sm:$0xff]  ;;  %v4504_v16 = vld [vmem:[#allocation3_spill] sm:$0xff] }
 0x177   : > { %v1725_v24 = vadd.f32 1.0, %v4492_v59  ;;  %v1726_v37 = vadd.f32 1.0, %v4493_v20  ;;  %v4496_v45 = vclamps-f32 %v3788_v11, 1.0  ;;  %v4497_v39 = vclamps-f32 %v3810_v13, 1.0  ;;  %v4506_v59 = vld [vmem:[#allocation5_spill] sm:$0xff] }
 0x178   : > { %v1727_v23 = vadd.f32 1.0, %v4494_v52  ;;  %v1728_v53 = vadd.f32 1.0, %v4495_v63  ;;  %v1666_v0 = vsel %vm4158_vm9, %v1665_v19, %v1661_v54  ;;  %v1694_v55 = vmul.f32 %v2256_v48, %v1692_v15  ;;  %v4513_v63 = vld [vmem:[#allocation10_spill] sm:$0xff]  ;;  %v4514_v54 = vld [vmem:[#allocation11_spill] sm:$0xff] }
 0x179   : > { %v1729_v50 = vadd.f32 1.0, %v4496_v45  ;;  %v1730_v41 = vadd.f32 1.0, %v4497_v39  ;;  %vm4207_vm13 = vcmp.eq.f32.partialorder %v1702_v17, 8.507059e+37  ;;  %v4500_v29 = vclamps-f32 %v3843_v35, 1.0  ;;  %v4515_v45 = vld [vmem:[#allocation12_spill] sm:$0xff] }
 0x17a   : > { %v1705_v34 = vor.u32 1.1754944e-38, %v1704_v62  ;;  %v4502_v12 = vclamps-f32 %v4501_v21, 1.0  ;;  %v1733_v11 = vadd.f32 1.0, %v1980_v46  ;;  %v1734_v13 = vadd.f32 1.0, %v1981_v18  ;;  %v4505_v18 = vld [vmem:[#allocation4_spill] sm:$0xff] }
 0x17b   : > { %v1731_v26 = vadd.f32 1.0, %v4500_v29  ;;  %v1695_v9 = vsub.f32 1.0, %v1694_v55  ;;  %vm1699_vm14 = vweird.f32 %v2256_v48  ;;  %v1735_v19 = vadd.f32 1.0, %v1982_v38 }
 0x17c   : > { %v1732_v1 = vadd.f32 1.0, %v4502_v12  ;;  %v1736_v17 = vadd.f32 1.0, %v1983_v47  ;;  %v1667_v35 = vmul.f32 %v1666_v0, %v1642_v58  ;;  %v1737_v42 = vadd.f32 1.0, %v1984_v56  ;;  %vm4230_vm15 = vmor %vm1698_vm12, %vm1699_vm14  ;;  %v4511_v56 = vld [vmem:[#allocation8_spill] sm:$0xff]  ;;  %v4520_v12 = vld [vmem:[#allocation17_spill] sm:$0xff] }
 0x17d   : > { %v1738_v27 = vadd.f32 1.0, %v1985_v31  ;;  %v1742_v4 = vmul.f32 %v1710_v40, %v4503_v7  ;;  %v1696_v46 = vmul.f32 %v2256_v48, %v1695_v9  ;;  %v1743_v14 = vmul.f32 %v1711_v28, %v4504_v16  ;;  %v4512_v31 = vld [vmem:[#allocation9_spill] sm:$0xff] }
 0x17e   : > { %v1744_v62 = vmul.f32 %v1712_v6, %v4505_v18  ;;  %v1745_v20 = vmul.f32 %v1713_v36, %v4506_v59  ;;  %v1746_v38 = vmul.f32 %v1714_v2, %v4509_v49  ;;  %v1747_v47 = vmul.f32 %v1715_v8, %v4510_v43  ;;  %v4516_v2 = vld [vmem:[#allocation13_spill] sm:$0xff]  ;;  %v4529_v43 = vld [vmem:[#allocation26_spill] sm:$0xff] }
 0x17f   : > { %v1748_v58 = vmul.f32 %v1716_v57, %v4511_v56  ;;  %v1749_v40 = vmul.f32 %v1717_v61, %v4512_v31  ;;  %v1697_v52 = vadd.f32 %v2256_v48, %v1696_v46  ;;  %v1750_v28 = vmul.f32 %v1718_v22, %v4513_v63  ;;  %v4517_v57 = vld [vmem:[#allocation14_spill] sm:$0xff]  ;;  %v4518_v61 = vld [vmem:[#allocation15_spill] sm:$0xff] }
 0x180   : > { %v1751_v6 = vmul.f32 %v1719_v33, %v4514_v54  ;;  %v1752_v36 = vmul.f32 %v1720_v60, %v4515_v45  ;;  %v1987_v15 = vclamps-f32 %v1667_v35, 1.0  ;;  %v1753_v8 = vmul.f32 %v1721_v5, %v4516_v2  ;;  %v4519_v33 = vld [vmem:[#allocation16_spill] sm:$0xff]  ;;  %v4530_v56 = vld [vmem:[#allocation27_spill] sm:$0xff]  ;;  %v4536_v45 = vld [vmem:[#allocation38_spill] sm:$0xff] }
 0x181   : > { %v1754_v39 = vmul.f32 %v1722_v10, %v4517_v57  ;;  %v1755_v0 = vmul.f32 %v1723_v44, %v4518_v61  ;;  %v1701_v22 = vsel %vm4230_vm15, %v2256_v48, %v1697_v52  ;;  %v1756_v60 = vmul.f32 %v1724_v51, %v4519_v33  ;;  %v4521_v10 = vld [vmem:[#allocation18_spill] sm:$0xff]  ;;  %v4522_v44 = vld [vmem:[#allocation19_spill] sm:$0xff]  ;;  %v4523_v51 = vld [vmem:[#allocation20_spill] sm:$0xff] }
 0x182   : > { %v2060_v55 = vpack.c.bf16 %v1743_v14, %v1742_v4  ;;  %v2065_v29 = vpack.c.bf16 %v1745_v20, %v1744_v62  ;;  %v1706_v21 = vsel %vm4207_vm13, %v1705_v34, %v1701_v22  ;;  %v1757_v9 = vmul.f32 %v1725_v24, %v4520_v12  ;;  %v4524_v14 = vld [vmem:[#allocation21_spill] sm:$0xff]  ;;  %v4525_v34 = vld [vmem:[#allocation22_spill] sm:$0xff]  ;;  %v4526_v20 = vld [vmem:[#allocation23_spill] sm:$0xff] }
 0x183   : > { %v2070_v35 = vpack.c.bf16 %v1747_v47, %v1746_v38  ;;  %v2075_v5 = vpack.c.bf16 %v1749_v40, %v1748_v58  ;;  %v1707_v7 = vmul.f32 %v1706_v21, %v1682_v32  ;;  %v1758_v46 = vmul.f32 %v1726_v37, %v4521_v10  ;;  %v4531_v58 = vld [vmem:[#allocation28_spill] sm:$0xff]  ;;  %v4532_v40 = vld [vmem:[#allocation29_spill] sm:$0xff] }
 0x184   : > { %v1759_v16 = vmul.f32 %v1727_v23, %v4522_v44  ;;  %2061 = vst [vmem:[%s4246_s26] sm:$0xff] %v2060_v55   ;;  %v2080_v48 = vpack.c.bf16 %v1751_v6, %v1750_v28  ;;  %v1739_v18 = vadd.f32 1.0, %v1986_v25  ;;  %v1760_v4 = vmul.f32 %v1728_v53, %v4523_v51  ;;  %v4528_v25 = vld [vmem:[#allocation25_spill] sm:$0xff]  ;;  %v4534_v28 = vld [vmem:[#allocation31_spill] sm:$0xff] }
 0x185   : > { %v1761_v62 = vmul.f32 %v1729_v50, %v4524_v14  ;;  %2152 = vst [vmem:[%s4246_s26 + $0x8] sm:$0xff] %v2065_v29   ;;  %v2085_v3 = vpack.c.bf16 %v1753_v8, %v1752_v36  ;;  %v1988_v24 = vclamps-f32 %v1707_v7, 1.0  ;;  %v1762_v59 = vmul.f32 %v1730_v41, %v4525_v34 }
 0x186   : > { %v1763_v32 = vmul.f32 %v1731_v26, %v4526_v20  ;;  %2153 = vst [vmem:[%s4246_s26 + $0x10] sm:$0xff] %v2070_v35   ;;  %v2090_v37 = vpack.c.bf16 %v1755_v0, %v1754_v39  ;;  %v1740_v23 = vadd.f32 1.0, %v1987_v15  ;;  %v1764_v49 = vmul.f32 %v1732_v1, %v4527_v30 }
 0x187   : > { %v1765_v38 = vmul.f32 %v1733_v11, %v4528_v25  ;;  %2154 = vst [vmem:[%s4246_s26 + $0x18] sm:$0xff] %v2075_v5   ;;  %v2095_v53 = vpack.c.bf16 %v1757_v9, %v1756_v60  ;;  %v1741_v50 = vadd.f32 1.0, %v1988_v24  ;;  %v1766_v47 = vmul.f32 %v1734_v13, %v4529_v43  ;;  %v4533_v11 = vld [vmem:[#allocation30_spill] sm:$0xff] }
 0x188   : > { %v1767_v41 = vmul.f32 %v1735_v19, %v4530_v56  ;;  %2155 = vst [vmem:[%s4246_s26 + $0x20] sm:$0xff] %v2080_v48   ;;  %v2100_v26 = vpack.c.bf16 %v1759_v16, %v1758_v46  ;;  %v1768_v31 = vmul.f32 %v1736_v17, %v4531_v58  ;;  %v1769_v52 = vmul.f32 %v1737_v42, %v4532_v40  ;;  %v4535_v19 = vld [vmem:[#allocation32_spill] sm:$0xff] }
 0x189   : > { %2156 = vst [vmem:[%s4246_s26 + $0x28] sm:$0xff] %v2085_v3   ;;  %v2105_v1 = vpack.c.bf16 %v1761_v62, %v1760_v4  ;;  %v1770_v63 = vmul.f32 %v1738_v27, %v4533_v11  ;;  %v1771_v54 = vmul.f32 %v1739_v18, %v4534_v28  ;;  %v2110_v13 = vpack.c.bf16 %v1763_v32, %v1762_v59 }
 0x18a   : > { %2157 = vst [vmem:[%s4246_s26 + $0x30] sm:$0xff] %v2090_v37   ;;  %v1772_v6 = vmul.f32 %v1740_v23, %v4535_v19  ;;  %v1773_v17 = vmul.f32 %v1741_v50, %v4536_v45  ;;  %v2115_v36 = vpack.c.bf16 %v1765_v38, %v1764_v49  ;;  %v2120_v42 = vpack.c.bf16 %v1767_v41, %v1766_v47 }
 0x18b   : > { %2158 = vst [vmem:[%s4246_s26 + $0x38] sm:$0xff] %v2095_v53   ;;  %v2125_v15 = vpack.c.bf16 %v1769_v52, %v1768_v31  ;;  %v2130_v27 = vpack.c.bf16 %v1771_v54, %v1770_v63 }
 0x18c   : > { %2159 = vst [vmem:[%s4246_s26 + $0x40] sm:$0xff] %v2100_v26   ;;  %v2135_v2 = vpack.c.bf16 %v1773_v17, %v1772_v6 }
 0x18d   : > { %2160 = vst [vmem:[%s4246_s26 + $0x48] sm:$0xff] %v2105_v1  }
 0x18e   : > { %2161 = vst [vmem:[%s4246_s26 + $0x50] sm:$0xff] %v2110_v13  }
 0x18f   : > { %2162 = vst [vmem:[%s4246_s26 + $0x58] sm:$0xff] %v2115_v36  }
 0x190   : > { %2163 = vst [vmem:[%s4246_s26 + $0x60] sm:$0xff] %v2120_v42  }
 0x191   : > { %2164 = vst [vmem:[%s4246_s26 + $0x68] sm:$0xff] %v2125_v15  }
 0x192   : > { %2165 = vst [vmem:[%s4246_s26 + $0x70] sm:$0xff] %v2130_v27  }
 0x193   : > { %2166 = vst [vmem:[%s4246_s26 + $0x78] sm:$0xff] %v2135_v2  }
 0x194 PF: > { %s13_s14 = sadd.s32 1, %s2279_s14   ;;  %s4537_s12 = smov %s2275_s13 }
 0x195   : > { %p10_p5 = scmp.ge.s32.totalorder %s13_s14, 4   ;;  %s4538_s13 = smov %s4540_s15 }
 0x197   :  { %12 = sbr.rel (!%p10_p5) target bundleno = 2 (0x2), region = 68 }

// kernel: conv_block.7
= control target key start
LH: loop header
LB: loop body
LE: loop exit
PB: predicated region body
PF: predicated region fallthrough
CT: control target
= control target key end

     0   :  { %s2178_s12 = smov 0   ;;  %s2180_s13 = smov 0   ;;  %s3551_s0 = inlined_call_operand.vmem [shape: bf16[2,256,128], index: 0, kind: input, shape index: {}]   ;;  %s3552_s1 = inlined_call_operand.vmem [shape: f32[1,128], index: 1, kind: input, shape index: {}]   ;;  %s3553_s2 = inlined_call_operand.vmem [shape: f32[1,128], index: 2, kind: input, shape index: {}]   ;;  %s3554_s3 = inlined_call_operand.vmem [shape: f32[2,256,128], index: 3, kind: output, shape index: {}]  }
   0x1   :  { %s2182_s14 = smov 0  }
   0x2 LB: > { %s25_s15 = sadd.s32 1, %s2152_s13  ;;  %p1920_p0 = scmp.ge.s32.totalorder %s2156_s14, 1  ;;  %s2156_s14 = sphi %s2182_s14, %s13_s14   ;;  %s2152_s13 = sphi %s2180_s13, %s3652_s13   ;;  %s2148_s12 = sphi %s2178_s12, %s3651_s12  }
   0x3   : > { %p27_p1 = scmp.ge.s32.totalorder %s25_s15, 2  ;;  %p172_p2 = scmp.lt.s32.totalorder %s2156_s14, 3 }
   0x5   : > { %s3654_s15 = smov (%p27_p1, %s25_s15), 0  ;;  %p173_p3 = pnand %p1920_p0, %p172_p2 }
   0x6   : > { %p208_p4 = scmp.lt.s32.totalorder (!%p173_p3), %s2148_s12, 1 }
   0x7   : > { %176 = sbr.rel (%p173_p3) target bundleno = 401 (0x191), region = 32 }
   0xc   : > { %s3656_s12 = smov (!%p208_p4, %s2148_s12), 1  ;;  %v2207_v0 = vld [vmem:[%s3552_s1] ss:$0 sm:$0xff] }
   0xd   : > { %s1959_s16 = sshll.u32 %s3656_s12, 7  ;;  %v2215_v5 = vld [vmem:[%s3553_s2] ss:$0 sm:$0xff]  ;;  %s1960_s24 = sshll.u32 %s3656_s12, 8 }
   0xe   : > { %s2202_s19 = scalar_lea.vmem %s3551_s0, %s1959_s16  ;;  %s2417_s27 = scalar_lea.vmem %s3554_s3, %s1960_s24 }
   0xf   : > { %v1962_v1 = vld [vmem:[%s2202_s19] sm:$0xff]   ;;  %v2025_v2 = vld [vmem:[%s2202_s19 + $0x8] sm:$0xff]   ;;  %v2026_v3 = vld [vmem:[%s2202_s19 + $0x10] sm:$0xff]  }
  0x10   : > { %v1963_v4 = vunpack.c.l.bf16 %v1962_v1  ;;  %v1964_v6 = vunpack.c.h.bf16 %v1962_v1  ;;  %v1967_v7 = vunpack.c.l.bf16 %v2025_v2  ;;  %v1968_v8 = vunpack.c.h.bf16 %v2025_v2  ;;  %v2283_v52 = vld [vmem:[%s2202_s19 + $0x18] sm:$0xff]  }
  0x11   : > { %v1971_v9 = vunpack.c.l.bf16 %v2026_v3  ;;  %v1972_v19 = vunpack.c.h.bf16 %v2026_v3  ;;  %v1975_v63 = vunpack.c.l.bf16 %v2283_v52 }
  0x12   : > { %v298_v10 = vmul.f32 %v2207_v0, %v1963_v4  ;;  %v299_v11 = vmul.f32 %v2207_v0, %v1964_v6  ;;  %v300_v12 = vmul.f32 %v2207_v0, %v1967_v7  ;;  %v301_v13 = vmul.f32 %v2207_v0, %v1968_v8 }
  0x13   : > { %v302_v14 = vmul.f32 %v2207_v0, %v1971_v9  ;;  %v303_v29 = vmul.f32 %v2207_v0, %v1972_v19 }
  0x14   : > { %v2223_v15 = vadd.f32 %v2215_v5, %v298_v10  ;;  %v2226_v16 = vadd.f32 %v2215_v5, %v299_v11  ;;  %v2229_v17 = vadd.f32 %v2215_v5, %v300_v12  ;;  %v2232_v18 = vadd.f32 %v2215_v5, %v301_v13 }
  0x15   : > { %v2247_v24 = vadd.f32 %v2215_v5, %v302_v14  ;;  %v2276_v41 = vadd.f32 %v2215_v5, %v303_v29 }
  0x16   : > { %v2235_v20 = vmul.f32 0.70710677, %v2223_v15  ;;  %v2238_v21 = vmul.f32 0.70710677, %v2226_v16  ;;  %v2241_v22 = vmul.f32 0.70710677, %v2229_v17 }
  0x17   : > { %v2244_v23 = vmul.f32 0.70710677, %v2232_v18  ;;  %v2267_v34 = vmul.f32 0.70710677, %v2247_v24  ;;  %v2289_v56 = vmul.f32 0.70710677, %v2276_v41 }
  0x18   : > { %v430_v25 = vmul.f32 %v2235_v20, %v2235_v20  ;;  %v470_v26 = vmul.f32 %v2238_v21, %v2238_v21  ;;  %v510_v27 = vmul.f32 %v2241_v22, %v2241_v22 }
  0x19   : > { %v550_v28 = vmul.f32 %v2244_v23, %v2244_v23 }
  0x1a   : > { %v2258_v30 = vmin.f32 %v430_v25, 16.0  ;;  %v2260_v31 = vmin.f32 %v470_v26, 16.0  ;;  %v2262_v32 = vmin.f32 %v510_v27, 16.0  ;;  %v590_v25 = vmul.f32 %v2267_v34, %v2267_v34 }
  0x1b   : > { %v2264_v33 = vmin.f32 %v550_v28, 16.0  ;;  %v304_v26 = vmul.f32 %v2207_v0, %v1975_v63 }
  0x1c   : > { %v432_v35 = vmul.f32 2.1237322e-06, %v2258_v30  ;;  %v443_v36 = vmul.f32 3.8918573e-05, %v2258_v30  ;;  %v472_v37 = vmul.f32 2.1237322e-06, %v2260_v31 }
  0x1d   : > { %v483_v38 = vmul.f32 3.8918573e-05, %v2260_v31  ;;  %v512_v39 = vmul.f32 2.1237322e-06, %v2262_v32  ;;  %v523_v40 = vmul.f32 3.8918573e-05, %v2262_v32 }
  0x1e   : > { %v433_v42 = vadd.f32 0.00028619796, %v432_v35  ;;  %v444_v43 = vadd.f32 0.001143296, %v443_v36  ;;  %v473_v44 = vadd.f32 0.00028619796, %v472_v37 }
  0x1f   : > { %v484_v45 = vadd.f32 0.001143296, %v483_v38  ;;  %v513_v46 = vadd.f32 0.00028619796, %v512_v39  ;;  %v524_v47 = vadd.f32 0.001143296, %v523_v40 }
  0x20   : > { %v434_v48 = vmul.f32 %v433_v42, %v2258_v30  ;;  %v445_v49 = vmul.f32 %v444_v43, %v2258_v30  ;;  %v474_v50 = vmul.f32 %v473_v44, %v2260_v31  ;;  %v552_v51 = vmul.f32 2.1237322e-06, %v2264_v33 }
  0x21   : > { %v485_v53 = vmul.f32 %v484_v45, %v2260_v31  ;;  %v514_v54 = vmul.f32 %v513_v46, %v2262_v32  ;;  %v525_v55 = vmul.f32 %v524_v47, %v2262_v32  ;;  %v563_v9 = vmul.f32 3.8918573e-05, %v2264_v33 }
  0x22   : > { %v435_v57 = vadd.f32 0.0036580483, %v434_v48  ;;  %v446_v58 = vadd.f32 0.014752088, %v445_v49  ;;  %v475_v59 = vadd.f32 0.0036580483, %v474_v50 }
  0x23   : > { %v486_v60 = vadd.f32 0.014752088, %v485_v53  ;;  %v515_v61 = vadd.f32 0.0036580483, %v514_v54  ;;  %v526_v62 = vadd.f32 0.014752088, %v525_v55 }
  0x24   : > { %v436_v1 = vmul.f32 %v435_v57, %v2258_v30  ;;  %v447_v2 = vmul.f32 %v446_v58, %v2258_v30  ;;  %v476_v3 = vmul.f32 %v475_v59, %v2260_v31  ;;  %v553_v4 = vadd.f32 0.00028619796, %v552_v51 }
  0x25   : > { %v487_v6 = vmul.f32 %v486_v60, %v2260_v31  ;;  %v516_v7 = vmul.f32 %v515_v61, %v2262_v32  ;;  %v527_v8 = vmul.f32 %v526_v62, %v2262_v32  ;;  %v564_v39 = vadd.f32 0.001143296, %v563_v9 }
  0x26   : > { %v437_v10 = vadd.f32 0.05243302, %v436_v1  ;;  %v448_v11 = vadd.f32 0.112945676, %v447_v2  ;;  %v477_v12 = vadd.f32 0.05243302, %v476_v3  ;;  %v554_v13 = vmul.f32 %v553_v4, %v2264_v33 }
  0x27   : > { %v488_v14 = vadd.f32 0.112945676, %v487_v6  ;;  %v517_v19 = vadd.f32 0.05243302, %v516_v7  ;;  %v528_v35 = vadd.f32 0.112945676, %v527_v8  ;;  %v565_v58 = vmul.f32 %v564_v39, %v2264_v33 }
  0x28   : > { %v438_v27 = vmul.f32 %v437_v10, %v2258_v30  ;;  %v449_v28 = vmul.f32 %v448_v11, %v2258_v30  ;;  %v478_v29 = vmul.f32 %v477_v12, %v2260_v31  ;;  %v555_v38 = vadd.f32 0.0036580483, %v554_v13 }
  0x29   : > { %v489_v36 = vmul.f32 %v488_v14, %v2260_v31  ;;  %v518_v37 = vmul.f32 %v517_v19, %v2262_v32  ;;  %v529_v44 = vmul.f32 %v528_v35, %v2262_v32  ;;  %v2310_v45 = vmul.f32 0.5, %v2223_v15 }
  0x2a   : > { %v439_v40 = vadd.f32 0.18741608, %v438_v27  ;;  %v450_v42 = vadd.f32 0.4994258, %v449_v28  ;;  %v479_v43 = vadd.f32 0.18741608, %v478_v29  ;;  %v556_v48 = vmul.f32 %v555_v38, %v2264_v33 }
  0x2b   : > { %v490_v46 = vadd.f32 0.4994258, %v489_v36  ;;  %v519_v47 = vadd.f32 0.18741608, %v518_v37  ;;  %v530_v53 = vadd.f32 0.4994258, %v529_v44  ;;  %v630_v60 = vmul.f32 %v2289_v56, %v2289_v56 }
  0x2c   : > { %v440_v49 = vmul.f32 %v439_v40, %v2258_v30  ;;  %v451_v50 = vmul.f32 %v450_v42, %v2258_v30  ;;  %v480_v51 = vmul.f32 %v479_v43, %v2260_v31  ;;  %v557_v57 = vadd.f32 0.05243302, %v556_v48 }
  0x2d   : > { %v491_v54 = vmul.f32 %v490_v46, %v2260_v31  ;;  %v520_v55 = vmul.f32 %v519_v47, %v2262_v32  ;;  %v2319_v59 = vmin.f32 %v590_v25, 16.0  ;;  %v2324_v61 = vadd.f32 %v2215_v5, %v304_v26 }
  0x2e   : > { %v452_v15 = vadd.f32 1.0, %v451_v50  ;;  %v441_v30 = vadd.f32 1.1283791, %v440_v49  ;;  %v531_v63 = vmul.f32 %v530_v53, %v2262_v32  ;;  %v566_v1 = vadd.f32 0.014752088, %v565_v58 }
  0x2f   : > { %v492_v62 = vadd.f32 1.0, %v491_v54  ;;  %v2328_v31 = vmul.f32 0.5, %v2226_v16  ;;  %v481_v2 = vadd.f32 1.1283791, %v480_v51  ;;  %v2331_v3 = vmul.f32 0.5, %v2229_v17 }
  0x30   : > { %2066 = vrcp.f32 %v452_v15  ;;  %v462_v4 = vand.u32 2147483647, %v452_v15  ;;  %v521_v6 = vadd.f32 1.1283791, %v520_v55  ;;  %v558_v7 = vmul.f32 %v557_v57, %v2264_v33 }
  0x31   : > { %2068 = vrcp.f32 %v492_v62  ;;  %v464_v8 = vand.u32 2147483648, %v452_v15  ;;  %v502_v9 = vand.u32 2147483647, %v492_v62  ;;  %v2335_v10 = vmul.f32 0.5, %v2232_v18 }
  0x32   : > { %v2337_v32 = vmin.f32 %v630_v60, 16.0  ;;  %v442_v11 = vmul.f32 %v441_v30, %v2235_v20  ;;  %v504_v16 = vand.u32 2147483648, %v492_v62  ;;  %v2340_v12 = vadd.f32 1.0, %v531_v63 }
  0x33   : > { %v567_v17 = vmul.f32 %v566_v1, %v2264_v33  ;;  %vm458_vm0 = vweird.f32 %v452_v15  ;;  %v482_v13 = vmul.f32 %v481_v2, %v2238_v21  ;;  %vm498_vm1 = vweird.f32 %v492_v62 }
  0x34   : > { %v592_v14 = vmul.f32 2.1237322e-06, %v2319_v59  ;;  %vm2345_vm2 = vcmp.eq.f32.partialorder %v462_v4, 8.507059e+37  ;;  %v2350_v18 = vmul.f32 %v521_v6, %v2241_v22  ;;  %2070 = vrcp.f32 %v2340_v12 }
  0x35   : > { %v559_v20 = vadd.f32 0.18741608, %v558_v7  ;;  %v603_v25 = vmul.f32 3.8918573e-05, %v2319_v59  ;;  %v465_v27 = vor.u32 1.1754944e-38, %v464_v8  ;;  %vm2354_vm3 = vcmp.eq.f32.partialorder %v502_v9, 8.507059e+37 }
  0x36   : > { %v2067_v26 = vpop.eup %2066  ;;  %v568_v21 = vadd.f32 0.112945676, %v567_v17  ;;  %v593_v29 = vadd.f32 0.00028619796, %v592_v14  ;;  %v505_v37 = vor.u32 1.1754944e-38, %v504_v16  ;;  %vm538_vm4 = vweird.f32 %v2340_v12 }
  0x37   : > { %v2069_v35 = vpop.eup %2068  ;;  %v454_v36 = vmul.f32 %v2067_v26, %v452_v15  ;;  %v542_v22 = vand.u32 2147483647, %v2340_v12  ;;  %vm459_vm5 = vweird.f32 %v2067_v26  ;;  %v544_v39 = vand.u32 2147483648, %v2340_v12 }
  0x38   : > { %v494_v38 = vmul.f32 %v2069_v35, %v492_v62  ;;  %v569_v40 = vmul.f32 %v568_v21, %v2264_v33  ;;  %v594_v43 = vmul.f32 %v593_v29, %v2319_v59  ;;  %v604_v44 = vadd.f32 0.001143296, %v603_v25  ;;  %vm2368_vm7 = vmor %vm458_vm0, %vm459_vm5 }
  0x39   : > { %v455_v42 = vsub.f32 1.0, %v454_v36  ;;  %v632_v46 = vmul.f32 2.1237322e-06, %v2337_v32  ;;  %vm499_vm6 = vweird.f32 %v2069_v35  ;;  %v560_v48 = vmul.f32 %v559_v20, %v2264_v33 }
  0x3a   : > { %v495_v47 = vsub.f32 1.0, %v494_v38  ;;  %v570_v49 = vadd.f32 0.4994258, %v569_v40  ;;  %v2071_v50 = vpop.eup %2070  ;;  %v595_v53 = vadd.f32 0.0036580483, %v594_v43  ;;  %v605_v54 = vmul.f32 %v604_v44, %v2319_v59  ;;  %vm2376_vm8 = vmor %vm498_vm1, %vm499_vm6 }
  0x3b   : > { %v456_v51 = vmul.f32 %v2067_v26, %v455_v42  ;;  %v633_v55 = vadd.f32 0.00028619796, %v632_v46  ;;  %v534_v60 = vmul.f32 %v2071_v50, %v2340_v12  ;;  %v643_v63 = vmul.f32 3.8918573e-05, %v2337_v32 }
  0x3c   : > { %v496_v58 = vmul.f32 %v2069_v35, %v495_v47  ;;  %v571_v30 = vmul.f32 %v570_v49, %v2264_v33  ;;  %v596_v4 = vmul.f32 %v595_v53, %v2319_v59  ;;  %v606_v15 = vadd.f32 0.014752088, %v605_v54 }
  0x3d   : > { %v457_v1 = vadd.f32 %v2067_v26, %v456_v51  ;;  %v634_v6 = vmul.f32 %v633_v55, %v2337_v32  ;;  %v535_v8 = vsub.f32 1.0, %v534_v60  ;;  %vm539_vm9 = vweird.f32 %v2071_v50 }
  0x3e   : > { %v497_v7 = vadd.f32 %v2069_v35, %v496_v58  ;;  %v2382_v9 = vadd.f32 1.0, %v571_v30  ;;  %vm2386_vm10 = vcmp.eq.f32.partialorder %v542_v22, 8.507059e+37  ;;  %v597_v62 = vadd.f32 0.05243302, %v596_v4  ;;  %vm2400_vm11 = vmor %vm538_vm4, %vm539_vm9 }
  0x3f   : > { %v461_v33 = vsel %vm2368_vm7, %v2067_v26, %v457_v1  ;;  %v607_v17 = vmul.f32 %v606_v15, %v2319_v59  ;;  %v536_v25 = vmul.f32 %v2071_v50, %v535_v8  ;;  %v545_v36 = vor.u32 1.1754944e-38, %v544_v39 }
  0x40   : > { %v466_v14 = vsel %vm2345_vm2, %v465_v27, %v461_v33  ;;  %v501_v20 = vsel %vm2376_vm8, %v2069_v35, %v497_v7  ;;  %2072 = vrcp.f32 %v2382_v9  ;;  %v635_v22 = vadd.f32 0.0036580483, %v634_v6 }
  0x41   : > { %v467_v21 = vmul.f32 %v466_v14, %v442_v11  ;;  %v506_v26 = vsel %vm2354_vm3, %v505_v37, %v501_v20  ;;  %v537_v27 = vadd.f32 %v2071_v50, %v536_v25  ;;  %v598_v38 = vmul.f32 %v597_v62, %v2319_v59 }
  0x42   : > { %v507_v19 = vmul.f32 %v506_v26, %v482_v13  ;;  %v644_v35 = vadd.f32 0.001143296, %v643_v63  ;;  %v561_v42 = vadd.f32 1.1283791, %v560_v48  ;;  %vm578_vm12 = vweird.f32 %v2382_v9 }
  0x43   : > { %v1925_v40 = vclamps-f32 %v467_v21, 1.0  ;;  %v608_v11 = vadd.f32 0.112945676, %v607_v17  ;;  %v541_v12 = vsel %vm2400_vm11, %v2071_v50, %v537_v27  ;;  %v582_v37 = vand.u32 2147483647, %v2382_v9 }
  0x44   : > { %v1926_v28 = vclamps-f32 %v507_v19, 1.0  ;;  %v599_v43 = vadd.f32 0.18741608, %v598_v38  ;;  %v546_v13 = vsel %vm2386_vm10, %v545_v36, %v541_v12  ;;  %v636_v46 = vmul.f32 %v635_v22, %v2337_v32 }
  0x45   : > { %v1710_v39 = vadd.f32 1.0, %v1925_v40  ;;  %v609_v44 = vmul.f32 %v608_v11, %v2319_v59  ;;  %v547_v49 = vmul.f32 %v546_v13, %v2350_v18  ;;  %v645_v51 = vmul.f32 %v644_v35, %v2337_v32 }
  0x46   : > { %v2073_v47 = vpop.eup %2072  ;;  %v1711_v48 = vadd.f32 1.0, %v1926_v28  ;;  %v600_v50 = vmul.f32 %v599_v43, %v2319_v59  ;;  %v584_v55 = vand.u32 2147483648, %v2382_v9  ;;  %v637_v30 = vadd.f32 0.05243302, %v636_v46 }
  0x47   : > { %v1742_v53 = vmul.f32 %v1710_v39, %v2310_v45  ;;  %v574_v54 = vmul.f32 %v2073_v47, %v2382_v9  ;;  %v610_v57 = vadd.f32 0.4994258, %v609_v44  ;;  %v1927_v60 = vclamps-f32 %v547_v49, 1.0 }
  0x48   : > { %v1743_v58 = vmul.f32 %v1711_v48, %v2328_v31  ;;  %vm579_vm13 = vweird.f32 %v2073_v47  ;;  %v646_v1 = vadd.f32 0.014752088, %v645_v51  ;;  %v2429_v2 = vmul.f32 0.70710677, %v2324_v61 }
  0x49   : > { %1774 = vst [vmem:[%s2417_s27] sm:$0xff] %v1742_v53  ;;  %v575_v18 = vsub.f32 1.0, %v574_v54  ;;  %v611_v63 = vmul.f32 %v610_v57, %v2319_v59  ;;  %v1712_v45 = vadd.f32 1.0, %v1927_v60  ;;  %v601_v4 = vadd.f32 1.1283791, %v600_v50  ;;  %v2028_v59 = vld [vmem:[%s2202_s19 + $0x20] sm:$0xff]   ;;  %vm2443_vm14 = vmor %vm578_vm12, %vm579_vm13 }
  0x4a   : > { %1775 = vst [vmem:[%s2417_s27 + $0x8] sm:$0xff] %v1743_v58  ;;  %v638_v15 = vmul.f32 %v637_v30, %v2337_v32  ;;  %v1976_v31 = vunpack.c.h.bf16 %v2283_v52  ;;  %v647_v8 = vmul.f32 %v646_v1, %v2337_v32  ;;  %v670_v33 = vmul.f32 %v2429_v2, %v2429_v2 }
  0x4b   : > { %v576_v6 = vmul.f32 %v2073_v47, %v575_v18  ;;  %v612_v7 = vadd.f32 1.0, %v611_v63  ;;  %v1744_v16 = vmul.f32 %v1712_v45, %v2331_v3  ;;  %v562_v62 = vmul.f32 %v561_v42, %v2244_v23 }
  0x4c   : > { %v585_v52 = vor.u32 1.1754944e-38, %v584_v55  ;;  %v305_v14 = vmul.f32 %v2207_v0, %v1976_v31  ;;  %vm583_vm15 = vcmp.eq.f32.partialorder %v582_v37, 8.507059e+37  ;;  %v639_v25 = vadd.f32 0.18741608, %v638_v15 }
  0x4d   : > { %v577_v20 = vadd.f32 %v2073_v47, %v576_v6  ;;  %2074 = vrcp.f32 %v612_v7  ;;  %1776 = vst [vmem:[%s2417_s27 + $0x10] sm:$0xff] %v1744_v16  ;;  %v2450_v21 = vmul.f32 0.5, %v2247_v24  ;;  %v622_v3 = vand.u32 2147483647, %v612_v7 }
  0x4e   : > { %v648_v23 = vadd.f32 0.112945676, %v647_v8  ;;  %v1979_v26 = vunpack.c.l.bf16 %v2028_v59  ;;  %v2455_v29 = vmul.f32 %v601_v4, %v2267_v34  ;;  %v2457_v36 = vmin.f32 %v670_v33, 16.0 }
  0x4f   : > { %v581_v9 = vsel %vm2443_vm14, %v2073_v47, %v577_v20  ;;  %v2460_v22 = vadd.f32 %v2215_v5, %v305_v14  ;;  %vm618_vm0 = vweird.f32 %v612_v7  ;;  %v624_v27 = vand.u32 2147483648, %v612_v7 }
  0x50   : > { %v586_v19 = vsel %vm583_vm15, %v585_v52, %v581_v9  ;;  %v649_v24 = vmul.f32 %v648_v23, %v2337_v32  ;;  %v672_v35 = vmul.f32 2.1237322e-06, %v2457_v36  ;;  %v683_v40 = vmul.f32 3.8918573e-05, %v2457_v36 }
  0x51   : > { %v587_v38 = vmul.f32 %v586_v19, %v562_v62  ;;  %v2466_v42 = vmul.f32 0.70710677, %v2460_v22  ;;  %vm2468_vm1 = vcmp.eq.f32.partialorder %v622_v3, 8.507059e+37  ;;  %v640_v11 = vmul.f32 %v639_v25, %v2337_v32 }
  0x52   : > { %v650_v28 = vadd.f32 0.4994258, %v649_v24  ;;  %v306_v12 = vmul.f32 %v2207_v0, %v1979_v26  ;;  %v673_v39 = vadd.f32 0.00028619796, %v672_v35  ;;  %v684_v13 = vadd.f32 0.001143296, %v683_v40 }
  0x53   : > { %v2075_v37 = vpop.eup %2074  ;;  %v1928_v43 = vclamps-f32 %v587_v38, 1.0  ;;  %v710_v44 = vmul.f32 %v2466_v42, %v2466_v42  ;;  %v1980_v49 = vunpack.c.h.bf16 %v2028_v59  ;;  %v625_v1 = vor.u32 1.1754944e-38, %v624_v27 }
  0x54   : > { %v614_v46 = vmul.f32 %v2075_v37, %v612_v7  ;;  %v651_v47 = vmul.f32 %v650_v28, %v2337_v32  ;;  %v2478_v48 = vadd.f32 %v2215_v5, %v306_v12  ;;  %v674_v51 = vmul.f32 %v673_v39, %v2457_v36 }
  0x55   : > { %v1713_v50 = vadd.f32 1.0, %v1928_v43  ;;  %v685_v53 = vmul.f32 %v684_v13, %v2457_v36  ;;  %v2482_v54 = vmin.f32 %v710_v44, 16.0  ;;  %vm619_vm2 = vweird.f32 %v2075_v37 }
  0x56   : > { %v615_v55 = vsub.f32 1.0, %v614_v46  ;;  %v2484_v57 = vadd.f32 1.0, %v651_v47  ;;  %v2487_v58 = vmul.f32 0.70710677, %v2478_v48  ;;  %v675_v60 = vadd.f32 0.0036580483, %v674_v51  ;;  %vm2494_vm3 = vmor %vm618_vm0, %vm619_vm2 }
  0x57   : > { %v1745_v32 = vmul.f32 %v1713_v50, %v2335_v10  ;;  %v686_v30 = vadd.f32 0.014752088, %v685_v53  ;;  %v712_v18 = vmul.f32 2.1237322e-06, %v2482_v54  ;;  %v641_v45 = vadd.f32 1.1283791, %v640_v11 }
  0x58   : > { %v616_v63 = vmul.f32 %v2075_v37, %v615_v55  ;;  %2076 = vrcp.f32 %v2484_v57  ;;  %v676_v15 = vmul.f32 %v675_v60, %v2457_v36  ;;  %v307_v6 = vmul.f32 %v2207_v0, %v1980_v49 }
  0x59   : > { %1777 = vst [vmem:[%s2417_s27 + $0x18] sm:$0xff] %v1745_v32  ;;  %v687_v31 = vmul.f32 %v686_v30, %v2457_v36  ;;  %v713_v10 = vadd.f32 0.00028619796, %v712_v18  ;;  %v664_v33 = vand.u32 2147483648, %v2484_v57  ;;  %v723_v59 = vmul.f32 3.8918573e-05, %v2482_v54 }
  0x5a   : > { %v617_v8 = vadd.f32 %v2075_v37, %v616_v63  ;;  %v750_v16 = vmul.f32 %v2487_v58, %v2487_v58  ;;  %vm658_vm4 = vweird.f32 %v2484_v57  ;;  %v677_v7 = vadd.f32 0.05243302, %v676_v15 }
  0x5b   : > { %v688_v62 = vadd.f32 0.112945676, %v687_v31  ;;  %v714_v17 = vmul.f32 %v713_v10, %v2482_v54  ;;  %v662_v14 = vand.u32 2147483647, %v2484_v57  ;;  %v724_v20 = vadd.f32 0.001143296, %v723_v59 }
  0x5c   : > { %v621_v52 = vsel %vm2494_vm3, %v2075_v37, %v617_v8  ;;  %v2510_v25 = vmin.f32 %v750_v16, 16.0  ;;  %v678_v23 = vmul.f32 %v677_v7, %v2457_v36  ;;  %v665_v24 = vor.u32 1.1754944e-38, %v664_v33  ;;  %v2029_v33 = vld [vmem:[%s2202_s19 + $0x28] sm:$0xff]  }
  0x5d   : > { %v626_v3 = vsel %vm2468_vm1, %v625_v1, %v621_v52  ;;  %v689_v26 = vmul.f32 %v688_v62, %v2457_v36  ;;  %v715_v9 = vadd.f32 0.0036580483, %v714_v17  ;;  %v725_v38 = vmul.f32 %v724_v20, %v2482_v54 }
  0x5e   : > { %v2077_v19 = vpop.eup %2076  ;;  %v627_v27 = vmul.f32 %v626_v3, %v2455_v29  ;;  %v752_v35 = vmul.f32 2.1237322e-06, %v2510_v25  ;;  %v679_v11 = vadd.f32 0.18741608, %v678_v23  ;;  %v763_v44 = vmul.f32 3.8918573e-05, %v2510_v25 }
  0x5f   : > { %v654_v40 = vmul.f32 %v2077_v19, %v2484_v57  ;;  %vm659_vm5 = vweird.f32 %v2077_v19  ;;  %v690_v28 = vadd.f32 0.4994258, %v689_v26  ;;  %v716_v12 = vmul.f32 %v715_v9, %v2482_v54 }
  0x60   : > { %v1929_v34 = vclamps-f32 %v627_v27, 1.0  ;;  %v726_v37 = vadd.f32 0.014752088, %v725_v38  ;;  %v753_v43 = vadd.f32 0.00028619796, %v752_v35  ;;  %v680_v13 = vmul.f32 %v679_v11, %v2457_v36  ;;  %vm2530_vm6 = vmor %vm658_vm4, %vm659_vm5 }
  0x61   : > { %v655_v39 = vsub.f32 1.0, %v654_v40  ;;  %v691_v29 = vmul.f32 %v690_v28, %v2457_v36  ;;  %v717_v47 = vadd.f32 0.05243302, %v716_v12  ;;  %v764_v32 = vadd.f32 0.001143296, %v763_v44 }
  0x62   : > { %v1714_v46 = vadd.f32 1.0, %v1929_v34  ;;  %v727_v49 = vmul.f32 %v726_v37, %v2482_v54  ;;  %v754_v50 = vmul.f32 %v753_v43, %v2510_v25  ;;  %v681_v53 = vadd.f32 1.1283791, %v680_v13 }
  0x63   : > { %v656_v51 = vmul.f32 %v2077_v19, %v655_v39  ;;  %v692_v55 = vadd.f32 1.0, %v691_v29  ;;  %v718_v30 = vmul.f32 %v717_v47, %v2482_v54  ;;  %v642_v1 = vmul.f32 %v641_v45, %v2289_v56 }
  0x64   : > { %v1746_v60 = vmul.f32 %v1714_v46, %v2450_v21  ;;  %v728_v18 = vadd.f32 0.112945676, %v727_v49  ;;  %v755_v63 = vadd.f32 0.0036580483, %v754_v50  ;;  %vm663_vm7 = vcmp.eq.f32.partialorder %v662_v14, 8.507059e+37 }
  0x65   : > { %v657_v4 = vadd.f32 %v2077_v19, %v656_v51  ;;  %2078 = vrcp.f32 %v692_v55  ;;  %v371_v21 = vmul.f32 0.5, %v2276_v41  ;;  %v719_v15 = vadd.f32 0.18741608, %v718_v30 }
  0x66   : > { %1778 = vst [vmem:[%s2417_s27 + $0x20] sm:$0xff] %v1746_v60  ;;  %v729_v57 = vmul.f32 %v728_v18, %v2482_v54  ;;  %v2540_v31 = vadd.f32 %v2215_v5, %v307_v6  ;;  %v2545_v8 = vmul.f32 0.5, %v2324_v61  ;;  %v756_v56 = vmul.f32 %v755_v63, %v2510_v25 }
  0x67   : > { %v661_v10 = vsel %vm2530_vm6, %v2077_v19, %v657_v4  ;;  %v765_v45 = vmul.f32 %v764_v32, %v2510_v25  ;;  %v682_v41 = vmul.f32 %v681_v53, %v2429_v2  ;;  %v2552_v16 = vmul.f32 0.5, %v2460_v22 }
  0x68   : > { %v666_v59 = vsel %vm663_vm7, %v665_v24, %v661_v10  ;;  %v720_v6 = vmul.f32 %v719_v15, %v2482_v54  ;;  %v730_v62 = vadd.f32 0.4994258, %v729_v57  ;;  %v757_v17 = vadd.f32 0.05243302, %v756_v56 }
  0x69   : > { %v667_v7 = vmul.f32 %v666_v59, %v642_v1  ;;  %v766_v52 = vadd.f32 0.014752088, %v765_v45  ;;  %v702_v14 = vand.u32 2147483647, %v692_v55  ;;  %v704_v61 = vand.u32 2147483648, %v692_v55 }
  0x6a   : > { %v2556_v20 = vmul.f32 0.70710677, %v2540_v31  ;;  %v1983_v3 = vunpack.c.l.bf16 %v2029_v33  ;;  %v731_v9 = vmul.f32 %v730_v62, %v2482_v54  ;;  %v758_v2 = vmul.f32 %v757_v17, %v2510_v25 }
  0x6b   : > { %v2079_v23 = vpop.eup %2078  ;;  %v1930_v26 = vclamps-f32 %v667_v7, 1.0  ;;  %v767_v22 = vmul.f32 %v766_v52, %v2510_v25  ;;  %vm698_vm8 = vweird.f32 %v692_v55  ;;  %v721_v27 = vadd.f32 1.1283791, %v720_v6  ;;  %v2605_v7 = vld [vmem:[%s2202_s19 + $0x30] sm:$0xff]  }
  0x6c   : > { %v694_v19 = vmul.f32 %v2079_v23, %v692_v55  ;;  %v790_v24 = vmul.f32 %v2556_v20, %v2556_v20  ;;  %vm699_vm9 = vweird.f32 %v2079_v23  ;;  %v732_v35 = vadd.f32 1.0, %v731_v9 }
  0x6d   : > { %v1715_v38 = vadd.f32 1.0, %v1930_v26  ;;  %v768_v40 = vadd.f32 0.112945676, %v767_v22  ;;  %v759_v28 = vadd.f32 0.18741608, %v758_v2  ;;  %v308_v54 = vmul.f32 %v2207_v0, %v1983_v3  ;;  %vm2574_vm11 = vmor %vm698_vm8, %vm699_vm9 }
  0x6e   : > { %v695_v11 = vsub.f32 1.0, %v694_v19  ;;  %v2563_v34 = vmin.f32 %v790_v24, 16.0  ;;  %vm2566_vm10 = vcmp.eq.f32.partialorder %v702_v14, 8.507059e+37  ;;  %v705_v43 = vor.u32 1.1754944e-38, %v704_v61 }
  0x6f   : > { %v1747_v12 = vmul.f32 %v1715_v38, %v371_v21  ;;  %2080 = vrcp.f32 %v732_v35  ;;  %v742_v13 = vand.u32 2147483647, %v732_v35  ;;  %v769_v29 = vmul.f32 %v768_v40, %v2510_v25 }
  0x70   : > { %v696_v39 = vmul.f32 %v2079_v23, %v695_v11  ;;  %v1984_v44 = vunpack.c.h.bf16 %v2029_v33  ;;  %v2579_v47 = vmul.f32 %v721_v27, %v2466_v42  ;;  %v792_v49 = vmul.f32 2.1237322e-06, %v2563_v34 }
  0x71   : > { %1779 = vst [vmem:[%s2417_s27 + $0x28] sm:$0xff] %v1747_v12  ;;  %v803_v50 = vmul.f32 3.8918573e-05, %v2563_v34  ;;  %v2584_v51 = vadd.f32 %v2215_v5, %v308_v54  ;;  %v744_v32 = vand.u32 2147483648, %v732_v35  ;;  %v760_v60 = vmul.f32 %v759_v28, %v2510_v25 }
  0x72   : > { %v697_v53 = vadd.f32 %v2079_v23, %v696_v39  ;;  %v770_v36 = vadd.f32 0.4994258, %v769_v29  ;;  %vm738_vm12 = vweird.f32 %v732_v35  ;;  %v793_v55 = vadd.f32 0.00028619796, %v792_v49 }
  0x73   : > { %v804_v30 = vadd.f32 0.001143296, %v803_v50  ;;  %v2588_v18 = vmul.f32 0.70710677, %v2584_v51  ;;  %vm2592_vm13 = vcmp.eq.f32.partialorder %v742_v13, 8.507059e+37  ;;  %v309_v4 = vmul.f32 %v2207_v0, %v1984_v44 }
  0x74   : > { %v701_v42 = vsel %vm2574_vm11, %v2079_v23, %v697_v53  ;;  %v771_v1 = vmul.f32 %v770_v36, %v2510_v25  ;;  %v794_v57 = vmul.f32 %v793_v55, %v2563_v34  ;;  %v761_v59 = vadd.f32 1.1283791, %v760_v60 }
  0x75   : > { %v2081_v21 = vpop.eup %2080  ;;  %v706_v15 = vsel %vm2566_vm10, %v705_v43, %v701_v42  ;;  %v805_v10 = vmul.f32 %v804_v30, %v2563_v34  ;;  %v830_v56 = vmul.f32 %v2588_v18, %v2588_v18  ;;  %v745_v25 = vor.u32 1.1754944e-38, %v744_v32 }
  0x76   : > { %v707_v45 = vmul.f32 %v706_v15, %v682_v41  ;;  %v734_v33 = vmul.f32 %v2081_v21, %v732_v35  ;;  %v772_v6 = vadd.f32 1.0, %v771_v1  ;;  %v795_v62 = vadd.f32 0.0036580483, %v794_v57 }
  0x77   : > { %v806_v17 = vadd.f32 0.014752088, %v805_v10  ;;  %v2607_v52 = vmin.f32 %v830_v56, 16.0  ;;  %vm739_vm14 = vweird.f32 %v2081_v21  ;;  %v2612_v41 = vadd.f32 %v2215_v5, %v309_v4 }
  0x78   : > { %v1931_v14 = vclamps-f32 %v707_v45, 1.0  ;;  %v735_v61 = vsub.f32 1.0, %v734_v33  ;;  %2082 = vrcp.f32 %v772_v6  ;;  %v796_v3 = vmul.f32 %v795_v62, %v2563_v34  ;;  %vm2618_vm15 = vmor %vm738_vm12, %vm739_vm14 }
  0x79   : > { %v807_v23 = vmul.f32 %v806_v17, %v2563_v34  ;;  %v1987_v26 = vunpack.c.l.bf16 %v2605_v7  ;;  %v832_v22 = vmul.f32 2.1237322e-06, %v2607_v52  ;;  %v843_v19 = vmul.f32 3.8918573e-05, %v2607_v52 }
  0x7a   : > { %v1716_v9 = vadd.f32 1.0, %v1931_v14  ;;  %v736_v2 = vmul.f32 %v2081_v21, %v735_v61  ;;  %v762_v24 = vmul.f32 %v761_v59, %v2487_v58  ;;  %vm778_vm0 = vweird.f32 %v772_v6 }
  0x7b   : > { %v797_v38 = vadd.f32 0.05243302, %v796_v3  ;;  %v808_v40 = vadd.f32 0.112945676, %v807_v23  ;;  %v833_v54 = vadd.f32 0.00028619796, %v832_v22  ;;  %v310_v44 = vmul.f32 %v2207_v0, %v1987_v26 }
  0x7c   : > { %v1748_v11 = vmul.f32 %v1716_v9, %v2545_v8  ;;  %v737_v28 = vadd.f32 %v2081_v21, %v736_v2  ;;  %v844_v12 = vadd.f32 0.001143296, %v843_v19  ;;  %v782_v37 = vand.u32 2147483647, %v772_v6 }
  0x7d   : > { %v798_v43 = vmul.f32 %v797_v38, %v2563_v34  ;;  %v809_v39 = vmul.f32 %v808_v40, %v2563_v34  ;;  %v2627_v35 = vmul.f32 0.70710677, %v2612_v41  ;;  %v834_v29 = vmul.f32 %v833_v54, %v2607_v52  ;;  %v2685_v54 = vld [vmem:[%s2202_s19 + $0x38] sm:$0xff]  }
  0x7e   : > { %v2083_v13 = vpop.eup %2082  ;;  %1780 = vst [vmem:[%s2417_s27 + $0x30] sm:$0xff] %v1748_v11  ;;  %v741_v58 = vsel %vm2618_vm15, %v2081_v21, %v737_v28  ;;  %v845_v8 = vmul.f32 %v844_v12, %v2607_v52  ;;  %v784_v50 = vand.u32 2147483648, %v772_v6  ;;  %v2644_v15 = vadd.f32 %v2215_v5, %v310_v44 }
  0x7f   : > { %v746_v46 = vsel %vm2592_vm13, %v745_v25, %v741_v58  ;;  %v774_v49 = vmul.f32 %v2083_v13, %v772_v6  ;;  %v799_v53 = vadd.f32 0.18741608, %v798_v43  ;;  %vm779_vm1 = vweird.f32 %v2083_v13 }
  0x80   : > { %v747_v32 = vmul.f32 %v746_v46, %v2579_v47  ;;  %v810_v60 = vadd.f32 0.4994258, %v809_v39  ;;  %v835_v36 = vadd.f32 0.0036580483, %v834_v29  ;;  %v846_v42 = vadd.f32 0.014752088, %v845_v8  ;;  %vm2655_vm3 = vmor %vm778_vm0, %vm779_vm1 }
  0x81   : > { %v775_v55 = vsub.f32 1.0, %v774_v49  ;;  %v800_v30 = vmul.f32 %v799_v53, %v2563_v34  ;;  %v870_v1 = vmul.f32 %v2627_v35, %v2627_v35  ;;  %vm2646_vm2 = vcmp.eq.f32.partialorder %v782_v37, 8.507059e+37 }
  0x82   : > { %v1932_v4 = vclamps-f32 %v747_v32, 1.0  ;;  %v811_v21 = vmul.f32 %v810_v60, %v2563_v34  ;;  %v836_v63 = vmul.f32 %v835_v36, %v2607_v52  ;;  %v847_v10 = vmul.f32 %v846_v42, %v2607_v52 }
  0x83   : > { %v776_v57 = vmul.f32 %v2083_v13, %v775_v55  ;;  %v2651_v56 = vmin.f32 %v870_v1, 16.0  ;;  %v785_v33 = vor.u32 1.1754944e-38, %v784_v50  ;;  %v801_v62 = vadd.f32 1.1283791, %v800_v30 }
  0x84   : > { %v1717_v45 = vadd.f32 1.0, %v1932_v4  ;;  %v812_v5 = vadd.f32 1.0, %v811_v21  ;;  %v837_v59 = vadd.f32 0.05243302, %v836_v63  ;;  %v848_v17 = vadd.f32 0.112945676, %v847_v10 }
  0x85   : > { %v777_v25 = vadd.f32 %v2083_v13, %v776_v57  ;;  %v872_v14 = vmul.f32 2.1237322e-06, %v2651_v56  ;;  %v2662_v3 = vmul.f32 0.70710677, %v2644_v15  ;;  %v1988_v6 = vunpack.c.h.bf16 %v2605_v7  ;;  %v2712_v57 = vld [vmem:[%s3552_s1] ss:$0 sm:$0xff] }
  0x86   : > { %v1749_v61 = vmul.f32 %v1717_v45, %v2552_v16  ;;  %2084 = vrcp.f32 %v812_v5  ;;  %v838_v26 = vmul.f32 %v837_v59, %v2607_v52  ;;  %v849_v9 = vmul.f32 %v848_v17, %v2607_v52 }
  0x87   : > { %v781_v23 = vsel %vm2655_vm3, %v2083_v13, %v777_v25  ;;  %v374_v2 = vmul.f32 0.5, %v2478_v48  ;;  %v2674_v22 = vmul.f32 0.5, %v2540_v31  ;;  %v873_v19 = vadd.f32 0.00028619796, %v872_v14 }
  0x88   : > { %1781 = vst [vmem:[%s2417_s27 + $0x38] sm:$0xff] %v1749_v61  ;;  %v786_v16 = vsel %vm2646_vm2, %v785_v33, %v781_v23  ;;  %v2677_v7 = vmul.f32 %v801_v62, %v2556_v20  ;;  %vm818_vm4 = vweird.f32 %v812_v5  ;;  %v850_v38 = vadd.f32 0.4994258, %v849_v9 }
  0x89   : > { %v787_v27 = vmul.f32 %v786_v16, %v762_v24  ;;  %v874_v40 = vmul.f32 %v873_v19, %v2651_v56  ;;  %v883_v11 = vmul.f32 3.8918573e-05, %v2651_v56  ;;  %v910_v48 = vmul.f32 %v2662_v3, %v2662_v3 }
  0x8a   : > { %v311_v28 = vmul.f32 %v2207_v0, %v1988_v6  ;;  %v822_v12 = vand.u32 2147483647, %v812_v5  ;;  %v839_v37 = vadd.f32 0.18741608, %v838_v26  ;;  %v851_v24 = vmul.f32 %v850_v38, %v2607_v52  ;;  %v2693_v0 = vld [vmem:[%s3553_s2] ss:$0 sm:$0xff] }
  0x8b   : > { %v1933_v31 = vclamps-f32 %v787_v27, 1.0  ;;  %v824_v43 = vand.u32 2147483648, %v812_v5  ;;  %v875_v39 = vadd.f32 0.0036580483, %v874_v40  ;;  %v884_v13 = vadd.f32 0.001143296, %v883_v11 }
  0x8c   : > { %v2085_v20 = vpop.eup %2084  ;;  %v2688_v58 = vmin.f32 %v910_v48, 16.0  ;;  %v2696_v44 = vadd.f32 %v2693_v0, %v311_v28  ;;  %v1991_v46 = vunpack.c.l.bf16 %v2685_v54  ;;  %v852_v49 = vadd.f32 1.0, %v851_v24 }
  0x8d   : > { %v1718_v29 = vadd.f32 1.0, %v1933_v31  ;;  %v814_v8 = vmul.f32 %v2085_v20, %v812_v5  ;;  %v876_v50 = vmul.f32 %v875_v39, %v2651_v56  ;;  %v885_v53 = vmul.f32 %v884_v13, %v2651_v56 }
  0x8e   : > { %v912_v32 = vmul.f32 2.1237322e-06, %v2688_v58  ;;  %vm819_vm5 = vweird.f32 %v2085_v20  ;;  %v923_v55 = vmul.f32 3.8918573e-05, %v2688_v58  ;;  %vm2703_vm6 = vcmp.eq.f32.partialorder %v822_v12, 8.507059e+37 }
  0x8f   : > { %v1750_v60 = vmul.f32 %v1718_v29, %v374_v2  ;;  %v815_v36 = vsub.f32 1.0, %v814_v8  ;;  %v840_v42 = vmul.f32 %v839_v37, %v2607_v52  ;;  %2086 = vrcp.f32 %v852_v49  ;;  %vm2716_vm7 = vmor %vm818_vm4, %vm819_vm5 }
  0x90   : > { %v862_v1 = vand.u32 2147483647, %v852_v49  ;;  %v877_v21 = vadd.f32 0.05243302, %v876_v50  ;;  %v886_v63 = vadd.f32 0.014752088, %v885_v53  ;;  %v312_v47 = vmul.f32 %v2712_v57, %v1991_v46 }
  0x91   : > { %1782 = vst [vmem:[%s2417_s27 + $0x40] sm:$0xff] %v1750_v60  ;;  %v816_v4 = vmul.f32 %v2085_v20, %v815_v36  ;;  %v825_v45 = vor.u32 1.1754944e-38, %v824_v43  ;;  %v864_v52 = vand.u32 2147483648, %v852_v49  ;;  %v913_v34 = vadd.f32 0.00028619796, %v912_v32 }
  0x92   : > { %v924_v33 = vadd.f32 0.001143296, %v923_v55  ;;  %v878_v25 = vmul.f32 %v877_v21, %v2651_v56  ;;  %v887_v62 = vmul.f32 %v886_v63, %v2651_v56  ;;  %v2723_v17 = vmul.f32 0.70710677, %v2696_v44 }
  0x93   : > { %v817_v59 = vadd.f32 %v2085_v20, %v816_v4  ;;  %v841_v14 = vadd.f32 1.1283791, %v840_v42  ;;  %vm858_vm8 = vweird.f32 %v852_v49  ;;  %v914_v5 = vmul.f32 %v913_v34, %v2688_v58 }
  0x94   : > { %v925_v61 = vmul.f32 %v924_v33, %v2688_v58  ;;  %vm2729_vm9 = vcmp.eq.f32.partialorder %v862_v1, 8.507059e+37  ;;  %v879_v26 = vadd.f32 0.18741608, %v878_v25  ;;  %v888_v9 = vadd.f32 0.112945676, %v887_v62 }
  0x95   : > { %v821_v6 = vsel %vm2716_vm7, %v2085_v20, %v817_v59  ;;  %v2734_v2 = vadd.f32 %v2693_v0, %v312_v47  ;;  %v2087_v16 = vpop.eup %2086  ;;  %v915_v27 = vadd.f32 0.0036580483, %v914_v5  ;;  %v950_v40 = vmul.f32 %v2723_v17, %v2723_v17 }
  0x96   : > { %v826_v19 = vsel %vm2703_vm6, %v825_v45, %v821_v6  ;;  %v926_v38 = vadd.f32 0.014752088, %v925_v61  ;;  %v854_v48 = vmul.f32 %v2087_v16, %v852_v49  ;;  %vm859_vm10 = vweird.f32 %v2087_v16 }
  0x97   : > { %v827_v11 = vmul.f32 %v826_v19, %v2677_v7  ;;  %v865_v28 = vor.u32 1.1754944e-38, %v864_v52  ;;  %v889_v31 = vmul.f32 %v888_v9, %v2651_v56  ;;  %v916_v12 = vmul.f32 %v915_v27, %v2688_v58  ;;  %vm2755_vm11 = vmor %vm858_vm8, %vm859_vm10 }
  0x98   : > { %v927_v37 = vmul.f32 %v926_v38, %v2688_v58  ;;  %v2744_v24 = vmin.f32 %v950_v40, 16.0  ;;  %v855_v43 = vsub.f32 1.0, %v854_v48  ;;  %v880_v39 = vmul.f32 %v879_v26, %v2651_v56 }
  0x99   : > { %v1934_v20 = vclamps-f32 %v827_v11, 1.0  ;;  %v2748_v13 = vmul.f32 0.70710677, %v2734_v2  ;;  %v842_v7 = vmul.f32 %v841_v14, %v2588_v18  ;;  %v890_v29 = vadd.f32 0.4994258, %v889_v31 }
  0x9a   : > { %v917_v8 = vadd.f32 0.05243302, %v916_v12  ;;  %v928_v46 = vadd.f32 0.112945676, %v927_v37  ;;  %v856_v53 = vmul.f32 %v2087_v16, %v855_v43  ;;  %v952_v32 = vmul.f32 2.1237322e-06, %v2744_v24 }
  0x9b   : > { %v1719_v50 = vadd.f32 1.0, %v1934_v20  ;;  %v1992_v60 = vunpack.c.h.bf16 %v2685_v54  ;;  %v891_v55 = vmul.f32 %v890_v29, %v2651_v56  ;;  %v963_v42 = vmul.f32 3.8918573e-05, %v2744_v24  ;;  %v2806_v43 = vld [vmem:[%s2202_s19 + $0x40] sm:$0xff]  }
  0x9c   : > { %v918_v18 = vmul.f32 %v917_v8, %v2688_v58  ;;  %v929_v30 = vmul.f32 %v928_v46, %v2688_v58  ;;  %v857_v4 = vadd.f32 %v2087_v16, %v856_v53  ;;  %v881_v21 = vadd.f32 1.1283791, %v880_v39 }
  0x9d   : > { %v1751_v1 = vmul.f32 %v1719_v50, %v2674_v22  ;;  %v953_v63 = vadd.f32 0.00028619796, %v952_v32  ;;  %v892_v54 = vadd.f32 1.0, %v891_v55  ;;  %v990_v10 = vmul.f32 %v2748_v13, %v2748_v13 }
  0x9e   : > { %v919_v47 = vadd.f32 0.18741608, %v918_v18  ;;  %v930_v49 = vadd.f32 0.4994258, %v929_v30  ;;  %v376_v56 = vmul.f32 0.5, %v2584_v51  ;;  %v861_v45 = vsel %vm2755_vm11, %v2087_v16, %v857_v4 }
  0x9f   : > { %1783 = vst [vmem:[%s2417_s27 + $0x48] sm:$0xff] %v1751_v1  ;;  %v954_v52 = vmul.f32 %v953_v63, %v2744_v24  ;;  %v964_v34 = vadd.f32 0.001143296, %v963_v42  ;;  %v866_v22 = vsel %vm2729_vm9, %v865_v28, %v861_v45  ;;  %v2774_v33 = vmul.f32 0.5, %v2612_v41 }
  0xa0   : > { %2088 = vrcp.f32 %v892_v54  ;;  %v2777_v59 = vmul.f32 0.5, %v2644_v15  ;;  %v867_v25 = vmul.f32 %v866_v22, %v842_v7  ;;  %v920_v62 = vmul.f32 %v919_v47, %v2688_v58 }
  0xa1   : > { %v931_v51 = vmul.f32 %v930_v49, %v2688_v58  ;;  %v313_v14 = vmul.f32 %v2712_v57, %v1992_v60  ;;  %v2783_v5 = vmul.f32 %v881_v21, %v2627_v35  ;;  %v955_v61 = vadd.f32 0.0036580483, %v954_v52 }
  0xa2   : > { %v965_v6 = vmul.f32 %v964_v34, %v2744_v24  ;;  %v2786_v23 = vmin.f32 %v990_v10, 16.0  ;;  %v1935_v41 = vclamps-f32 %v867_v25, 1.0  ;;  %v902_v26 = vand.u32 2147483647, %v892_v54 }
  0xa3   : > { %v904_v9 = vand.u32 2147483648, %v892_v54  ;;  %v2788_v15 = vadd.f32 1.0, %v931_v51  ;;  %v921_v16 = vadd.f32 1.1283791, %v920_v62  ;;  %v2791_v19 = vmul.f32 0.5, %v2696_v44 }
  0xa4   : > { %v956_v58 = vmul.f32 %v955_v61, %v2744_v24  ;;  %v966_v27 = vadd.f32 0.014752088, %v965_v6  ;;  %v1720_v35 = vadd.f32 1.0, %v1935_v41  ;;  %v992_v38 = vmul.f32 2.1237322e-06, %v2786_v23 }
  0xa5   : > { %2090 = vrcp.f32 %v2788_v15  ;;  %v1003_v40 = vmul.f32 3.8918573e-05, %v2786_v23  ;;  %vm898_vm12 = vweird.f32 %v892_v54  ;;  %v2799_v44 = vadd.f32 %v2693_v0, %v313_v14 }
  0xa6   : > { %v2089_v11 = vpop.eup %2088  ;;  %v957_v48 = vadd.f32 0.05243302, %v956_v58  ;;  %v967_v28 = vmul.f32 %v966_v27, %v2744_v24  ;;  %v1752_v31 = vmul.f32 %v1720_v35, %v376_v56  ;;  %vm2801_vm13 = vcmp.eq.f32.partialorder %v902_v26, 8.507059e+37 }
  0xa7   : > { %v894_v12 = vmul.f32 %v2089_v11, %v892_v54  ;;  %v905_v20 = vor.u32 1.1754944e-38, %v904_v9  ;;  %v922_v39 = vmul.f32 %v921_v16, %v2662_v3  ;;  %vm938_vm14 = vweird.f32 %v2788_v15 }
  0xa8   : > { %v958_v7 = vmul.f32 %v957_v48, %v2744_v24  ;;  %v968_v29 = vadd.f32 0.112945676, %v967_v28  ;;  %1784 = vst [vmem:[%s2417_s27 + $0x50] sm:$0xff] %v1752_v31  ;;  %vm899_vm15 = vweird.f32 %v2089_v11  ;;  %v993_v46 = vadd.f32 0.00028619796, %v992_v38 }
  0xa9   : > { %v895_v8 = vsub.f32 1.0, %v894_v12  ;;  %v1004_v50 = vadd.f32 0.001143296, %v1003_v40  ;;  %v2814_v60 = vmul.f32 0.70710677, %v2799_v44  ;;  %v1995_v36 = vunpack.c.l.bf16 %v2806_v43  ;;  %vm2821_vm0 = vmor %vm898_vm12, %vm899_vm15 }
  0xaa   : > { %v959_v53 = vadd.f32 0.18741608, %v958_v7  ;;  %v969_v32 = vmul.f32 %v968_v29, %v2744_v24  ;;  %v942_v18 = vand.u32 2147483647, %v2788_v15  ;;  %v994_v30 = vmul.f32 %v993_v46, %v2786_v23 }
  0xab   : > { %v2091_v55 = vpop.eup %2090  ;;  %v896_v3 = vmul.f32 %v2089_v11, %v895_v8  ;;  %v1005_v42 = vmul.f32 %v1004_v50, %v2786_v23  ;;  %v944_v21 = vand.u32 2147483648, %v2788_v15  ;;  %v1030_v45 = vmul.f32 %v2814_v60, %v2814_v60 }
  0xac   : > { %v934_v4 = vmul.f32 %v2091_v55, %v2788_v15  ;;  %v960_v63 = vmul.f32 %v959_v53, %v2744_v24  ;;  %v970_v47 = vadd.f32 0.4994258, %v969_v32  ;;  %v995_v10 = vadd.f32 0.0036580483, %v994_v30 }
  0xad   : > { %v897_v49 = vadd.f32 %v2089_v11, %v896_v3  ;;  %v1006_v56 = vadd.f32 0.014752088, %v1005_v42  ;;  %vm939_vm1 = vweird.f32 %v2091_v55  ;;  %v314_v34 = vmul.f32 %v2712_v57, %v1995_v36 }
  0xae   : > { %v935_v52 = vsub.f32 1.0, %v934_v4  ;;  %v971_v54 = vmul.f32 %v970_v47, %v2744_v24  ;;  %v961_v25 = vadd.f32 1.1283791, %v960_v63  ;;  %v996_v62 = vmul.f32 %v995_v10, %v2786_v23  ;;  %vm2843_vm2 = vmor %vm938_vm14, %vm939_vm1  ;;  %v2877_v10 = vld [vmem:[%s2202_s19 + $0x48] sm:$0xff]  }
  0xaf   : > { %v901_v22 = vsel %vm2821_vm0, %v2089_v11, %v897_v49  ;;  %v1007_v51 = vmul.f32 %v1006_v56, %v2786_v23  ;;  %v2838_v41 = vmin.f32 %v1030_v45, 16.0  ;;  %v945_v9 = vor.u32 1.1754944e-38, %v944_v21 }
  0xb0   : > { %v906_v14 = vsel %vm2801_vm13, %v905_v20, %v901_v22  ;;  %v936_v61 = vmul.f32 %v2091_v55, %v935_v52  ;;  %v972_v6 = vadd.f32 1.0, %v971_v54  ;;  %v997_v16 = vadd.f32 0.05243302, %v996_v62 }
  0xb1   : > { %v907_v26 = vmul.f32 %v906_v14, %v2783_v5  ;;  %v1008_v58 = vadd.f32 0.112945676, %v1007_v51  ;;  %vm943_vm3 = vcmp.eq.f32.partialorder %v942_v18, 8.507059e+37  ;;  %v1996_v35 = vunpack.c.h.bf16 %v2806_v43 }
  0xb2   : > { %v937_v27 = vadd.f32 %v2091_v55, %v936_v61  ;;  %2092 = vrcp.f32 %v972_v6  ;;  %v998_v40 = vmul.f32 %v997_v16, %v2786_v23  ;;  %v2851_v5 = vadd.f32 %v2693_v0, %v314_v34 }
  0xb3   : > { %v1936_v38 = vclamps-f32 %v907_v26, 1.0  ;;  %v1009_v11 = vmul.f32 %v1008_v58, %v2786_v23  ;;  %v2856_v48 = vmul.f32 %v961_v25, %v2723_v17  ;;  %v1032_v28 = vmul.f32 2.1237322e-06, %v2838_v41 }
  0xb4   : > { %v941_v15 = vsel %vm2843_vm2, %v2091_v55, %v937_v27  ;;  %v1043_v31 = vmul.f32 3.8918573e-05, %v2838_v41  ;;  %v982_v20 = vand.u32 2147483647, %v972_v6  ;;  %v999_v43 = vadd.f32 0.18741608, %v998_v40 }
  0xb5   : > { %v1721_v12 = vadd.f32 1.0, %v1936_v38  ;;  %v946_v37 = vsel %vm943_vm3, %v945_v9, %v941_v15  ;;  %v1010_v29 = vadd.f32 0.4994258, %v1009_v11  ;;  %v1033_v8 = vadd.f32 0.00028619796, %v1032_v28 }
  0xb6   : > { %v947_v7 = vmul.f32 %v946_v37, %v922_v39  ;;  %v1044_v46 = vadd.f32 0.001143296, %v1043_v31  ;;  %v984_v53 = vand.u32 2147483648, %v972_v6  ;;  %v1000_v32 = vmul.f32 %v999_v43, %v2786_v23 }
  0xb7   : > { %v1753_v50 = vmul.f32 %v1721_v12, %v2774_v33  ;;  %v2863_v17 = vmul.f32 0.70710677, %v2851_v5  ;;  %v1011_v3 = vmul.f32 %v1010_v29, %v2786_v23  ;;  %v1034_v18 = vmul.f32 %v1033_v8, %v2838_v41 }
  0xb8   : > { %v2093_v36 = vpop.eup %2092  ;;  %v1937_v55 = vclamps-f32 %v947_v7, 1.0  ;;  %v1045_v39 = vmul.f32 %v1044_v46, %v2838_v41  ;;  %v1001_v42 = vadd.f32 1.1283791, %v1000_v32  ;;  %v315_v1 = vmul.f32 %v2712_v57, %v1996_v35 }
  0xb9   : > { %1785 = vst [vmem:[%s2417_s27 + $0x58] sm:$0xff] %v1753_v50  ;;  %v974_v30 = vmul.f32 %v2093_v36, %v972_v6  ;;  %v1070_v33 = vmul.f32 %v2863_v17, %v2863_v17  ;;  %v2872_v21 = vadd.f32 1.0, %v1011_v3  ;;  %v1035_v63 = vadd.f32 0.0036580483, %v1034_v18 }
  0xba   : > { %v1722_v4 = vadd.f32 1.0, %v1937_v55  ;;  %v1046_v47 = vadd.f32 0.014752088, %v1045_v39  ;;  %vm978_vm4 = vweird.f32 %v972_v6  ;;  %vm979_vm5 = vweird.f32 %v2093_v36 }
  0xbb   : > { %v975_v23 = vsub.f32 1.0, %v974_v30  ;;  %v2874_v49 = vmin.f32 %v1070_v33, 16.0  ;;  %vm2880_vm6 = vcmp.eq.f32.partialorder %v982_v20, 8.507059e+37  ;;  %v985_v52 = vor.u32 1.1754944e-38, %v984_v53  ;;  %vm2891_vm7 = vmor %vm978_vm4, %vm979_vm5 }
  0xbc   : > { %v1754_v56 = vmul.f32 %v1722_v4, %v2777_v59  ;;  %2094 = vrcp.f32 %v2872_v21  ;;  %v1036_v34 = vmul.f32 %v1035_v63, %v2838_v41  ;;  %v1047_v22 = vmul.f32 %v1046_v47, %v2838_v41 }
  0xbd   : > { %v976_v54 = vmul.f32 %v2093_v36, %v975_v23  ;;  %v2888_v25 = vadd.f32 %v2693_v0, %v315_v1  ;;  %v2896_v59 = vmul.f32 %v1001_v42, %v2748_v13  ;;  %v1072_v51 = vmul.f32 2.1237322e-06, %v2874_v49 }
  0xbe   : > { %1786 = vst [vmem:[%s2417_s27 + $0x60] sm:$0xff] %v1754_v56  ;;  %v1083_v14 = vmul.f32 3.8918573e-05, %v2874_v49  ;;  %v1999_v61 = vunpack.c.l.bf16 %v2877_v10  ;;  %vm1018_vm8 = vweird.f32 %v2872_v21  ;;  %v1037_v26 = vadd.f32 0.05243302, %v1036_v34 }
  0xbf   : > { %v977_v6 = vadd.f32 %v2093_v36, %v976_v54  ;;  %v1048_v24 = vadd.f32 0.112945676, %v1047_v22  ;;  %v1022_v9 = vand.u32 2147483647, %v2872_v21  ;;  %v1073_v16 = vadd.f32 0.00028619796, %v1072_v51 }
  0xc0   : > { %v1084_v58 = vadd.f32 0.001143296, %v1083_v14  ;;  %v316_v27 = vmul.f32 %v2712_v57, %v1999_v61  ;;  %v1038_v35 = vmul.f32 %v1037_v26, %v2838_v41  ;;  %v2909_v40 = vmul.f32 0.70710677, %v2888_v25 }
  0xc1   : > { %v981_v13 = vsel %vm2891_vm7, %v2093_v36, %v977_v6  ;;  %v1049_v38 = vmul.f32 %v1048_v24, %v2838_v41  ;;  %v1074_v28 = vmul.f32 %v1073_v16, %v2874_v49  ;;  %v1024_v43 = vand.u32 2147483648, %v2872_v21 }
  0xc2   : > { %v2095_v11 = vpop.eup %2094  ;;  %v986_v15 = vsel %vm2880_vm6, %v985_v52, %v981_v13  ;;  %v1085_v31 = vmul.f32 %v1084_v58, %v2874_v49  ;;  %v2916_v12 = vadd.f32 %v2693_v0, %v316_v27  ;;  %v1039_v7 = vadd.f32 0.18741608, %v1038_v35 }
  0xc3   : > { %v987_v37 = vmul.f32 %v986_v15, %v2856_v48  ;;  %v1014_v20 = vmul.f32 %v2095_v11, %v2872_v21  ;;  %v1050_v29 = vadd.f32 0.4994258, %v1049_v38  ;;  %v1075_v8 = vadd.f32 0.0036580483, %v1074_v28 }
  0xc4   : > { %v1086_v46 = vadd.f32 0.014752088, %v1085_v31  ;;  %v1110_v50 = vmul.f32 %v2909_v40, %v2909_v40  ;;  %vm1019_vm9 = vweird.f32 %v2095_v11  ;;  %v1040_v36 = vmul.f32 %v1039_v7, %v2838_v41 }
  0xc5   : > { %v1938_v53 = vclamps-f32 %v987_v37, 1.0  ;;  %v1015_v32 = vsub.f32 1.0, %v1014_v20  ;;  %v1051_v55 = vmul.f32 %v1050_v29, %v2838_v41  ;;  %v1076_v48 = vmul.f32 %v1075_v8, %v2874_v49  ;;  %vm2934_vm10 = vmor %vm1018_vm8, %vm1019_vm9 }
  0xc6   : > { %v1087_v3 = vmul.f32 %v1086_v46, %v2874_v49  ;;  %v2928_v18 = vmul.f32 0.70710677, %v2916_v12  ;;  %v1041_v42 = vadd.f32 1.1283791, %v1040_v36  ;;  %v2930_v33 = vmin.f32 %v1110_v50, 16.0 }
  0xc7   : > { %v1723_v39 = vadd.f32 1.0, %v1938_v53  ;;  %v1016_v30 = vmul.f32 %v2095_v11, %v1015_v32  ;;  %v1025_v41 = vor.u32 1.1754944e-38, %v1024_v43  ;;  %v1052_v4 = vadd.f32 1.0, %v1051_v55  ;;  %v2975_v53 = vld [vmem:[%s2202_s19 + $0x50] sm:$0xff]  }
  0xc8   : > { %v1077_v63 = vadd.f32 0.05243302, %v1076_v48  ;;  %v1088_v47 = vadd.f32 0.112945676, %v1087_v3  ;;  %vm1023_vm11 = vcmp.eq.f32.partialorder %v1022_v9, 8.507059e+37  ;;  %v380_v52 = vmul.f32 0.5, %v2734_v2 }
  0xc9   : > { %v1755_v23 = vmul.f32 %v1723_v39, %v2791_v19  ;;  %v1017_v56 = vadd.f32 %v2095_v11, %v1016_v30  ;;  %v1112_v45 = vmul.f32 2.1237322e-06, %v2930_v33  ;;  %2096 = vrcp.f32 %v1052_v4 }
  0xca   : > { %v1150_v21 = vmul.f32 %v2928_v18, %v2928_v18  ;;  %v2000_v54 = vunpack.c.h.bf16 %v2877_v10  ;;  %v1078_v22 = vmul.f32 %v1077_v63, %v2874_v49  ;;  %v1089_v19 = vmul.f32 %v1088_v47, %v2874_v49 }
  0xcb   : > { %1787 = vst [vmem:[%s2417_s27 + $0x68] sm:$0xff] %v1755_v23  ;;  %v1021_v34 = vsel %vm2934_vm10, %v2095_v11, %v1017_v56  ;;  %v1113_v62 = vadd.f32 0.00028619796, %v1112_v45  ;;  %v2950_v14 = vmul.f32 0.5, %v2799_v44  ;;  %v2953_v2 = vmul.f32 %v1041_v42, %v2814_v60 }
  0xcc   : > { %v1026_v51 = vsel %vm1023_vm11, %v1025_v41, %v1021_v34  ;;  %v1062_v61 = vand.u32 2147483647, %v1052_v4  ;;  %v1079_v10 = vadd.f32 0.18741608, %v1078_v22  ;;  %v1090_v26 = vadd.f32 0.4994258, %v1089_v19 }
  0xcd   : > { %v1027_v6 = vmul.f32 %v1026_v51, %v2896_v59  ;;  %v1114_v24 = vmul.f32 %v1113_v62, %v2930_v33  ;;  %vm1058_vm12 = vweird.f32 %v1052_v4  ;;  %v1123_v9 = vmul.f32 3.8918573e-05, %v2930_v33 }
  0xce   : > { %v2958_v16 = vmin.f32 %v1150_v21, 16.0  ;;  %v317_v58 = vmul.f32 %v2712_v57, %v2000_v54  ;;  %v1064_v44 = vand.u32 2147483648, %v1052_v4  ;;  %v1091_v13 = vmul.f32 %v1090_v26, %v2874_v49 }
  0xcf   : > { %v1939_v27 = vclamps-f32 %v1027_v6, 1.0  ;;  %v1115_v60 = vadd.f32 0.0036580483, %v1114_v24  ;;  %v2097_v35 = vpop.eup %2096  ;;  %v1080_v38 = vmul.f32 %v1079_v10, %v2874_v49  ;;  %v1124_v59 = vadd.f32 0.001143296, %v1123_v9 }
  0xd0   : > { %v1152_v11 = vmul.f32 2.1237322e-06, %v2958_v16  ;;  %v1163_v15 = vmul.f32 3.8918573e-05, %v2958_v16  ;;  %v1054_v31 = vmul.f32 %v2097_v35, %v1052_v4  ;;  %vm2965_vm13 = vcmp.eq.f32.partialorder %v1062_v61, 8.507059e+37 }
  0xd1   : > { %v1724_v28 = vadd.f32 1.0, %v1939_v27  ;;  %v2970_v20 = vadd.f32 %v2693_v0, %v317_v58  ;;  %v1092_v43 = vadd.f32 1.0, %v1091_v13  ;;  %v1116_v7 = vmul.f32 %v1115_v60, %v2930_v33 }
  0xd2   : > { %v1125_v49 = vmul.f32 %v1124_v59, %v2930_v33  ;;  %v1153_v29 = vadd.f32 0.00028619796, %v1152_v11  ;;  %v1055_v46 = vsub.f32 1.0, %v1054_v31  ;;  %vm1059_vm14 = vweird.f32 %v2097_v35 }
  0xd3   : > { %v1756_v8 = vmul.f32 %v1724_v28, %v380_v52  ;;  %v1164_v50 = vadd.f32 0.001143296, %v1163_v15  ;;  %v1081_v32 = vadd.f32 1.1283791, %v1080_v38  ;;  %2098 = vrcp.f32 %v1092_v43  ;;  %vm2980_vm15 = vmor %vm1058_vm12, %vm1059_vm14 }
  0xd4   : > { %v1102_v36 = vand.u32 2147483647, %v1092_v43  ;;  %v1104_v55 = vand.u32 2147483648, %v1092_v43  ;;  %v1056_v48 = vmul.f32 %v2097_v35, %v1055_v46  ;;  %v1117_v3 = vadd.f32 0.05243302, %v1116_v7 }
  0xd5   : > { %1788 = vst [vmem:[%s2417_s27 + $0x70] sm:$0xff] %v1756_v8  ;;  %v1126_v39 = vadd.f32 0.014752088, %v1125_v49  ;;  %v1154_v30 = vmul.f32 %v1153_v29, %v2958_v16  ;;  %v1065_v1 = vor.u32 1.1754944e-38, %v1064_v44  ;;  %v1165_v41 = vmul.f32 %v1164_v50, %v2958_v16 }
  0xd6   : > { %v2986_v63 = vmul.f32 0.70710677, %v2970_v20  ;;  %v2003_v47 = vunpack.c.l.bf16 %v2975_v53  ;;  %v1057_v23 = vadd.f32 %v2097_v35, %v1056_v48  ;;  %v1118_v56 = vmul.f32 %v1117_v3, %v2930_v33 }
  0xd7   : > { %v1127_v45 = vmul.f32 %v1126_v39, %v2930_v33  ;;  %v1155_v52 = vadd.f32 0.0036580483, %v1154_v30  ;;  %v1082_v4 = vmul.f32 %v1081_v32, %v2863_v17  ;;  %vm1098_vm0 = vweird.f32 %v1092_v43 }
  0xd8   : > { %v1166_v21 = vadd.f32 0.014752088, %v1165_v41  ;;  %v1190_v54 = vmul.f32 %v2986_v63, %v2986_v63  ;;  %v1061_v34 = vsel %vm2980_vm15, %v2097_v35, %v1057_v23  ;;  %vm2996_vm1 = vcmp.eq.f32.partialorder %v1102_v36, 8.507059e+37 }
  0xd9   : > { %v1105_v19 = vor.u32 1.1754944e-38, %v1104_v55  ;;  %v1128_v62 = vadd.f32 0.112945676, %v1127_v45  ;;  %v2099_v51 = vpop.eup %2098  ;;  %v1066_v61 = vsel %vm2965_vm13, %v1065_v1, %v1061_v34  ;;  %v1156_v17 = vmul.f32 %v1155_v52, %v2958_v16 }
  0xda   : > { %v1167_v6 = vmul.f32 %v1166_v21, %v2958_v16  ;;  %v3004_v10 = vmin.f32 %v1190_v54, 16.0  ;;  %v1067_v26 = vmul.f32 %v1066_v61, %v2953_v2  ;;  %v1094_v24 = vmul.f32 %v2099_v51, %v1092_v43 }
  0xdb   : > { %v1119_v9 = vadd.f32 0.18741608, %v1118_v56  ;;  %v318_v58 = vmul.f32 %v2712_v57, %v2003_v47  ;;  %v1129_v27 = vmul.f32 %v1128_v62, %v2930_v33  ;;  %v1157_v44 = vadd.f32 0.05243302, %v1156_v17 }
  0xdc   : > { %v1168_v13 = vadd.f32 0.112945676, %v1167_v6  ;;  %v1192_v60 = vmul.f32 2.1237322e-06, %v3004_v10  ;;  %v1940_v35 = vclamps-f32 %v1067_v26, 1.0  ;;  %v1095_v38 = vsub.f32 1.0, %v1094_v24 }
  0xdd   : > { %vm1099_vm2 = vweird.f32 %v2099_v51  ;;  %v1203_v59 = vmul.f32 3.8918573e-05, %v3004_v10  ;;  %v1130_v11 = vadd.f32 0.4994258, %v1129_v27  ;;  %v1158_v15 = vmul.f32 %v1157_v44, %v2958_v16 }
  0xde   : > { %v1169_v2 = vmul.f32 %v1168_v13, %v2958_v16  ;;  %v1193_v28 = vadd.f32 0.00028619796, %v1192_v60  ;;  %v1725_v31 = vadd.f32 1.0, %v1940_v35  ;;  %v1096_v37 = vmul.f32 %v2099_v51, %v1095_v38  ;;  %vm3015_vm3 = vmor %vm1098_vm0, %vm1099_vm2 }
  0xdf   : > { %v1204_v7 = vadd.f32 0.001143296, %v1203_v59  ;;  %v2004_v49 = vunpack.c.h.bf16 %v2975_v53  ;;  %v1120_v8 = vmul.f32 %v1119_v9, %v2930_v33  ;;  %v1131_v46 = vmul.f32 %v1130_v11, %v2930_v33 }
  0xe0   : > { %v1159_v50 = vadd.f32 0.18741608, %v1158_v15  ;;  %v1170_v32 = vadd.f32 0.4994258, %v1169_v2  ;;  %v1757_v36 = vmul.f32 %v1725_v31, %v2950_v14  ;;  %v1097_v55 = vadd.f32 %v2099_v51, %v1096_v37 }
  0xe1   : > { %v1194_v48 = vmul.f32 %v1193_v28, %v3004_v10  ;;  %v1205_v3 = vmul.f32 %v1204_v7, %v3004_v10  ;;  %v1132_v39 = vadd.f32 1.0, %v1131_v46  ;;  %v3027_v30 = vadd.f32 %v2693_v0, %v318_v58 }
  0xe2   : > { %v1160_v43 = vmul.f32 %v1159_v50, %v2958_v16  ;;  %v1171_v53 = vmul.f32 %v1170_v32, %v2958_v16  ;;  %1789 = vst [vmem:[%s2417_s27 + $0x78] sm:$0xff] %v1757_v36  ;;  %v382_v33 = vmul.f32 0.5, %v2851_v5  ;;  %v1101_v42 = vsel %vm3015_vm3, %v2099_v51, %v1097_v55 }
  0xe3   : > { %v1195_v14 = vadd.f32 0.0036580483, %v1194_v48  ;;  %v1206_v1 = vadd.f32 0.014752088, %v1205_v3  ;;  %v1106_v41 = vsel %vm2996_vm1, %v1105_v19, %v1101_v42  ;;  %v1121_v47 = vadd.f32 1.1283791, %v1120_v8 }
  0xe4   : > { %2100 = vrcp.f32 %v1132_v39  ;;  %v319_v23 = vmul.f32 %v2712_v57, %v2004_v49  ;;  %v1107_v16 = vmul.f32 %v1106_v41, %v1082_v4  ;;  %v1142_v56 = vand.u32 2147483647, %v1132_v39  ;;  %v3048_v4 = vld [vmem:[%s2202_s19 + $0x58] sm:$0xff]  }
  0xe5   : > { %v1144_v45 = vand.u32 2147483648, %v1132_v39  ;;  %v1172_v52 = vadd.f32 1.0, %v1171_v53  ;;  %v1161_v21 = vadd.f32 1.1283791, %v1160_v43  ;;  %v1196_v5 = vmul.f32 %v1195_v14, %v3004_v10 }
  0xe6   : > { %v1207_v54 = vmul.f32 %v1206_v1, %v3004_v10  ;;  %v3039_v34 = vmul.f32 0.70710677, %v3027_v30  ;;  %v1941_v62 = vclamps-f32 %v1107_v16, 1.0  ;;  %v3042_v22 = vmul.f32 0.5, %v2888_v25 }
  0xe7   : > { %v3045_v19 = vmul.f32 0.5, %v2916_v12  ;;  %2102 = vrcp.f32 %v1172_v52  ;;  %v1122_v51 = vmul.f32 %v1121_v47, %v2909_v40  ;;  %vm1138_vm4 = vweird.f32 %v1132_v39 }
  0xe8   : > { %v1145_v61 = vor.u32 1.1754944e-38, %v1144_v45  ;;  %v1197_v17 = vadd.f32 0.05243302, %v1196_v5  ;;  %v1726_v6 = vadd.f32 1.0, %v1941_v62  ;;  %vm3051_vm5 = vcmp.eq.f32.partialorder %v1142_v56, 8.507059e+37 }
  0xe9   : > { %v1208_v24 = vadd.f32 0.112945676, %v1207_v54  ;;  %v1230_v25 = vmul.f32 %v3039_v34, %v3039_v34  ;;  %v3058_v12 = vadd.f32 %v2693_v0, %v319_v23  ;;  %v1162_v58 = vmul.f32 %v1161_v21, %v2928_v18 }
  0xea   : > { %v2101_v9 = vpop.eup %2100  ;;  %vm1178_vm6 = vweird.f32 %v1172_v52  ;;  %v1198_v40 = vmul.f32 %v1197_v17, %v3004_v10  ;;  %v2007_v27 = vunpack.c.l.bf16 %v3048_v4  ;;  %v1758_v44 = vmul.f32 %v1726_v6, %v382_v33 }
  0xeb   : > { %v1134_v13 = vmul.f32 %v2101_v9, %v1132_v39  ;;  %v1182_v60 = vand.u32 2147483647, %v1172_v52  ;;  %v1209_v35 = vmul.f32 %v1208_v24, %v3004_v10  ;;  %v1184_v38 = vand.u32 2147483648, %v1172_v52 }
  0xec   : > { %v1199_v59 = vadd.f32 0.18741608, %v1198_v40  ;;  %v3064_v11 = vmin.f32 %v1230_v25, 16.0  ;;  %v3067_v15 = vmul.f32 0.70710677, %v3058_v12  ;;  %1790 = vst [vmem:[%s2417_s27 + $0x80] sm:$0xff] %v1758_v44  ;;  %vm1139_vm7 = vweird.f32 %v2101_v9 }
  0xed   : > { %v2103_v2 = vpop.eup %2102  ;;  %v1135_v18 = vsub.f32 1.0, %v1134_v13  ;;  %v1210_v28 = vadd.f32 0.4994258, %v1209_v35  ;;  %v320_v31 = vmul.f32 %v2712_v57, %v2007_v27  ;;  %vm3078_vm9 = vmor %vm1138_vm4, %vm1139_vm7  ;;  %vm3085_vm10 = vcmp.eq.f32.partialorder %v1182_v60, 8.507059e+37 }
  0xee   : > { %v1174_v37 = vmul.f32 %v2103_v2, %v1172_v52  ;;  %vm1179_vm8 = vweird.f32 %v2103_v2  ;;  %v1200_v7 = vmul.f32 %v1199_v59, %v3004_v10  ;;  %v1232_v49 = vmul.f32 2.1237322e-06, %v3064_v11 }
  0xef   : > { %v1136_v29 = vmul.f32 %v2101_v9, %v1135_v18  ;;  %v1211_v8 = vmul.f32 %v1210_v28, %v3004_v10  ;;  %v1243_v46 = vmul.f32 3.8918573e-05, %v3064_v11  ;;  %v1270_v50 = vmul.f32 %v3067_v15, %v3067_v15  ;;  %vm3096_vm11 = vmor %vm1178_vm6, %vm1179_vm8 }
  0xf0   : > { %v1175_v36 = vsub.f32 1.0, %v1174_v37  ;;  %v1201_v55 = vadd.f32 1.1283791, %v1200_v7  ;;  %v1233_v48 = vadd.f32 0.00028619796, %v1232_v49  ;;  %v3083_v3 = vadd.f32 %v2693_v0, %v320_v31 }
  0xf1   : > { %v1137_v43 = vadd.f32 %v2101_v9, %v1136_v29  ;;  %v1212_v10 = vadd.f32 1.0, %v1211_v8  ;;  %v1244_v33 = vadd.f32 0.001143296, %v1243_v46  ;;  %v1185_v14 = vor.u32 1.1754944e-38, %v1184_v38 }
  0xf2   : > { %v1176_v42 = vmul.f32 %v2103_v2, %v1175_v36  ;;  %v1234_v39 = vmul.f32 %v1233_v48, %v3064_v11  ;;  %v3090_v1 = vmin.f32 %v1270_v50, 16.0  ;;  %v3101_v23 = vmul.f32 %v1201_v55, %v2986_v63 }
  0xf3   : > { %v1141_v41 = vsel %vm3078_vm9, %v2101_v9, %v1137_v43  ;;  %2104 = vrcp.f32 %v1212_v10  ;;  %v2008_v16 = vunpack.c.h.bf16 %v3048_v4  ;;  %v3107_v5 = vmul.f32 0.70710677, %v3083_v3 }
  0xf4   : > { %v1146_v56 = vsel %vm3051_vm5, %v1145_v61, %v1141_v41  ;;  %v1177_v45 = vadd.f32 %v2103_v2, %v1176_v42  ;;  %v1235_v21 = vadd.f32 0.0036580483, %v1234_v39  ;;  %vm1218_vm12 = vweird.f32 %v1212_v10 }
  0xf5   : > { %v1147_v54 = vmul.f32 %v1146_v56, %v1122_v51  ;;  %v1245_v52 = vmul.f32 %v1244_v33, %v3064_v11  ;;  %v1272_v62 = vmul.f32 2.1237322e-06, %v3090_v1  ;;  %v1222_v17 = vand.u32 2147483647, %v1212_v10 }
  0xf6   : > { %v1181_v63 = vsel %vm3096_vm11, %v2103_v2, %v1177_v45  ;;  %v1236_v4 = vmul.f32 %v1235_v21, %v3064_v11  ;;  %v1283_v6 = vmul.f32 3.8918573e-05, %v3090_v1  ;;  %v1224_v9 = vand.u32 2147483648, %v1212_v10 }
  0xf7   : > { %v1942_v61 = vclamps-f32 %v1147_v54, 1.0  ;;  %v1186_v26 = vsel %vm3085_vm10, %v1185_v14, %v1181_v63  ;;  %v1246_v24 = vadd.f32 0.014752088, %v1245_v52  ;;  %v1273_v25 = vadd.f32 0.00028619796, %v1272_v62  ;;  %v3155_v62 = vld [vmem:[%s2202_s19 + $0x60] sm:$0xff]  }
  0xf8   : > { %v1187_v51 = vmul.f32 %v1186_v26, %v1162_v58  ;;  %v1237_v40 = vadd.f32 0.05243302, %v1236_v4  ;;  %v1284_v27 = vadd.f32 0.001143296, %v1283_v6  ;;  %v1310_v38 = vmul.f32 %v3107_v5, %v3107_v5 }
  0xf9   : > { %v2105_v44 = vpop.eup %2104  ;;  %v1727_v13 = vadd.f32 1.0, %v1942_v61  ;;  %v1247_v60 = vmul.f32 %v1246_v24, %v3064_v11  ;;  %v1274_v35 = vmul.f32 %v1273_v25, %v3090_v1  ;;  %v321_v28 = vmul.f32 %v2712_v57, %v2008_v16 }
  0xfa   : > { %v1943_v59 = vclamps-f32 %v1187_v51, 1.0  ;;  %v1214_v2 = vmul.f32 %v2105_v44, %v1212_v10  ;;  %v1238_v18 = vmul.f32 %v1237_v40, %v3064_v11  ;;  %vm1219_vm13 = vweird.f32 %v2105_v44 }
  0xfb   : > { %v1759_v58 = vmul.f32 %v1727_v13, %v3042_v22  ;;  %v1248_v31 = vadd.f32 0.112945676, %v1247_v60  ;;  %v1275_v37 = vadd.f32 0.0036580483, %v1274_v35  ;;  %v1285_v8 = vmul.f32 %v1284_v27, %v3090_v1  ;;  %vm3137_vm15 = vmor %vm1218_vm12, %vm1219_vm13 }
  0xfc   : > { %v1728_v7 = vadd.f32 1.0, %v1943_v59  ;;  %v1215_v49 = vsub.f32 1.0, %v1214_v2  ;;  %v1239_v29 = vadd.f32 0.18741608, %v1238_v18  ;;  %vm3126_vm14 = vcmp.eq.f32.partialorder %v1222_v17, 8.507059e+37 }
  0xfd   : > { %1791 = vst [vmem:[%s2417_s27 + $0x88] sm:$0xff] %v1759_v58  ;;  %v1249_v50 = vmul.f32 %v1248_v31, %v3064_v11  ;;  %v1276_v57 = vmul.f32 %v1275_v37, %v3090_v1  ;;  %v3132_v32 = vmin.f32 %v1310_v38, 16.0  ;;  %v1225_v55 = vor.u32 1.1754944e-38, %v1224_v9  ;;  %v3311_v31 = vld [vmem:[%s2202_s19 + $0x70] sm:$0xff]  }
  0xfe   : > { %v1760_v22 = vmul.f32 %v1728_v7, %v3045_v19  ;;  %v1216_v36 = vmul.f32 %v2105_v44, %v1215_v49  ;;  %v1286_v48 = vadd.f32 0.014752088, %v1285_v8  ;;  %v1240_v53 = vmul.f32 %v1239_v29, %v3064_v11 }
  0xff   : > { %v1250_v33 = vadd.f32 0.4994258, %v1249_v50  ;;  %v1277_v42 = vadd.f32 0.05243302, %v1276_v57  ;;  %v1312_v14 = vmul.f32 2.1237322e-06, %v3132_v32  ;;  %v3147_v47 = vadd.f32 %v2693_v0, %v321_v28 }
 0x100   : > { %1792 = vst [vmem:[%s2417_s27 + $0x90] sm:$0xff] %v1760_v22  ;;  %v1217_v39 = vadd.f32 %v2105_v44, %v1216_v36  ;;  %v1287_v19 = vmul.f32 %v1286_v48, %v3090_v1  ;;  %v1323_v41 = vmul.f32 3.8918573e-05, %v3132_v32  ;;  %v385_v45 = vmul.f32 0.5, %v2970_v20  ;;  %v3200_v57 = vld [vmem:[%s3553_s2] ss:$0 sm:$0xff] }
 0x101   : > { %v1251_v10 = vmul.f32 %v1250_v33, %v3064_v11  ;;  %v1278_v16 = vmul.f32 %v1277_v42, %v3090_v1  ;;  %v1313_v56 = vadd.f32 0.00028619796, %v1312_v14  ;;  %v1241_v17 = vadd.f32 1.1283791, %v1240_v53 }
 0x102   : > { %v1221_v21 = vsel %vm3137_vm15, %v2105_v44, %v1217_v39  ;;  %v1288_v54 = vadd.f32 0.112945676, %v1287_v19  ;;  %v1324_v52 = vadd.f32 0.001143296, %v1323_v41  ;;  %v3164_v61 = vmul.f32 0.70710677, %v3147_v47 }
 0x103   : > { %v1226_v63 = vsel %vm3126_vm14, %v1225_v55, %v1221_v21  ;;  %v1252_v0 = vadd.f32 1.0, %v1251_v10  ;;  %v1314_v4 = vmul.f32 %v1313_v56, %v3132_v32  ;;  %v1279_v24 = vadd.f32 0.18741608, %v1278_v16 }
 0x104   : > { %v1227_v11 = vmul.f32 %v1226_v63, %v3101_v23  ;;  %v1289_v6 = vmul.f32 %v1288_v54, %v3090_v1  ;;  %v1325_v20 = vmul.f32 %v1324_v52, %v3132_v32  ;;  %v2011_v25 = vunpack.c.l.bf16 %v3155_v62 }
 0x105   : > { %2106 = vrcp.f32 %v1252_v0  ;;  %v1262_v26 = vand.u32 2147483647, %v1252_v0  ;;  %v3168_v9 = vmul.f32 0.5, %v3027_v30  ;;  %v1315_v27 = vadd.f32 0.0036580483, %v1314_v4 }
 0x106   : > { %v1944_v51 = vclamps-f32 %v1227_v11, 1.0  ;;  %v1290_v40 = vadd.f32 0.4994258, %v1289_v6  ;;  %v3171_v23 = vmul.f32 %v1241_v17, %v3039_v34  ;;  %v3174_v44 = vmul.f32 0.5, %v3058_v12  ;;  %v3187_v12 = vld [vmem:[%s3552_s1] ss:$0 sm:$0xff] }
 0x107   : > { %v1326_v13 = vadd.f32 0.014752088, %v1325_v20  ;;  %v1350_v60 = vmul.f32 %v3164_v61, %v3164_v61  ;;  %v1264_v38 = vand.u32 2147483648, %v1252_v0  ;;  %v1316_v30 = vmul.f32 %v1315_v27, %v3132_v32 }
 0x108   : > { %v1729_v35 = vadd.f32 1.0, %v1944_v51  ;;  %v1291_v59 = vmul.f32 %v1290_v40, %v3090_v1  ;;  %v1280_v2 = vmul.f32 %v1279_v24, %v3090_v1  ;;  %v322_v28 = vmul.f32 %v3187_v12, %v2011_v25 }
 0x109   : > { %v1327_v18 = vmul.f32 %v1326_v13, %v3132_v32  ;;  %v3182_v34 = vmin.f32 %v1350_v60, 16.0  ;;  %vm3190_vm0 = vcmp.eq.f32.partialorder %v1262_v26, 8.507059e+37  ;;  %v1317_v7 = vadd.f32 0.05243302, %v1316_v30 }
 0x10a   : > { %v1761_v58 = vmul.f32 %v1729_v35, %v385_v45  ;;  %v1292_v37 = vadd.f32 1.0, %v1291_v59  ;;  %vm1258_vm1 = vweird.f32 %v1252_v0  ;;  %v1265_v50 = vor.u32 1.1754944e-38, %v1264_v38 }
 0x10b   : > { %v2107_v49 = vpop.eup %2106  ;;  %v1328_v1 = vadd.f32 0.112945676, %v1327_v18  ;;  %v1352_v29 = vmul.f32 2.1237322e-06, %v3182_v34  ;;  %v1363_v8 = vmul.f32 3.8918573e-05, %v3182_v34  ;;  %v3203_v22 = vadd.f32 %v3200_v57, %v322_v28 }
 0x10c   : > { %1793 = vst [vmem:[%s2417_s27 + $0x98] sm:$0xff] %v1761_v58  ;;  %v1254_v46 = vmul.f32 %v2107_v49, %v1252_v0  ;;  %2108 = vrcp.f32 %v1292_v37  ;;  %v1281_v36 = vadd.f32 1.1283791, %v1280_v2  ;;  %v1302_v55 = vand.u32 2147483647, %v1292_v37 }
 0x10d   : > { %v1318_v48 = vmul.f32 %v1317_v7, %v3132_v32  ;;  %v1329_v43 = vmul.f32 %v1328_v1, %v3132_v32  ;;  %vm1259_vm2 = vweird.f32 %v2107_v49  ;;  %v1353_v33 = vadd.f32 0.00028619796, %v1352_v29 }
 0x10e   : > { %v1255_v53 = vsub.f32 1.0, %v1254_v46  ;;  %v1364_v42 = vadd.f32 0.001143296, %v1363_v8  ;;  %v1304_v14 = vand.u32 2147483648, %v1292_v37  ;;  %v2012_v41 = vunpack.c.h.bf16 %v3155_v62  ;;  %vm3214_vm3 = vmor %vm1258_vm1, %vm1259_vm2 }
 0x10f   : > { %v1319_v39 = vadd.f32 0.18741608, %v1318_v48  ;;  %v1330_v19 = vadd.f32 0.4994258, %v1329_v43  ;;  %v1354_v16 = vmul.f32 %v1353_v33, %v3182_v34  ;;  %v3211_v45 = vmul.f32 0.70710677, %v3203_v22 }
 0x110   : > { %v1256_v10 = vmul.f32 %v2107_v49, %v1255_v53  ;;  %v1365_v56 = vmul.f32 %v1364_v42, %v3182_v34  ;;  %v1282_v54 = vmul.f32 %v1281_v36, %v3067_v15  ;;  %vm1298_vm4 = vweird.f32 %v1292_v37  ;;  %v3230_v15 = vld [vmem:[%s2202_s19 + $0x68] sm:$0xff]  }
 0x111   : > { %v1320_v52 = vmul.f32 %v1319_v39, %v3132_v32  ;;  %v1331_v62 = vmul.f32 %v1330_v19, %v3132_v32  ;;  %v1355_v4 = vadd.f32 0.0036580483, %v1354_v16  ;;  %v1390_v6 = vmul.f32 %v3211_v45, %v3211_v45 }
 0x112   : > { %v2109_v63 = vpop.eup %2108  ;;  %v1257_v17 = vadd.f32 %v2107_v49, %v1256_v10  ;;  %v1366_v11 = vadd.f32 0.014752088, %v1365_v56  ;;  %vm3223_vm5 = vcmp.eq.f32.partialorder %v1302_v55, 8.507059e+37  ;;  %v1305_v26 = vor.u32 1.1754944e-38, %v1304_v14 }
 0x113   : > { %v1294_v20 = vmul.f32 %v2109_v63, %v1292_v37  ;;  %v3227_v24 = vadd.f32 1.0, %v1331_v62  ;;  %v1356_v25 = vmul.f32 %v1355_v4, %v3182_v34  ;;  %v3236_v40 = vmin.f32 %v1390_v6, 16.0 }
 0x114   : > { %v1261_v32 = vsel %vm3214_vm3, %v2107_v49, %v1257_v17  ;;  %v1367_v51 = vmul.f32 %v1366_v11, %v3182_v34  ;;  %vm1299_vm6 = vweird.f32 %v2109_v63  ;;  %v1321_v35 = vadd.f32 1.1283791, %v1320_v52 }
 0x115   : > { %v1266_v27 = vsel %vm3190_vm0, %v1265_v50, %v1261_v32  ;;  %v1295_v13 = vsub.f32 1.0, %v1294_v20  ;;  %2110 = vrcp.f32 %v3227_v24  ;;  %v323_v38 = vmul.f32 %v3187_v12, %v2012_v41  ;;  %vm3246_vm7 = vmor %vm1298_vm4, %vm1299_vm6 }
 0x116   : > { %v1267_v60 = vmul.f32 %v1266_v27, %v3171_v23  ;;  %v2015_v59 = vunpack.c.l.bf16 %v3230_v15  ;;  %v1357_v2 = vadd.f32 0.05243302, %v1356_v25  ;;  %v1368_v18 = vadd.f32 0.112945676, %v1367_v51 }
 0x117   : > { %v1296_v30 = vmul.f32 %v2109_v63, %v1295_v13  ;;  %v1392_v28 = vmul.f32 2.1237322e-06, %v3236_v40  ;;  %vm1338_vm8 = vweird.f32 %v3227_v24  ;;  %v1342_v23 = vand.u32 2147483647, %v3227_v24 }
 0x118   : > { %v1945_v58 = vclamps-f32 %v1267_v60, 1.0  ;;  %v1403_v7 = vmul.f32 3.8918573e-05, %v3236_v40  ;;  %v1358_v1 = vmul.f32 %v1357_v2, %v3182_v34  ;;  %v1369_v29 = vmul.f32 %v1368_v18, %v3182_v34 }
 0x119   : > { %v1297_v49 = vadd.f32 %v2109_v63, %v1296_v30  ;;  %v1393_v8 = vadd.f32 0.00028619796, %v1392_v28  ;;  %v1344_v50 = vand.u32 2147483648, %v3227_v24  ;;  %v3257_v36 = vadd.f32 %v3200_v57, %v323_v38 }
 0x11a   : > { %v1730_v46 = vadd.f32 1.0, %v1945_v58  ;;  %v1404_v37 = vadd.f32 0.001143296, %v1403_v7  ;;  %v1359_v43 = vadd.f32 0.18741608, %v1358_v1  ;;  %v1322_v32 = vmul.f32 %v1321_v35, %v3107_v5 }
 0x11b   : > { %v2111_v55 = vpop.eup %2110  ;;  %v1301_v48 = vsel %vm3246_vm7, %v2109_v63, %v1297_v49  ;;  %v1370_v53 = vadd.f32 0.4994258, %v1369_v29  ;;  %v1394_v33 = vmul.f32 %v1393_v8, %v3236_v40  ;;  %v3271_v52 = vmul.f32 0.70710677, %v3257_v36 }
 0x11c   : > { %v1762_v42 = vmul.f32 %v1730_v46, %v3168_v9  ;;  %v1306_v14 = vsel %vm3223_vm5, %v1305_v26, %v1301_v48  ;;  %v1334_v39 = vmul.f32 %v2111_v55, %v3227_v24  ;;  %vm1339_vm9 = vweird.f32 %v2111_v55 }
 0x11d   : > { %v1307_v19 = vmul.f32 %v1306_v14, %v1282_v54  ;;  %v1360_v41 = vmul.f32 %v1359_v43, %v3182_v34  ;;  %v1371_v10 = vmul.f32 %v1370_v53, %v3182_v34  ;;  %v1395_v16 = vadd.f32 0.0036580483, %v1394_v33  ;;  %vm3285_vm10 = vmor %vm1338_vm8, %vm1339_vm9 }
 0x11e   : > { %1794 = vst [vmem:[%s2417_s27 + $0xa0] sm:$0xff] %v1762_v42  ;;  %v1335_v56 = vsub.f32 1.0, %v1334_v39  ;;  %v1405_v21 = vmul.f32 %v1404_v37, %v3236_v40  ;;  %v324_v9 = vmul.f32 %v3187_v12, %v2015_v59  ;;  %v1430_v34 = vmul.f32 %v3271_v52, %v3271_v52 }
 0x11f   : > { %v1946_v62 = vclamps-f32 %v1307_v19, 1.0  ;;  %v1361_v63 = vadd.f32 1.1283791, %v1360_v41  ;;  %v3274_v17 = vadd.f32 1.0, %v1371_v10  ;;  %v1396_v54 = vmul.f32 %v1395_v16, %v3236_v40 }
 0x120   : > { %v1336_v4 = vmul.f32 %v2111_v55, %v1335_v56  ;;  %v1406_v11 = vadd.f32 0.014752088, %v1405_v21  ;;  %v3280_v6 = vadd.f32 %v3200_v57, %v324_v9  ;;  %v1345_v26 = vor.u32 1.1754944e-38, %v1344_v50 }
 0x121   : > { %v1731_v20 = vadd.f32 1.0, %v1946_v62  ;;  %2112 = vrcp.f32 %v3274_v17  ;;  %vm1343_vm11 = vcmp.eq.f32.partialorder %v1342_v23, 8.507059e+37  ;;  %v1397_v51 = vadd.f32 0.05243302, %v1396_v54 }
 0x122   : > { %v1337_v25 = vadd.f32 %v2111_v55, %v1336_v4  ;;  %v1407_v13 = vmul.f32 %v1406_v11, %v3236_v40  ;;  %v3293_v60 = vmin.f32 %v1430_v34, 16.0  ;;  %v3296_v24 = vmul.f32 0.70710677, %v3280_v6 }
 0x123   : > { %v1763_v27 = vmul.f32 %v1731_v20, %v3174_v44  ;;  %v388_v38 = vmul.f32 0.5, %v3083_v3  ;;  %v1362_v5 = vmul.f32 %v1361_v63, %v3164_v61  ;;  %v1398_v35 = vmul.f32 %v1397_v51, %v3236_v40 }
 0x124   : > { %v1341_v59 = vsel %vm3285_vm10, %v2111_v55, %v1337_v25  ;;  %v1408_v44 = vadd.f32 0.112945676, %v1407_v13  ;;  %v1432_v2 = vmul.f32 2.1237322e-06, %v3293_v60  ;;  %v1470_v18 = vmul.f32 %v3296_v24, %v3296_v24 }
 0x125   : > { %1795 = vst [vmem:[%s2417_s27 + $0xa8] sm:$0xff] %v1763_v27  ;;  %v1346_v30 = vsel %vm1343_vm11, %v1345_v26, %v1341_v59  ;;  %vm1378_vm12 = vweird.f32 %v3274_v17  ;;  %v1382_v3 = vand.u32 2147483647, %v3274_v17  ;;  %v1443_v58 = vmul.f32 3.8918573e-05, %v3293_v60 }
 0x126   : > { %v1347_v28 = vmul.f32 %v1346_v30, %v1322_v32  ;;  %v1384_v23 = vand.u32 2147483648, %v3274_v17  ;;  %v1409_v7 = vmul.f32 %v1408_v44, %v3236_v40  ;;  %v1433_v49 = vadd.f32 0.00028619796, %v1432_v2 }
 0x127   : > { %v2113_v61 = vpop.eup %2112  ;;  %v3315_v1 = vmin.f32 %v1470_v18, 16.0  ;;  %v1399_v46 = vadd.f32 0.18741608, %v1398_v35  ;;  %v2016_v50 = vunpack.c.h.bf16 %v3230_v15  ;;  %v1444_v48 = vadd.f32 0.001143296, %v1443_v58 }
 0x128   : > { %v1947_v29 = vclamps-f32 %v1347_v28, 1.0  ;;  %v1374_v8 = vmul.f32 %v2113_v61, %v3274_v17  ;;  %v1410_v37 = vadd.f32 0.4994258, %v1409_v7  ;;  %v1434_v55 = vmul.f32 %v1433_v49, %v3293_v60 }
 0x129   : > { %v2019_v43 = vunpack.c.l.bf16 %v3311_v31  ;;  %vm1379_vm13 = vweird.f32 %v2113_v61  ;;  %v1472_v42 = vmul.f32 2.1237322e-06, %v3315_v1  ;;  %v1445_v19 = vmul.f32 %v1444_v48, %v3293_v60 }
 0x12a   : > { %v1732_v53 = vadd.f32 1.0, %v1947_v29  ;;  %v1375_v33 = vsub.f32 1.0, %v1374_v8  ;;  %v1411_v14 = vmul.f32 %v1410_v37, %v3236_v40  ;;  %v1435_v39 = vadd.f32 0.0036580483, %v1434_v55  ;;  %vm3327_vm14 = vmor %vm1378_vm12, %vm1379_vm13 }
 0x12b   : > { %v1483_v41 = vmul.f32 3.8918573e-05, %v3315_v1  ;;  %v1385_v16 = vor.u32 1.1754944e-38, %v1384_v23  ;;  %v1473_v56 = vadd.f32 0.00028619796, %v1472_v42  ;;  %vm1383_vm15 = vcmp.eq.f32.partialorder %v1382_v3, 8.507059e+37 }
 0x12c   : > { %v1764_v15 = vmul.f32 %v1732_v53, %v388_v38  ;;  %v1376_v10 = vmul.f32 %v2113_v61, %v1375_v33  ;;  %v1412_v9 = vadd.f32 1.0, %v1411_v14  ;;  %v1436_v62 = vmul.f32 %v1435_v39, %v3293_v60 }
 0x12d   : > { %v1446_v63 = vadd.f32 0.014752088, %v1445_v19  ;;  %v1484_v54 = vadd.f32 0.001143296, %v1483_v41  ;;  %v1400_v11 = vmul.f32 %v1399_v46, %v3236_v40  ;;  %v1474_v34 = vmul.f32 %v1473_v56, %v3315_v1 }
 0x12e   : > { %1796 = vst [vmem:[%s2417_s27 + $0xb0] sm:$0xff] %v1764_v15  ;;  %v1377_v4 = vadd.f32 %v2113_v61, %v1376_v10  ;;  %2114 = vrcp.f32 %v1412_v9  ;;  %v325_v20 = vmul.f32 %v3187_v12, %v2016_v50  ;;  %v326_v17 = vmul.f32 %v3187_v12, %v2019_v43 }
 0x12f   : > { %v1437_v26 = vadd.f32 0.05243302, %v1436_v62  ;;  %v1447_v32 = vmul.f32 %v1446_v63, %v3293_v60  ;;  %v1475_v25 = vadd.f32 0.0036580483, %v1474_v34  ;;  %v1485_v27 = vmul.f32 %v1484_v54, %v3315_v1 }
 0x130   : > { %v1381_v0 = vsel %vm3327_vm14, %v2113_v61, %v1377_v4  ;;  %v389_v13 = vmul.f32 0.5, %v3147_v47  ;;  %v1401_v38 = vadd.f32 1.1283791, %v1400_v11  ;;  %v3344_v44 = vadd.f32 %v3200_v57, %v325_v20 }
 0x131   : > { %v1386_v51 = vsel %vm1383_vm15, %v1385_v16, %v1381_v0  ;;  %v1448_v59 = vadd.f32 0.112945676, %v1447_v32  ;;  %v1476_v35 = vmul.f32 %v1475_v25, %v3315_v1  ;;  %v1486_v30 = vadd.f32 0.014752088, %v1485_v27 }
 0x132   : > { %v1387_v40 = vmul.f32 %v1386_v51, %v1362_v5  ;;  %v3347_v2 = vadd.f32 %v3200_v57, %v326_v17  ;;  %vm1418_vm0 = vweird.f32 %v1412_v9  ;;  %v1438_v28 = vmul.f32 %v1437_v26, %v3293_v60 }
 0x133   : > { %v1449_v3 = vmul.f32 %v1448_v59, %v3293_v60  ;;  %v1477_v47 = vadd.f32 0.05243302, %v1476_v35  ;;  %v1487_v5 = vmul.f32 %v1486_v30, %v3315_v1  ;;  %v3353_v61 = vmul.f32 0.70710677, %v3344_v44 }
 0x134   : > { %v1948_v18 = vclamps-f32 %v1387_v40, 1.0  ;;  %v2115_v58 = vpop.eup %2114  ;;  %v3356_v23 = vmul.f32 0.70710677, %v3347_v2  ;;  %v1422_v29 = vand.u32 2147483647, %v1412_v9  ;;  %v1424_v8 = vand.u32 2147483648, %v1412_v9 }
 0x135   : > { %v1414_v49 = vmul.f32 %v2115_v58, %v1412_v9  ;;  %v1450_v46 = vadd.f32 0.4994258, %v1449_v3  ;;  %v1478_v50 = vmul.f32 %v1477_v47, %v3315_v1  ;;  %v1488_v37 = vadd.f32 0.112945676, %v1487_v5 }
 0x136   : > { %v1733_v7 = vadd.f32 1.0, %v1948_v18  ;;  %v1510_v55 = vmul.f32 %v3353_v61, %v3353_v61  ;;  %vm1419_vm1 = vweird.f32 %v2115_v58  ;;  %v1550_v53 = vmul.f32 %v3356_v23, %v3356_v23 }
 0x137   : > { %v1415_v43 = vsub.f32 1.0, %v1414_v49  ;;  %v1439_v33 = vadd.f32 0.18741608, %v1438_v28  ;;  %v1451_v42 = vmul.f32 %v1450_v46, %v3293_v60  ;;  %v1489_v14 = vmul.f32 %v1488_v37, %v3315_v1  ;;  %vm3371_vm2 = vmor %vm1418_vm0, %vm1419_vm1 }
 0x138   : > { %v1765_v48 = vmul.f32 %v1733_v7, %v389_v13  ;;  %v3365_v39 = vmin.f32 %v1510_v55, 16.0  ;;  %v1402_v19 = vmul.f32 %v1401_v38, %v3211_v45  ;;  %v1425_v15 = vor.u32 1.1754944e-38, %v1424_v8 }
 0x139   : > { %v1416_v41 = vmul.f32 %v2115_v58, %v1415_v43  ;;  %v2020_v10 = vunpack.c.h.bf16 %v3311_v31  ;;  %v1452_v56 = vadd.f32 1.0, %v1451_v42  ;;  %v1479_v21 = vadd.f32 0.18741608, %v1478_v50 }
 0x13a   : > { %1797 = vst [vmem:[%s2417_s27 + $0xb8] sm:$0xff] %v1765_v48  ;;  %v1490_v62 = vadd.f32 0.4994258, %v1489_v14  ;;  %v3375_v63 = vmin.f32 %v1550_v53, 16.0  ;;  %vm1423_vm3 = vcmp.eq.f32.partialorder %v1422_v29, 8.507059e+37  ;;  %v390_v11 = vmul.f32 0.5, %v3203_v22 }
 0x13b   : > { %v1417_v54 = vadd.f32 %v2115_v58, %v1416_v41  ;;  %v1512_v4 = vmul.f32 2.1237322e-06, %v3365_v39  ;;  %v1523_v45 = vmul.f32 3.8918573e-05, %v3365_v39  ;;  %v1440_v31 = vmul.f32 %v1439_v33, %v3293_v60 }
 0x13c   : > { %2116 = vrcp.f32 %v1452_v56  ;;  %v1552_v9 = vmul.f32 2.1237322e-06, %v3375_v63  ;;  %v3385_v20 = vmul.f32 0.5, %v3257_v36  ;;  %v1491_v17 = vmul.f32 %v1490_v62, %v3315_v1 }
 0x13d   : > { %v1421_v34 = vsel %vm3371_vm2, %v2115_v58, %v1417_v54  ;;  %v1513_v0 = vadd.f32 0.00028619796, %v1512_v4  ;;  %v1480_v32 = vmul.f32 %v1479_v21, %v3315_v1  ;;  %v1524_v25 = vadd.f32 0.001143296, %v1523_v45 }
 0x13e   : > { %v1426_v26 = vsel %vm1423_vm3, %v1425_v15, %v1421_v34  ;;  %v327_v22 = vmul.f32 %v3187_v12, %v2020_v10  ;;  %v1462_v60 = vand.u32 2147483647, %v1452_v56  ;;  %v3390_v27 = vadd.f32 1.0, %v1491_v17 }
 0x13f   : > { %v1427_v51 = vmul.f32 %v1426_v26, %v1402_v19  ;;  %v1514_v13 = vmul.f32 %v1513_v0, %v3365_v39  ;;  %v1441_v40 = vadd.f32 1.1283791, %v1440_v31  ;;  %vm1458_vm4 = vweird.f32 %v1452_v56 }
 0x140   : > { %v1525_v36 = vmul.f32 %v1524_v25, %v3365_v39  ;;  %v1553_v38 = vadd.f32 0.00028619796, %v1552_v9  ;;  %v1464_v35 = vand.u32 2147483648, %v1452_v56  ;;  %2118 = vrcp.f32 %v3390_v27 }
 0x141   : > { %v1949_v59 = vclamps-f32 %v1427_v51, 1.0  ;;  %v1563_v1 = vmul.f32 3.8918573e-05, %v3375_v63  ;;  %v1515_v18 = vadd.f32 0.0036580483, %v1514_v13  ;;  %v3398_v58 = vadd.f32 %v3200_v57, %v327_v22 }
 0x142   : > { %v2117_v30 = vpop.eup %2116  ;;  %v1526_v28 = vadd.f32 0.014752088, %v1525_v36  ;;  %v1554_v3 = vmul.f32 %v1553_v38, %v3375_v63  ;;  %vm3400_vm5 = vcmp.eq.f32.partialorder %v1462_v60, 8.507059e+37  ;;  %v1481_v49 = vadd.f32 1.1283791, %v1480_v32 }
 0x143   : > { %v1734_v47 = vadd.f32 1.0, %v1949_v59  ;;  %v1454_v5 = vmul.f32 %v2117_v30, %v1452_v56  ;;  %v1504_v29 = vand.u32 2147483648, %v3390_v27  ;;  %v1516_v8 = vmul.f32 %v1515_v18, %v3365_v39  ;;  %v2039_v56 = vld [vmem:[%s2202_s19 + $0x78] sm:$0xff]  }
 0x144   : > { %v1527_v46 = vmul.f32 %v1526_v28, %v3365_v39  ;;  %v1555_v50 = vadd.f32 0.0036580483, %v1554_v3  ;;  %vm1459_vm6 = vweird.f32 %v2117_v30  ;;  %v1564_v48 = vadd.f32 0.001143296, %v1563_v1 }
 0x145   : > { %v1766_v37 = vmul.f32 %v1734_v47, %v390_v11  ;;  %v1455_v55 = vsub.f32 1.0, %v1454_v5  ;;  %v1442_v43 = vmul.f32 %v1441_v40, %v3271_v52  ;;  %v1517_v53 = vadd.f32 0.05243302, %v1516_v8  ;;  %vm3415_vm7 = vmor %vm1458_vm4, %vm1459_vm6 }
 0x146   : > { %v1528_v33 = vadd.f32 0.112945676, %v1527_v46  ;;  %v3409_v42 = vmul.f32 0.70710677, %v3398_v58  ;;  %v2119_v14 = vpop.eup %2118  ;;  %v1465_v41 = vor.u32 1.1754944e-38, %v1464_v35  ;;  %v1556_v15 = vmul.f32 %v1555_v50, %v3375_v63 }
 0x147   : > { %1798 = vst [vmem:[%s2417_s27 + $0xc0] sm:$0xff] %v1766_v37  ;;  %v1456_v19 = vmul.f32 %v2117_v30, %v1455_v55  ;;  %v1565_v10 = vmul.f32 %v1564_v48, %v3375_v63  ;;  %v1494_v52 = vmul.f32 %v2119_v14, %v3390_v27  ;;  %vm1498_vm8 = vweird.f32 %v3390_v27 }
 0x148   : > { %v1502_v21 = vand.u32 2147483647, %v3390_v27  ;;  %v1529_v62 = vmul.f32 %v1528_v33, %v3365_v39  ;;  %v1518_v4 = vmul.f32 %v1517_v53, %v3365_v39  ;;  %v1590_v11 = vmul.f32 %v3409_v42, %v3409_v42 }
 0x149   : > { %v1457_v54 = vadd.f32 %v2117_v30, %v1456_v19  ;;  %v1566_v45 = vadd.f32 0.014752088, %v1565_v10  ;;  %v1495_v31 = vsub.f32 1.0, %v1494_v52  ;;  %vm1499_vm9 = vweird.f32 %v2119_v14 }
 0x14a   : > { %v1505_v9 = vor.u32 1.1754944e-38, %v1504_v29  ;;  %v1530_v34 = vadd.f32 0.4994258, %v1529_v62  ;;  %v1557_v0 = vadd.f32 0.05243302, %v1556_v15  ;;  %v3430_v32 = vmin.f32 %v1590_v11, 16.0  ;;  %vm3437_vm10 = vmor %vm1498_vm8, %vm1499_vm9 }
 0x14b   : > { %v1461_v17 = vsel %vm3415_vm7, %v2117_v30, %v1457_v54  ;;  %v1567_v26 = vmul.f32 %v1566_v45, %v3375_v63  ;;  %v1496_v22 = vmul.f32 %v2119_v14, %v1495_v31  ;;  %v2023_v60 = vunpack.c.l.bf16 %v2039_v56 }
 0x14c   : > { %v1466_v25 = vsel %vm3400_vm5, %v1465_v41, %v1461_v17  ;;  %v1531_v51 = vmul.f32 %v1530_v34, %v3365_v39  ;;  %v1519_v36 = vadd.f32 0.18741608, %v1518_v4  ;;  %v1592_v59 = vmul.f32 2.1237322e-06, %v3430_v32 }
 0x14d   : > { %v1467_v13 = vmul.f32 %v1466_v25, %v1442_v43  ;;  %v1568_v38 = vadd.f32 0.112945676, %v1567_v26  ;;  %v1482_v35 = vmul.f32 %v1481_v49, %v3296_v24  ;;  %v1497_v1 = vadd.f32 %v2119_v14, %v1496_v22 }
 0x14e   : > { %vm1503_vm11 = vcmp.eq.f32.partialorder %v1502_v21, 8.507059e+37  ;;  %v1532_v30 = vadd.f32 1.0, %v1531_v51  ;;  %v1558_v28 = vmul.f32 %v1557_v0, %v3375_v63  ;;  %v1593_v47 = vadd.f32 0.00028619796, %v1592_v59 }
 0x14f   : > { %v1950_v18 = vclamps-f32 %v1467_v13, 1.0  ;;  %v1569_v3 = vmul.f32 %v1568_v38, %v3375_v63  ;;  %v1501_v27 = vsel %vm3437_vm10, %v2119_v14, %v1497_v1  ;;  %v1603_v5 = vmul.f32 3.8918573e-05, %v3430_v32 }
 0x150   : > { %2120 = vrcp.f32 %v1532_v30  ;;  %v1506_v29 = vsel %vm1503_vm11, %v1505_v9, %v1501_v27  ;;  %v1520_v24 = vmul.f32 %v1519_v36, %v3365_v39  ;;  %v328_v49 = vmul.f32 %v3187_v12, %v2023_v60 }
 0x151   : > { %v1735_v7 = vadd.f32 1.0, %v1950_v18  ;;  %v1507_v8 = vmul.f32 %v1506_v29, %v1482_v35  ;;  %v1570_v46 = vadd.f32 0.4994258, %v1569_v3  ;;  %v2024_v50 = vunpack.c.h.bf16 %v2039_v56 }
 0x152   : > { %v1559_v55 = vadd.f32 0.18741608, %v1558_v28  ;;  %v1594_v48 = vmul.f32 %v1593_v47, %v3430_v32  ;;  %v392_v43 = vmul.f32 0.5, %v3280_v6  ;;  %v1604_v14 = vadd.f32 0.001143296, %v1603_v5 }
 0x153   : > { %v1767_v37 = vmul.f32 %v1735_v7, %v3385_v20  ;;  %v1951_v53 = vclamps-f32 %v1507_v8, 1.0  ;;  %v1571_v33 = vmul.f32 %v1570_v46, %v3375_v63  ;;  %v1521_v19 = vadd.f32 1.1283791, %v1520_v24 }
 0x154   : > { %v1595_v41 = vadd.f32 0.0036580483, %v1594_v48  ;;  %v3456_v39 = vadd.f32 %v3200_v57, %v328_v49  ;;  %v1605_v20 = vmul.f32 %v1604_v14, %v3430_v32  ;;  %v329_v52 = vmul.f32 %v3187_v12, %v2024_v50 }
 0x155   : > { %1799 = vst [vmem:[%s2417_s27 + $0xc8] sm:$0xff] %v1767_v37  ;;  %v1736_v10 = vadd.f32 1.0, %v1951_v53  ;;  %v3458_v16 = vadd.f32 1.0, %v1571_v33  ;;  %vm1538_vm12 = vweird.f32 %v1532_v30  ;;  %v1560_v21 = vmul.f32 %v1559_v55, %v3375_v63 }
 0x156   : > { %v2121_v15 = vpop.eup %2120  ;;  %v3464_v62 = vmul.f32 0.70710677, %v3456_v39  ;;  %v1542_v4 = vand.u32 2147483647, %v1532_v30  ;;  %v1544_v45 = vand.u32 2147483648, %v1532_v30  ;;  %v1596_v56 = vmul.f32 %v1595_v41, %v3430_v32 }
 0x157   : > { %v1534_v6 = vmul.f32 %v2121_v15, %v1532_v30  ;;  %v1768_v54 = vmul.f32 %v1736_v10, %v392_v43  ;;  %2122 = vrcp.f32 %v3458_v16  ;;  %vm1539_vm13 = vweird.f32 %v2121_v15 }
 0x158   : > { %v1606_v31 = vadd.f32 0.014752088, %v1605_v20  ;;  %v1630_v12 = vmul.f32 %v3464_v62, %v3464_v62  ;;  %v3472_v9 = vadd.f32 %v3200_v57, %v329_v52  ;;  %v393_v63 = vmul.f32 0.5, %v3344_v44  ;;  %vm3478_vm14 = vmor %vm1538_vm12, %vm1539_vm13 }
 0x159   : > { %v1535_v11 = vsub.f32 1.0, %v1534_v6  ;;  %1800 = vst [vmem:[%s2417_s27 + $0xd0] sm:$0xff] %v1768_v54  ;;  %v1522_v34 = vmul.f32 %v1521_v19, %v3353_v61  ;;  %v1545_v25 = vor.u32 1.1754944e-38, %v1544_v45  ;;  %v1561_v22 = vadd.f32 1.1283791, %v1560_v21 }
 0x15a   : > { %v1607_v0 = vmul.f32 %v1606_v31, %v3430_v32  ;;  %v3482_v51 = vmin.f32 %v1630_v12, 16.0  ;;  %v3485_v60 = vmul.f32 0.70710677, %v3472_v9  ;;  %vm1543_vm15 = vcmp.eq.f32.partialorder %v1542_v4, 8.507059e+37 }
 0x15b   : > { %v1536_v17 = vmul.f32 %v2121_v15, %v1535_v11  ;;  %v1597_v44 = vadd.f32 0.05243302, %v1596_v56  ;;  %vm1578_vm0 = vweird.f32 %v3458_v16  ;;  %v1582_v1 = vand.u32 2147483647, %v3458_v16 }
 0x15c   : > { %v1608_v13 = vadd.f32 0.112945676, %v1607_v0  ;;  %v1632_v40 = vmul.f32 2.1237322e-06, %v3482_v51  ;;  %v1643_v36 = vmul.f32 3.8918573e-05, %v3482_v51  ;;  %v1670_v38 = vmul.f32 %v3485_v60, %v3485_v60 }
 0x15d   : > { %v1537_v57 = vadd.f32 %v2121_v15, %v1536_v17  ;;  %v2123_v61 = vpop.eup %2122  ;;  %v1584_v30 = vand.u32 2147483648, %v3458_v16  ;;  %v1598_v7 = vmul.f32 %v1597_v44, %v3430_v32  ;;  %v1562_v50 = vmul.f32 %v1561_v22, %v3356_v23 }
 0x15e   : > { %v1574_v35 = vmul.f32 %v2123_v61, %v3458_v16  ;;  %v1609_v28 = vmul.f32 %v1608_v13, %v3430_v32  ;;  %v1633_v3 = vadd.f32 0.00028619796, %v1632_v40  ;;  %v1644_v47 = vadd.f32 0.001143296, %v1643_v36 }
 0x15f   : > { %v1541_v59 = vsel %vm3478_vm14, %v2121_v15, %v1537_v57  ;;  %vm1579_vm1 = vweird.f32 %v2123_v61  ;;  %v3501_v8 = vmin.f32 %v1670_v38, 16.0  ;;  %v1585_v55 = vor.u32 1.1754944e-38, %v1584_v30 }
 0x160   : > { %v1546_v18 = vsel %vm1543_vm15, %v1545_v25, %v1541_v59  ;;  %v1575_v5 = vsub.f32 1.0, %v1574_v35  ;;  %v1610_v29 = vadd.f32 0.4994258, %v1609_v28  ;;  %v1634_v24 = vmul.f32 %v1633_v3, %v3482_v51  ;;  %vm3506_vm2 = vmor %vm1578_vm0, %vm1579_vm1 }
 0x161   : > { %v1547_v27 = vmul.f32 %v1546_v18, %v1522_v34  ;;  %v1645_v49 = vmul.f32 %v1644_v47, %v3482_v51  ;;  %v1672_v14 = vmul.f32 2.1237322e-06, %v3501_v8  ;;  %vm1583_vm3 = vcmp.eq.f32.partialorder %v1582_v1, 8.507059e+37 }
 0x162   : > { %v1576_v37 = vmul.f32 %v2123_v61, %v1575_v5  ;;  %v1611_v43 = vmul.f32 %v1610_v29, %v3430_v32  ;;  %v1635_v53 = vadd.f32 0.0036580483, %v1634_v24  ;;  %v1683_v23 = vmul.f32 3.8918573e-05, %v3501_v8 }
 0x163   : > { %v1952_v46 = vclamps-f32 %v1547_v27, 1.0  ;;  %v1646_v33 = vadd.f32 0.014752088, %v1645_v49  ;;  %v1599_v15 = vadd.f32 0.18741608, %v1598_v7  ;;  %v394_v56 = vmul.f32 0.5, %v3347_v2 }
 0x164   : > { %v1577_v41 = vadd.f32 %v2123_v61, %v1576_v37  ;;  %v1612_v10 = vadd.f32 1.0, %v1611_v43  ;;  %v1673_v20 = vadd.f32 0.00028619796, %v1672_v14  ;;  %v1636_v21 = vmul.f32 %v1635_v53, %v3482_v51 }
 0x165   : > { %v1737_v19 = vadd.f32 1.0, %v1952_v46  ;;  %v1647_v16 = vmul.f32 %v1646_v33, %v3482_v51  ;;  %v1684_v54 = vadd.f32 0.001143296, %v1683_v23  ;;  %v395_v33 = vmul.f32 0.5, %v3398_v58 }
 0x166   : > { %v1581_v6 = vsel %vm3506_vm2, %v2123_v61, %v1577_v41  ;;  %2124 = vrcp.f32 %v1612_v10  ;;  %v1674_v31 = vmul.f32 %v1673_v20, %v3501_v8  ;;  %v1637_v17 = vadd.f32 0.05243302, %v1636_v21 }
 0x167   : > { %v1769_v52 = vmul.f32 %v1737_v19, %v393_v63  ;;  %v1586_v4 = vsel %vm1583_vm3, %v1585_v55, %v1581_v6  ;;  %v1648_v11 = vadd.f32 0.112945676, %v1647_v16  ;;  %v1685_v12 = vmul.f32 %v1684_v54, %v3501_v8 }
 0x168   : > { %v1587_v45 = vmul.f32 %v1586_v4, %v1562_v50  ;;  %v1600_v63 = vmul.f32 %v1599_v15, %v3430_v32  ;;  %v1675_v26 = vadd.f32 0.0036580483, %v1674_v31  ;;  %v1638_v36 = vmul.f32 %v1637_v17, %v3482_v51 }
 0x169   : > { %1801 = vst [vmem:[%s2417_s27 + $0xd8] sm:$0xff] %v1769_v52  ;;  %v1649_v0 = vmul.f32 %v1648_v11, %v3482_v51  ;;  %v1686_v25 = vadd.f32 0.014752088, %v1685_v12  ;;  %v1624_v38 = vand.u32 2147483648, %v1612_v10  ;;  %vm1618_vm4 = vweird.f32 %v1612_v10 }
 0x16a   : > { %v1953_v34 = vclamps-f32 %v1587_v45, 1.0  ;;  %v1601_v2 = vadd.f32 1.1283791, %v1600_v63  ;;  %v1676_v32 = vmul.f32 %v1675_v26, %v3501_v8  ;;  %v1622_v30 = vand.u32 2147483647, %v1612_v10 }
 0x16b   : > { %v1650_v57 = vadd.f32 0.4994258, %v1649_v0  ;;  %v1687_v13 = vmul.f32 %v1686_v25, %v3501_v8  ;;  %v1639_v47 = vadd.f32 0.18741608, %v1638_v36  ;;  %v1625_v27 = vor.u32 1.1754944e-38, %v1624_v38 }
 0x16c   : > { %v1738_v22 = vadd.f32 1.0, %v1953_v34  ;;  %v2125_v44 = vpop.eup %2124  ;;  %v1677_v5 = vadd.f32 0.05243302, %v1676_v32  ;;  %v1602_v7 = vmul.f32 %v1601_v2, %v3409_v42  ;;  %vm1623_vm7 = vcmp.eq.f32.partialorder %v1622_v30, 8.507059e+37 }
 0x16d   : > { %v1614_v40 = vmul.f32 %v2125_v44, %v1612_v10  ;;  %v1651_v59 = vmul.f32 %v1650_v57, %v3482_v51  ;;  %v1688_v35 = vadd.f32 0.112945676, %v1687_v13  ;;  %vm1619_vm5 = vweird.f32 %v2125_v44 }
 0x16e   : > { %v1770_v61 = vmul.f32 %v1738_v22, %v394_v56  ;;  %vm1620_vm6 = vmor %vm1618_vm4, %vm1619_vm5  ;;  %v1640_v46 = vmul.f32 %v1639_v47, %v3482_v51  ;;  %v1678_v55 = vmul.f32 %v1677_v5, %v3501_v8  ;;  %v396_v17 = vmul.f32 0.5, %v3456_v39 }
 0x16f   : > { %v1615_v1 = vsub.f32 1.0, %v1614_v40  ;;  %v1652_v18 = vadd.f32 1.0, %v1651_v59  ;;  %v1689_v28 = vmul.f32 %v1688_v35, %v3501_v8  ;;  %v397_v2 = vmul.f32 0.5, %v3472_v9 }
 0x170   : > { %1802 = vst [vmem:[%s2417_s27 + $0xe0] sm:$0xff] %v1770_v61  ;;  %v1641_v19 = vadd.f32 1.1283791, %v1640_v46  ;;  %v1679_v23 = vadd.f32 0.18741608, %v1678_v55 }
 0x171   : > { %v1616_v3 = vmul.f32 %v2125_v44, %v1615_v1  ;;  %2126 = vrcp.f32 %v1652_v18  ;;  %v1690_v24 = vadd.f32 0.4994258, %v1689_v28  ;;  %vm1658_vm8 = vweird.f32 %v1652_v18 }
 0x172   : > { %v1664_v41 = vand.u32 2147483648, %v1652_v18  ;;  %v1662_v10 = vand.u32 2147483647, %v1652_v18  ;;  %v1680_v6 = vmul.f32 %v1679_v23, %v3501_v8  ;;  %v1642_v58 = vmul.f32 %v1641_v19, %v3464_v62 }
 0x173   : > { %v1617_v29 = vadd.f32 %v2125_v44, %v1616_v3  ;;  %v1691_v50 = vmul.f32 %v1690_v24, %v3501_v8 }
 0x174   : > { %v1665_v52 = vor.u32 1.1754944e-38, %v1664_v41  ;;  %vm1663_vm11 = vcmp.eq.f32.partialorder %v1662_v10, 8.507059e+37  ;;  %v1681_v56 = vadd.f32 1.1283791, %v1680_v6 }
 0x175   : > { %v1621_v49 = vsel %vm1620_vm6, %v2125_v44, %v1617_v29  ;;  %v1692_v43 = vadd.f32 1.0, %v1691_v50 }
 0x176   : > { %v1626_v37 = vsel %vm1623_vm7, %v1625_v27, %v1621_v49  ;;  %v1682_v25 = vmul.f32 %v1681_v56, %v3485_v60 }
 0x177   : > { %v1627_v48 = vmul.f32 %v1626_v37, %v1602_v7  ;;  %v2127_v53 = vpop.eup %2126  ;;  %2128 = vrcp.f32 %v1692_v43  ;;  %vm1698_vm12 = vweird.f32 %v1692_v43  ;;  %v1704_v31 = vand.u32 2147483648, %v1692_v43 }
 0x178   : > { %v1654_v42 = vmul.f32 %v2127_v53, %v1652_v18  ;;  %vm1659_vm9 = vweird.f32 %v2127_v53  ;;  %v1702_v63 = vand.u32 2147483647, %v1692_v43 }
 0x179   : > { %v1954_v14 = vclamps-f32 %v1627_v48, 1.0  ;;  %vm1660_vm10 = vmor %vm1658_vm8, %vm1659_vm9  ;;  %v1705_v62 = vor.u32 1.1754944e-38, %v1704_v31 }
 0x17a   : > { %v1655_v51 = vsub.f32 1.0, %v1654_v42  ;;  %vm1703_vm15 = vcmp.eq.f32.partialorder %v1702_v63, 8.507059e+37 }
 0x17b   : > { %v1739_v15 = vadd.f32 1.0, %v1954_v14 }
 0x17c   : > { %v1656_v20 = vmul.f32 %v2127_v53, %v1655_v51 }
 0x17d   : > { %v1771_v16 = vmul.f32 %v1739_v15, %v395_v33  ;;  %v2129_v54 = vpop.eup %2128 }
 0x17e   : > { %v1657_v21 = vadd.f32 %v2127_v53, %v1656_v20  ;;  %v1694_v45 = vmul.f32 %v2129_v54, %v1692_v43  ;;  %vm1699_vm13 = vweird.f32 %v2129_v54 }
 0x17f   : > { %1803 = vst [vmem:[%s2417_s27 + $0xe8] sm:$0xff] %v1771_v16  ;;  %vm1700_vm14 = vmor %vm1698_vm12, %vm1699_vm13 }
 0x180   : > { %v1661_v4 = vsel %vm1660_vm10, %v2127_v53, %v1657_v21  ;;  %v1695_v34 = vsub.f32 1.0, %v1694_v45 }
 0x181   : > { %v1666_v11 = vsel %vm1663_vm11, %v1665_v52, %v1661_v4 }
 0x182   : > { %v1667_v12 = vmul.f32 %v1666_v11, %v1642_v58  ;;  %v1696_v0 = vmul.f32 %v2129_v54, %v1695_v34 }
 0x184   : > { %v1955_v8 = vclamps-f32 %v1667_v12, 1.0  ;;  %v1697_v22 = vadd.f32 %v2129_v54, %v1696_v0 }
 0x186   : > { %v1740_v26 = vadd.f32 1.0, %v1955_v8  ;;  %v1701_v44 = vsel %vm1700_vm14, %v2129_v54, %v1697_v22 }
 0x187   : > { %v1706_v13 = vsel %vm1703_vm15, %v1705_v62, %v1701_v44 }
 0x188   : > { %v1772_v57 = vmul.f32 %v1740_v26, %v396_v17  ;;  %v1707_v61 = vmul.f32 %v1706_v13, %v1682_v25 }
 0x18a   : > { %1804 = vst [vmem:[%s2417_s27 + $0xf0] sm:$0xff] %v1772_v57  ;;  %v1956_v40 = vclamps-f32 %v1707_v61, 1.0 }
 0x18c   : > { %v1741_v36 = vadd.f32 1.0, %v1956_v40 }
 0x18e   : > { %v1773_v39 = vmul.f32 %v1741_v36, %v397_v2 }
 0x190   : > { %1805 = vst [vmem:[%s2417_s27 + $0xf8] sm:$0xff] %v1773_v39 }
 0x191 PF: > { %s13_s14 = sadd.s32 1, %s2156_s14   ;;  %s3651_s12 = smov %s2152_s13 }
 0x192   : > { %p10_p5 = scmp.ge.s32.totalorder %s13_s14, 4   ;;  %s3652_s13 = smov %s3654_s15 }
 0x194   :  { %12 = sbr.rel (!%p10_p5) target bundleno = 2 (0x2), region = 68 }

// kernel: conv_block.4
= control target key start
LH: loop header
LB: loop body
LE: loop exit
PB: predicated region body
PF: predicated region fallthrough
CT: control target
= control target key end

     0   :  { %s5365_s15 = smov 0   ;;  %s5367_s16 = smov 0   ;;  %s6732_s0 = inlined_call_operand.vmem [shape: bf16[2,18,18,8], index: 0, kind: input, shape index: {}]   ;;  %s6733_s1 = inlined_call_operand.vmem [shape: bf16[72,128], index: 1, kind: input, shape index: {}]   ;;  %s6734_s2 = inlined_call_operand.vmem [shape: bf16[2,256,128], index: 2, kind: output, shape index: {0}]   ;;  %s6735_s3 = inlined_call_operand.vmem [shape: f32[2,1,128], index: 3, kind: output, shape index: {1}]   ;;  %s6736_s4 = inlined_call_operand.vmem [shape: f32[2,1,128], index: 4, kind: output, shape index: {2}]  }
   0x1   :  { %s5369_s17 = smov 0  }
   0x2 LB: > { %s27_s18 = sadd.s32 1, %s5334_s16  ;;  %p4512_p0 = scmp.ge.s32.totalorder %s5338_s17, 1  ;;  %s5338_s17 = sphi %s5369_s17, %s15_s17   ;;  %s5334_s16 = sphi %s5367_s16, %s6750_s16   ;;  %s5330_s15 = sphi %s5365_s15, %s6749_s15  }
   0x3   : > { %p29_p1 = scmp.ge.s32.totalorder %s27_s18, 2  ;;  %p194_p2 = scmp.lt.s32.totalorder %s5338_s17, 3 }
   0x5   : > { %s6752_s18 = smov (%p29_p1, %s27_s18), 0  ;;  %p195_p3 = pnand %p4512_p0, %p194_p2 }
   0x7   : > { %198 = sbr.rel (%p195_p3) target bundleno = 771 (0x303), region = 28 }
   0xc   : > { %v705_v0 = vld [vmem:[%s6733_s1 + $0x4] sm:$0xf]  ;;  %vm803_vm0 = vcmask 1043456   ;;  %p239_p4 = scmp.lt.s32.totalorder %s5330_s15, 1  ;;  %v1279_v2 = vld [vmem:[%s6733_s1 + $0x8] sm:$0xf] }
   0xd   : > { %v805_v1 = vsel %vm803_vm0, %v705_v0, 0  ;;  %v1377_v3 = vsel %vm803_vm0, %v1279_v2, 0  ;;  %v1533_v4 = vld [vmem:[%s6733_s1 + $0xc] sm:$0xf]  ;;  %v301_v5 = vld [vmem:[%s6733_s1] sm:$0xf] }
   0xe   : > { %5238 = vmatpush.bf16.msra.mxu1 %v805_v1  ;;  %5239 = vmatpush.bf16.msra.mxu2 %v805_v1  ;;  %s6754_s15 = smov (!%p239_p4, %s5330_s15), 1  ;;  %v2218_v6 = vld [vmem:[%s6733_s1 + $0x10] sm:$0xf]  ;;  %v1663_v7 = vsel %vm803_vm0, %v1533_v4, 0  ;;  %v1025_v8 = vsel %vm803_vm0, %v301_v5, 0  ;;  %vm754_vm4 = vcmask 64512  }
   0xf   : > { %5240 = vmatpush.bf16.msra.mxu3 %v805_v1  ;;  %814 = vmatpush.bf16.msra.mxu0 %v805_v1  ;;  %s5241_s29 = smul.u32 216, %s6754_s15  ;;  %v2316_v9 = vsel %vm803_vm0, %v2218_v6, 0  ;;  %vm318_vm1 = vsmask.f32 3328  ;;  %vm319_vm2 = vsmask.f32 7440  ;;  %s261_s25 = scalar_lea.vmem %s6735_s3, %s6754_s15 }
  0x10   : > { %vm5421_vm3 = vmor %vm318_vm1, %vm319_vm2  ;;  %vm1164_vm5 = vcmask 1042432   ;;  %vm1165_vm6 = vcmask 1046532   ;;  %s5094_s19 = sshll.u32 %s6754_s15, 7  ;;  %s267_s28 = scalar_lea.vmem %s6736_s4, %s6754_s15 }
  0x11   : > { %s5409_s6 = scalar_lea.vmem %s6732_s0, %s5241_s29  ;;  %vm5595_vm7 = vmor %vm1164_vm5, %vm1165_vm6  ;;  %s6477_s22 = scalar_lea.vmem %s6734_s2, %s5094_s19 }
  0x12   : > { %1386 = vmatpush.bf16.msrb.mxu2 %v1377_v3  ;;  %1034 = vmatpush.bf16.msrb.mxu1 %v1025_v8  ;;  %v277_v10 = vld [vmem:[%s5409_s6 + $0x30] sm:$0xf]  ;;  %v278_v11 = vld [vmem:[%s5409_s6 + $0x34] sm:$0xf]  ;;  %v306_v12 = vld [vmem:[%s5409_s6 + $0x38] sm:$0x1] }
  0x13   : > { %1672 = vmatpush.bf16.msrb.mxu3 %v1663_v7  ;;  %2325 = vmatpush.bf16.msrb.mxu0 %v2316_v9  ;;  %v418_v13 = vshrl.u32 %v277_v10, 16  ;;  %v421_v14 = vshll.u32 %v277_v10, 16  ;;  %v427_v15 = vshll.u32 %v278_v11, 16  ;;  %v431_v16 = vshrl.u32 %v278_v11, 16  ;;  %v285_v17 = vld [vmem:[%s5409_s6 + $0x60] sm:$0xf] }
  0x14   : > { %v437_v18 = vshll.u32 %v306_v12, 16  ;;  %v286_v19 = vld [vmem:[%s5409_s6 + $0x64] sm:$0xf]  ;;  %v310_v20 = vld [vmem:[%s5409_s6 + $0x68] sm:$0x1]  ;;  %v514_v21 = vshrl.u32 %v285_v17, 16 }
  0x15   : > { %v420_v22 = vrot.slane %v418_v13, 4  ;;  %v423_v23 = vrot.slane %v421_v14, 5  ;;  %v429_v24 = vrot.slane %v427_v15, 5  ;;  %v433_v25 = vrot.slane %v431_v16, 4  ;;  %v293_v26 = vld [vmem:[%s5409_s6 + $0x90] sm:$0xf] }
  0x16   : > { %v439_v27 = vrot.slane %v437_v18, 5  ;;  %v516_v28 = vrot.slane %v514_v21, 4  ;;  %v517_v29 = vshll.u32 %v285_v17, 16  ;;  %v523_v30 = vshll.u32 %v286_v19, 16  ;;  %v294_v35 = vld [vmem:[%s5409_s6 + $0x94] sm:$0xf] }
  0x17   : > { %v424_v31 = vor.u32 %v423_v23, %v420_v22  ;;  %v434_v32 = vor.u32 %v433_v25, %v429_v24  ;;  %v527_v33 = vshrl.u32 %v286_v19, 16  ;;  %v533_v34 = vshll.u32 %v310_v20, 16  ;;  %v314_v45 = vld [vmem:[%s5409_s6 + $0x98] sm:$0x1]  ;;  %v269_v61 = vld [vmem:[%s5409_s6] sm:$0xf] }
  0x18   : > { %v519_v37 = vrot.slane %v517_v29, 5  ;;  %v525_v38 = vrot.slane %v523_v30, 5  ;;  %v610_v39 = vshrl.u32 %v293_v26, 16  ;;  %v613_v47 = vshll.u32 %v293_v26, 16  ;;  %v5434_v1 = vld [vmem:[%s5409_s6 + $0x4] sm:$0xf] }
  0x19   : > { %v425_v40 = vrot.slane %v424_v31, 4  ;;  %v435_v41 = vrot.slane %v434_v32, 4  ;;  %v529_v42 = vrot.slane %v527_v33, 4  ;;  %v535_v43 = vrot.slane %v533_v34, 5  ;;  %v5437_v2 = vld [vmem:[%s5409_s6 + $0x8] sm:$0x1] }
  0x1a   : > { %v520_v44 = vor.u32 %v519_v37, %v516_v28  ;;  %v612_v46 = vrot.slane %v610_v39, 4  ;;  %v619_v48 = vshll.u32 %v294_v35, 16  ;;  %v623_v52 = vshrl.u32 %v294_v35, 16  ;;  %v279_v19 = vld [vmem:[%s5409_s6 + $0x3c] sm:$0xf] }
  0x1b   : > { %v430_v49 = vsel %vm5421_vm3, %v425_v40, %v429_v24  ;;  %v440_v50 = vsel %vm5421_vm3, %v435_v41, %v439_v27  ;;  %v530_v51 = vor.u32 %v529_v42, %v525_v38  ;;  %v615_v56 = vrot.slane %v613_v47, 5  ;;  %v5449_v20 = vld [vmem:[%s5409_s6 + $0x40] sm:$0xf]  ;;  %v5454_v25 = vld [vmem:[%s5409_s6 + $0x44] sm:$0x1] }
  0x1c   : > { %v714_v53 = vunpack.c.l.b16 %v430_v49  ;;  %v715_v54 = vunpack.c.l.b16 %v440_v50  ;;  %v521_v55 = vrot.slane %v520_v44, 4  ;;  %v621_v58 = vrot.slane %v619_v48, 5  ;;  %v287_v33 = vld [vmem:[%s5409_s6 + $0x6c] sm:$0xf]  ;;  %v311_v47 = vld [vmem:[%s5409_s6 + $0x74] sm:$0x1] }
  0x1d   : > { %v531_v57 = vrot.slane %v530_v51, 4  ;;  %v625_v59 = vrot.slane %v623_v52, 4  ;;  %v629_v60 = vshll.u32 %v314_v45, 16  ;;  %v616_v0 = vor.u32 %v615_v56, %v612_v46 }
  0x1e   : > { %v742_v62 = vpack.c.b16 %v715_v54, %v714_v53  ;;  %v526_v63 = vsel %vm5421_vm3, %v521_v55, %v525_v38  ;;  %v322_v9 = vshrl.u32 %v269_v61, 16  ;;  %v325_v10 = vshll.u32 %v269_v61, 16  ;;  %v295_v61 = vld [vmem:[%s5409_s6 + $0x9c] sm:$0xf] }
  0x1f   : > { %v536_v3 = vsel %vm5421_vm3, %v531_v57, %v535_v43  ;;  %v722_v4 = vunpack.c.l.b16 %v526_v63  ;;  %v626_v5 = vor.u32 %v625_v59, %v621_v58  ;;  %v631_v6 = vrot.slane %v629_v60, 5  ;;  %v288_v43 = vld [vmem:[%s5409_s6 + $0x70] sm:$0xf] }
  0x20   : > { %4520 = vmatmul.msk.bf16.vlgmr.msra.gmra.mxu1 %vm754_vm4, %v742_v62  ;;  %v723_v7 = vunpack.c.l.b16 %v536_v3  ;;  %v617_v8 = vrot.slane %v616_v0, 4  ;;  %v331_v12 = vshll.u32 %v5434_v1, 16  ;;  %v335_v13 = vshrl.u32 %v5434_v1, 16  ;;  %v296_v3 = vld [vmem:[%s5409_s6 + $0xa0] sm:$0xf] }
  0x21   : > { %v627_v11 = vrot.slane %v626_v5, 4  ;;  %v341_v14 = vshll.u32 %v5437_v2, 16  ;;  %v324_v17 = vrot.slane %v322_v9, 4  ;;  %v327_v18 = vrot.slane %v325_v10, 5 }
  0x22   : > { %v746_v15 = vpack.c.b16 %v723_v7, %v722_v4  ;;  %v622_v16 = vsel %vm5421_vm3, %v617_v8, %v621_v58  ;;  %v333_v23 = vrot.slane %v331_v12, 5  ;;  %v337_v24 = vrot.slane %v335_v13, 4  ;;  %v315_v8 = vld [vmem:[%s5409_s6 + $0xa4] sm:$0x1] }
  0x23   : > { %v632_v21 = vsel %vm5421_vm3, %v627_v11, %v631_v6  ;;  %v730_v22 = vunpack.c.l.b16 %v622_v16  ;;  %v328_v27 = vor.u32 %v327_v18, %v324_v17  ;;  %v343_v28 = vrot.slane %v341_v14, 5 }
  0x24   : > { %4524 = vmatmul.msk.bf16.vlgmr.msra.gmra.mxu2 %vm754_vm4, %v746_v15  ;;  %v731_v26 = vunpack.c.l.b16 %v632_v21  ;;  %v338_v29 = vor.u32 %v337_v24, %v333_v23  ;;  %v442_v30 = vshrl.u32 %v279_v19, 16  ;;  %v445_v31 = vshll.u32 %v279_v19, 16 }
  0x25   : > { %v451_v32 = vshll.u32 %v5449_v20, 16  ;;  %v329_v35 = vrot.slane %v328_v27, 4  ;;  %v455_v37 = vshrl.u32 %v5449_v20, 16  ;;  %v461_v38 = vshll.u32 %v5454_v25, 16 }
  0x26   : > { %v750_v34 = vpack.c.b16 %v731_v26, %v730_v22  ;;  %v339_v39 = vrot.slane %v338_v29, 4  ;;  %v444_v40 = vrot.slane %v442_v30, 4  ;;  %v447_v41 = vrot.slane %v445_v31, 5  ;;  %v271_v22 = vld [vmem:[%s5409_s6 + $0xc] sm:$0xf] }
  0x27   : > { %v453_v42 = vrot.slane %v451_v32, 5  ;;  %v334_v44 = vsel %vm5421_vm3, %v329_v35, %v333_v23  ;;  %v457_v45 = vrot.slane %v455_v37, 4  ;;  %v463_v46 = vrot.slane %v461_v38, 5  ;;  %v5483_v32 = vld [vmem:[%s5409_s6 + $0x14] sm:$0x1] }
  0x28   : > { %4528 = vmatmul.msk.bf16.vlgmr.msra.gmra.mxu3 %vm754_vm4, %v750_v34  ;;  %v538_v48 = vshrl.u32 %v287_v33, 16  ;;  %v344_v49 = vsel %vm5421_vm3, %v339_v39, %v343_v28  ;;  %v706_v50 = vunpack.c.l.b16 %v334_v44  ;;  %v448_v51 = vor.u32 %v447_v41, %v444_v40  ;;  %v5480_v28 = vld [vmem:[%s5409_s6 + $0x10] sm:$0xf] }
  0x29   : > { %v541_v52 = vshll.u32 %v287_v33, 16  ;;  %v707_v53 = vunpack.c.l.b16 %v344_v49  ;;  %v458_v54 = vor.u32 %v457_v45, %v453_v42  ;;  %v547_v56 = vshll.u32 %v288_v43, 16 }
  0x2a   : > { %v540_v55 = vrot.slane %v538_v48, 4  ;;  %v449_v57 = vrot.slane %v448_v51, 4  ;;  %v551_v59 = vshrl.u32 %v288_v43, 16  ;;  %v557_v60 = vshll.u32 %v311_v47, 16  ;;  %v5493_v47 = vld [vmem:[%s5409_s6 + $0x4c] sm:$0xf] }
  0x2b   : > { %v543_v58 = vrot.slane %v541_v52, 5  ;;  %v738_v62 = vpack.c.b16 %v707_v53, %v706_v50  ;;  %v459_v63 = vrot.slane %v458_v54, 4  ;;  %v549_v0 = vrot.slane %v547_v56, 5  ;;  %v5498_v56 = vld [vmem:[%s5409_s6 + $0x50] sm:$0x1] }
  0x2c   : > { %v454_v4 = vsel %vm5421_vm3, %v449_v57, %v453_v42  ;;  %v553_v6 = vrot.slane %v551_v59, 4  ;;  %v559_v7 = vrot.slane %v557_v60, 5  ;;  %v634_v11 = vshrl.u32 %v295_v61, 16  ;;  %v281_v42 = vld [vmem:[%s5409_s6 + $0x48] sm:$0xf] }
  0x2d   : > { %v544_v5 = vor.u32 %v543_v58, %v540_v55  ;;  %4516 = vmatmul.msk.bf16.vlgmr.msra.gmra.mxu0 %vm754_vm4, %v738_v62  ;;  %v464_v9 = vsel %vm5421_vm3, %v459_v63, %v463_v46  ;;  %v716_v10 = vunpack.c.l.b16 %v454_v4  ;;  %v637_v12 = vshll.u32 %v295_v61, 16 }
  0x2e   : > { %v717_v13 = vunpack.c.l.b16 %v464_v9  ;;  %v554_v15 = vor.u32 %v553_v6, %v549_v0  ;;  %v643_v16 = vshll.u32 %v296_v3, 16  ;;  %v636_v17 = vrot.slane %v634_v11, 4 }
  0x2f   : > { %v545_v14 = vrot.slane %v544_v5, 4  ;;  %v639_v18 = vrot.slane %v637_v12, 5  ;;  %v647_v19 = vshrl.u32 %v296_v3, 16  ;;  %v653_v21 = vshll.u32 %v315_v8, 16  ;;  %v289_v3 = vld [vmem:[%s5409_s6 + $0x78] sm:$0xf] }
  0x30   : > { %v743_v23 = vpack.c.b16 %v717_v13, %v716_v10  ;;  %v555_v26 = vrot.slane %v554_v15, 4  ;;  %v645_v27 = vrot.slane %v643_v16, 5  ;;  %v346_v35 = vshrl.u32 %v271_v22, 16  ;;  %v290_v8 = vld [vmem:[%s5409_s6 + $0x7c] sm:$0xf] }
  0x31   : > { %v550_v24 = vsel %vm5421_vm3, %v545_v14, %v549_v0  ;;  %v640_v30 = vor.u32 %v639_v18, %v636_v17  ;;  %v649_v31 = vrot.slane %v647_v19, 4  ;;  %v655_v34 = vrot.slane %v653_v21, 5  ;;  %v312_v16 = vld [vmem:[%s5409_s6 + $0x80] sm:$0x1] }
  0x32   : > { %v724_v29 = vunpack.c.l.b16 %v550_v24  ;;  %4521 = vmatmul.msk.bf16.gmra.mxu1 %vm754_vm4, %v743_v23  ;;  %v560_v33 = vsel %vm5421_vm3, %v555_v26, %v559_v7  ;;  %v349_v37 = vshll.u32 %v271_v22, 16  ;;  %v355_v41 = vshll.u32 %v5480_v28, 16 }
  0x33   : > { %v725_v38 = vunpack.c.l.b16 %v560_v33  ;;  %v641_v39 = vrot.slane %v640_v30, 4  ;;  %v650_v40 = vor.u32 %v649_v31, %v645_v27  ;;  %v348_v43 = vrot.slane %v346_v35, 4 }
  0x34   : > { %v351_v44 = vrot.slane %v349_v37, 5  ;;  %v359_v45 = vshrl.u32 %v5480_v28, 16  ;;  %v365_v46 = vshll.u32 %v5483_v32, 16  ;;  %v357_v51 = vrot.slane %v355_v41, 5 }
  0x35   : > { %v747_v48 = vpack.c.b16 %v725_v38, %v724_v29  ;;  %v646_v49 = vsel %vm5421_vm3, %v641_v39, %v645_v27  ;;  %v651_v50 = vrot.slane %v650_v40, 4  ;;  %v466_v58 = vshrl.u32 %v281_v42, 16  ;;  %v298_v39 = vld [vmem:[%s5409_s6 + $0xac] sm:$0xf]  ;;  %v316_v40 = vld [vmem:[%s5409_s6 + $0xb0] sm:$0x1] }
  0x36   : > { %v732_v52 = vunpack.c.l.b16 %v646_v49  ;;  %v352_v53 = vor.u32 %v351_v44, %v348_v43  ;;  %v361_v54 = vrot.slane %v359_v45, 4  ;;  %v367_v55 = vrot.slane %v365_v46, 5 }
  0x37   : > { %4525 = vmatmul.msk.bf16.gmra.mxu2 %vm754_vm4, %v747_v48  ;;  %v656_v57 = vsel %vm5421_vm3, %v651_v50, %v655_v34  ;;  %v469_v59 = vshll.u32 %v281_v42, 16  ;;  %v475_v60 = vshll.u32 %v5493_v47, 16  ;;  %v479_v0 = vshrl.u32 %v5493_v47, 16  ;;  %v297_v34 = vld [vmem:[%s5409_s6 + $0xa8] sm:$0xf] }
  0x38   : > { %v733_v61 = vunpack.c.l.b16 %v656_v57  ;;  %v353_v62 = vrot.slane %v352_v53, 4  ;;  %v362_v63 = vor.u32 %v361_v54, %v357_v51  ;;  %v468_v4 = vrot.slane %v466_v58, 4 }
  0x39   : > { %v471_v5 = vrot.slane %v469_v59, 5  ;;  %v477_v6 = vrot.slane %v475_v60, 5  ;;  %v485_v7 = vshll.u32 %v5498_v56, 16  ;;  %v481_v12 = vrot.slane %v479_v0, 4  ;;  %v273_v59 = vld [vmem:[%s5409_s6 + $0x18] sm:$0xf] }
  0x3a   : > { %v751_v9 = vpack.c.b16 %v733_v61, %v732_v52  ;;  %v358_v10 = vsel %vm5421_vm3, %v353_v62, %v357_v51  ;;  %v363_v11 = vrot.slane %v362_v63, 4  ;;  %v562_v17 = vshrl.u32 %v289_v3, 16  ;;  %v5526_v63 = vld [vmem:[%s5409_s6 + $0x1c] sm:$0xf]  ;;  %v5529_v0 = vld [vmem:[%s5409_s6 + $0x20] sm:$0x1] }
  0x3b   : > { %v708_v13 = vunpack.c.l.b16 %v358_v10  ;;  %v472_v14 = vor.u32 %v471_v5, %v468_v4  ;;  %v487_v15 = vrot.slane %v485_v7, 5  ;;  %v482_v19 = vor.u32 %v481_v12, %v477_v6 }
  0x3c   : > { %4529 = vmatmul.msk.bf16.gmra.mxu3 %vm754_vm4, %v751_v9  ;;  %v368_v18 = vsel %vm5421_vm3, %v363_v11, %v367_v55  ;;  %v565_v21 = vshll.u32 %v289_v3, 16  ;;  %v571_v22 = vshll.u32 %v290_v8, 16  ;;  %v564_v26 = vrot.slane %v562_v17, 4 }
  0x3d   : > { %v709_v23 = vunpack.c.l.b16 %v368_v18  ;;  %v473_v24 = vrot.slane %v472_v14, 4  ;;  %v575_v27 = vshrl.u32 %v290_v8, 16  ;;  %v483_v29 = vrot.slane %v482_v19, 4 }
  0x3e   : > { %v567_v30 = vrot.slane %v565_v21, 5  ;;  %v573_v31 = vrot.slane %v571_v22, 5  ;;  %v581_v33 = vshll.u32 %v312_v16, 16  ;;  %v658_v48 = vshrl.u32 %v297_v34, 16  ;;  %v5539_v21 = vld [vmem:[%s5409_s6 + $0x58] sm:$0xf] }
  0x3f   : > { %v739_v35 = vpack.c.b16 %v709_v23, %v708_v13  ;;  %v478_v37 = vsel %vm5421_vm3, %v473_v24, %v477_v6  ;;  %v577_v38 = vrot.slane %v575_v27, 4  ;;  %v488_v41 = vsel %vm5421_vm3, %v483_v29, %v487_v15  ;;  %v283_v15 = vld [vmem:[%s5409_s6 + $0x54] sm:$0xf]  ;;  %v5544_v27 = vld [vmem:[%s5409_s6 + $0x5c] sm:$0x1] }
  0x40   : > { %v718_v42 = vunpack.c.l.b16 %v478_v37  ;;  %v568_v43 = vor.u32 %v567_v30, %v564_v26  ;;  %v583_v44 = vrot.slane %v581_v33, 5  ;;  %v719_v45 = vunpack.c.l.b16 %v488_v41 }
  0x41   : > { %4517 = vmatmul.msk.bf16.gmra.mxu0 %vm754_vm4, %v739_v35  ;;  %v578_v46 = vor.u32 %v577_v38, %v573_v31  ;;  %v661_v49 = vshll.u32 %v297_v34, 16  ;;  %v667_v51 = vshll.u32 %v298_v39, 16  ;;  %v671_v52 = vshrl.u32 %v298_v39, 16  ;;  %v291_v39 = vld [vmem:[%s5409_s6 + $0x84] sm:$0xf] }
  0x42   : > { %v569_v50 = vrot.slane %v568_v43, 4  ;;  %v677_v53 = vshll.u32 %v316_v40, 16  ;;  %v744_v54 = vpack.c.b16 %v719_v45, %v718_v42  ;;  %v660_v57 = vrot.slane %v658_v48, 4 }
  0x43   : > { %v579_v55 = vrot.slane %v578_v46, 4  ;;  %v663_v58 = vrot.slane %v661_v49, 5  ;;  %v669_v61 = vrot.slane %v667_v51, 5  ;;  %v673_v62 = vrot.slane %v671_v52, 4  ;;  %v292_v49 = vld [vmem:[%s5409_s6 + $0x88] sm:$0xf] }
  0x44   : > { %v574_v60 = vsel %vm5421_vm3, %v569_v50, %v573_v31  ;;  %4522 = vmatmul.msk.bf16.gmra.mxu1 %vm754_vm4, %v744_v54  ;;  %v679_v6 = vrot.slane %v677_v53, 5  ;;  %v370_v9 = vshrl.u32 %v273_v59, 16  ;;  %v373_v10 = vshll.u32 %v273_v59, 16  ;;  %v313_v53 = vld [vmem:[%s5409_s6 + $0x8c] sm:$0x1] }
  0x45   : > { %v584_v3 = vsel %vm5421_vm3, %v579_v55, %v583_v44  ;;  %v726_v4 = vunpack.c.l.b16 %v574_v60  ;;  %v664_v5 = vor.u32 %v663_v58, %v660_v57  ;;  %v674_v8 = vor.u32 %v673_v62, %v669_v61 }
  0x46   : > { %v727_v7 = vunpack.c.l.b16 %v584_v3  ;;  %v379_v12 = vshll.u32 %v5526_v63, 16  ;;  %v383_v13 = vshrl.u32 %v5526_v63, 16  ;;  %v389_v14 = vshll.u32 %v5529_v0, 16 }
  0x47   : > { %v665_v11 = vrot.slane %v664_v5, 4  ;;  %v675_v17 = vrot.slane %v674_v8, 4  ;;  %v372_v18 = vrot.slane %v370_v9, 4  ;;  %v375_v19 = vrot.slane %v373_v10, 5  ;;  %v299_v8 = vld [vmem:[%s5409_s6 + $0xb4] sm:$0xf] }
  0x48   : > { %v748_v16 = vpack.c.b16 %v727_v7, %v726_v4  ;;  %v381_v23 = vrot.slane %v379_v12, 5  ;;  %v385_v24 = vrot.slane %v383_v13, 4  ;;  %v391_v26 = vrot.slane %v389_v14, 5  ;;  %v300_v12 = vld [vmem:[%s5409_s6 + $0xb8] sm:$0xf] }
  0x49   : > { %v670_v22 = vsel %vm5421_vm3, %v665_v11, %v669_v61  ;;  %v680_v29 = vsel %vm5421_vm3, %v675_v17, %v679_v6  ;;  %v376_v31 = vor.u32 %v375_v19, %v372_v18  ;;  %v490_v33 = vshrl.u32 %v283_v15, 16  ;;  %v317_v17 = vld [vmem:[%s5409_s6 + $0xbc] sm:$0x1] }
  0x4a   : > { %4526 = vmatmul.msk.bf16.gmra.mxu2 %vm754_vm4, %v748_v16  ;;  %v734_v30 = vunpack.c.l.b16 %v670_v22  ;;  %v735_v34 = vunpack.c.l.b16 %v680_v29  ;;  %v386_v35 = vor.u32 %v385_v24, %v381_v23  ;;  %v493_v37 = vshll.u32 %v283_v15, 16 }
  0x4b   : > { %v499_v38 = vshll.u32 %v5539_v21, 16  ;;  %v377_v40 = vrot.slane %v376_v31, 4  ;;  %v492_v41 = vrot.slane %v490_v33, 4  ;;  %v503_v42 = vshrl.u32 %v5539_v21, 16 }
  0x4c   : > { %v509_v43 = vshll.u32 %v5544_v27, 16  ;;  %v752_v44 = vpack.c.b16 %v735_v34, %v734_v30  ;;  %v387_v45 = vrot.slane %v386_v35, 4  ;;  %v495_v46 = vrot.slane %v493_v37, 5  ;;  %v275_v37 = vld [vmem:[%s5409_s6 + $0x24] sm:$0xf] }
  0x4d   : > { %v501_v48 = vrot.slane %v499_v38, 5  ;;  %v382_v50 = vsel %vm5421_vm3, %v377_v40, %v381_v23  ;;  %v505_v51 = vrot.slane %v503_v42, 4  ;;  %v586_v54 = vshrl.u32 %v291_v39, 16  ;;  %v5572_v42 = vld [vmem:[%s5409_s6 + $0x28] sm:$0xf] }
  0x4e   : > { %v511_v52 = vrot.slane %v509_v43, 5  ;;  %4530 = vmatmul.msk.bf16.gmra.mxu3 %vm754_vm4, %v752_v44  ;;  %v392_v55 = vsel %vm5421_vm3, %v387_v45, %v391_v26  ;;  %v710_v57 = vunpack.c.l.b16 %v382_v50  ;;  %v496_v58 = vor.u32 %v495_v46, %v492_v41 }
  0x4f   : > { %v589_v59 = vshll.u32 %v291_v39, 16  ;;  %v711_v60 = vunpack.c.l.b16 %v392_v55  ;;  %v506_v61 = vor.u32 %v505_v51, %v501_v48  ;;  %v588_v62 = vrot.slane %v586_v54, 4 }
  0x50   : > { %v595_v3 = vshll.u32 %v292_v49, 16  ;;  %v497_v4 = vrot.slane %v496_v58, 4  ;;  %v599_v6 = vshrl.u32 %v292_v49, 16  ;;  %v605_v7 = vshll.u32 %v313_v53, 16 }
  0x51   : > { %v591_v5 = vrot.slane %v589_v59, 5  ;;  %v740_v9 = vpack.c.b16 %v711_v60, %v710_v57  ;;  %v507_v10 = vrot.slane %v506_v61, 4  ;;  %v682_v22 = vshrl.u32 %v299_v8, 16  ;;  %v1116_v61 = vld [vmem:[%s5409_s6] sm:$0xe] }
  0x52   : > { %v597_v11 = vrot.slane %v595_v3, 5  ;;  %v502_v13 = vsel %vm5421_vm3, %v497_v4, %v501_v48  ;;  %v601_v15 = vrot.slane %v599_v6, 4  ;;  %v607_v16 = vrot.slane %v605_v7, 5  ;;  %v5576_v48 = vld [vmem:[%s5409_s6 + $0x2c] sm:$0x1] }
  0x53   : > { %v592_v14 = vor.u32 %v591_v5, %v588_v62  ;;  %4518 = vmatmul.msk.bf16.gmra.mxu0 %vm754_vm4, %v740_v9  ;;  %v512_v18 = vsel %vm5421_vm3, %v507_v10, %v511_v52  ;;  %v720_v19 = vunpack.c.l.b16 %v502_v13  ;;  %v685_v23 = vshll.u32 %v299_v8, 16  ;;  %v4756_v6 = vld [vmem:[%s5409_s6 + $0xc] sm:$0xf] }
  0x54   : > { %v721_v24 = vunpack.c.l.b16 %v512_v18  ;;  %v602_v29 = vor.u32 %v601_v15, %v597_v11  ;;  %v691_v30 = vshll.u32 %v300_v12, 16  ;;  %v684_v31 = vrot.slane %v682_v22, 4 }
  0x55   : > { %v593_v26 = vrot.slane %v592_v14, 4  ;;  %v687_v33 = vrot.slane %v685_v23, 5  ;;  %v695_v34 = vshrl.u32 %v300_v12, 16  ;;  %v701_v35 = vshll.u32 %v317_v17, 16  ;;  %v4757_v12 = vld [vmem:[%s5409_s6 + $0x10] sm:$0xf] }
  0x56   : > { %v745_v38 = vpack.c.b16 %v721_v24, %v720_v19  ;;  %v603_v40 = vrot.slane %v602_v29, 4  ;;  %v693_v41 = vrot.slane %v691_v30, 5  ;;  %v1172_v43 = vrot.slane %v5437_v2, 5 }
  0x57   : > { %v598_v39 = vsel %vm5421_vm3, %v593_v26, %v597_v11  ;;  %v688_v45 = vor.u32 %v687_v33, %v684_v31  ;;  %v697_v46 = vrot.slane %v695_v34, 4  ;;  %v703_v50 = vrot.slane %v701_v35, 5  ;;  %v2869_v11 = vld [vmem:[%s6733_s1 + $0x18] sm:$0xf] }
  0x58   : > { %v728_v44 = vunpack.c.l.b16 %v598_v39  ;;  %4523 = vmatmul.msk.bf16.gmra.mxu1 %vm754_vm4, %v745_v38  ;;  %v608_v49 = vsel %vm5421_vm3, %v603_v40, %v607_v16  ;;  %v394_v51 = vshrl.u32 %v275_v37, 16  ;;  %v397_v52 = vshll.u32 %v275_v37, 16  ;;  %v4758_v38 = vld [vmem:[%s5409_s6 + $0x14] sm:$0x1] }
  0x59   : > { %v729_v53 = vunpack.c.l.b16 %v608_v49  ;;  %v689_v54 = vrot.slane %v688_v45, 4  ;;  %v698_v55 = vor.u32 %v697_v46, %v693_v41  ;;  %v403_v2 = vshll.u32 %v5572_v42, 16  ;;  %v3554_v45 = vld [vmem:[%s6733_s1 + $0x1c] sm:$0xf] }
  0x5a   : > { %v396_v57 = vrot.slane %v394_v51, 4  ;;  %v399_v58 = vrot.slane %v397_v52, 5  ;;  %v407_v59 = vshrl.u32 %v5572_v42, 16  ;;  %v413_v60 = vshll.u32 %v5576_v48, 16  ;;  %v5095_v51 = vld [vmem:[%s5409_s6] sm:$0xff] }
  0x5b   : > { %v749_v62 = vpack.c.b16 %v729_v53, %v728_v44  ;;  %v694_v3 = vsel %vm5421_vm3, %v689_v54, %v693_v41  ;;  %v699_v4 = vrot.slane %v698_v55, 4  ;;  %v405_v5 = vrot.slane %v403_v2, 5  ;;  %v3951_v2 = vld [vmem:[%s6733_s1 + $0x20] sm:$0xf] }
  0x5c   : > { %v736_v7 = vunpack.c.l.b16 %v694_v3  ;;  %v400_v8 = vor.u32 %v399_v58, %v396_v57  ;;  %v409_v9 = vrot.slane %v407_v59, 4  ;;  %v415_v10 = vrot.slane %v413_v60, 5 }
  0x5d   : > { %4527 = vmatmul.msk.bf16.gmra.mxu2 %vm754_vm4, %v749_v62  ;;  %v704_v13 = vsel %vm5421_vm3, %v699_v4, %v703_v50  ;;  %v4612_v14 = vrot.slane %v1116_v61, 9  ;;  %v1169_v19 = vrot.slane %v5434_v1, 5  ;;  %v2999_v22 = vsel %vm803_vm0, %v2869_v11, 0  ;;  %v2615_v50 = vld [vmem:[%s6733_s1 + $0x14] sm:$0xf] }
  0x5e   : > { %v737_v15 = vunpack.c.l.b16 %v704_v13  ;;  %v401_v16 = vrot.slane %v400_v8, 4  ;;  %v410_v17 = vor.u32 %v409_v9, %v405_v5  ;;  %v1835_v23 = vshrl.u32 %v4756_v6, 16  ;;  %3008 = vmatpush.bf16.msra.mxu2 %v2999_v22  ;;  %v1117_v8 = vld [vmem:[%s5409_s6 + $0xc] sm:$0xe] }
  0x5f   : > { %v1838_v24 = vshll.u32 %v4756_v6, 16  ;;  %v1844_v26 = vshll.u32 %v4757_v12, 16  ;;  %v1170_v33 = vsel %vm5595_vm7, %v4612_v14, %v1169_v19  ;;  %v1171_v35 = vrot.slane %v1169_v19, 4  ;;  %v4760_v6 = vld [vmem:[%s5409_s6 + $0x1c] sm:$0xf] }
  0x60   : > { %v753_v29 = vpack.c.b16 %v737_v15, %v736_v7  ;;  %v406_v30 = vsel %vm5421_vm3, %v401_v16, %v405_v5  ;;  %v411_v31 = vrot.slane %v410_v17, 4  ;;  %v1280_v37 = vunpack.c.l.b16 %v1170_v33  ;;  %v4759_v5 = vld [vmem:[%s5409_s6 + $0x18] sm:$0xf]  ;;  %v5111_v15 = vld [vmem:[%s5409_s6 + $0xc] sm:$0xff] }
  0x61   : > { %v712_v34 = vunpack.c.l.b16 %v406_v30  ;;  %v1837_v1 = vrot.slane %v1835_v23, 4  ;;  %v1840_v40 = vrot.slane %v1838_v24, 5  ;;  %v1846_v41 = vrot.slane %v1844_v26, 5  ;;  %v4761_v30 = vld [vmem:[%s5409_s6 + $0x20] sm:$0x1] }
  0x62   : > { %4531 = vmatmul.msk.bf16.gmra.mxu3 %vm754_vm4, %v753_v29  ;;  %v416_v39 = vsel %vm5421_vm3, %v411_v31, %v415_v10  ;;  %v1848_v44 = vshrl.u32 %v4757_v12, 16  ;;  %v1173_v49 = vsel %vm5595_vm7, %v1171_v35, %v1172_v43  ;;  %v1854_v55 = vshll.u32 %v4758_v38, 16  ;;  %v5096_v35 = vld [vmem:[%s5409_s6 + $0xc] sm:$0xff] }
  0x63   : > { %v713_v46 = vunpack.c.l.b16 %v416_v39  ;;  %v1281_v52 = vunpack.c.l.b16 %v1173_v49  ;;  %v1841_v53 = vor.u32 %v1840_v40, %v1837_v1  ;;  %v3652_v58 = vsel %vm803_vm0, %v3554_v45, 0 }
  0x64   : > { %v1850_v54 = vrot.slane %v1848_v44, 4  ;;  %3661 = vmatpush.bf16.msra.mxu3 %v3652_v58  ;;  %v2713_v60 = vsel %vm803_vm0, %v2615_v50, 0  ;;  %v4049_v61 = vsel %vm803_vm0, %v3951_v2, 0  ;;  %v1856_v4 = vrot.slane %v1854_v55, 5  ;;  %v1118_v50 = vld [vmem:[%s5409_s6 + $0x18] sm:$0xe] }
  0x65   : > { %v741_v57 = vpack.c.b16 %v713_v46, %v712_v34  ;;  %v1312_v43 = vpack.c.b16 %v1281_v52, %v1280_v37  ;;  %2722 = vmatpush.bf16.msra.mxu1 %v2713_v60  ;;  %v1842_v62 = vrot.slane %v1841_v53, 4  ;;  %4058 = vmatpush.bf16.msra.mxu0 %v4049_v61  ;;  %v1176_v7 = vrot.slane %v5480_v28, 5  ;;  %v4763_v46 = vld [vmem:[%s5409_s6 + $0x28] sm:$0xf] }
  0x66   : > { %v1851_v59 = vor.u32 %v1850_v54, %v1846_v41  ;;  %v1859_v9 = vshrl.u32 %v4759_v5, 16  ;;  %v1862_v10 = vshll.u32 %v4759_v5, 16  ;;  %v1868_v13 = vshll.u32 %v4760_v6, 16 }
  0x67   : > { %4519 = vmatmul.msk.bf16.gmra.mxu0 %vm754_vm4, %v741_v57  ;;  %v1847_v11 = vsel %vm5421_vm3, %v1842_v62, %v1846_v41  ;;  %v1872_v14 = vshrl.u32 %v4760_v6, 16  ;;  %v4613_v16 = vrot.slane %v1117_v8, 9  ;;  %v1178_v17 = vrot.slane %v1176_v7, 4  ;;  %v4762_v41 = vld [vmem:[%s5409_s6 + $0x24] sm:$0xf] }
  0x68   : > { %4596 = vmatmul.msk.bf16.vlgmr.msrb.gmra.mxu1 %vm754_vm4, %v5095_v51  ;;  %v1852_v3 = vrot.slane %v1851_v59, 4  ;;  %v1179_v28 = vrot.slane %v5483_v32, 5  ;;  %v2219_v19 = vunpack.c.l.b16 %v1847_v11  ;;  %v1861_v23 = vrot.slane %v1859_v9, 4  ;;  %v4764_v6 = vld [vmem:[%s5409_s6 + $0x2c] sm:$0x1] }
  0x69   : > { %v1864_v24 = vrot.slane %v1862_v10, 5  ;;  %v1870_v26 = vrot.slane %v1868_v13, 5  ;;  %v1874_v29 = vrot.slane %v1872_v14, 4  ;;  %v1177_v31 = vsel %vm5595_vm7, %v4613_v16, %v1176_v7 }
  0x6a   : > { %v1857_v12 = vsel %vm5421_vm3, %v1852_v3, %v1856_v4  ;;  %v1180_v33 = vsel %vm5595_vm7, %v1178_v17, %v1179_v28  ;;  %v1878_v38 = vshll.u32 %v4761_v30, 16  ;;  %v1282_v1 = vunpack.c.l.b16 %v1177_v31 }
  0x6b   : > { %v2220_v22 = vunpack.c.l.b16 %v1857_v12  ;;  %v1865_v32 = vor.u32 %v1864_v24, %v1861_v23  ;;  %v1875_v37 = vor.u32 %v1874_v29, %v1870_v26  ;;  %v1283_v39 = vunpack.c.l.b16 %v1180_v33  ;;  %v5097_v12 = vld [vmem:[%s5409_s6 + $0x18] sm:$0xff]  ;;  %v1119_v29 = vld [vmem:[%s5409_s6 + $0x24] sm:$0xe] }
  0x6c   : > { %v1880_v45 = vrot.slane %v1878_v38, 5  ;;  %v1183_v51 = vrot.slane %v5526_v63, 5  ;;  %v1883_v52 = vshrl.u32 %v4762_v41, 16  ;;  %v1886_v54 = vshll.u32 %v4762_v41, 16 }
  0x6d   : > { %4628 = vmatmul.msk.bf16.vlgmr.msrb.gmra.mxu2 %vm754_vm4, %v1312_v43  ;;  %v2251_v34 = vpack.c.b16 %v2220_v22, %v2219_v19  ;;  %v1866_v40 = vrot.slane %v1865_v32, 4  ;;  %v1876_v44 = vrot.slane %v1875_v37, 4  ;;  %v1313_v49 = vpack.c.b16 %v1283_v39, %v1282_v1  ;;  %v5112_v43 = vld [vmem:[%s5409_s6 + $0x18] sm:$0xff]  ;;  %v4765_v19 = vld [vmem:[%s5409_s6 + $0x30] sm:$0xf]  ;;  %v5113_v32 = vld [vmem:[%s5409_s6 + $0x24] sm:$0xff] }
  0x6e   : > { %v1892_v55 = vshll.u32 %v4763_v46, 16  ;;  %v1896_v2 = vshrl.u32 %v4763_v46, 16  ;;  %v4614_v58 = vrot.slane %v1118_v50, 9  ;;  %v1185_v60 = vrot.slane %v1183_v51, 4  ;;  %v4766_v22 = vld [vmem:[%s5409_s6 + $0x34] sm:$0xf] }
  0x6f   : > { %v1871_v53 = vsel %vm5421_vm3, %v1866_v40, %v1870_v26  ;;  %v1881_v57 = vsel %vm5421_vm3, %v1876_v44, %v1880_v45  ;;  %v1186_v63 = vrot.slane %v5529_v0, 5  ;;  %v1885_v61 = vrot.slane %v1883_v52, 4  ;;  %v4767_v45 = vld [vmem:[%s5409_s6 + $0x38] sm:$0x1] }
  0x70   : > { %v2221_v59 = vunpack.c.l.b16 %v1871_v53  ;;  %v2222_v62 = vunpack.c.l.b16 %v1881_v57  ;;  %v1888_v3 = vrot.slane %v1886_v54, 5  ;;  %v1894_v4 = vrot.slane %v1892_v55, 5  ;;  %v4769_v57 = vld [vmem:[%s5409_s6 + $0x40] sm:$0xf] }
  0x71   : > { %v1898_v5 = vrot.slane %v1896_v2, 4  ;;  %v1184_v7 = vsel %vm5595_vm7, %v4614_v58, %v1183_v51  ;;  %v1187_v8 = vsel %vm5595_vm7, %v1185_v60, %v1186_v63  ;;  %v1902_v0 = vshll.u32 %v4764_v6, 16  ;;  %v4768_v2 = vld [vmem:[%s5409_s6 + $0x3c] sm:$0xf]  ;;  %v5266_v63 = vld [vmem:[%s5409_s6 + $0x34] sm:$0xf] }
  0x72   : > { %4740 = vmatmul.msk.bf16.vlgmr.msrb.gmra.mxu3 %vm754_vm4, %v5111_v15  ;;  %v2252_v9 = vpack.c.b16 %v2222_v62, %v2221_v59  ;;  %v1889_v10 = vor.u32 %v1888_v3, %v1885_v61  ;;  %v1284_v13 = vunpack.c.l.b16 %v1184_v7  ;;  %v1285_v14 = vunpack.c.l.b16 %v1187_v8  ;;  %v1120_v62 = vld [vmem:[%s5409_s6 + $0x30] sm:$0xe] }
  0x73   : > { %v1899_v11 = vor.u32 %v1898_v5, %v1894_v4  ;;  %v1904_v17 = vrot.slane %v1902_v0, 5  ;;  %v1190_v23 = vrot.slane %v5572_v42, 5  ;;  %v1907_v30 = vshrl.u32 %v4765_v19, 16  ;;  %v5267_v0 = vld [vmem:[%s5409_s6 + $0x38] sm:$0x1] }
  0x74   : > { %v1890_v15 = vrot.slane %v1889_v10, 4  ;;  %v1314_v28 = vpack.c.b16 %v1285_v14, %v1284_v13  ;;  %v1910_v31 = vshll.u32 %v4765_v19, 16  ;;  %v1916_v33 = vshll.u32 %v4766_v22, 16  ;;  %v5114_v13 = vld [vmem:[%s5409_s6 + $0x30] sm:$0xff] }
  0x75   : > { %v1900_v16 = vrot.slane %v1899_v11, 4  ;;  %v1192_v37 = vrot.slane %v1190_v23, 4  ;;  %v1193_v42 = vrot.slane %v5576_v48, 5  ;;  %v1909_v39 = vrot.slane %v1907_v30, 4  ;;  %v5098_v48 = vld [vmem:[%s5409_s6 + $0x24] sm:$0xff] }
  0x76   : > { %v1895_v24 = vsel %vm5421_vm3, %v1890_v15, %v1894_v4  ;;  %v1912_v40 = vrot.slane %v1910_v31, 5  ;;  %v1918_v41 = vrot.slane %v1916_v33, 5  ;;  %v1926_v53 = vshll.u32 %v4767_v45, 16  ;;  %v5099_v33 = vld [vmem:[%s5409_s6 + $0x30] sm:$0xff] }
  0x77   : > { %4804 = vmatmul.msk.bf16.vlgmr.msrb.gmra.mxu0 %vm754_vm4, %v2251_v34  ;;  %v1905_v26 = vsel %vm5421_vm3, %v1900_v16, %v1904_v17  ;;  %v1920_v34 = vshrl.u32 %v4766_v22, 16  ;;  %v2223_v38 = vunpack.c.l.b16 %v1895_v24  ;;  %v1197_v61 = vrot.slane %v5266_v63, 5  ;;  %v4770_v22 = vld [vmem:[%s5409_s6 + $0x44] sm:$0x1] }
  0x78   : > { %4597 = vmatmul.msk.bf16.gmra.mxu1 %vm754_vm4, %v5096_v35  ;;  %v4615_v35 = vrot.slane %v1119_v29, 9  ;;  %v2224_v1 = vunpack.c.l.b16 %v1905_v26  ;;  %v1913_v51 = vor.u32 %v1912_v40, %v1909_v39  ;;  %v1928_v59 = vrot.slane %v1926_v53, 5  ;;  %v4771_v39 = vld [vmem:[%s5409_s6 + $0x48] sm:$0xf]  ;;  %v4772_v40 = vld [vmem:[%s5409_s6 + $0x4c] sm:$0xf] }
  0x79   : > { %v1922_v44 = vrot.slane %v1920_v34, 4  ;;  %v1931_v3 = vshrl.u32 %v4768_v2, 16  ;;  %v1934_v4 = vshll.u32 %v4768_v2, 16  ;;  %v1940_v5 = vshll.u32 %v4769_v57, 16  ;;  %v5115_v2 = vld [vmem:[%s5409_s6 + $0x3c] sm:$0xff] }
  0x7a   : > { %v1191_v46 = vsel %vm5595_vm7, %v4615_v35, %v1190_v23  ;;  %v2253_v50 = vpack.c.b16 %v2224_v1, %v2223_v38  ;;  %v1914_v58 = vrot.slane %v1913_v51, 4  ;;  %v1944_v6 = vshrl.u32 %v4769_v57, 16 }
  0x7b   : > { %v1923_v52 = vor.u32 %v1922_v44, %v1918_v41  ;;  %v1286_v54 = vunpack.c.l.b16 %v1191_v46  ;;  %v4616_v10 = vrot.slane %v1120_v62, 9  ;;  %v1199_v11 = vrot.slane %v1197_v61, 4 }
  0x7c   : > { %v1919_v8 = vsel %vm5421_vm3, %v1914_v58, %v1918_v41  ;;  %v1933_v14 = vrot.slane %v1931_v3, 4  ;;  %v1936_v15 = vrot.slane %v1934_v4, 5  ;;  %v1942_v16 = vrot.slane %v1940_v5, 5  ;;  %v4773_v4 = vld [vmem:[%s5409_s6 + $0x50] sm:$0x1] }
  0x7d   : > { %4629 = vmatmul.msk.bf16.gmra.mxu2 %vm754_vm4, %v1313_v49  ;;  %v1194_v49 = vsel %vm5595_vm7, %v1192_v37, %v1193_v42  ;;  %v1946_v17 = vrot.slane %v1944_v6, 4  ;;  %v1198_v23 = vsel %vm5595_vm7, %v4616_v10, %v1197_v61  ;;  %v1950_v30 = vshll.u32 %v4770_v22, 16 }
  0x7e   : > { %v1287_v55 = vunpack.c.l.b16 %v1194_v49  ;;  %v1937_v26 = vor.u32 %v1936_v15, %v1933_v14  ;;  %v1955_v51 = vshrl.u32 %v4771_v39, 16  ;;  %v1964_v53 = vshll.u32 %v4772_v40, 16 }
  0x7f   : > { %v1947_v29 = vor.u32 %v1946_v17, %v1942_v16  ;;  %v1952_v1 = vrot.slane %v1950_v30, 5 }
  0x80   : > { %v1315_v60 = vpack.c.b16 %v1287_v55, %v1286_v54  ;;  %v1938_v42 = vrot.slane %v1937_v26, 4  ;;  %v1968_v54 = vshrl.u32 %v4772_v40, 16  ;;  %v1966_v62 = vrot.slane %v1964_v53, 5 }
  0x81   : > { %v1948_v38 = vrot.slane %v1947_v29, 4  ;;  %v1211_v26 = vrot.slane %v5493_v47, 5 }
  0x82   : > { %4741 = vmatmul.msk.bf16.gmra.mxu3 %vm754_vm4, %v5112_v43  ;;  %v1924_v43 = vrot.slane %v1923_v52, 4  ;;  %v1943_v45 = vsel %vm5421_vm3, %v1938_v42, %v1942_v16  ;;  %v1958_v52 = vshll.u32 %v4771_v39, 16  ;;  %v1970_v3 = vrot.slane %v1968_v54, 4  ;;  %v4776_v54 = vld [vmem:[%s5409_s6 + $0x5c] sm:$0x1] }
  0x83   : > { %v1953_v46 = vsel %vm5421_vm3, %v1948_v38, %v1952_v1  ;;  %v2227_v55 = vunpack.c.l.b16 %v1943_v45  ;;  %v5116_v1 = vld [vmem:[%s5409_s6 + $0x48] sm:$0xff]  ;;  %v1213_v40 = vrot.slane %v1211_v26, 4 }
  0x84   : > { %v2228_v57 = vunpack.c.l.b16 %v1953_v46  ;;  %v1960_v61 = vrot.slane %v1958_v52, 5  ;;  %v1971_v10 = vor.u32 %v1970_v3, %v1966_v62 }
  0x86   : > { %v1972_v16 = vrot.slane %v1971_v10, 4 }
  0x87   : > { %4805 = vmatmul.msk.bf16.gmra.mxu0 %vm754_vm4, %v2252_v9  ;;  %v1929_v9 = vsel %vm5421_vm3, %v1924_v43, %v1928_v59 }
  0x88   : > { %4598 = vmatmul.msk.bf16.gmra.mxu1 %vm754_vm4, %v5097_v12  ;;  %v1200_v12 = vrot.slane %v5267_v0, 5  ;;  %v2226_v19 = vunpack.c.l.b16 %v1929_v9 }
  0x8a   : > { %v1201_v24 = vsel %vm5595_vm7, %v1199_v11, %v1200_v12  ;;  %v1974_v11 = vshll.u32 %v4773_v4, 16  ;;  %v5100_v12 = vld [vmem:[%s5409_s6 + $0x3c] sm:$0xff] }
  0x8b   : > { %v1289_v35 = vunpack.c.l.b16 %v1201_v24  ;;  %v4775_v24 = vld [vmem:[%s5409_s6 + $0x58] sm:$0xf]  ;;  %v4777_v4 = vld [vmem:[%s5409_s6 + $0x60] sm:$0xf] }
  0x8c   : > { %v1976_v17 = vrot.slane %v1974_v11, 5  ;;  %v1992_v42 = vshrl.u32 %v4775_v24, 16 }
  0x8d   : > { %4630 = vmatmul.msk.bf16.gmra.mxu2 %vm754_vm4, %v1314_v28  ;;  %v2225_v28 = vunpack.c.l.b16 %v1919_v8  ;;  %v2255_v8 = vpack.c.b16 %v2228_v57, %v2227_v55 }
  0x8e   : > { %v1977_v30 = vsel %vm5421_vm3, %v1972_v16, %v1976_v17  ;;  %v1994_v52 = vrot.slane %v1992_v42, 4 }
  0x8f   : > { %v2254_v31 = vpack.c.b16 %v2226_v19, %v2225_v28  ;;  %v2230_v46 = vunpack.c.l.b16 %v1977_v30 }
  0x92   : > { %4742 = vmatmul.msk.bf16.gmra.mxu3 %vm754_vm4, %v5113_v32  ;;  %v1288_v32 = vunpack.c.l.b16 %v1198_v23  ;;  %v4774_v23 = vld [vmem:[%s5409_s6 + $0x54] sm:$0xf] }
  0x94   : > { %v1316_v44 = vpack.c.b16 %v1289_v35, %v1288_v32  ;;  %v1982_v32 = vshll.u32 %v4774_v23, 16  ;;  %v1988_v35 = vshll.u32 %v4775_v24, 16 }
  0x97   : > { %4806 = vmatmul.msk.bf16.gmra.mxu0 %vm754_vm4, %v2253_v50  ;;  %v1204_v50 = vrot.slane %v5449_v20, 5  ;;  %v1957_v20 = vrot.slane %v1955_v51, 4  ;;  %v1990_v51 = vrot.slane %v1988_v35, 5  ;;  %v1221_v35 = vrot.slane %v5544_v27, 5 }
  0x98   : > { %4599 = vmatmul.msk.bf16.gmra.mxu1 %vm754_vm4, %v5098_v48  ;;  %v1121_v48 = vld [vmem:[%s5409_s6 + $0x3c] sm:$0xe] }
  0x99   : > { %v4617_v43 = vrot.slane %v1121_v48, 9  ;;  %v1206_v59 = vrot.slane %v1204_v50, 4  ;;  %v1984_v48 = vrot.slane %v1982_v32, 5 }
  0x9b   : > { %v1205_v5 = vsel %vm5595_vm7, %v4617_v43, %v1204_v50  ;;  %v5101_v43 = vld [vmem:[%s5409_s6 + $0x48] sm:$0xff] }
  0x9d   : > { %v5690_v7 = vpop.f32.mrf.mxu1  ;;  %4631 = vmatmul.msk.bf16.gmra.mxu2 %vm754_vm4, %v1315_v60  ;;  %v1207_v60 = vrot.slane %v5454_v25, 5  ;;  %v1961_v25 = vor.u32 %v1960_v61, %v1957_v20  ;;  %v1998_v20 = vshll.u32 %v4776_v54, 16  ;;  %v5102_v54 = vld [vmem:[%s5409_s6 + $0x54] sm:$0xff] }
  0x9f   : > { %v1208_v6 = vsel %vm5595_vm7, %v1206_v59, %v1207_v60  ;;  %v1962_v15 = vrot.slane %v1961_v25, 4  ;;  %v1995_v60 = vor.u32 %v1994_v52, %v1990_v51  ;;  %v2000_v10 = vrot.slane %v1998_v20, 5 }
  0xa0   : > { %v1291_v14 = vunpack.c.l.b16 %v1208_v6 }
  0xa1   : > { %v1967_v29 = vsel %vm5421_vm3, %v1962_v15, %v1966_v62  ;;  %v1996_v25 = vrot.slane %v1995_v60, 4  ;;  %v1218_v15 = vrot.slane %v5539_v21, 5 }
  0xa2   : > { %4743 = vmatmul.msk.bf16.gmra.mxu3 %vm754_vm4, %v5114_v13  ;;  %v1290_v13 = vunpack.c.l.b16 %v1205_v5  ;;  %v2229_v45 = vunpack.c.l.b16 %v1967_v29  ;;  %v4778_v5 = vld [vmem:[%s5409_s6 + $0x64] sm:$0xf] }
  0xa3   : > { %v2016_v16 = vshrl.u32 %v4778_v5, 16  ;;  %v2001_v24 = vsel %vm5421_vm3, %v1996_v25, %v2000_v10  ;;  %v1220_v32 = vrot.slane %v1218_v15, 4  ;;  %v5268_v10 = vld [vmem:[%s5409_s6 + $0x64] sm:$0xf] }
  0xa4   : > { %v1317_v19 = vpack.c.b16 %v1291_v14, %v1290_v13  ;;  %v2256_v57 = vpack.c.b16 %v2230_v46, %v2229_v45  ;;  %v2006_v13 = vshll.u32 %v4777_v4, 16  ;;  %v2012_v14 = vshll.u32 %v4778_v5, 16 }
  0xa5   : > { %v5706_v34 = vpop.f32.mrf.mxu1  ;;  %v2018_v42 = vrot.slane %v2016_v16, 4 }
  0xa6   : > { %v2008_v30 = vrot.slane %v2006_v13, 5  ;;  %v1124_v13 = vld [vmem:[%s5409_s6 + $0x60] sm:$0xe] }
  0xa7   : > { %v5708_v37 = vpop.f32.mrf.mxu2  ;;  %4807 = vmatmul.msk.bf16.gmra.mxu0 %vm754_vm4, %v2254_v31  ;;  %v1122_v31 = vld [vmem:[%s5409_s6 + $0x48] sm:$0xe] }
  0xa8   : > { %4600 = vmatmul.msk.bf16.gmra.mxu1 %vm754_vm4, %v5099_v33  ;;  %v1979_v33 = vshrl.u32 %v4774_v23, 16  ;;  %v4618_v47 = vrot.slane %v1122_v31, 9  ;;  %v2014_v31 = vrot.slane %v2012_v14, 5 }
  0xaa   : > { %v5714_v41 = vpop.f32.mrf.mxu0  ;;  %v1981_v50 = vrot.slane %v1979_v33, 4  ;;  %v5117_v33 = vld [vmem:[%s5409_s6 + $0x54] sm:$0xff]  ;;  %v2019_v27 = vor.u32 %v2018_v42, %v2014_v31 }
  0xab   : > { %v5720_v49 = vpop.f32.mrf.mxu3 }
  0xac   : > { %v1985_v59 = vor.u32 %v1984_v48, %v1981_v50  ;;  %v1222_v48 = vsel %vm5595_vm7, %v1220_v32, %v1221_v35  ;;  %v2020_v60 = vrot.slane %v2019_v27, 4 }
  0xad   : > { %4632 = vmatmul.msk.bf16.gmra.mxu2 %vm754_vm4, %v1316_v44  ;;  %v1214_v44 = vrot.slane %v5498_v56, 5 }
  0xaf   : > { %v5726_v58 = vpop.f32.mrf.mxu1  ;;  %v5729_v63 = vpop.f32.mrf.mxu2  ;;  %v1215_v56 = vsel %vm5595_vm7, %v1213_v40, %v1214_v44  ;;  %v4779_v40 = vld [vmem:[%s5409_s6 + $0x68] sm:$0x1] }
  0xb0   : > { %v1293_v62 = vunpack.c.l.b16 %v1215_v56 }
  0xb2   : > { %4744 = vmatmul.msk.bf16.gmra.mxu3 %vm754_vm4, %v5115_v2  ;;  %v5737_v9 = vpop.f32.mrf.mxu0  ;;  %v1212_v2 = vsel %vm5595_vm7, %v4618_v47, %v1211_v26  ;;  %v2232_v47 = vunpack.c.l.b16 %v2001_v24 }
  0xb3   : > { %v5739_v0 = vpop.f32.mrf.mxu3  ;;  %v1292_v61 = vunpack.c.l.b16 %v1212_v2 }
  0xb5   : > { %v1318_v11 = vpack.c.b16 %v1293_v62, %v1292_v61  ;;  %v4780_v61 = vld [vmem:[%s5409_s6 + $0x6c] sm:$0xf]  ;;  %v4781_v62 = vld [vmem:[%s5409_s6 + $0x70] sm:$0xf] }
  0xb6   : > { %v2027_v14 = vshrl.u32 %v4780_v61, 16  ;;  %v2036_v16 = vshll.u32 %v4781_v62, 16 }
  0xb7   : > { %4808 = vmatmul.msk.bf16.gmra.mxu0 %vm754_vm4, %v2255_v8  ;;  %v5743_v28 = vpop.f32.mrf.mxu1  ;;  %v1986_v8 = vrot.slane %v1985_v59, 4 }
  0xb8   : > { %4601 = vmatmul.msk.bf16.gmra.mxu1 %vm754_vm4, %v5100_v12  ;;  %v2003_v12 = vshrl.u32 %v4777_v4, 16  ;;  %v2029_v35 = vrot.slane %v2027_v14, 4  ;;  %v4784_v14 = vld [vmem:[%s5409_s6 + $0x7c] sm:$0xf] }
  0xb9   : > { %v1991_v23 = vsel %vm5421_vm3, %v1986_v8, %v1990_v51  ;;  %v2022_v51 = vshll.u32 %v4779_v40, 16 }
  0xba   : > { %v5746_v22 = vpop.f32.mrf.mxu2  ;;  %v2005_v29 = vrot.slane %v2003_v12, 4 }
  0xbb   : > { %v2024_v20 = vrot.slane %v2022_v51, 5 }
  0xbc   : > { %v2009_v46 = vor.u32 %v2008_v30, %v2005_v29  ;;  %v5118_v30 = vld [vmem:[%s5409_s6 + $0x60] sm:$0xff] }
  0xbd   : > { %4633 = vmatmul.msk.bf16.gmra.mxu2 %vm754_vm4, %v1317_v19  ;;  %v1123_v19 = vld [vmem:[%s5409_s6 + $0x54] sm:$0xe]  ;;  %v2025_v25 = vsel %vm5421_vm3, %v2020_v60, %v2024_v20 }
  0xbe   : > { %v5756_v38 = vpop.f32.mrf.mxu0  ;;  %v4619_v21 = vrot.slane %v1123_v19, 9  ;;  %v2010_v59 = vrot.slane %v2009_v46, 4  ;;  %v2040_v19 = vshrl.u32 %v4781_v62, 16  ;;  %v4782_v46 = vld [vmem:[%s5409_s6 + $0x74] sm:$0x1] }
  0xbf   : > { %v5760_v39 = vpop.f32.mrf.mxu3 }
  0xc0   : > { %v1219_v50 = vsel %vm5595_vm7, %v4619_v21, %v1218_v15  ;;  %v2015_v8 = vsel %vm5421_vm3, %v2010_v59, %v2014_v31  ;;  %v2030_v15 = vshll.u32 %v4780_v61, 16  ;;  %v4620_v21 = vrot.slane %v1124_v13, 9  ;;  %v4783_v13 = vld [vmem:[%s5409_s6 + $0x78] sm:$0xf] }
  0xc1   : > { %v5763_v53 = vpop.f32.mrf.mxu1  ;;  %v1294_v56 = vunpack.c.l.b16 %v1219_v50  ;;  %v2233_v31 = vunpack.c.l.b16 %v2015_v8 }
  0xc2   : > { %4745 = vmatmul.msk.bf16.gmra.mxu3 %vm754_vm4, %v5116_v1  ;;  %v5767_v55 = vpop.f32.mrf.mxu2  ;;  %v2231_v1 = vunpack.c.l.b16 %v1991_v23  ;;  %v5269_v23 = vld [vmem:[%s5409_s6 + $0x68] sm:$0x1]  ;;  %v2032_v42 = vrot.slane %v2030_v15, 5  ;;  %v5270_v15 = vld [vmem:[%s5409_s6 + $0x70] sm:$0xf] }
  0xc3   : > { %v1228_v24 = vrot.slane %v5269_v23, 5  ;;  %v1125_v23 = vld [vmem:[%s5409_s6 + $0x6c] sm:$0xe] }
  0xc4   : > { %v2257_v52 = vpack.c.b16 %v2232_v47, %v2231_v1  ;;  %v2038_v1 = vrot.slane %v2036_v16, 5  ;;  %v2042_v47 = vrot.slane %v2040_v19, 4  ;;  %v2033_v51 = vor.u32 %v2032_v42, %v2029_v35  ;;  %v5271_v42 = vld [vmem:[%s5409_s6 + $0x74] sm:$0x1] }
  0xc5   : > { %v1232_v16 = vrot.slane %v5270_v15, 5 }
  0xc6   : > { %v5774_v3 = vpop.f32.mrf.mxu0 }
  0xc7   : > { %4809 = vmatmul.msk.bf16.gmra.mxu0 %vm754_vm4, %v2256_v57  ;;  %v5779_v6 = vpop.f32.mrf.mxu3  ;;  %v1295_v57 = vunpack.c.l.b16 %v1222_v48 }
  0xc8   : > { %4602 = vmatmul.msk.bf16.gmra.mxu1 %vm754_vm4, %v5101_v43 }
  0xc9   : > { %v5783_v17 = vpop.f32.mrf.mxu1  ;;  %v1319_v4 = vpack.c.b16 %v1295_v57, %v1294_v56  ;;  %v5103_v57 = vld [vmem:[%s5409_s6 + $0x60] sm:$0xff] }
  0xcd   : > { %v5790_v26 = vpop.f32.mrf.mxu2  ;;  %4634 = vmatmul.msk.bf16.gmra.mxu2 %vm754_vm4, %v1318_v11  ;;  %v1225_v11 = vrot.slane %v5268_v10, 5 }
  0xcf   : > { %v1227_v32 = vrot.slane %v1225_v11, 4  ;;  %v1226_v50 = vsel %vm5595_vm7, %v4620_v21, %v1225_v11  ;;  %v2064_v21 = vshrl.u32 %v4784_v14, 16 }
  0xd0   : > { %v5796_v44 = vpop.f32.mrf.mxu0  ;;  %v1296_v20 = vunpack.c.l.b16 %v1226_v50  ;;  %v4621_v50 = vrot.slane %v1125_v23, 9 }
  0xd1   : > { %v5798_v45 = vpop.f32.mrf.mxu3  ;;  %v1229_v48 = vsel %vm5595_vm7, %v1227_v32, %v1228_v24 }
  0xd2   : > { %4746 = vmatmul.msk.bf16.gmra.mxu3 %vm754_vm4, %v5117_v33  ;;  %v2234_v33 = vunpack.c.l.b16 %v2025_v25  ;;  %v1297_v61 = vunpack.c.l.b16 %v1229_v48  ;;  %v1234_v48 = vrot.slane %v1232_v16, 4 }
  0xd4   : > { %v2258_v27 = vpack.c.b16 %v2234_v33, %v2233_v31  ;;  %v1320_v11 = vpack.c.b16 %v1297_v61, %v1296_v20  ;;  %v2054_v31 = vshll.u32 %v4783_v13, 16  ;;  %v2060_v33 = vshll.u32 %v4784_v14, 16 }
  0xd5   : > { %v5806_v2 = vpop.f32.mrf.mxu1  ;;  %v5808_v43 = vpop.f32.mrf.mxu2  ;;  %v2066_v20 = vrot.slane %v2064_v21, 4 }
  0xd7   : > { %4810 = vmatmul.msk.bf16.gmra.mxu0 %vm754_vm4, %v2257_v52  ;;  %v2043_v52 = vor.u32 %v2042_v47, %v2038_v1  ;;  %v1235_v47 = vrot.slane %v5271_v42, 5 }
  0xd8   : > { %4603 = vmatmul.msk.bf16.gmra.mxu1 %vm754_vm4, %v5102_v54  ;;  %v5814_v5 = vpop.f32.mrf.mxu0  ;;  %v2046_v54 = vshll.u32 %v4782_v46, 16  ;;  %v5119_v46 = vld [vmem:[%s5409_s6 + $0x6c] sm:$0xff] }
  0xd9   : > { %v5821_v12 = vpop.f32.mrf.mxu3  ;;  %v2044_v8 = vrot.slane %v2043_v52, 4 }
  0xda   : > { %v2048_v25 = vrot.slane %v2046_v54, 5 }
  0xdd   : > { %4635 = vmatmul.msk.bf16.gmra.mxu2 %vm754_vm4, %v1319_v4  ;;  %v5826_v29 = vpop.f32.mrf.mxu1  ;;  %v2034_v4 = vrot.slane %v2033_v51, 4 }
  0xdf   : > { %v2039_v19 = vsel %vm5421_vm3, %v2034_v4, %v2038_v1  ;;  %v4785_v4 = vld [vmem:[%s5409_s6 + $0x80] sm:$0x1] }
  0xe0   : > { %v5829_v40 = vpop.f32.mrf.mxu2 }
  0xe2   : > { %4747 = vmatmul.msk.bf16.gmra.mxu3 %vm754_vm4, %v5118_v30  ;;  %v2051_v30 = vshrl.u32 %v4783_v13, 16  ;;  %v5104_v13 = vld [vmem:[%s5409_s6 + $0x6c] sm:$0xff] }
  0xe4   : > { %v5837_v56 = vpop.f32.mrf.mxu0  ;;  %v2053_v54 = vrot.slane %v2051_v30, 4 }
  0xe5   : > { %v5840_v59 = vpop.f32.mrf.mxu3  ;;  %v1036_v60 = vpop.f32.mrf.mxu1 }
  0xe6   : > { %v1037_v62 = vadd.f32 %v1036_v60, %v5714_v41  ;;  %v2049_v41 = vsel %vm5421_vm3, %v2044_v8, %v2048_v25  ;;  %v2062_v60 = vrot.slane %v2060_v33, 5  ;;  %v1233_v8 = vsel %vm5595_vm7, %v4621_v50, %v1232_v16 }
  0xe7   : > { %4811 = vmatmul.msk.bf16.gmra.mxu0 %vm754_vm4, %v2258_v27  ;;  %v2235_v27 = vunpack.c.l.b16 %v2039_v19  ;;  %v2236_v51 = vunpack.c.l.b16 %v2049_v41  ;;  %v2070_v19 = vshll.u32 %v4785_v4, 16 }
  0xe8   : > { %v5844_v10 = vpop.f32.mrf.mxu2  ;;  %4604 = vmatmul.msk.bf16.gmra.mxu1 %vm754_vm4, %v5103_v57  ;;  %v2056_v57 = vrot.slane %v2054_v31, 5  ;;  %v2067_v15 = vor.u32 %v2066_v20, %v2062_v60 }
  0xe9   : > { %v2259_v25 = vpack.c.b16 %v2236_v51, %v2235_v27  ;;  %v2072_v42 = vrot.slane %v2070_v19, 5  ;;  %v4787_v27 = vld [vmem:[%s5409_s6 + $0x88] sm:$0xf]  ;;  %v5272_v51 = vld [vmem:[%s5409_s6 + $0x7c] sm:$0xf] }
  0xea   : > { %v2057_v14 = vor.u32 %v2056_v57, %v2053_v54  ;;  %v1126_v54 = vld [vmem:[%s5409_s6 + $0x78] sm:$0xe] }
  0xec   : > { %v5855_v24 = vpop.f32.mrf.mxu0  ;;  %v2058_v21 = vrot.slane %v2057_v14, 4 }
  0xed   : > { %v5857_v32 = vpop.f32.mrf.mxu3  ;;  %4636 = vmatmul.msk.bf16.gmra.mxu2 %vm754_vm4, %v1320_v11  ;;  %v1038_v35 = vpop.f32.mrf.mxu1 }
  0xee   : > { %v1039_v1 = vadd.f32 %v1038_v35, %v5737_v9  ;;  %v1236_v9 = vsel %vm5595_vm7, %v1234_v48, %v1235_v47  ;;  %v2068_v35 = vrot.slane %v2067_v15, 4  ;;  %v4786_v47 = vld [vmem:[%s5409_s6 + $0x84] sm:$0xf]  ;;  %v5120_v15 = vld [vmem:[%s5409_s6 + $0x78] sm:$0xff] }
  0xef   : > { %v1299_v30 = vunpack.c.l.b16 %v1236_v9  ;;  %v2078_v57 = vshll.u32 %v4786_v47, 16  ;;  %v2088_v9 = vshrl.u32 %v4787_v27, 16 }
  0xf0   : > { %v1388_v52 = vpop.f32.mrf.mxu2  ;;  %v2073_v4 = vsel %vm5421_vm3, %v2068_v35, %v2072_v42 }
  0xf1   : > { %v1468_v61 = vadd.f32 %v1388_v52, %v1037_v62  ;;  %v1298_v62 = vunpack.c.l.b16 %v1233_v8  ;;  %v1239_v52 = vrot.slane %v5272_v51, 5  ;;  %v2084_v8 = vshll.u32 %v4787_v27, 16 }
  0xf2   : > { %4748 = vmatmul.msk.bf16.gmra.mxu3 %vm754_vm4, %v5119_v46  ;;  %v2090_v35 = vrot.slane %v2088_v9, 4 }
  0xf3   : > { %v1321_v48 = vpack.c.b16 %v1299_v30, %v1298_v62 }
  0xf4   : > { %v2327_v11 = vpop.f32.mrf.mxu0 }
  0xf5   : > { %v1674_v41 = vpop.f32.mrf.mxu3  ;;  %v1041_v23 = vpop.f32.mrf.mxu1 }
  0xf6   : > { %v1754_v31 = vadd.f32 %v1674_v41, %v1468_v61  ;;  %v1042_v16 = vadd.f32 %v1041_v23, %v5756_v38  ;;  %v2075_v38 = vshrl.u32 %v4786_v47, 16  ;;  %v2063_v61 = vsel %vm5421_vm3, %v2058_v21, %v2062_v60 }
  0xf7   : > { %4812 = vmatmul.msk.bf16.gmra.mxu0 %vm754_vm4, %v2259_v25  ;;  %v5273_v25 = vld [vmem:[%s5409_s6 + $0x80] sm:$0x1]  ;;  %v4622_v41 = vrot.slane %v1126_v54, 9  ;;  %v1241_v23 = vrot.slane %v1239_v52, 4  ;;  %v2237_v62 = vunpack.c.l.b16 %v2063_v61  ;;  %v2238_v60 = vunpack.c.l.b16 %v2073_v4 }
  0xf8   : > { %v1390_v33 = vpop.f32.mrf.mxu2  ;;  %4605 = vmatmul.msk.bf16.gmra.mxu1 %vm754_vm4, %v5104_v13  ;;  %v5874_v46 = vadd.f32 %v2327_v11, %v1754_v31  ;;  %v1242_v11 = vrot.slane %v5273_v25, 5  ;;  %v2077_v30 = vrot.slane %v2075_v38, 4  ;;  %v2080_v31 = vrot.slane %v2078_v57, 5  ;;  %v5105_v38 = vld [vmem:[%s5409_s6 + $0x78] sm:$0xff] }
  0xf9   : > { %v1469_v50 = vadd.f32 %v1390_v33, %v1039_v1  ;;  %v2086_v21 = vrot.slane %v2084_v8, 5  ;;  %v2260_v27 = vpack.c.b16 %v2238_v60, %v2237_v62  ;;  %v4790_v62 = vld [vmem:[%s5409_s6 + $0x94] sm:$0xf]  ;;  %v5274_v60 = vld [vmem:[%s5409_s6 + $0x88] sm:$0xf] }
  0xfa   : > { %v2081_v51 = vor.u32 %v2080_v31, %v2077_v30  ;;  %v1246_v30 = vrot.slane %v5274_v60, 5  ;;  %v1127_v31 = vld [vmem:[%s5409_s6 + $0x84] sm:$0xe] }
  0xfb   : > { %v2091_v57 = vor.u32 %v2090_v35, %v2086_v21 }
  0xfc   : > { %v2329_v20 = vpop.f32.mrf.mxu0  ;;  %v2082_v25 = vrot.slane %v2081_v51, 4 }
  0xfd   : > { %v1676_v1 = vpop.f32.mrf.mxu3  ;;  %4637 = vmatmul.msk.bf16.gmra.mxu2 %vm754_vm4, %v1321_v48  ;;  %v1043_v13 = vpop.f32.mrf.mxu1  ;;  %v4788_v48 = vld [vmem:[%s5409_s6 + $0x8c] sm:$0x1] }
  0xfe   : > { %v1755_v14 = vadd.f32 %v1676_v1, %v1469_v50  ;;  %v1044_v19 = vadd.f32 %v1043_v13, %v5774_v3  ;;  %v1240_v50 = vsel %vm5595_vm7, %v4622_v41, %v1239_v52  ;;  %v1243_v3 = vsel %vm5595_vm7, %v1241_v23, %v1242_v11 }
  0xff   : > { %v2094_v61 = vshll.u32 %v4788_v48, 16  ;;  %v1301_v8 = vunpack.c.l.b16 %v1243_v3  ;;  %v2092_v1 = vrot.slane %v2091_v57, 4  ;;  %v2112_v3 = vshrl.u32 %v4790_v62, 16  ;;  %v5121_v57 = vld [vmem:[%s5409_s6 + $0x84] sm:$0xff] }
 0x100   : > { %v1393_v33 = vpop.f32.mrf.mxu2  ;;  %v5887_v42 = vadd.f32 %v2329_v20, %v1755_v14  ;;  %v4789_v14 = vld [vmem:[%s5409_s6 + $0x90] sm:$0xf] }
 0x101   : > { %v1470_v47 = vadd.f32 %v1393_v33, %v1042_v16  ;;  %v1300_v16 = vunpack.c.l.b16 %v1240_v50  ;;  %v2096_v13 = vrot.slane %v2094_v61, 5  ;;  %v2099_v33 = vshrl.u32 %v4789_v14, 16 }
 0x102   : > { %4749 = vmatmul.msk.bf16.gmra.mxu3 %vm754_vm4, %v5120_v15  ;;  %v2102_v48 = vshll.u32 %v4789_v14, 16  ;;  %v2108_v50 = vshll.u32 %v4790_v62, 16  ;;  %v4623_v61 = vrot.slane %v1127_v31, 9 }
 0x103   : > { %v1322_v23 = vpack.c.b16 %v1301_v8, %v1300_v16  ;;  %v2101_v8 = vrot.slane %v2099_v33, 4 }
 0x104   : > { %v2332_v54 = vpop.f32.mrf.mxu0 }
 0x105   : > { %v1679_v4 = vpop.f32.mrf.mxu3  ;;  %v1046_v20 = vpop.f32.mrf.mxu1 }
 0x106   : > { %v1756_v9 = vadd.f32 %v1679_v4, %v1470_v47  ;;  %v1047_v52 = vadd.f32 %v1046_v20, %v5796_v44  ;;  %v2087_v44 = vsel %vm5421_vm3, %v2082_v25, %v2086_v21  ;;  %v2097_v47 = vsel %vm5421_vm3, %v2092_v1, %v2096_v13 }
 0x107   : > { %4813 = vmatmul.msk.bf16.gmra.mxu0 %vm754_vm4, %v2260_v27  ;;  %v5275_v27 = vld [vmem:[%s5409_s6 + $0x8c] sm:$0x1]  ;;  %v1248_v4 = vrot.slane %v1246_v30, 4  ;;  %v2239_v20 = vunpack.c.l.b16 %v2087_v44  ;;  %v2240_v16 = vunpack.c.l.b16 %v2097_v47  ;;  %v2104_v25 = vrot.slane %v2102_v48, 5  ;;  %v5106_v44 = vld [vmem:[%s5409_s6 + $0x84] sm:$0xff] }
 0x108   : > { %v1395_v11 = vpop.f32.mrf.mxu2  ;;  %4606 = vmatmul.msk.bf16.gmra.mxu1 %vm754_vm4, %v5105_v38  ;;  %v5900_v15 = vadd.f32 %v2332_v54, %v1756_v9  ;;  %v1249_v51 = vrot.slane %v5275_v27, 5  ;;  %v2114_v1 = vrot.slane %v2112_v3, 4 }
 0x109   : > { %v1471_v41 = vadd.f32 %v1395_v11, %v1044_v19  ;;  %v2110_v11 = vrot.slane %v2108_v50, 5  ;;  %v2261_v62 = vpack.c.b16 %v2240_v16, %v2239_v20  ;;  %v2105_v31 = vor.u32 %v2104_v25, %v2101_v8  ;;  %v4793_v20 = vld [vmem:[%s5409_s6 + $0xa0] sm:$0xf]  ;;  %v5276_v16 = vld [vmem:[%s5409_s6 + $0x94] sm:$0xf] }
 0x10a   : > { %v1253_v8 = vrot.slane %v5276_v16, 5 }
 0x10b   : > { %v2115_v33 = vor.u32 %v2114_v1, %v2110_v11 }
 0x10c   : > { %v2334_v35 = vpop.f32.mrf.mxu0 }
 0x10d   : > { %v1681_v19 = vpop.f32.mrf.mxu3  ;;  %4638 = vmatmul.msk.bf16.gmra.mxu2 %vm754_vm4, %v1322_v23  ;;  %v1048_v54 = vpop.f32.mrf.mxu1  ;;  %v4791_v23 = vld [vmem:[%s5409_s6 + $0x98] sm:$0x1] }
 0x10e   : > { %v1757_v38 = vadd.f32 %v1681_v19, %v1471_v41  ;;  %v1049_v21 = vadd.f32 %v1048_v54, %v5814_v5  ;;  %v1247_v41 = vsel %vm5595_vm7, %v4623_v61, %v1246_v30  ;;  %v1250_v5 = vsel %vm5595_vm7, %v1248_v4, %v1249_v51 }
 0x10f   : > { %v2118_v47 = vshll.u32 %v4791_v23, 16  ;;  %v1303_v50 = vunpack.c.l.b16 %v1250_v5  ;;  %v2106_v51 = vrot.slane %v2105_v31, 4  ;;  %v2116_v19 = vrot.slane %v2115_v33, 4  ;;  %v5122_v33 = vld [vmem:[%s5409_s6 + $0x90] sm:$0xff] }
 0x110   : > { %v1398_v9 = vpop.f32.mrf.mxu2  ;;  %v5913_v13 = vadd.f32 %v2334_v35, %v1757_v38  ;;  %v4792_v38 = vld [vmem:[%s5409_s6 + $0x9c] sm:$0xf]  ;;  %v2136_v5 = vshrl.u32 %v4793_v20, 16 }
 0x111   : > { %v1472_v14 = vadd.f32 %v1398_v9, %v1047_v52  ;;  %v1302_v52 = vunpack.c.l.b16 %v1247_v41  ;;  %v2120_v54 = vrot.slane %v2118_v47, 5  ;;  %v1128_v9 = vld [vmem:[%s5409_s6 + $0x90] sm:$0xe]  ;;  %v2126_v25 = vshll.u32 %v4792_v38, 16 }
 0x112   : > { %4750 = vmatmul.msk.bf16.gmra.mxu3 %vm754_vm4, %v5121_v57  ;;  %v2132_v41 = vshll.u32 %v4793_v20, 16 }
 0x113   : > { %v1323_v4 = vpack.c.b16 %v1303_v50, %v1302_v52  ;;  %v2121_v23 = vsel %vm5421_vm3, %v2116_v19, %v2120_v54  ;;  %v2138_v19 = vrot.slane %v2136_v5, 4 }
 0x114   : > { %v2337_v60 = vpop.f32.mrf.mxu0 }
 0x115   : > { %v1684_v48 = vpop.f32.mrf.mxu3  ;;  %v1051_v35 = vpop.f32.mrf.mxu1 }
 0x116   : > { %v1758_v3 = vadd.f32 %v1684_v48, %v1472_v14  ;;  %v1052_v30 = vadd.f32 %v1051_v35, %v5837_v56  ;;  %v2123_v56 = vshrl.u32 %v4792_v38, 16  ;;  %v2111_v14 = vsel %vm5421_vm3, %v2106_v51, %v2110_v11 }
 0x117   : > { %4814 = vmatmul.msk.bf16.gmra.mxu0 %vm754_vm4, %v2261_v62  ;;  %v5277_v62 = vld [vmem:[%s5409_s6 + $0x98] sm:$0x1]  ;;  %v4624_v48 = vrot.slane %v1128_v9, 9  ;;  %v1255_v35 = vrot.slane %v1253_v8, 4  ;;  %v2241_v52 = vunpack.c.l.b16 %v2111_v14  ;;  %v2242_v11 = vunpack.c.l.b16 %v2121_v23 }
 0x118   : > { %v1400_v27 = vpop.f32.mrf.mxu2  ;;  %4607 = vmatmul.msk.bf16.gmra.mxu1 %vm754_vm4, %v5106_v44  ;;  %v5926_v57 = vadd.f32 %v2337_v60, %v1758_v3  ;;  %v1256_v60 = vrot.slane %v5277_v62, 5  ;;  %v2125_v50 = vrot.slane %v2123_v56, 4  ;;  %v2128_v3 = vrot.slane %v2126_v25, 5  ;;  %v5107_v56 = vld [vmem:[%s5409_s6 + $0x90] sm:$0xff] }
 0x119   : > { %v1473_v61 = vadd.f32 %v1400_v27, %v1049_v21  ;;  %v2134_v51 = vrot.slane %v2132_v41, 5  ;;  %v2262_v20 = vpack.c.b16 %v2242_v11, %v2241_v52  ;;  %v4796_v11 = vld [vmem:[%s5409_s6 + $0xac] sm:$0xf] }
 0x11a   : > { %v2129_v16 = vor.u32 %v2128_v3, %v2125_v50  ;;  %v1129_v50 = vld [vmem:[%s5409_s6 + $0x9c] sm:$0xe] }
 0x11b   : > { %v2139_v25 = vor.u32 %v2138_v19, %v2134_v51 }
 0x11c   : > { %v2339_v1 = vpop.f32.mrf.mxu0 }
 0x11d   : > { %v1686_v21 = vpop.f32.mrf.mxu3  ;;  %4639 = vmatmul.msk.bf16.gmra.mxu2 %vm754_vm4, %v1323_v4  ;;  %v1053_v44 = vpop.f32.mrf.mxu1  ;;  %v4794_v4 = vld [vmem:[%s5409_s6 + $0xa4] sm:$0x1] }
 0x11e   : > { %v1759_v31 = vadd.f32 %v1686_v21, %v1473_v61  ;;  %v1054_v47 = vadd.f32 %v1053_v44, %v5855_v24  ;;  %v1254_v61 = vsel %vm5595_vm7, %v4624_v48, %v1253_v8  ;;  %v1257_v24 = vsel %vm5595_vm7, %v1255_v35, %v1256_v60  ;;  %v4795_v44 = vld [vmem:[%s5409_s6 + $0xa8] sm:$0xf]  ;;  %v5278_v35 = vld [vmem:[%s5409_s6 + $0xa0] sm:$0xf] }
 0x11f   : > { %v2142_v14 = vshll.u32 %v4794_v4, 16  ;;  %v1305_v41 = vunpack.c.l.b16 %v1257_v24  ;;  %v2130_v8 = vrot.slane %v2129_v16, 4  ;;  %v2140_v60 = vrot.slane %v2139_v25, 4 }
 0x120   : > { %v1403_v27 = vpop.f32.mrf.mxu2  ;;  %v5939_v54 = vadd.f32 %v2339_v1, %v1759_v31  ;;  %v1260_v52 = vrot.slane %v5278_v35, 5  ;;  %v2150_v19 = vshll.u32 %v4795_v44, 16  ;;  %v2160_v24 = vshrl.u32 %v4796_v11, 16 }
 0x121   : > { %v1474_v38 = vadd.f32 %v1403_v27, %v1052_v30  ;;  %v1304_v30 = vunpack.c.l.b16 %v1254_v61  ;;  %v2144_v21 = vrot.slane %v2142_v14, 5  ;;  %v2135_v3 = vsel %vm5421_vm3, %v2130_v8, %v2134_v51 }
 0x122   : > { %4751 = vmatmul.msk.bf16.gmra.mxu3 %vm754_vm4, %v5122_v33  ;;  %v2147_v27 = vshrl.u32 %v4795_v44, 16  ;;  %v2156_v61 = vshll.u32 %v4796_v11, 16  ;;  %v1262_v25 = vrot.slane %v1260_v52, 4  ;;  %v2243_v51 = vunpack.c.l.b16 %v2135_v3  ;;  %v4797_v11 = vld [vmem:[%s5409_s6 + $0xb0] sm:$0x1]  ;;  %v5108_v3 = vld [vmem:[%s5409_s6 + $0x9c] sm:$0xff] }
 0x123   : > { %v1324_v48 = vpack.c.b16 %v1305_v41, %v1304_v30  ;;  %v2145_v4 = vsel %vm5421_vm3, %v2140_v60, %v2144_v21  ;;  %v2152_v8 = vrot.slane %v2150_v19, 5  ;;  %v2162_v21 = vrot.slane %v2160_v24, 4 }
 0x124   : > { %v2342_v9 = vpop.f32.mrf.mxu0  ;;  %v2244_v41 = vunpack.c.l.b16 %v2145_v4  ;;  %v2158_v60 = vrot.slane %v2156_v61, 5  ;;  %v2166_v4 = vshll.u32 %v4797_v11, 16 }
 0x125   : > { %v1689_v1 = vpop.f32.mrf.mxu3  ;;  %v1056_v23 = vpop.f32.mrf.mxu1 }
 0x126   : > { %v1760_v5 = vadd.f32 %v1689_v1, %v1474_v38  ;;  %v5123_v1 = vld [vmem:[%s5409_s6 + $0x9c] sm:$0xff]  ;;  %v1057_v30 = vadd.f32 %v1056_v23, %v5690_v7  ;;  %v2263_v7 = vpack.c.b16 %v2244_v41, %v2243_v51  ;;  %v2168_v51 = vrot.slane %v2166_v4, 5 }
 0x127   : > { %4815 = vmatmul.msk.bf16.gmra.mxu0 %vm754_vm4, %v2262_v20  ;;  %v5279_v20 = vld [vmem:[%s5409_s6 + $0xa4] sm:$0x1] }
 0x128   : > { %v1405_v62 = vpop.f32.mrf.mxu2  ;;  %4608 = vmatmul.msk.bf16.gmra.mxu1 %vm754_vm4, %v5107_v56  ;;  %v5951_v31 = vadd.f32 %v2342_v9, %v1760_v5  ;;  %v1263_v16 = vrot.slane %v5279_v20, 5  ;;  %v4625_v56 = vrot.slane %v1129_v50, 9  ;;  %v2149_v5 = vrot.slane %v2147_v27, 4 }
 0x129   : > { %v1475_v33 = vadd.f32 %v1405_v62, %v1054_v47 }
 0x12a   : > { %v2153_v23 = vor.u32 %v2152_v8, %v2149_v5 }
 0x12c   : > { %v2344_v38 = vpop.f32.mrf.mxu0 }
 0x12d   : > { %v1691_v47 = vpop.f32.mrf.mxu3  ;;  %4640 = vmatmul.msk.bf16.gmra.mxu2 %vm754_vm4, %v1324_v48  ;;  %v1058_v9 = vpop.f32.mrf.mxu1  ;;  %v1261_v48 = vsel %vm5595_vm7, %v4625_v56, %v1260_v52  ;;  %v4798_v52 = vld [vmem:[%s5409_s6 + $0xb4] sm:$0xf]  ;;  %v2154_v56 = vrot.slane %v2153_v23, 4 }
 0x12e   : > { %v1761_v14 = vadd.f32 %v1691_v47, %v1475_v33  ;;  %v1264_v33 = vsel %vm5595_vm7, %v1262_v25, %v1263_v16  ;;  %v1306_v27 = vunpack.c.l.b16 %v1261_v48  ;;  %v4799_v47 = vld [vmem:[%s5409_s6 + $0xb8] sm:$0xf]  ;;  %v1059_v16 = vadd.f32 %v1058_v9, %v5706_v34 }
 0x12f   : > { %v1307_v19 = vunpack.c.l.b16 %v1264_v33  ;;  %v2171_v5 = vshrl.u32 %v4798_v52, 16  ;;  %v2174_v8 = vshll.u32 %v4798_v52, 16  ;;  %v2184_v48 = vshrl.u32 %v4799_v47, 16  ;;  %v1130_v33 = vld [vmem:[%s5409_s6 + $0xa8] sm:$0xe] }
 0x130   : > { %v1408_v62 = vpop.f32.mrf.mxu2  ;;  %v5964_v44 = vadd.f32 %v2344_v38, %v1761_v14  ;;  %v2163_v38 = vor.u32 %v2162_v21, %v2158_v60  ;;  %v5280_v21 = vld [vmem:[%s5409_s6 + $0xac] sm:$0xf]  ;;  %v2159_v9 = vsel %vm5421_vm3, %v2154_v56, %v2158_v60 }
 0x131   : > { %v1476_v35 = vadd.f32 %v1408_v62, %v1057_v30  ;;  %v1325_v14 = vpack.c.b16 %v1307_v19, %v1306_v27  ;;  %v2180_v62 = vshll.u32 %v4799_v47, 16  ;;  %v2173_v27 = vrot.slane %v2171_v5, 4 }
 0x132   : > { %4752 = vmatmul.msk.bf16.gmra.mxu3 %vm754_vm4, %v5123_v1  ;;  %v2164_v1 = vrot.slane %v2163_v38, 4  ;;  %v2176_v19 = vrot.slane %v2174_v8, 5  ;;  %v2186_v47 = vrot.slane %v2184_v48, 4  ;;  %v5109_v48 = vld [vmem:[%s5409_s6 + $0xa8] sm:$0xff] }
 0x133   : > { %v2182_v38 = vrot.slane %v2180_v62, 5 }
 0x134   : > { %v2347_v50 = vpop.f32.mrf.mxu0  ;;  %v2169_v11 = vsel %vm5421_vm3, %v2164_v1, %v2168_v51 }
 0x135   : > { %v1694_v61 = vpop.f32.mrf.mxu3  ;;  %v1061_v24 = vpop.f32.mrf.mxu1  ;;  %v2246_v56 = vunpack.c.l.b16 %v2169_v11  ;;  %v2187_v8 = vor.u32 %v2186_v47, %v2182_v38 }
 0x136   : > { %v1762_v20 = vadd.f32 %v1694_v61, %v1476_v35  ;;  %v1267_v35 = vrot.slane %v5280_v21, 5  ;;  %v5124_v61 = vld [vmem:[%s5409_s6 + $0xa8] sm:$0xff]  ;;  %v1062_v60 = vadd.f32 %v1061_v24, %v5726_v58 }
 0x137   : > { %4816 = vmatmul.msk.bf16.gmra.mxu0 %vm754_vm4, %v2263_v7  ;;  %v5281_v7 = vld [vmem:[%s5409_s6 + $0xb0] sm:$0x1] }
 0x138   : > { %v1410_v25 = vpop.f32.mrf.mxu2  ;;  %4609 = vmatmul.msk.bf16.gmra.mxu1 %vm754_vm4, %v5108_v3  ;;  %v5978_v30 = vadd.f32 %v2347_v50, %v1762_v20  ;;  %v1270_v23 = vrot.slane %v5281_v7, 5  ;;  %v4626_v20 = vrot.slane %v1130_v33, 9  ;;  %v1269_v52 = vrot.slane %v1267_v35, 4 }
 0x139   : > { %v1477_v41 = vadd.f32 %v1410_v25, %v1059_v16  ;;  %v2245_v16 = vunpack.c.l.b16 %v2159_v9  ;;  %v4800_v25 = vld [vmem:[%s5409_s6 + $0xbc] sm:$0x1] }
 0x13a   : > { %v1271_v5 = vsel %vm5595_vm7, %v1269_v52, %v1270_v23  ;;  %v2190_v58 = vshll.u32 %v4800_v25, 16  ;;  %v4802_v52 = vld [vmem:[%s5409_s6 + $0xc4] sm:$0xf] }
 0x13b   : > { %v2264_v24 = vpack.c.b16 %v2246_v56, %v2245_v16  ;;  %v1309_v11 = vunpack.c.l.b16 %v1271_v5  ;;  %v1131_v16 = vld [vmem:[%s5409_s6 + $0xb4] sm:$0xe]  ;;  %v5283_v56 = vld [vmem:[%s5409_s6 + $0xb8] sm:$0xf]  ;;  %v2208_v5 = vshrl.u32 %v4802_v52, 16 }
 0x13c   : > { %v2349_v34 = vpop.f32.mrf.mxu0  ;;  %v1274_v25 = vrot.slane %v5283_v56, 5 }
 0x13d   : > { %v1696_v50 = vpop.f32.mrf.mxu3  ;;  %4641 = vmatmul.msk.bf16.gmra.mxu2 %vm754_vm4, %v1325_v14  ;;  %v1063_v3 = vpop.f32.mrf.mxu1  ;;  %v2177_v14 = vor.u32 %v2176_v19, %v2173_v27  ;;  %v2192_v27 = vrot.slane %v2190_v58, 5  ;;  %v4801_v19 = vld [vmem:[%s5409_s6 + $0xc0] sm:$0xf]  ;;  %v5284_v58 = vld [vmem:[%s5409_s6 + $0x14] sm:$0x1] }
 0x13e   : > { %v1763_v4 = vadd.f32 %v1696_v50, %v1477_v41  ;;  %v1268_v41 = vsel %vm5595_vm7, %v4626_v20, %v1267_v35  ;;  %v2188_v35 = vrot.slane %v2187_v8, 4  ;;  %v1064_v23 = vadd.f32 %v1063_v3, %v5743_v28 }
 0x13f   : > { %v1308_v9 = vunpack.c.l.b16 %v1268_v41  ;;  %v2178_v50 = vrot.slane %v2177_v14, 4  ;;  %v2195_v3 = vshrl.u32 %v4801_v19, 16  ;;  %v2198_v14 = vshll.u32 %v4801_v19, 16  ;;  %v5125_v19 = vld [vmem:[%s5409_s6 + $0xb4] sm:$0xff] }
 0x140   : > { %v1413_v1 = vpop.f32.mrf.mxu2  ;;  %v5991_v51 = vadd.f32 %v2349_v34, %v1763_v4  ;;  %v5282_v4 = vld [vmem:[%s5409_s6 + $0x10] sm:$0xf]  ;;  %v2193_v28 = vsel %vm5421_vm3, %v2188_v35, %v2192_v27  ;;  %v2204_v41 = vshll.u32 %v4802_v52, 16  ;;  %v1276_v35 = vrot.slane %v1274_v25, 4  ;;  %v4820_v27 = vld [vmem:[%s5409_s6 + $0xc] sm:$0xe] }
 0x141   : > { %v1478_v21 = vadd.f32 %v1413_v1, %v1062_v60  ;;  %v1326_v60 = vpack.c.b16 %v1309_v11, %v1308_v9  ;;  %v5285_v9 = vld [vmem:[%s5409_s6 + $0xbc] sm:$0x1]  ;;  %v4836_v52 = vrot.slane %v4820_v27, 9 }
 0x142   : > { %4753 = vmatmul.msk.bf16.gmra.mxu3 %vm754_vm4, %v5124_v61  ;;  %v2505_v61 = vrot.slane %v5282_v4, 5  ;;  %v2197_v4 = vrot.slane %v2195_v3, 4 }
 0x144   : > { %v2352_v62 = vpop.f32.mrf.mxu0  ;;  %v2507_v8 = vrot.slane %v2505_v61, 4 }
 0x145   : > { %v1699_v33 = vpop.f32.mrf.mxu3  ;;  %v1066_v34 = vpop.f32.mrf.mxu1 }
 0x146   : > { %v1764_v7 = vadd.f32 %v1699_v33, %v1478_v21  ;;  %v2183_v21 = vsel %vm5421_vm3, %v2178_v50, %v2182_v38  ;;  %v4627_v33 = vrot.slane %v1131_v16, 9  ;;  %v1067_v56 = vadd.f32 %v1066_v34, %v5763_v53 }
 0x147   : > { %4817 = vmatmul.msk.bf16.gmra.mxu0 %vm754_vm4, %v2264_v24  ;;  %v2508_v24 = vrot.slane %v5284_v58, 5  ;;  %v2247_v38 = vunpack.c.l.b16 %v2183_v21  ;;  %v2206_v16 = vrot.slane %v2204_v41, 5  ;;  %v2210_v58 = vrot.slane %v2208_v5, 4  ;;  %v4803_v21 = vld [vmem:[%s5409_s6 + $0xc8] sm:$0x1] }
 0x148   : > { %v1415_v20 = vpop.f32.mrf.mxu2  ;;  %4610 = vmatmul.msk.bf16.gmra.mxu1 %vm754_vm4, %v5109_v48  ;;  %v6007_v1 = vadd.f32 %v2352_v62, %v1764_v7  ;;  %v1277_v62 = vrot.slane %v5285_v9, 5  ;;  %v2248_v7 = vunpack.c.l.b16 %v2193_v28  ;;  %v2506_v28 = vsel %vm5595_vm7, %v4836_v52, %v2505_v61  ;;  %v4980_v41 = vld [vmem:[%s5409_s6 + $0x18] sm:$0xf] }
 0x149   : > { %v1479_v47 = vadd.f32 %v1415_v20, %v1064_v23  ;;  %v2200_v20 = vrot.slane %v2198_v14, 5  ;;  %v2616_v53 = vunpack.c.l.b16 %v2506_v28  ;;  %v2214_v27 = vshll.u32 %v4803_v21, 16 }
 0x14a   : > { %v1278_v14 = vsel %vm5595_vm7, %v1276_v35, %v1277_v62  ;;  %v2265_v5 = vpack.c.b16 %v2248_v7, %v2247_v38  ;;  %v3171_v62 = vshrl.u32 %v4980_v41, 16  ;;  %v3174_v35 = vshll.u32 %v4980_v41, 16 }
 0x14c   : > { %v2354_v48 = vpop.f32.mrf.mxu0  ;;  %v3173_v21 = vrot.slane %v3171_v62, 4 }
 0x14d   : > { %v1701_v11 = vpop.f32.mrf.mxu3  ;;  %4642 = vmatmul.msk.bf16.gmra.mxu2 %vm754_vm4, %v1326_v60  ;;  %v1068_v50 = vpop.f32.mrf.mxu1  ;;  %v1275_v60 = vsel %vm5595_vm7, %v4627_v33, %v1274_v25  ;;  %v6031_v25 = vld [vmem:[%s5409_s6 + $0x1c] sm:$0xf]  ;;  %v2211_v33 = vor.u32 %v2210_v58, %v2206_v16 }
 0x14e   : > { %v1765_v23 = vadd.f32 %v1701_v11, %v1479_v47  ;;  %v2509_v47 = vsel %vm5595_vm7, %v2507_v8, %v2508_v24  ;;  %v2201_v11 = vor.u32 %v2200_v20, %v2197_v4  ;;  %v5110_v24 = vld [vmem:[%s5409_s6 + $0xb4] sm:$0xff]  ;;  %v3184_v38 = vshrl.u32 %v6031_v25, 16 }
 0x14f   : > { %v2617_v34 = vunpack.c.l.b16 %v2509_v47  ;;  %v1069_v4 = vadd.f32 %v1068_v50, %v5783_v17 }
 0x150   : > { %v1418_v9 = vpop.f32.mrf.mxu2  ;;  %v6035_v52 = vadd.f32 %v2354_v48, %v1765_v23  ;;  %v2202_v48 = vrot.slane %v2201_v11, 4  ;;  %v2212_v23 = vrot.slane %v2211_v33, 4  ;;  %v3186_v41 = vrot.slane %v3184_v38, 4 }
 0x151   : > { %v1480_v3 = vadd.f32 %v1418_v9, %v1067_v56  ;;  %v6033_v61 = vpack.c.b16 %v2617_v34, %v2616_v53  ;;  %v1310_v56 = vunpack.c.l.b16 %v1275_v60  ;;  %v1311_v9 = vunpack.c.l.b16 %v1278_v14 }
 0x152   : > { %4754 = vmatmul.msk.bf16.gmra.mxu3 %vm754_vm4, %v5125_v19  ;;  %6741 = vst [vmem:[#allocation2_spill] sm:$0xff] %v6035_v52  ;;  %v3180_v19 = vshll.u32 %v6031_v25, 16  ;;  %v2216_v60 = vrot.slane %v2214_v27, 5  ;;  %v3176_v14 = vrot.slane %v3174_v35, 5  ;;  %v2207_v17 = vsel %vm5421_vm3, %v2202_v48, %v2206_v16  ;;  %v5044_v48 = vld [vmem:[%s5409_s6 + $0x18] sm:$0xe] }
 0x153   : > { %v1327_v58 = vpack.c.b16 %v1311_v9, %v1310_v56  ;;  %v5126_v9 = vld [vmem:[%s5409_s6 + $0xc0] sm:$0xff]  ;;  %v2249_v16 = vunpack.c.l.b16 %v2207_v17 }
 0x154   : > { %v2357_v8 = vpop.f32.mrf.mxu0  ;;  %v3182_v34 = vrot.slane %v3180_v19, 5  ;;  %v2217_v50 = vsel %vm5421_vm3, %v2212_v23, %v2216_v60  ;;  %v3177_v27 = vor.u32 %v3176_v14, %v3173_v21  ;;  %v4983_v23 = vld [vmem:[%s5409_s6 + $0x24] sm:$0xf]  ;;  %v6061_v60 = vld [vmem:[%s5409_s6 + $0x28] sm:$0xf] }
 0x155   : > { %v1704_v28 = vpop.f32.mrf.mxu3  ;;  %v1071_v47 = vpop.f32.mrf.mxu1  ;;  %v2250_v35 = vunpack.c.l.b16 %v2217_v50 }
 0x156   : > { %v1766_v7 = vadd.f32 %v1704_v28, %v1480_v3  ;;  %v6046_v3 = vld [vmem:[%s5409_s6 + $0x20] sm:$0x1]  ;;  %v1072_v62 = vadd.f32 %v1071_v47, %v5806_v2  ;;  %v3178_v38 = vrot.slane %v3177_v27, 4  ;;  %v5286_v47 = vld [vmem:[%s5409_s6 + $0x1c] sm:$0xf] }
 0x157   : > { %4818 = vmatmul.msk.bf16.gmra.mxu0 %vm754_vm4, %v2265_v5  ;;  %v2512_v14 = vrot.slane %v5286_v47, 5  ;;  %v4821_v27 = vld [vmem:[%s5409_s6 + $0x18] sm:$0xe] }
 0x158   : > { %v1420_v20 = vpop.f32.mrf.mxu2  ;;  %4611 = vmatmul.msk.bf16.gmra.mxu1 %vm754_vm4, %v5110_v24  ;;  %v6043_v52 = vadd.f32 %v2357_v8, %v1766_v7  ;;  %v3187_v24 = vor.u32 %v3186_v41, %v3182_v34  ;;  %v3190_v8 = vshll.u32 %v6046_v3, 16  ;;  %v3183_v17 = vsel %vm5421_vm3, %v3178_v38, %v3182_v34 }
 0x159   : > { %v1481_v53 = vadd.f32 %v1420_v20, %v1069_v4  ;;  %v2266_v20 = vpack.c.b16 %v2250_v35, %v2249_v16  ;;  %v3844_v34 = vrot.slane %v6046_v3, 5  ;;  %v5287_v16 = vld [vmem:[%s5409_s6 + $0x20] sm:$0x1]  ;;  %v4837_v38 = vrot.slane %v4821_v27, 9 }
 0x15a   : > { %v3188_v7 = vrot.slane %v3187_v24, 4  ;;  %v3192_v4 = vrot.slane %v3190_v8, 5  ;;  %v3195_v24 = vshrl.u32 %v4983_v23, 16  ;;  %v3198_v8 = vshll.u32 %v4983_v23, 16 }
 0x15b   : > { %v2515_v35 = vrot.slane %v5287_v16, 5  ;;  %v2513_v27 = vsel %vm5595_vm7, %v4837_v38, %v2512_v14  ;;  %v4986_v38 = vld [vmem:[%s5409_s6 + $0x30] sm:$0xf] }
 0x15c   : > { %v2359_v5 = vpop.f32.mrf.mxu0  ;;  %v3193_v50 = vsel %vm5421_vm3, %v3188_v7, %v3192_v4  ;;  %v2514_v7 = vrot.slane %v2512_v14, 4  ;;  %v3200_v3 = vrot.slane %v3198_v8, 5 }
 0x15d   : > { %v1706_v11 = vpop.f32.mrf.mxu3  ;;  %4643 = vmatmul.msk.bf16.gmra.mxu2 %vm754_vm4, %v1327_v58  ;;  %v1073_v33 = vpop.f32.mrf.mxu1  ;;  %v3841_v58 = vrot.slane %v6031_v25, 5  ;;  %v3556_v23 = vunpack.c.l.b16 %v3193_v50 }
 0x15e   : > { %v1767_v56 = vadd.f32 %v1706_v11, %v1481_v53  ;;  %v5060_v11 = vrot.slane %v5044_v48, 9  ;;  %v5127_v48 = vld [vmem:[%s5409_s6 + $0x18] sm:$0xff]  ;;  %v2516_v50 = vsel %vm5595_vm7, %v2514_v7, %v2515_v35  ;;  %v6101_v7 = vld [vmem:[%s5409_s6 + $0x34] sm:$0xf] }
 0x160   : > { %v1423_v28 = vpop.f32.mrf.mxu2  ;;  %v6063_v21 = vadd.f32 %v2359_v5, %v1767_v56  ;;  %v3204_v5 = vshll.u32 %v6061_v60, 16  ;;  %v3208_v56 = vshrl.u32 %v6061_v60, 16 }
 0x161   : > { %v1482_v19 = vadd.f32 %v1423_v28, %v1072_v62  ;;  %v3843_v62 = vrot.slane %v3841_v58, 4 }
 0x162   : > { %4755 = vmatmul.msk.bf16.gmra.mxu3 %vm754_vm4, %v5126_v9  ;;  %v1074_v9 = vadd.f32 %v1073_v33, %v5826_v29  ;;  %v3197_v33 = vrot.slane %v3195_v24, 4  ;;  %v6084_v47 = vrot.slane %v3204_v5, 5 }
 0x164   : > { %v2362_v2 = vpop.f32.mrf.mxu0  ;;  %v3201_v5 = vor.u32 %v3200_v3, %v3197_v33  ;;  %v5045_v33 = vld [vmem:[%s5409_s6 + $0x24] sm:$0xe] }
 0x165   : > { %v1709_v53 = vpop.f32.mrf.mxu3  ;;  %v1076_v41 = vpop.f32.mrf.mxu1 }
 0x166   : > { %v1768_v25 = vadd.f32 %v1709_v53, %v1482_v19  ;;  %v3555_v19 = vunpack.c.l.b16 %v3183_v17  ;;  %v3210_v53 = vrot.slane %v3208_v56, 4  ;;  %v1077_v14 = vadd.f32 %v1076_v41, %v5708_v37 }
 0x167   : > { %4819 = vmatmul.msk.bf16.gmra.mxu0 %vm754_vm4, %v2266_v20  ;;  %v3842_v20 = vsel %vm5595_vm7, %v5060_v11, %v3841_v58  ;;  %v3848_v37 = vrot.slane %v6061_v60, 5 }
 0x168   : > { %v1425_v28 = vpop.f32.mrf.mxu2  ;;  %4852 = vmatmul.msk.bf16.vlgmr.msra.gmra.mxu1 %vm754_vm4, %v6033_v61  ;;  %v6082_v29 = vadd.f32 %v2362_v2, %v1768_v25  ;;  %v3845_v61 = vsel %vm5595_vm7, %v3843_v62, %v3844_v34  ;;  %v3587_v2 = vpack.c.b16 %v3556_v23, %v3555_v19  ;;  %v3952_v11 = vunpack.c.l.b16 %v3842_v20 }
 0x169   : > { %v1483_v4 = vadd.f32 %v1425_v28, %v1074_v9  ;;  %v6093_v9 = vld [vmem:[%s5409_s6 + $0x2c] sm:$0x1]  ;;  %v3953_v8 = vunpack.c.l.b16 %v3845_v61  ;;  %v3211_v56 = vor.u32 %v3210_v53, %v6084_v47  ;;  %v2618_v62 = vunpack.c.l.b16 %v2513_v27 }
 0x16a   : > { %v2619_v34 = vunpack.c.l.b16 %v2516_v50  ;;  %v3214_v16 = vshll.u32 %v6093_v9, 16  ;;  %v3219_v53 = vshrl.u32 %v4986_v38, 16  ;;  %v3222_v61 = vshll.u32 %v4986_v38, 16 }
 0x16b   : > { %v3984_v19 = vpack.c.b16 %v3953_v8, %v3952_v11  ;;  %v3228_v27 = vshll.u32 %v6101_v7, 16  ;;  %v3232_v50 = vshrl.u32 %v6101_v7, 16  ;;  %v5288_v11 = vld [vmem:[%s5409_s6 + $0x28] sm:$0xf]  ;;  %v3851_v60 = vrot.slane %v6093_v9, 5 }
 0x16c   : > { %v2364_v17 = vpop.f32.mrf.mxu0  ;;  %v2649_v23 = vpack.c.b16 %v2619_v34, %v2618_v62  ;;  %v3216_v20 = vrot.slane %v3214_v16, 5  ;;  %v2519_v8 = vrot.slane %v5288_v11, 5  ;;  %v5061_v62 = vrot.slane %v5045_v33, 9  ;;  %v5128_v11 = vld [vmem:[%s5409_s6 + $0x24] sm:$0xff] }
 0x16d   : > { %v1711_v58 = vpop.f32.mrf.mxu3  ;;  %4964 = vmatmul.msk.bf16.vlgmr.msra.gmra.mxu2 %vm754_vm4, %v5127_v48  ;;  %v1078_v24 = vpop.f32.mrf.mxu1  ;;  %v3212_v48 = vrot.slane %v3211_v56, 4  ;;  %v3224_v33 = vrot.slane %v3222_v61, 5  ;;  %v6122_v9 = vrot.slane %v3228_v27, 5 }
 0x16e   : > { %v1769_v25 = vadd.f32 %v1711_v58, %v1483_v4  ;;  %v3202_v4 = vrot.slane %v3201_v5, 4  ;;  %v5289_v5 = vld [vmem:[%s5409_s6 + $0x2c] sm:$0x1] }
 0x16f   : > { %v2522_v56 = vrot.slane %v5289_v5, 5  ;;  %v3217_v16 = vsel %vm5421_vm3, %v3212_v48, %v3216_v20  ;;  %v3849_v20 = vsel %vm5595_vm7, %v5061_v62, %v3848_v37 }
 0x170   : > { %v1428_v35 = vpop.f32.mrf.mxu2  ;;  %v6106_v41 = vadd.f32 %v2364_v17, %v1769_v25  ;;  %v4822_v17 = vld [vmem:[%s5409_s6 + $0x24] sm:$0xe]  ;;  %v1079_v25 = vadd.f32 %v1078_v24, %v5729_v63  ;;  %v3207_v34 = vsel %vm5421_vm3, %v3202_v4, %v6084_v47  ;;  %v2521_v24 = vrot.slane %v2519_v8, 4 }
 0x171   : > { %v1484_v28 = vadd.f32 %v1428_v35, %v1077_v14  ;;  %v3850_v35 = vrot.slane %v3848_v37, 4  ;;  %v4838_v63 = vrot.slane %v4822_v17, 9  ;;  %v3557_v47 = vunpack.c.l.b16 %v3207_v34 }
 0x172   : > { %5028 = vmatmul.msk.bf16.vlgmr.msra.gmra.mxu3 %vm754_vm4, %v3587_v2  ;;  %6742 = vst [vmem:[#allocation3_spill] sm:$0xff] %v6106_v41  ;;  %v3558_v4 = vunpack.c.l.b16 %v3217_v16  ;;  %v6128_v41 = vld [vmem:[%s5409_s6 + $0x38] sm:$0x1] }
 0x173   : > { %v3238_v37 = vshll.u32 %v6128_v41, 16 }
 0x174   : > { %v2367_v3 = vpop.f32.mrf.mxu0  ;;  %v3588_v17 = vpack.c.b16 %v3558_v4, %v3557_v47  ;;  %v5290_v4 = vld [vmem:[%s5409_s6 + $0x34] sm:$0xf] }
 0x175   : > { %v1714_v58 = vpop.f32.mrf.mxu3  ;;  %v1081_v2 = vpop.f32.mrf.mxu1 }
 0x176   : > { %v1770_v14 = vadd.f32 %v1714_v58, %v1484_v28  ;;  %v3221_v28 = vrot.slane %v3219_v53, 4  ;;  %v3234_v58 = vrot.slane %v3232_v50, 4  ;;  %v2523_v50 = vsel %vm5595_vm7, %v2521_v24, %v2522_v56  ;;  %v6147_v24 = vld [vmem:[%s5409_s6 + $0x40] sm:$0xf] }
 0x177   : > { %5076 = vmatmul.msk.bf16.vlgmr.msra.gmra.mxu0 %vm754_vm4, %v3984_v19 }
 0x178   : > { %v1430_v38 = vpop.f32.mrf.mxu2  ;;  %4853 = vmatmul.msk.bf16.gmra.mxu1 %vm754_vm4, %v2649_v23  ;;  %v6125_v5 = vadd.f32 %v2367_v3, %v1770_v14  ;;  %v3852_v23 = vsel %vm5595_vm7, %v3850_v35, %v3851_v60  ;;  %v3225_v53 = vor.u32 %v3224_v33, %v3221_v28  ;;  %v2520_v3 = vsel %vm5595_vm7, %v4838_v63, %v2519_v8 }
 0x179   : > { %v1485_v19 = vadd.f32 %v1430_v38, %v1079_v25  ;;  %v3235_v14 = vor.u32 %v3234_v58, %v6122_v9  ;;  %v1082_v60 = vadd.f32 %v1081_v2, %v5746_v22  ;;  %v3954_v25 = vunpack.c.l.b16 %v3849_v20  ;;  %v5046_v58 = vld [vmem:[%s5409_s6 + $0x30] sm:$0xe] }
 0x17a   : > { %v3955_v34 = vunpack.c.l.b16 %v3852_v23  ;;  %v2620_v35 = vunpack.c.l.b16 %v2520_v3  ;;  %v2621_v8 = vunpack.c.l.b16 %v2523_v50  ;;  %v3226_v28 = vrot.slane %v3225_v53, 4 }
 0x17b   : > { %v3236_v56 = vrot.slane %v3235_v14, 4  ;;  %v3240_v33 = vrot.slane %v3238_v37, 5  ;;  %v3855_v63 = vrot.slane %v6101_v7, 5  ;;  %v2526_v20 = vrot.slane %v5290_v4, 5  ;;  %v4823_v7 = vld [vmem:[%s5409_s6 + $0x30] sm:$0xe] }
 0x17c   : > { %v2369_v48 = vpop.f32.mrf.mxu0  ;;  %v2650_v47 = vpack.c.b16 %v2621_v8, %v2620_v35  ;;  %v5062_v50 = vrot.slane %v5046_v58, 9 }
 0x17d   : > { %v1716_v61 = vpop.f32.mrf.mxu3  ;;  %4965 = vmatmul.msk.bf16.gmra.mxu2 %vm754_vm4, %v5128_v11  ;;  %v1083_v27 = vpop.f32.mrf.mxu1  ;;  %v4989_v11 = vld [vmem:[%s5409_s6 + $0x3c] sm:$0xf]  ;;  %v3241_v3 = vsel %vm5421_vm3, %v3236_v56, %v3240_v33  ;;  %v5129_v33 = vld [vmem:[%s5409_s6 + $0x30] sm:$0xff] }
 0x17e   : > { %v1771_v62 = vadd.f32 %v1716_v61, %v1485_v19  ;;  %v3985_v19 = vpack.c.b16 %v3955_v34, %v3954_v25  ;;  %v3231_v61 = vsel %vm5421_vm3, %v3226_v28, %v6122_v9  ;;  %v3243_v14 = vshrl.u32 %v4989_v11, 16  ;;  %v5291_v34 = vld [vmem:[%s5409_s6 + $0x38] sm:$0x1] }
 0x17f   : > { %v3857_v25 = vrot.slane %v3855_v63, 4  ;;  %v3858_v9 = vrot.slane %v6128_v41, 5  ;;  %v3559_v8 = vunpack.c.l.b16 %v3231_v61  ;;  %v2528_v28 = vrot.slane %v2526_v20, 4 }
 0x180   : > { %v1433_v16 = vpop.f32.mrf.mxu2  ;;  %v6149_v22 = vadd.f32 %v2369_v48, %v1771_v62  ;;  %v3246_v48 = vshll.u32 %v4989_v11, 16  ;;  %v3252_v62 = vshll.u32 %v6147_v24, 16  ;;  %v3560_v58 = vunpack.c.l.b16 %v3241_v3 }
 0x181   : > { %v1486_v38 = vadd.f32 %v1433_v16, %v1082_v60  ;;  %v1084_v60 = vadd.f32 %v1083_v27, %v5767_v55  ;;  %v2529_v16 = vrot.slane %v5291_v34, 5  ;;  %v3856_v11 = vsel %vm5595_vm7, %v5062_v50, %v3855_v63 }
 0x182   : > { %5029 = vmatmul.msk.bf16.gmra.mxu3 %vm754_vm4, %v3588_v17  ;;  %v3256_v17 = vshrl.u32 %v6147_v24, 16  ;;  %v3245_v55 = vrot.slane %v3243_v14, 4  ;;  %v3248_v27 = vrot.slane %v3246_v48, 5  ;;  %v6170_v41 = vrot.slane %v3252_v62, 5 }
 0x183   : > { %v2530_v3 = vsel %vm5595_vm7, %v2528_v28, %v2529_v16  ;;  %v3956_v50 = vunpack.c.l.b16 %v3856_v11  ;;  %v5047_v11 = vld [vmem:[%s5409_s6 + $0x3c] sm:$0xe] }
 0x184   : > { %v2372_v2 = vpop.f32.mrf.mxu0  ;;  %v3258_v4 = vrot.slane %v3256_v17, 4  ;;  %v3249_v62 = vor.u32 %v3248_v27, %v3245_v55 }
 0x185   : > { %v1719_v23 = vpop.f32.mrf.mxu3  ;;  %v1086_v53 = vpop.f32.mrf.mxu1 }
 0x186   : > { %v1772_v37 = vadd.f32 %v1719_v23, %v1486_v38  ;;  %v4839_v38 = vrot.slane %v4823_v7, 9  ;;  %v6179_v7 = vld [vmem:[%s5409_s6 + $0x44] sm:$0x1]  ;;  %v3259_v17 = vor.u32 %v3258_v4, %v6170_v41  ;;  %v3250_v28 = vrot.slane %v3249_v62, 4 }
 0x187   : > { %5077 = vmatmul.msk.bf16.gmra.mxu0 %vm754_vm4, %v3985_v19 }
 0x188   : > { %v1435_v35 = vpop.f32.mrf.mxu2  ;;  %4854 = vmatmul.msk.bf16.gmra.mxu1 %vm754_vm4, %v2650_v47  ;;  %v6168_v19 = vadd.f32 %v2372_v2, %v1772_v37  ;;  %v3859_v47 = vsel %vm5595_vm7, %v3857_v25, %v3858_v9  ;;  %v2527_v61 = vsel %vm5595_vm7, %v4839_v38, %v2526_v20  ;;  %v3589_v2 = vpack.c.b16 %v3560_v58, %v3559_v8  ;;  %v6187_v38 = vld [vmem:[%s5409_s6 + $0x4c] sm:$0xf] }
 0x189   : > { %v1487_v56 = vadd.f32 %v1435_v35, %v1084_v60  ;;  %v3957_v48 = vunpack.c.l.b16 %v3859_v47  ;;  %v1087_v20 = vadd.f32 %v1086_v53, %v5790_v26  ;;  %v2622_v60 = vunpack.c.l.b16 %v2527_v61  ;;  %v4992_v35 = vld [vmem:[%s5409_s6 + $0x48] sm:$0xf] }
 0x18a   : > { %v2623_v25 = vunpack.c.l.b16 %v2530_v3  ;;  %v3262_v9 = vshll.u32 %v6179_v7, 16  ;;  %v3862_v26 = vrot.slane %v6147_v24, 5  ;;  %v3267_v27 = vshrl.u32 %v4992_v35, 16 }
 0x18b   : > { %v3986_v8 = vpack.c.b16 %v3957_v48, %v3956_v50  ;;  %v3270_v4 = vshll.u32 %v4992_v35, 16  ;;  %v3276_v47 = vshll.u32 %v6187_v38, 16  ;;  %v3280_v61 = vshrl.u32 %v6187_v38, 16  ;;  %v5293_v48 = vld [vmem:[%s5409_s6 + $0x44] sm:$0x1] }
 0x18c   : > { %v2374_v23 = vpop.f32.mrf.mxu0  ;;  %v3264_v58 = vrot.slane %v3262_v9, 5  ;;  %v2536_v62 = vrot.slane %v5293_v48, 5  ;;  %v3865_v24 = vrot.slane %v6179_v7, 5  ;;  %v3864_v9 = vrot.slane %v3862_v26, 4  ;;  %v6214_v48 = vld [vmem:[%s5409_s6 + $0x50] sm:$0x1] }
 0x18d   : > { %v1721_v63 = vpop.f32.mrf.mxu3  ;;  %4966 = vmatmul.msk.bf16.gmra.mxu2 %vm754_vm4, %v5129_v33  ;;  %v1088_v14 = vpop.f32.mrf.mxu1  ;;  %v2651_v33 = vpack.c.b16 %v2623_v25, %v2622_v60  ;;  %v3255_v60 = vsel %vm5421_vm3, %v3250_v28, %v6170_v41  ;;  %v3272_v35 = vrot.slane %v3270_v4, 5  ;;  %v6208_v7 = vrot.slane %v3276_v47, 5 }
 0x18e   : > { %v1773_v37 = vadd.f32 %v1721_v63, %v1487_v56  ;;  %v3260_v56 = vrot.slane %v3259_v17, 4  ;;  %v3561_v41 = vunpack.c.l.b16 %v3255_v60 }
 0x190   : > { %v1438_v34 = vpop.f32.mrf.mxu2  ;;  %v6192_v53 = vadd.f32 %v2374_v23, %v1773_v37  ;;  %v4824_v23 = vld [vmem:[%s5409_s6 + $0x3c] sm:$0xe]  ;;  %v1089_v37 = vadd.f32 %v1088_v14, %v5808_v43  ;;  %v3265_v25 = vsel %vm5421_vm3, %v3260_v56, %v3264_v58 }
 0x191   : > { %v1488_v16 = vadd.f32 %v1438_v34, %v1087_v20  ;;  %v5063_v20 = vrot.slane %v5047_v11, 9  ;;  %v3282_v11 = vrot.slane %v3280_v61, 4  ;;  %v4840_v43 = vrot.slane %v4824_v23, 9 }
 0x192   : > { %5030 = vmatmul.msk.bf16.gmra.mxu3 %vm754_vm4, %v3589_v2  ;;  %v5292_v2 = vld [vmem:[%s5409_s6 + $0x40] sm:$0xf]  ;;  %v3562_v28 = vunpack.c.l.b16 %v3265_v25 }
 0x193   : > { %v2533_v50 = vrot.slane %v5292_v2, 5  ;;  %v3863_v58 = vsel %vm5595_vm7, %v5063_v20, %v3862_v26  ;;  %v3286_v26 = vshll.u32 %v6214_v48, 16 }
 0x194   : > { %v2377_v55 = vpop.f32.mrf.mxu0  ;;  %v3590_v23 = vpack.c.b16 %v3562_v28, %v3561_v41  ;;  %v5294_v28 = vld [vmem:[%s5409_s6 + $0x4c] sm:$0xf] }
 0x195   : > { %v1724_v3 = vpop.f32.mrf.mxu3  ;;  %v1091_v63 = vpop.f32.mrf.mxu1  ;;  %v2535_v14 = vrot.slane %v2533_v50, 4 }
 0x196   : > { %v1774_v17 = vadd.f32 %v1724_v3, %v1488_v16  ;;  %v3269_v16 = vrot.slane %v3267_v27, 4  ;;  %v5130_v3 = vld [vmem:[%s5409_s6 + $0x3c] sm:$0xff] }
 0x197   : > { %5078 = vmatmul.msk.bf16.gmra.mxu0 %vm754_vm4, %v3986_v8  ;;  %v2537_v61 = vsel %vm5595_vm7, %v2535_v14, %v2536_v62  ;;  %v6233_v14 = vld [vmem:[%s5409_s6 + $0x58] sm:$0xf] }
 0x198   : > { %v1440_v34 = vpop.f32.mrf.mxu2  ;;  %4855 = vmatmul.msk.bf16.gmra.mxu1 %vm754_vm4, %v2651_v33  ;;  %v6211_v2 = vadd.f32 %v2377_v55, %v1774_v17  ;;  %v3866_v33 = vsel %vm5595_vm7, %v3864_v9, %v3865_v24  ;;  %v3273_v27 = vor.u32 %v3272_v35, %v3269_v16  ;;  %v2534_v55 = vsel %vm5595_vm7, %v4840_v43, %v2533_v50 }
 0x199   : > { %v1489_v8 = vadd.f32 %v1440_v34, %v1089_v37  ;;  %v3283_v17 = vor.u32 %v3282_v11, %v6208_v7  ;;  %v1092_v24 = vadd.f32 %v1091_v63, %v5829_v40  ;;  %v3958_v37 = vunpack.c.l.b16 %v3863_v58  ;;  %v5048_v11 = vld [vmem:[%s5409_s6 + $0x48] sm:$0xe] }
 0x19a   : > { %v3959_v60 = vunpack.c.l.b16 %v3866_v33  ;;  %v2624_v9 = vunpack.c.l.b16 %v2534_v55  ;;  %v2625_v50 = vunpack.c.l.b16 %v2537_v61  ;;  %v3274_v16 = vrot.slane %v3273_v27, 4 }
 0x19b   : > { %v3284_v62 = vrot.slane %v3283_v17, 4  ;;  %v3288_v35 = vrot.slane %v3286_v26, 5  ;;  %v3869_v43 = vrot.slane %v6187_v38, 5  ;;  %v2540_v58 = vrot.slane %v5294_v28, 5  ;;  %v4825_v38 = vld [vmem:[%s5409_s6 + $0x48] sm:$0xe] }
 0x19c   : > { %v2379_v56 = vpop.f32.mrf.mxu0  ;;  %v2652_v41 = vpack.c.b16 %v2625_v50, %v2624_v9  ;;  %v5064_v61 = vrot.slane %v5048_v11, 9 }
 0x19d   : > { %v1726_v4 = vpop.f32.mrf.mxu3  ;;  %4967 = vmatmul.msk.bf16.gmra.mxu2 %vm754_vm4, %v5130_v3  ;;  %v1093_v47 = vpop.f32.mrf.mxu1  ;;  %v4995_v3 = vld [vmem:[%s5409_s6 + $0x54] sm:$0xf]  ;;  %v3289_v55 = vsel %vm5421_vm3, %v3284_v62, %v3288_v35  ;;  %v5131_v35 = vld [vmem:[%s5409_s6 + $0x48] sm:$0xff] }
 0x19e   : > { %v1775_v20 = vadd.f32 %v1726_v4, %v1489_v8  ;;  %v3987_v8 = vpack.c.b16 %v3959_v60, %v3958_v37  ;;  %v3279_v4 = vsel %vm5421_vm3, %v3274_v16, %v6208_v7  ;;  %v3291_v17 = vshrl.u32 %v4995_v3, 16  ;;  %v5295_v60 = vld [vmem:[%s5409_s6 + $0x50] sm:$0x1] }
 0x19f   : > { %v3871_v37 = vrot.slane %v3869_v43, 4  ;;  %v3872_v7 = vrot.slane %v6214_v48, 5  ;;  %v3563_v50 = vunpack.c.l.b16 %v3279_v4  ;;  %v2542_v16 = vrot.slane %v2540_v58, 4 }
 0x1a0   : > { %v1443_v25 = vpop.f32.mrf.mxu2  ;;  %v6235_v40 = vadd.f32 %v2379_v56, %v1775_v20  ;;  %v3294_v56 = vshll.u32 %v4995_v3, 16  ;;  %v3300_v20 = vshll.u32 %v6233_v14, 16  ;;  %v3564_v11 = vunpack.c.l.b16 %v3289_v55 }
 0x1a1   : > { %v1490_v34 = vadd.f32 %v1443_v25, %v1092_v24  ;;  %v1094_v24 = vadd.f32 %v1093_v47, %v5844_v10  ;;  %v2543_v25 = vrot.slane %v5295_v60, 5  ;;  %v3870_v3 = vsel %vm5595_vm7, %v5064_v61, %v3869_v43 }
 0x1a2   : > { %5031 = vmatmul.msk.bf16.gmra.mxu3 %vm754_vm4, %v3590_v23  ;;  %v3304_v23 = vshrl.u32 %v6233_v14, 16  ;;  %v3293_v10 = vrot.slane %v3291_v17, 4  ;;  %v3296_v47 = vrot.slane %v3294_v56, 5  ;;  %v6256_v48 = vrot.slane %v3300_v20, 5 }
 0x1a3   : > { %v2544_v55 = vsel %vm5595_vm7, %v2542_v16, %v2543_v25  ;;  %v3960_v61 = vunpack.c.l.b16 %v3870_v3  ;;  %v5049_v3 = vld [vmem:[%s5409_s6 + $0x54] sm:$0xe] }
 0x1a4   : > { %v2382_v63 = vpop.f32.mrf.mxu0  ;;  %v3306_v28 = vrot.slane %v3304_v23, 4  ;;  %v3297_v20 = vor.u32 %v3296_v47, %v3293_v10 }
 0x1a5   : > { %v1729_v33 = vpop.f32.mrf.mxu3  ;;  %v1096_v27 = vpop.f32.mrf.mxu1 }
 0x1a6   : > { %v1776_v26 = vadd.f32 %v1729_v33, %v1490_v34  ;;  %v4841_v34 = vrot.slane %v4825_v38, 9  ;;  %v6265_v38 = vld [vmem:[%s5409_s6 + $0x5c] sm:$0x1]  ;;  %v3307_v23 = vor.u32 %v3306_v28, %v6256_v48  ;;  %v3298_v16 = vrot.slane %v3297_v20, 4 }
 0x1a7   : > { %5079 = vmatmul.msk.bf16.gmra.mxu0 %vm754_vm4, %v3987_v8 }
 0x1a8   : > { %v1445_v9 = vpop.f32.mrf.mxu2  ;;  %4856 = vmatmul.msk.bf16.gmra.mxu1 %vm754_vm4, %v2652_v41  ;;  %v6254_v8 = vadd.f32 %v2382_v63, %v1776_v26  ;;  %v3873_v41 = vsel %vm5595_vm7, %v3871_v37, %v3872_v7  ;;  %v2541_v4 = vsel %vm5595_vm7, %v4841_v34, %v2540_v58  ;;  %v3591_v63 = vpack.c.b16 %v3564_v11, %v3563_v50  ;;  %v6273_v34 = vld [vmem:[%s5409_s6 + $0x64] sm:$0xf] }
 0x1a9   : > { %v1491_v62 = vadd.f32 %v1445_v9, %v1094_v24  ;;  %v3961_v56 = vunpack.c.l.b16 %v3873_v41  ;;  %v1097_v58 = vadd.f32 %v1096_v27, %v5720_v49  ;;  %v2626_v24 = vunpack.c.l.b16 %v2541_v4  ;;  %v4998_v9 = vld [vmem:[%s5409_s6 + $0x60] sm:$0xf] }
 0x1aa   : > { %v2627_v37 = vunpack.c.l.b16 %v2544_v55  ;;  %v3310_v7 = vshll.u32 %v6265_v38, 16  ;;  %v3876_v49 = vrot.slane %v6233_v14, 5  ;;  %v3315_v47 = vshrl.u32 %v4998_v9, 16 }
 0x1ab   : > { %v3988_v50 = vpack.c.b16 %v3961_v56, %v3960_v61  ;;  %v3318_v28 = vshll.u32 %v4998_v9, 16  ;;  %v3324_v41 = vshll.u32 %v6273_v34, 16  ;;  %v3328_v4 = vshrl.u32 %v6273_v34, 16  ;;  %v5297_v56 = vld [vmem:[%s5409_s6 + $0x5c] sm:$0x1] }
 0x1ac   : > { %v2384_v33 = vpop.f32.mrf.mxu0  ;;  %v3312_v11 = vrot.slane %v3310_v7, 5  ;;  %v2550_v20 = vrot.slane %v5297_v56, 5  ;;  %v3879_v14 = vrot.slane %v6265_v38, 5  ;;  %v3878_v7 = vrot.slane %v3876_v49, 4 }
 0x1ad   : > { %v1731_v43 = vpop.f32.mrf.mxu3  ;;  %4968 = vmatmul.msk.bf16.gmra.mxu2 %vm754_vm4, %v5131_v35  ;;  %v1098_v17 = vpop.f32.mrf.mxu1  ;;  %v2653_v35 = vpack.c.b16 %v2627_v37, %v2626_v24  ;;  %v3303_v24 = vsel %vm5421_vm3, %v3298_v16, %v6256_v48  ;;  %v3320_v9 = vrot.slane %v3318_v28, 5  ;;  %v3326_v38 = vrot.slane %v3324_v41, 5  ;;  %v6298_v16 = vld [vmem:[%s5409_s6 + $0x68] sm:$0x1] }
 0x1ae   : > { %v1777_v26 = vadd.f32 %v1731_v43, %v1491_v62  ;;  %v3308_v62 = vrot.slane %v3307_v23, 4  ;;  %v3565_v56 = vunpack.c.l.b16 %v3303_v24 }
 0x1b0   : > { %v1448_v60 = vpop.f32.mrf.mxu2  ;;  %v6278_v27 = vadd.f32 %v2384_v33, %v1777_v26  ;;  %v4826_v33 = vld [vmem:[%s5409_s6 + $0x54] sm:$0xe]  ;;  %v1099_v26 = vadd.f32 %v1098_v17, %v5739_v0  ;;  %v3313_v37 = vsel %vm5421_vm3, %v3308_v62, %v3312_v11 }
 0x1b1   : > { %v1492_v25 = vadd.f32 %v1448_v60, %v1097_v58  ;;  %v5065_v58 = vrot.slane %v5049_v3, 9  ;;  %v3330_v3 = vrot.slane %v3328_v4, 4  ;;  %v3566_v48 = vunpack.c.l.b16 %v3313_v37 }
 0x1b2   : > { %5032 = vmatmul.msk.bf16.gmra.mxu3 %vm754_vm4, %v3591_v63  ;;  %6743 = vst [vmem:[#allocation4_spill] sm:$0xff] %v6278_v27  ;;  %v5296_v63 = vld [vmem:[%s5409_s6 + $0x58] sm:$0xf] }
 0x1b3   : > { %v2547_v61 = vrot.slane %v5296_v63, 5  ;;  %v4842_v63 = vrot.slane %v4826_v33, 9  ;;  %v3877_v62 = vsel %vm5595_vm7, %v5065_v58, %v3876_v49  ;;  %v3331_v4 = vor.u32 %v3330_v3, %v3326_v38 }
 0x1b4   : > { %v2387_v10 = vpop.f32.mrf.mxu0  ;;  %v3592_v58 = vpack.c.b16 %v3566_v48, %v3565_v56  ;;  %v3962_v33 = vunpack.c.l.b16 %v3877_v62 }
 0x1b5   : > { %v1734_v55 = vpop.f32.mrf.mxu3  ;;  %v1101_v43 = vpop.f32.mrf.mxu1  ;;  %v2549_v0 = vrot.slane %v2547_v61, 4 }
 0x1b6   : > { %v1778_v23 = vadd.f32 %v1734_v55, %v1492_v25  ;;  %v3317_v25 = vrot.slane %v3315_v47, 4 }
 0x1b7   : > { %5080 = vmatmul.msk.bf16.gmra.mxu0 %vm754_vm4, %v3988_v50  ;;  %v5132_v50 = vld [vmem:[%s5409_s6 + $0x54] sm:$0xff]  ;;  %v2551_v41 = vsel %vm5595_vm7, %v2549_v0, %v2550_v20  ;;  %v3883_v0 = vrot.slane %v6273_v34, 5  ;;  %v5299_v34 = vld [vmem:[%s5409_s6 + $0x68] sm:$0x1] }
 0x1b8   : > { %v1450_v60 = vpop.f32.mrf.mxu2  ;;  %4857 = vmatmul.msk.bf16.gmra.mxu1 %vm754_vm4, %v2653_v35  ;;  %v6295_v17 = vadd.f32 %v2387_v10, %v1778_v23  ;;  %v3880_v35 = vsel %vm5595_vm7, %v3878_v7, %v3879_v14  ;;  %v3321_v11 = vor.u32 %v3320_v9, %v3317_v25  ;;  %v2548_v10 = vsel %vm5595_vm7, %v4842_v63, %v2547_v61  ;;  %v5001_v9 = vld [vmem:[%s5409_s6 + $0x6c] sm:$0xf]  ;;  %v5050_v63 = vld [vmem:[%s5409_s6 + $0x60] sm:$0xe] }
 0x1b9   : > { %v1493_v55 = vadd.f32 %v1450_v60, %v1099_v26  ;;  %v3334_v23 = vshll.u32 %v6298_v16, 16  ;;  %v1102_v14 = vadd.f32 %v1101_v43, %v5760_v39  ;;  %v3963_v26 = vunpack.c.l.b16 %v3880_v35 }
 0x1ba   : > { %v2628_v37 = vunpack.c.l.b16 %v2548_v10  ;;  %v2629_v7 = vunpack.c.l.b16 %v2551_v41  ;;  %v3322_v61 = vrot.slane %v3321_v11, 4  ;;  %v3332_v25 = vrot.slane %v3331_v4, 4  ;;  %v5298_v11 = vld [vmem:[%s5409_s6 + $0x64] sm:$0xf] }
 0x1bb   : > { %v3336_v20 = vrot.slane %v3334_v23, 5  ;;  %v3989_v3 = vpack.c.b16 %v3963_v26, %v3962_v33  ;;  %v3339_v10 = vshrl.u32 %v5001_v9, 16  ;;  %v3342_v4 = vshll.u32 %v5001_v9, 16 }
 0x1bc   : > { %v2389_v27 = vpop.f32.mrf.mxu0  ;;  %v2654_v43 = vpack.c.b16 %v2629_v7, %v2628_v37  ;;  %v3327_v62 = vsel %vm5421_vm3, %v3322_v61, %v3326_v38  ;;  %v3885_v37 = vrot.slane %v3883_v0, 4  ;;  %v3886_v7 = vrot.slane %v6298_v16, 5  ;;  %v5133_v61 = vld [vmem:[%s5409_s6 + $0x60] sm:$0xff] }
 0x1bd   : > { %v1736_v47 = vpop.f32.mrf.mxu3  ;;  %4969 = vmatmul.msk.bf16.gmra.mxu2 %vm754_vm4, %v5132_v50  ;;  %v1103_v28 = vpop.f32.mrf.mxu1  ;;  %v3337_v35 = vsel %vm5421_vm3, %v3332_v25, %v3336_v20  ;;  %v3567_v26 = vunpack.c.l.b16 %v3327_v62 }
 0x1be   : > { %v1779_v49 = vadd.f32 %v1736_v47, %v1493_v55  ;;  %v6314_v55 = vld [vmem:[%s5409_s6 + $0x70] sm:$0xf]  ;;  %v2554_v47 = vrot.slane %v5298_v11, 5  ;;  %v1104_v38 = vadd.f32 %v1103_v28, %v5779_v6  ;;  %v6339_v28 = vld [vmem:[%s5409_s6 + $0x74] sm:$0x1]  ;;  %v3887_v16 = vsel %vm5595_vm7, %v3885_v37, %v3886_v7 }
 0x1bf   : > { %v3348_v23 = vshll.u32 %v6314_v55, 16 }
 0x1c0   : > { %v1453_v24 = vpop.f32.mrf.mxu2  ;;  %v6316_v50 = vadd.f32 %v2389_v27, %v1779_v49  ;;  %v4827_v27 = vld [vmem:[%s5409_s6 + $0x60] sm:$0xe]  ;;  %v3352_v49 = vshrl.u32 %v6314_v55, 16  ;;  %v2556_v20 = vrot.slane %v2554_v47, 4 }
 0x1c1   : > { %v1494_v60 = vadd.f32 %v1453_v24, %v1102_v14  ;;  %v5066_v14 = vrot.slane %v5050_v63, 9  ;;  %v3568_v24 = vunpack.c.l.b16 %v3337_v35  ;;  %v4843_v25 = vrot.slane %v4827_v27, 9 }
 0x1c2   : > { %5033 = vmatmul.msk.bf16.gmra.mxu3 %vm754_vm4, %v3592_v58  ;;  %v2557_v58 = vrot.slane %v5299_v34, 5  ;;  %v6336_v11 = vrot.slane %v3348_v23, 5  ;;  %v3354_v6 = vrot.slane %v3352_v49, 4  ;;  %v3358_v23 = vshll.u32 %v6339_v28, 16 }
 0x1c4   : > { %v2392_v39 = vpop.f32.mrf.mxu0  ;;  %v3360_v7 = vrot.slane %v3358_v23, 5 }
 0x1c5   : > { %v1739_v56 = vpop.f32.mrf.mxu3  ;;  %v1106_v48 = vpop.f32.mrf.mxu1 }
 0x1c6   : > { %v1780_v41 = vadd.f32 %v1739_v56, %v1494_v60  ;;  %v3341_v56 = vrot.slane %v3339_v10, 4  ;;  %v2555_v10 = vsel %vm5595_vm7, %v4843_v25, %v2554_v47  ;;  %v1107_v49 = vadd.f32 %v1106_v48, %v5798_v45  ;;  %v5004_v47 = vld [vmem:[%s5409_s6 + $0x78] sm:$0xf] }
 0x1c7   : > { %5081 = vmatmul.msk.bf16.gmra.mxu0 %vm754_vm4, %v3989_v3  ;;  %v3344_v3 = vrot.slane %v3342_v4, 5  ;;  %v3890_v25 = vrot.slane %v6314_v55, 5 }
 0x1c8   : > { %v1455_v33 = vpop.f32.mrf.mxu2  ;;  %4858 = vmatmul.msk.bf16.gmra.mxu1 %vm754_vm4, %v2654_v43  ;;  %v6334_v9 = vadd.f32 %v2392_v39, %v1780_v41  ;;  %v3884_v43 = vsel %vm5595_vm7, %v5066_v14, %v3883_v0  ;;  %v3593_v39 = vpack.c.b16 %v3568_v24, %v3567_v26  ;;  %v2558_v41 = vsel %vm5595_vm7, %v2556_v20, %v2557_v58 }
 0x1c9   : > { %v1495_v60 = vadd.f32 %v1455_v33, %v1104_v38  ;;  %v3345_v4 = vor.u32 %v3344_v3, %v3341_v56  ;;  %v3355_v0 = vor.u32 %v3354_v6, %v6336_v11  ;;  %v3964_v34 = vunpack.c.l.b16 %v3884_v43  ;;  %v6360_v56 = vld [vmem:[%s5409_s6 + $0x7c] sm:$0xf] }
 0x1ca   : > { %v3965_v38 = vunpack.c.l.b16 %v3887_v16  ;;  %v2630_v33 = vunpack.c.l.b16 %v2555_v10  ;;  %v2631_v26 = vunpack.c.l.b16 %v2558_v41  ;;  %v3363_v3 = vshrl.u32 %v5004_v47, 16  ;;  %v5300_v10 = vld [vmem:[%s5409_s6 + $0x70] sm:$0xf] }
 0x1cb   : > { %v3346_v58 = vrot.slane %v3345_v4, 4  ;;  %v3356_v37 = vrot.slane %v3355_v0, 4  ;;  %v3366_v6 = vshll.u32 %v5004_v47, 16  ;;  %v2561_v41 = vrot.slane %v5300_v10, 5 }
 0x1cc   : > { %v2394_v63 = vpop.f32.mrf.mxu0  ;;  %v2655_v20 = vpack.c.b16 %v2631_v26, %v2630_v33  ;;  %v3892_v23 = vrot.slane %v3890_v25, 4 }
 0x1cd   : > { %v1741_v62 = vpop.f32.mrf.mxu3  ;;  %4970 = vmatmul.msk.bf16.gmra.mxu2 %vm754_vm4, %v5133_v61  ;;  %v1108_v35 = vpop.f32.mrf.mxu1  ;;  %v3990_v61 = vpack.c.b16 %v3965_v38, %v3964_v34  ;;  %v3351_v55 = vsel %vm5421_vm3, %v3346_v58, %v6336_v11  ;;  %v3376_v34 = vshrl.u32 %v6360_v56, 16  ;;  %v3365_v11 = vrot.slane %v3363_v3, 4  ;;  %v6384_v3 = vld [vmem:[%s5409_s6 + $0x80] sm:$0x1] }
 0x1ce   : > { %v1781_v27 = vadd.f32 %v1741_v62, %v1495_v60  ;;  %v5051_v60 = vld [vmem:[%s5409_s6 + $0x6c] sm:$0xe]  ;;  %v1109_v0 = vadd.f32 %v1108_v35, %v5821_v12  ;;  %v3368_v33 = vrot.slane %v3366_v6, 5  ;;  %v2563_v47 = vrot.slane %v2561_v41, 4 }
 0x1cf   : > { %v5067_v62 = vrot.slane %v5051_v60, 9  ;;  %v3569_v12 = vunpack.c.l.b16 %v3351_v55 }
 0x1d0   : > { %v1458_v14 = vpop.f32.mrf.mxu2  ;;  %v6357_v45 = vadd.f32 %v2394_v63, %v1781_v27  ;;  %v3361_v63 = vsel %vm5421_vm3, %v3356_v37, %v3360_v7  ;;  %v3893_v27 = vrot.slane %v6339_v28, 5  ;;  %v5301_v28 = vld [vmem:[%s5409_s6 + $0x74] sm:$0x1]  ;;  %v3369_v6 = vor.u32 %v3368_v33, %v3365_v11  ;;  %v5052_v33 = vld [vmem:[%s5409_s6 + $0x78] sm:$0xe] }
 0x1d1   : > { %v1496_v24 = vadd.f32 %v1458_v14, %v1107_v49  ;;  %v3372_v49 = vshll.u32 %v6360_v56, 16  ;;  %v2564_v58 = vrot.slane %v5301_v28, 5  ;;  %v3570_v35 = vunpack.c.l.b16 %v3361_v63  ;;  %v6398_v28 = vld [vmem:[%s5409_s6 + $0x88] sm:$0xf] }
 0x1d2   : > { %5034 = vmatmul.msk.bf16.gmra.mxu3 %vm754_vm4, %v3593_v39  ;;  %v4828_v39 = vld [vmem:[%s5409_s6 + $0x6c] sm:$0xe]  ;;  %v3891_v7 = vsel %vm5595_vm7, %v5067_v62, %v3890_v25  ;;  %v3894_v60 = vsel %vm5595_vm7, %v3892_v23, %v3893_v27  ;;  %v3382_v23 = vshll.u32 %v6384_v3, 16  ;;  %v3370_v11 = vrot.slane %v3369_v6, 4 }
 0x1d3   : > { %v4844_v14 = vrot.slane %v4828_v39, 9  ;;  %v2565_v25 = vsel %vm5595_vm7, %v2563_v47, %v2564_v58  ;;  %v3966_v55 = vunpack.c.l.b16 %v3891_v7  ;;  %v3967_v63 = vunpack.c.l.b16 %v3894_v60 }
 0x1d4   : > { %v2397_v48 = vpop.f32.mrf.mxu0 }
 0x1d5   : > { %v1744_v43 = vpop.f32.mrf.mxu3  ;;  %v1111_v16 = vpop.f32.mrf.mxu1  ;;  %v2562_v10 = vsel %vm5595_vm7, %v4844_v14, %v2561_v41  ;;  %v5007_v41 = vld [vmem:[%s5409_s6 + $0x84] sm:$0xf]  ;;  %v3991_v14 = vpack.c.b16 %v3967_v63, %v3966_v55 }
 0x1d6   : > { %v1782_v4 = vadd.f32 %v1744_v43, %v1496_v24  ;;  %v5134_v24 = vld [vmem:[%s5409_s6 + $0x6c] sm:$0xff]  ;;  %v1112_v27 = vadd.f32 %v1111_v16, %v5840_v59  ;;  %v3384_v59 = vrot.slane %v3382_v23, 5  ;;  %v5068_v16 = vrot.slane %v5052_v33, 9  ;;  %v5135_v33 = vld [vmem:[%s5409_s6 + $0x78] sm:$0xff] }
 0x1d7   : > { %5082 = vmatmul.msk.bf16.gmra.mxu0 %vm754_vm4, %v3990_v61  ;;  %v3374_v61 = vrot.slane %v3372_v49, 5  ;;  %v3387_v60 = vshrl.u32 %v5007_v41, 16 }
 0x1d8   : > { %v1460_v38 = vpop.f32.mrf.mxu2  ;;  %4859 = vmatmul.msk.bf16.gmra.mxu1 %vm754_vm4, %v2655_v20  ;;  %v6377_v37 = vadd.f32 %v2397_v48, %v1782_v4  ;;  %v3378_v20 = vrot.slane %v3376_v34, 4  ;;  %v3594_v4 = vpack.c.b16 %v3570_v35, %v3569_v12  ;;  %v2632_v34 = vunpack.c.l.b16 %v2562_v10 }
 0x1d9   : > { %v1497_v26 = vadd.f32 %v1460_v38, %v1109_v0  ;;  %v2633_v38 = vunpack.c.l.b16 %v2565_v25  ;;  %v3375_v7 = vsel %vm5421_vm3, %v3370_v11, %v3374_v61  ;;  %v3900_v10 = vrot.slane %v6384_v3, 5  ;;  %v4829_v25 = vld [vmem:[%s5409_s6 + $0x78] sm:$0xe] }
 0x1da   : > { %v3379_v0 = vor.u32 %v3378_v20, %v3374_v61  ;;  %v3390_v20 = vshll.u32 %v5007_v41, 16  ;;  %v5303_v41 = vld [vmem:[%s5409_s6 + $0x80] sm:$0x1] }
 0x1db   : > { %v2656_v35 = vpack.c.b16 %v2633_v38, %v2632_v34  ;;  %v3389_v34 = vrot.slane %v3387_v60, 4 }
 0x1dc   : > { %v2399_v43 = vpop.f32.mrf.mxu0  ;;  %v3380_v47 = vrot.slane %v3379_v0, 4  ;;  %v3571_v0 = vunpack.c.l.b16 %v3375_v7  ;;  %v3392_v38 = vrot.slane %v3390_v20, 5  ;;  %v5009_v7 = vld [vmem:[%s5409_s6 + $0x8c] sm:$0x1] }
 0x1dd   : > { %v1746_v39 = vpop.f32.mrf.mxu3  ;;  %4971 = vmatmul.msk.bf16.gmra.mxu2 %vm754_vm4, %v5134_v24  ;;  %v1113_v48 = vpop.f32.mrf.mxu1 }
 0x1de   : > { %v1783_v62 = vadd.f32 %v1746_v39, %v1497_v26  ;;  %v3897_v26 = vrot.slane %v6360_v56, 5  ;;  %v5302_v56 = vld [vmem:[%s5409_s6 + $0x7c] sm:$0xf]  ;;  %v1114_v61 = vadd.f32 %v1113_v48, %v5857_v32 }
 0x1e0   : > { %v1463_v49 = vpop.f32.mrf.mxu2  ;;  %v6400_v58 = vadd.f32 %v2399_v43, %v1783_v62  ;;  %v3899_v63 = vrot.slane %v3897_v26, 4  ;;  %v3396_v43 = vshll.u32 %v6398_v28, 16  ;;  %v3400_v62 = vshrl.u32 %v6398_v28, 16 }
 0x1e1   : > { %v1498_v24 = vadd.f32 %v1463_v49, %v1112_v27  ;;  %v3385_v27 = vsel %vm5421_vm3, %v3380_v47, %v3384_v59  ;;  %v3898_v23 = vsel %vm5595_vm7, %v5068_v16, %v3897_v26  ;;  %v4845_v49 = vrot.slane %v4829_v25, 9 }
 0x1e2   : > { %5035 = vmatmul.msk.bf16.gmra.mxu3 %vm754_vm4, %v3594_v4  ;;  %v2568_v4 = vrot.slane %v5302_v56, 5  ;;  %v3572_v48 = vunpack.c.l.b16 %v3385_v27  ;;  %v3901_v47 = vsel %vm5595_vm7, %v3899_v63, %v3900_v10  ;;  %v6422_v59 = vrot.slane %v3396_v43, 5 }
 0x1e3   : > { %v3968_v16 = vunpack.c.l.b16 %v3898_v23  ;;  %v3969_v20 = vunpack.c.l.b16 %v3901_v47  ;;  %v3393_v25 = vor.u32 %v3392_v38, %v3389_v34  ;;  %v3406_v43 = vshll.u32 %v5009_v7, 16 }
 0x1e4   : > { %v2402_v12 = vpop.f32.mrf.mxu0  ;;  %v3904_v23 = vrot.slane %v6398_v28, 5  ;;  %v3907_v34 = vrot.slane %v5009_v7, 5 }
 0x1e5   : > { %v1749_v6 = vpop.f32.mrf.mxu3  ;;  %v2724_v39 = vpop.f32.mrf.mxu1  ;;  %v3394_v47 = vrot.slane %v3393_v25, 4  ;;  %v5304_v25 = vld [vmem:[%s5409_s6 + $0x88] sm:$0xf] }
 0x1e6   : > { %v1784_v55 = vadd.f32 %v1749_v6, %v1498_v24  ;;  %v2570_v24 = vrot.slane %v2568_v4, 4  ;;  %v2804_v38 = vadd.f32 %v2724_v39, %v5874_v46  ;;  %v2575_v7 = vrot.slane %v5304_v25, 5  ;;  %v4830_v39 = vld [vmem:[%s5409_s6 + $0x84] sm:$0xe] }
 0x1e7   : > { %5083 = vmatmul.msk.bf16.gmra.mxu0 %vm754_vm4, %v3991_v14  ;;  %v2571_v14 = vrot.slane %v5303_v41, 5  ;;  %v3992_v41 = vpack.c.b16 %v3969_v20, %v3968_v16  ;;  %v3399_v46 = vsel %vm5421_vm3, %v3394_v47, %v6422_v59 }
 0x1e8   : > { %v1465_v3 = vpop.f32.mrf.mxu2  ;;  %4860 = vmatmul.msk.bf16.gmra.mxu1 %vm754_vm4, %v2656_v35  ;;  %v6418_v32 = vadd.f32 %v2402_v12, %v1784_v55  ;;  %v3402_v35 = vrot.slane %v3400_v62, 4  ;;  %v2569_v12 = vsel %vm5595_vm7, %v4845_v49, %v2568_v4  ;;  %v3595_v55 = vpack.c.b16 %v3572_v48, %v3571_v0  ;;  %v5053_v62 = vld [vmem:[%s5409_s6 + $0x84] sm:$0xe] }
 0x1e9   : > { %v1499_v11 = vadd.f32 %v1465_v3, %v1114_v61  ;;  %v2572_v10 = vsel %vm5595_vm7, %v2570_v24, %v2571_v14  ;;  %v2634_v27 = vunpack.c.l.b16 %v2569_v12  ;;  %v3408_v49 = vrot.slane %v3406_v43, 5 }
 0x1ea   : > { %6744 = vst [vmem:[#allocation5_spill] sm:$0xff] %v6418_v32  ;;  %v3403_v63 = vor.u32 %v3402_v35, %v6422_v59  ;;  %v2635_v3 = vunpack.c.l.b16 %v2572_v10  ;;  %v6435_v32 = vld [vmem:[%s5409_s6 + $0x94] sm:$0xf]  ;;  %v5069_v0 = vrot.slane %v5053_v62, 9  ;;  %v3906_v35 = vrot.slane %v3904_v23, 4 }
 0x1eb   : > { %v3420_v16 = vshll.u32 %v6435_v32, 16  ;;  %v2577_v47 = vrot.slane %v2575_v7, 4 }
 0x1ec   : > { %v2404_v26 = vpop.f32.mrf.mxu0  ;;  %v3404_v4 = vrot.slane %v3403_v63, 4  ;;  %v2657_v48 = vpack.c.b16 %v2635_v3, %v2634_v27  ;;  %v3908_v59 = vsel %vm5595_vm7, %v3906_v35, %v3907_v34 }
 0x1ed   : > { %v1751_v60 = vpop.f32.mrf.mxu3  ;;  %4972 = vmatmul.msk.bf16.gmra.mxu2 %vm754_vm4, %v5135_v33  ;;  %v2726_v6 = vpop.f32.mrf.mxu1  ;;  %v5010_v33 = vld [vmem:[%s5409_s6 + $0x90] sm:$0xf] }
 0x1ee   : > { %v1785_v56 = vadd.f32 %v1751_v60, %v1499_v11  ;;  %v3411_v11 = vshrl.u32 %v5010_v33, 16  ;;  %v3414_v24 = vshll.u32 %v5010_v33, 16  ;;  %v3424_v60 = vshrl.u32 %v6435_v32, 16  ;;  %v5136_v33 = vld [vmem:[%s5409_s6 + $0x84] sm:$0xff] }
 0x1ef   : > { %v2805_v43 = vadd.f32 %v2726_v6, %v5887_v42 }
 0x1f0   : > { %v3010_v61 = vpop.f32.mrf.mxu2  ;;  %v6439_v14 = vadd.f32 %v2404_v26, %v1785_v56  ;;  %v3409_v26 = vsel %vm5421_vm3, %v3404_v4, %v3408_v49  ;;  %v3905_v56 = vsel %vm5595_vm7, %v5069_v0, %v3904_v23  ;;  %v3416_v63 = vrot.slane %v3414_v24, 5  ;;  %v5305_v4 = vld [vmem:[%s5409_s6 + $0x8c] sm:$0x1] }
 0x1f1   : > { %v3090_v20 = vadd.f32 %v3010_v61, %v2804_v38  ;;  %v6457_v61 = vrot.slane %v3420_v16, 5  ;;  %v3426_v27 = vrot.slane %v3424_v60, 4  ;;  %v2578_v23 = vrot.slane %v5305_v4, 5  ;;  %v5054_v4 = vld [vmem:[%s5409_s6 + $0x90] sm:$0xe] }
 0x1f2   : > { %5036 = vmatmul.msk.bf16.gmra.mxu3 %vm754_vm4, %v3595_v55  ;;  %v3413_v55 = vrot.slane %v3411_v11, 4  ;;  %v3573_v0 = vunpack.c.l.b16 %v3399_v46  ;;  %v3574_v42 = vunpack.c.l.b16 %v3409_v26  ;;  %v3970_v11 = vunpack.c.l.b16 %v3905_v56 }
 0x1f3   : > { %v3971_v24 = vunpack.c.l.b16 %v3908_v59 }
 0x1f4   : > { %v4060_v28 = vpop.f32.mrf.mxu0  ;;  %v3417_v6 = vor.u32 %v3416_v63, %v3413_v55  ;;  %v3596_v46 = vpack.c.b16 %v3574_v42, %v3573_v0 }
 0x1f5   : > { %v3663_v12 = vpop.f32.mrf.mxu3  ;;  %v2729_v10 = vpop.f32.mrf.mxu1  ;;  %v3993_v59 = vpack.c.b16 %v3971_v24, %v3970_v11 }
 0x1f6   : > { %v3743_v3 = vadd.f32 %v3663_v12, %v3090_v20  ;;  %v2579_v20 = vsel %vm5595_vm7, %v2577_v47, %v2578_v23  ;;  %v3427_v12 = vor.u32 %v3426_v27, %v6457_v61  ;;  %v2806_v56 = vadd.f32 %v2729_v10, %v5900_v15 }
 0x1f7   : > { %5084 = vmatmul.msk.bf16.gmra.mxu0 %vm754_vm4, %v3992_v41  ;;  %v4846_v41 = vrot.slane %v4830_v39, 9  ;;  %v3418_v39 = vrot.slane %v3417_v6, 4  ;;  %v3911_v23 = vrot.slane %v6435_v32, 5 }
 0x1f8   : > { %v3012_v62 = vpop.f32.mrf.mxu2  ;;  %4861 = vmatmul.msk.bf16.gmra.mxu1 %vm754_vm4, %v2657_v48  ;;  %v6462_v48 = vld [vmem:[%s5409_s6 + $0x98] sm:$0x1]  ;;  %v4140_v34 = vadd.f32 %v4060_v28, %v3743_v3  ;;  %v3428_v27 = vrot.slane %v3427_v12, 4  ;;  %v6480_v3 = vld [vmem:[%s5409_s6 + $0xa0] sm:$0xf] }
 0x1f9   : > { %v3091_v49 = vadd.f32 %v3012_v62, %v2805_v43  ;;  %v2576_v60 = vsel %vm5595_vm7, %v4846_v41, %v2575_v7  ;;  %v3430_v28 = vshll.u32 %v6462_v48, 16  ;;  %v2637_v43 = vunpack.c.l.b16 %v2579_v20  ;;  %v5013_v7 = vld [vmem:[%s5409_s6 + $0x9c] sm:$0xf] }
 0x1fa   : > { %v2636_v63 = vunpack.c.l.b16 %v2576_v60  ;;  %v4274_v62 = vmul.f32 %v4140_v34, %v4140_v34  ;;  %v3438_v0 = vshll.u32 %v5013_v7, 16  ;;  %v3423_v11 = vsel %vm5421_vm3, %v3418_v39, %v6457_v61  ;;  %v5306_v60 = vld [vmem:[%s5409_s6 + $0x94] sm:$0xf] }
 0x1fb   : > { %v3432_v10 = vrot.slane %v3430_v28, 5  ;;  %v3444_v24 = vshll.u32 %v6480_v3, 16  ;;  %v2582_v20 = vrot.slane %v5306_v60, 5  ;;  %v3448_v12 = vshrl.u32 %v6480_v3, 16  ;;  %v4831_v28 = vld [vmem:[%s5409_s6 + $0x90] sm:$0xe] }
 0x1fc   : > { %v4062_v38 = vpop.f32.mrf.mxu0  ;;  %v3575_v39 = vunpack.c.l.b16 %v3423_v11 }
 0x1fd   : > { %v3665_v35 = vpop.f32.mrf.mxu3  ;;  %4973 = vmatmul.msk.bf16.gmra.mxu2 %vm754_vm4, %v5136_v33  ;;  %v2731_v16 = vpop.f32.mrf.mxu1  ;;  %v3433_v61 = vsel %vm5421_vm3, %v3428_v27, %v3432_v10 }
 0x1fe   : > { %v3744_v25 = vadd.f32 %v3665_v35, %v3091_v49  ;;  %v3435_v49 = vshrl.u32 %v5013_v7, 16  ;;  %v3913_v7 = vrot.slane %v3911_v23, 4 }
 0x200   : > { %v4141_v26 = vadd.f32 %v4062_v38, %v3744_v25  ;;  %v3015_v55 = vpop.f32.mrf.mxu2  ;;  %v2658_v38 = vpack.c.b16 %v2637_v43, %v2636_v63  ;;  %v5070_v25 = vrot.slane %v5054_v4, 9  ;;  %v2807_v63 = vadd.f32 %v2731_v16, %v5913_v13 }
 0x201   : > { %v3092_v15 = vadd.f32 %v3015_v55, %v2806_v56  ;;  %v3440_v56 = vrot.slane %v3438_v0, 5  ;;  %v3450_v4 = vrot.slane %v3448_v12, 4  ;;  %v3576_v0 = vunpack.c.l.b16 %v3433_v61 }
 0x202   : > { %v5146_v33 = vpack.c.bf16 %v4141_v26, %v4140_v34  ;;  %v4236_v41 = vadd.f32 %v4141_v26, %v4140_v34  ;;  %v4275_v47 = vmul.f32 %v4141_v26, %v4141_v26  ;;  %5037 = vmatmul.msk.bf16.gmra.mxu3 %vm754_vm4, %v3596_v46  ;;  %v3914_v46 = vrot.slane %v6462_v48, 5  ;;  %v5137_v48 = vld [vmem:[%s5409_s6 + $0x90] sm:$0xff] }
 0x203   : > { %v3437_v26 = vrot.slane %v3435_v49, 4 }
 0x204   : > { %5147 = vst [vmem:[%s6477_s22] sm:$0xff] %v5146_v33   ;;  %v4306_v42 = vadd.f32 %v4275_v47, %v4274_v62  ;;  %v4065_v6 = vpop.f32.mrf.mxu0  ;;  %v6499_v62 = vrot.slane %v3444_v24, 5  ;;  %v4847_v33 = vrot.slane %v4831_v28, 9  ;;  %v2584_v47 = vrot.slane %v2582_v20, 4 }
 0x205   : > { %v3668_v34 = vpop.f32.mrf.mxu3  ;;  %v2734_v35 = vpop.f32.mrf.mxu1  ;;  %v3441_v11 = vor.u32 %v3440_v56, %v3437_v26  ;;  %v3915_v24 = vsel %vm5595_vm7, %v3913_v7, %v3914_v46  ;;  %v5016_v7 = vld [vmem:[%s5409_s6 + $0xa8] sm:$0xf] }
 0x206   : > { %v3745_v32 = vadd.f32 %v3668_v34, %v3092_v15  ;;  %v3973_v46 = vunpack.c.l.b16 %v3915_v24  ;;  %v2808_v56 = vadd.f32 %v2734_v35, %v5926_v57  ;;  %v3918_v57 = vrot.slane %v6480_v3, 5 }
 0x207   : > { %5085 = vmatmul.msk.bf16.gmra.mxu0 %vm754_vm4, %v3993_v59  ;;  %v5307_v59 = vld [vmem:[%s5409_s6 + $0x98] sm:$0x1]  ;;  %v3442_v61 = vrot.slane %v3441_v11, 4  ;;  %v3459_v35 = vshrl.u32 %v5016_v7, 16 }
 0x208   : > { %v4142_v55 = vadd.f32 %v4065_v6, %v3745_v32  ;;  %v3017_v43 = vpop.f32.mrf.mxu2  ;;  %4862 = vmatmul.msk.bf16.gmra.mxu1 %vm754_vm4, %v2658_v38  ;;  %v2585_v15 = vrot.slane %v5307_v59, 5  ;;  %v6504_v6 = vld [vmem:[%s5409_s6 + $0xa4] sm:$0x1]  ;;  %v3912_v38 = vsel %vm5595_vm7, %v5070_v25, %v3911_v23  ;;  %v3597_v25 = vpack.c.b16 %v3576_v0, %v3575_v39 }
 0x209   : > { %v3093_v49 = vadd.f32 %v3017_v43, %v2807_v63  ;;  %v3454_v32 = vshll.u32 %v6504_v6, 16  ;;  %v3972_v28 = vunpack.c.l.b16 %v3912_v38  ;;  %v3462_v0 = vshll.u32 %v5016_v7, 16 }
 0x20a   : > { %v4237_v27 = vadd.f32 %v4236_v41, %v4142_v55  ;;  %v4276_v10 = vmul.f32 %v4142_v55, %v4142_v55  ;;  %v2583_v41 = vsel %vm5595_vm7, %v4847_v33, %v2582_v20  ;;  %v2586_v12 = vsel %vm5595_vm7, %v2584_v47, %v2585_v15  ;;  %v6520_v47 = vld [vmem:[%s5409_s6 + $0xac] sm:$0xf] }
 0x20b   : > { %v2638_v43 = vunpack.c.l.b16 %v2583_v41  ;;  %v2639_v20 = vunpack.c.l.b16 %v2586_v12  ;;  %v3456_v33 = vrot.slane %v3454_v32, 5  ;;  %v5308_v41 = vld [vmem:[%s5409_s6 + $0xa0] sm:$0xf] }
 0x20c   : > { %v4307_v13 = vadd.f32 %v4306_v42, %v4276_v10  ;;  %v4067_v16 = vpop.f32.mrf.mxu0  ;;  %v3451_v42 = vor.u32 %v3450_v4, %v6499_v62  ;;  %v3994_v10 = vpack.c.b16 %v3973_v46, %v3972_v28  ;;  %v2589_v12 = vrot.slane %v5308_v41, 5 }
 0x20d   : > { %v3670_v34 = vpop.f32.mrf.mxu3  ;;  %4974 = vmatmul.msk.bf16.gmra.mxu2 %vm754_vm4, %v5137_v48  ;;  %v2736_v60 = vpop.f32.mrf.mxu1  ;;  %v2659_v38 = vpack.c.b16 %v2639_v20, %v2638_v43  ;;  %v3461_v28 = vrot.slane %v3459_v35, 4  ;;  %v3464_v46 = vrot.slane %v3462_v0, 5  ;;  %v5138_v20 = vld [vmem:[%s5409_s6 + $0x9c] sm:$0xff]  ;;  %v6544_v0 = vld [vmem:[%s5409_s6 + $0xb0] sm:$0x1] }
 0x20e   : > { %v3746_v23 = vadd.f32 %v3670_v34, %v3093_v49  ;;  %v3452_v48 = vrot.slane %v3451_v42, 4  ;;  %v5055_v49 = vld [vmem:[%s5409_s6 + $0x9c] sm:$0xe]  ;;  %v3472_v42 = vshrl.u32 %v6520_v47, 16  ;;  %v3478_v41 = vshll.u32 %v6544_v0, 16 }
 0x210   : > { %v4143_v26 = vadd.f32 %v4067_v16, %v3746_v23  ;;  %v3020_v63 = vpop.f32.mrf.mxu2  ;;  %v3457_v32 = vsel %vm5421_vm3, %v3452_v48, %v3456_v33  ;;  %v4832_v23 = vld [vmem:[%s5409_s6 + $0x9c] sm:$0xe]  ;;  %v2591_v48 = vrot.slane %v2589_v12, 4  ;;  %v5309_v33 = vld [vmem:[%s5409_s6 + $0xa4] sm:$0x1] }
 0x211   : > { %v3094_v39 = vadd.f32 %v3020_v63, %v2808_v56  ;;  %v3921_v63 = vrot.slane %v6504_v6, 5  ;;  %v4848_v7 = vrot.slane %v4832_v23, 9  ;;  %v3578_v35 = vunpack.c.l.b16 %v3457_v32 }
 0x212   : > { %v5151_v59 = vpack.c.bf16 %v4143_v26, %v4142_v55  ;;  %v4238_v15 = vadd.f32 %v4237_v27, %v4143_v26  ;;  %v4277_v4 = vmul.f32 %v4143_v26, %v4143_v26  ;;  %5038 = vmatmul.msk.bf16.gmra.mxu3 %vm754_vm4, %v3597_v25  ;;  %v3447_v55 = vsel %vm5421_vm3, %v3442_v61, %v6499_v62 }
 0x213   : > { %v3468_v27 = vshll.u32 %v6520_v47, 16  ;;  %v3577_v25 = vunpack.c.l.b16 %v3447_v55  ;;  %v3920_v62 = vrot.slane %v3918_v57, 4  ;;  %v2809_v26 = vadd.f32 %v2736_v60, %v5939_v54 }
 0x214   : > { %5223 = vst [vmem:[%s6477_s22 + $0x8] sm:$0xff] %v5151_v59   ;;  %v4308_v11 = vadd.f32 %v4307_v13, %v4277_v4  ;;  %v4070_v16 = vpop.f32.mrf.mxu0  ;;  %v5071_v13 = vrot.slane %v5055_v49, 9  ;;  %v2592_v59 = vrot.slane %v5309_v33, 5  ;;  %v3474_v4 = vrot.slane %v3472_v42, 4 }
 0x215   : > { %v3673_v24 = vpop.f32.mrf.mxu3  ;;  %v2739_v34 = vpop.f32.mrf.mxu1  ;;  %v6539_v43 = vrot.slane %v3468_v27, 5  ;;  %v3465_v54 = vor.u32 %v3464_v46, %v3461_v28  ;;  %v3598_v42 = vpack.c.b16 %v3578_v35, %v3577_v25 }
 0x216   : > { %v3747_v3 = vadd.f32 %v3673_v24, %v3094_v39  ;;  %v3919_v6 = vsel %vm5595_vm7, %v5071_v13, %v3918_v57  ;;  %v2593_v24 = vsel %vm5595_vm7, %v2591_v48, %v2592_v59 }
 0x217   : > { %5086 = vmatmul.msk.bf16.gmra.mxu0 %vm754_vm4, %v3994_v10  ;;  %v3466_v13 = vrot.slane %v3465_v54, 4 }
 0x218   : > { %v4144_v61 = vadd.f32 %v4070_v16, %v3747_v3  ;;  %v3022_v56 = vpop.f32.mrf.mxu2  ;;  %4863 = vmatmul.msk.bf16.gmra.mxu1 %vm754_vm4, %v2659_v38  ;;  %v3922_v38 = vsel %vm5595_vm7, %v3920_v62, %v3921_v63  ;;  %v3974_v3 = vunpack.c.l.b16 %v3919_v6  ;;  %v2810_v62 = vadd.f32 %v2739_v34, %v5951_v31 }
 0x219   : > { %v3095_v49 = vadd.f32 %v3022_v56, %v2809_v26  ;;  %v3975_v32 = vunpack.c.l.b16 %v3922_v38  ;;  %v5019_v26 = vld [vmem:[%s5409_s6 + $0xb4] sm:$0xf]  ;;  %v3480_v63 = vrot.slane %v3478_v41, 5  ;;  %v3925_v31 = vrot.slane %v6520_v47, 5  ;;  %v5310_v38 = vld [vmem:[%s5409_s6 + $0xac] sm:$0xf] }
 0x21a   : > { %v4239_v39 = vadd.f32 %v4238_v15, %v4144_v61  ;;  %v4278_v10 = vmul.f32 %v4144_v61, %v4144_v61  ;;  %v2590_v15 = vsel %vm5595_vm7, %v4848_v7, %v2589_v12  ;;  %v2641_v12 = vunpack.c.l.b16 %v2593_v24 }
 0x21b   : > { %v2640_v46 = vunpack.c.l.b16 %v2590_v15  ;;  %v3995_v59 = vpack.c.b16 %v3975_v32, %v3974_v3  ;;  %v3483_v34 = vshrl.u32 %v5019_v26, 16 }
 0x21c   : > { %v4309_v60 = vadd.f32 %v4308_v11, %v4278_v10  ;;  %v4072_v16 = vpop.f32.mrf.mxu0  ;;  %v3475_v11 = vor.u32 %v3474_v4, %v6539_v43  ;;  %v5056_v4 = vld [vmem:[%s5409_s6 + $0xa8] sm:$0xe]  ;;  %v3486_v10 = vshll.u32 %v5019_v26, 16  ;;  %v5311_v26 = vld [vmem:[%s5409_s6 + $0xb0] sm:$0x1] }
 0x21d   : > { %v3675_v55 = vpop.f32.mrf.mxu3  ;;  %4975 = vmatmul.msk.bf16.gmra.mxu2 %vm754_vm4, %v5138_v20  ;;  %v2741_v27 = vpop.f32.mrf.mxu1  ;;  %v6560_v20 = vld [vmem:[%s5409_s6 + $0xb8] sm:$0xf]  ;;  %v2660_v54 = vpack.c.b16 %v2641_v12, %v2640_v46 }
 0x21e   : > { %v3748_v57 = vadd.f32 %v3675_v55, %v3095_v49  ;;  %v3476_v56 = vrot.slane %v3475_v11, 4  ;;  %v2596_v55 = vrot.slane %v5310_v38, 5  ;;  %v3496_v15 = vshrl.u32 %v6560_v20, 16  ;;  %v4833_v11 = vld [vmem:[%s5409_s6 + $0xa8] sm:$0xe] }
 0x21f   : > { %v2811_v32 = vadd.f32 %v2741_v27, %v5964_v44  ;;  %v4849_v46 = vrot.slane %v4833_v11, 9 }
 0x220   : > { %v4145_v23 = vadd.f32 %v4072_v16, %v3748_v57  ;;  %v3025_v28 = vpop.f32.mrf.mxu2  ;;  %v3481_v24 = vsel %vm5421_vm3, %v3476_v56, %v3480_v63  ;;  %v3485_v57 = vrot.slane %v3483_v34, 4  ;;  %v2598_v12 = vrot.slane %v2596_v55, 4 }
 0x221   : > { %v3096_v25 = vadd.f32 %v3025_v28, %v2810_v62  ;;  %v5139_v28 = vld [vmem:[%s5409_s6 + $0xa8] sm:$0xff]  ;;  %v2599_v56 = vrot.slane %v5311_v26, 5  ;;  %v3498_v63 = vrot.slane %v3496_v15, 4  ;;  %v5057_v26 = vld [vmem:[%s5409_s6 + $0xb4] sm:$0xe] }
 0x222   : > { %v5156_v7 = vpack.c.bf16 %v4145_v23, %v4144_v61  ;;  %v4240_v48 = vadd.f32 %v4239_v39, %v4145_v23  ;;  %v4279_v33 = vmul.f32 %v4145_v23, %v4145_v23  ;;  %5039 = vmatmul.msk.bf16.gmra.mxu3 %vm754_vm4, %v3598_v42  ;;  %v3471_v61 = vsel %vm5421_vm3, %v3466_v13, %v6539_v43 }
 0x223   : > { %v3492_v39 = vshll.u32 %v6560_v20, 16  ;;  %v3579_v41 = vunpack.c.l.b16 %v3471_v61  ;;  %v3927_v43 = vrot.slane %v3925_v31, 4  ;;  %v3488_v42 = vrot.slane %v3486_v10, 5 }
 0x224   : > { %5224 = vst [vmem:[%s6477_s22 + $0x10] sm:$0xff] %v5156_v7   ;;  %v4310_v49 = vadd.f32 %v4309_v60, %v4279_v33  ;;  %v4075_v35 = vpop.f32.mrf.mxu0  ;;  %v5072_v60 = vrot.slane %v5056_v4, 9  ;;  %v3928_v23 = vrot.slane %v6544_v0, 5  ;;  %v6584_v4 = vld [vmem:[%s5409_s6 + $0xbc] sm:$0x1]  ;;  %v2600_v61 = vsel %vm5595_vm7, %v2598_v12, %v2599_v56 }
 0x225   : > { %v3678_v16 = vpop.f32.mrf.mxu3  ;;  %v2744_v6 = vpop.f32.mrf.mxu1  ;;  %v6579_v62 = vrot.slane %v3492_v39, 5  ;;  %v3489_v44 = vor.u32 %v3488_v42, %v3485_v57  ;;  %v3502_v39 = vshll.u32 %v6584_v4, 16  ;;  %v5022_v57 = vld [vmem:[%s5409_s6 + $0xc0] sm:$0xf] }
 0x226   : > { %v3749_v47 = vadd.f32 %v3678_v16, %v3096_v25  ;;  %v3926_v0 = vsel %vm5595_vm7, %v5072_v60, %v3925_v31  ;;  %v3929_v10 = vsel %vm5595_vm7, %v3927_v43, %v3928_v23  ;;  %v2812_v60 = vadd.f32 %v2744_v6, %v5978_v30 }
 0x227   : > { %5087 = vmatmul.msk.bf16.gmra.mxu0 %vm754_vm4, %v3995_v59  ;;  %v3580_v59 = vunpack.c.l.b16 %v3481_v24  ;;  %v3976_v38 = vunpack.c.l.b16 %v3926_v0  ;;  %v3977_v15 = vunpack.c.l.b16 %v3929_v10  ;;  %v3932_v30 = vrot.slane %v6560_v20, 5 }
 0x228   : > { %v4146_v3 = vadd.f32 %v4075_v35, %v3749_v47  ;;  %v3027_v13 = vpop.f32.mrf.mxu2  ;;  %4864 = vmatmul.msk.bf16.gmra.mxu1 %vm754_vm4, %v2660_v54  ;;  %v3490_v47 = vrot.slane %v3489_v44, 4  ;;  %v3507_v6 = vshrl.u32 %v5022_v57, 16  ;;  %v3510_v56 = vshll.u32 %v5022_v57, 16 }
 0x229   : > { %v3097_v25 = vadd.f32 %v3027_v13, %v2811_v32  ;;  %v3599_v16 = vpack.c.b16 %v3580_v59, %v3579_v41  ;;  %v3504_v32 = vrot.slane %v3502_v39, 5  ;;  %v6600_v13 = vld [vmem:[%s5409_s6 + $0xc4] sm:$0xf]  ;;  %v3996_v12 = vpack.c.b16 %v3977_v15, %v3976_v38 }
 0x22a   : > { %v4241_v7 = vadd.f32 %v4240_v48, %v4146_v3  ;;  %v4280_v33 = vmul.f32 %v4146_v3, %v4146_v3  ;;  %v2597_v48 = vsel %vm5595_vm7, %v4849_v46, %v2596_v55  ;;  %v2643_v55 = vunpack.c.l.b16 %v2600_v61 }
 0x22b   : > { %v2642_v43 = vunpack.c.l.b16 %v2597_v48  ;;  %v3520_v10 = vshrl.u32 %v6600_v13, 16  ;;  %v4834_v48 = vld [vmem:[%s5409_s6 + $0xb4] sm:$0xe]  ;;  %v3512_v39 = vrot.slane %v3510_v56, 5  ;;  %v3935_v15 = vrot.slane %v6584_v4, 5 }
 0x22c   : > { %v4311_v27 = vadd.f32 %v4310_v49, %v4280_v33  ;;  %v4077_v34 = vpop.f32.mrf.mxu0  ;;  %v3499_v49 = vor.u32 %v3498_v63, %v6579_v62 }
 0x22d   : > { %v3680_v35 = vpop.f32.mrf.mxu3  ;;  %4976 = vmatmul.msk.bf16.gmra.mxu2 %vm754_vm4, %v5139_v28  ;;  %v2746_v54 = vpop.f32.mrf.mxu1  ;;  %v3522_v57 = vrot.slane %v3520_v10, 4 }
 0x22e   : > { %v3750_v31 = vadd.f32 %v3680_v35, %v3097_v25  ;;  %v3500_v42 = vrot.slane %v3499_v49, 4  ;;  %v2661_v25 = vpack.c.b16 %v2643_v55, %v2642_v43  ;;  %v3509_v49 = vrot.slane %v3507_v6, 4  ;;  %v5313_v43 = vld [vmem:[%s5409_s6 + $0xbc] sm:$0x1] }
 0x22f   : > { %v2606_v55 = vrot.slane %v5313_v43, 5 }
 0x230   : > { %v4147_v24 = vadd.f32 %v4077_v34, %v3750_v31  ;;  %v3030_v11 = vpop.f32.mrf.mxu2  ;;  %v5312_v34 = vld [vmem:[%s5409_s6 + $0xb8] sm:$0xf]  ;;  %v3505_v35 = vsel %vm5421_vm3, %v3500_v42, %v3504_v32 }
 0x231   : > { %v3098_v41 = vadd.f32 %v3030_v11, %v2812_v60  ;;  %v2603_v0 = vrot.slane %v5312_v34, 5  ;;  %v4850_v60 = vrot.slane %v4834_v48, 9 }
 0x232   : > { %v5161_v23 = vpack.c.bf16 %v4147_v24, %v4146_v3  ;;  %v4242_v28 = vadd.f32 %v4241_v7, %v4147_v24  ;;  %v4281_v46 = vmul.f32 %v4147_v24, %v4147_v24  ;;  %5040 = vmatmul.msk.bf16.gmra.mxu3 %vm754_vm4, %v3599_v16  ;;  %v3495_v3 = vsel %vm5421_vm3, %v3490_v47, %v6579_v62  ;;  %v5140_v24 = vld [vmem:[%s5409_s6 + $0xb4] sm:$0xff] }
 0x233   : > { %v3516_v7 = vshll.u32 %v6600_v13, 16  ;;  %v3581_v61 = vunpack.c.l.b16 %v3495_v3  ;;  %v3934_v62 = vrot.slane %v3932_v30, 4  ;;  %v2813_v16 = vadd.f32 %v2746_v54, %v5991_v51 }
 0x234   : > { %5225 = vst [vmem:[%s6477_s22 + $0x18] sm:$0xff] %v5161_v23   ;;  %v4312_v63 = vadd.f32 %v4311_v27, %v4281_v46  ;;  %v4080_v33 = vpop.f32.mrf.mxu0  ;;  %v5073_v27 = vrot.slane %v5057_v26, 9  ;;  %v2605_v11 = vrot.slane %v2603_v0, 4  ;;  %v3582_v46 = vunpack.c.l.b16 %v3505_v35 }
 0x235   : > { %v3683_v59 = vpop.f32.mrf.mxu3  ;;  %v2749_v44 = vpop.f32.mrf.mxu1  ;;  %v3518_v47 = vrot.slane %v3516_v7, 5  ;;  %v3936_v4 = vsel %vm5595_vm7, %v3934_v62, %v3935_v15 }
 0x236   : > { %v3751_v20 = vadd.f32 %v3683_v59, %v3098_v41  ;;  %v6622_v41 = vld [vmem:[%s5409_s6 + $0xc8] sm:$0x1]  ;;  %v3933_v26 = vsel %vm5595_vm7, %v5073_v27, %v3932_v30  ;;  %v3600_v7 = vpack.c.b16 %v3582_v46, %v3581_v61  ;;  %v3979_v59 = vunpack.c.l.b16 %v3936_v4 }
 0x237   : > { %5088 = vmatmul.msk.bf16.gmra.mxu0 %vm754_vm4, %v3996_v12  ;;  %v3513_v12 = vor.u32 %v3512_v39, %v3509_v49  ;;  %v3978_v30 = vunpack.c.l.b16 %v3933_v26  ;;  %v5025_v49 = vld [vmem:[%s5409_s6 + $0xcc] sm:$0xf] }
 0x238   : > { %v4148_v31 = vadd.f32 %v4080_v33, %v3751_v20  ;;  %v3032_v38 = vpop.f32.mrf.mxu2  ;;  %4865 = vmatmul.msk.bf16.gmra.mxu1 %vm754_vm4, %v2661_v25  ;;  %v2607_v33 = vsel %vm5595_vm7, %v2605_v11, %v2606_v55  ;;  %v3523_v25 = vor.u32 %v3522_v57, %v3518_v47  ;;  %v2814_v20 = vadd.f32 %v2749_v44, %v6007_v1  ;;  %v6643_v55 = vld [vmem:[%s5409_s6 + $0xd0] sm:$0xf] }
 0x239   : > { %v3099_v23 = vadd.f32 %v3032_v38, %v2813_v16  ;;  %v3514_v34 = vrot.slane %v3513_v12, 4  ;;  %v3997_v15 = vpack.c.b16 %v3979_v59, %v3978_v30  ;;  %v3534_v46 = vshll.u32 %v5025_v49, 16  ;;  %v5141_v30 = vld [vmem:[%s5409_s6 + $0xc0] sm:$0xff] }
 0x23a   : > { %v4243_v42 = vadd.f32 %v4242_v28, %v4148_v31  ;;  %v4282_v32 = vmul.f32 %v4148_v31, %v4148_v31  ;;  %v2604_v28 = vsel %vm5595_vm7, %v4850_v60, %v2603_v0  ;;  %v2645_v0 = vunpack.c.l.b16 %v2607_v33  ;;  %v6745_v33 = vld [vmem:[#allocation2_spill] sm:$0xff] }
 0x23b   : > { %v2644_v27 = vunpack.c.l.b16 %v2604_v28  ;;  %v3524_v48 = vrot.slane %v3523_v25, 4  ;;  %v3939_v60 = vrot.slane %v6600_v13, 5  ;;  %v3519_v43 = vsel %vm5421_vm3, %v3514_v34, %v3518_v47 }
 0x23c   : > { %v4313_v51 = vadd.f32 %v4312_v63, %v4282_v32  ;;  %v4082_v54 = vpop.f32.mrf.mxu0  ;;  %v3526_v63 = vshll.u32 %v6622_v41, 16  ;;  %v5314_v32 = vld [vmem:[%s5409_s6 + $0xc4] sm:$0xf]  ;;  %v3583_v26 = vunpack.c.l.b16 %v3519_v43  ;;  %v3540_v4 = vshll.u32 %v6643_v55, 16 }
 0x23d   : > { %v3685_v6 = vpop.f32.mrf.mxu3  ;;  %4977 = vmatmul.msk.bf16.gmra.mxu2 %vm754_vm4, %v5140_v24  ;;  %v2751_v56 = vpop.f32.mrf.mxu1  ;;  %v5058_v24 = vld [vmem:[%s5409_s6 + $0xc0] sm:$0xe]  ;;  %v2662_v11 = vpack.c.b16 %v2645_v0, %v2644_v27  ;;  %v3941_v47 = vrot.slane %v3939_v60, 4 }
 0x23e   : > { %v3752_v3 = vadd.f32 %v3685_v6, %v3099_v23  ;;  %v3528_v62 = vrot.slane %v3526_v63, 5  ;;  %v2610_v23 = vrot.slane %v5314_v32, 5  ;;  %v3544_v6 = vshrl.u32 %v6643_v55, 16 }
 0x23f   : > { %v2815_v25 = vadd.f32 %v2751_v56, %v6745_v33 }
 0x240   : > { %v4149_v10 = vadd.f32 %v4082_v54, %v3752_v3  ;;  %v3035_v35 = vpop.f32.mrf.mxu2  ;;  %v3529_v13 = vsel %vm5421_vm3, %v3524_v48, %v3528_v62  ;;  %v5074_v54 = vrot.slane %v5058_v24, 9  ;;  %v3942_v3 = vrot.slane %v6622_v41, 5 }
 0x241   : > { %v3100_v61 = vadd.f32 %v3035_v35, %v2814_v20  ;;  %v2612_v34 = vrot.slane %v2610_v23, 4  ;;  %v3536_v35 = vrot.slane %v3534_v46, 5  ;;  %v3584_v62 = vunpack.c.l.b16 %v3529_v13 }
 0x242   : > { %v5166_v39 = vpack.c.bf16 %v4149_v10, %v4148_v31  ;;  %v4244_v16 = vadd.f32 %v4243_v42, %v4149_v10  ;;  %v4283_v38 = vmul.f32 %v4149_v10, %v4149_v10  ;;  %5041 = vmatmul.msk.bf16.gmra.mxu3 %vm754_vm4, %v3600_v7  ;;  %v3531_v31 = vshrl.u32 %v5025_v49, 16  ;;  %v5315_v10 = vld [vmem:[%s5409_s6 + $0xc8] sm:$0x1] }
 0x243   : > { %v2613_v20 = vrot.slane %v5315_v10, 5  ;;  %v3542_v49 = vrot.slane %v3540_v4, 5  ;;  %v3943_v41 = vsel %vm5595_vm7, %v3941_v47, %v3942_v3 }
 0x244   : > { %5226 = vst [vmem:[%s6477_s22 + $0x20] sm:$0xff] %v5166_v39   ;;  %v4314_v1 = vadd.f32 %v4313_v51, %v4283_v38  ;;  %v4085_v44 = vpop.f32.mrf.mxu0  ;;  %v4835_v51 = vld [vmem:[%s5409_s6 + $0xc0] sm:$0xe]  ;;  %v3533_v7 = vrot.slane %v3531_v31, 4  ;;  %v3546_v39 = vrot.slane %v3544_v6, 4  ;;  %v3601_v31 = vpack.c.b16 %v3584_v62, %v3583_v26 }
 0x245   : > { %v3688_v57 = vpop.f32.mrf.mxu3  ;;  %v2754_v42 = vpop.f32.mrf.mxu1  ;;  %v4851_v59 = vrot.slane %v4835_v51, 9  ;;  %v3981_v32 = vunpack.c.l.b16 %v3943_v41 }
 0x246   : > { %v3753_v12 = vadd.f32 %v3688_v57, %v3100_v61  ;;  %v3940_v61 = vsel %vm5595_vm7, %v5074_v54, %v3939_v60  ;;  %v3537_v43 = vor.u32 %v3536_v35, %v3533_v7  ;;  %v3547_v60 = vor.u32 %v3546_v39, %v3542_v49 }
 0x247   : > { %5089 = vmatmul.msk.bf16.gmra.mxu0 %vm754_vm4, %v3997_v15  ;;  %v5027_v15 = vld [vmem:[%s5409_s6 + $0xd4] sm:$0x1]  ;;  %v3980_v57 = vunpack.c.l.b16 %v3940_v61  ;;  %v2816_v13 = vadd.f32 %v2754_v42, %v6043_v52  ;;  %v5059_v52 = vld [vmem:[%s5409_s6 + $0xcc] sm:$0xe]  ;;  %v3946_v42 = vrot.slane %v6643_v55, 5 }
 0x248   : > { %v4150_v28 = vadd.f32 %v4085_v44, %v3753_v12  ;;  %v3037_v63 = vpop.f32.mrf.mxu2  ;;  %4866 = vmatmul.msk.bf16.gmra.mxu1 %vm754_vm4, %v2662_v11  ;;  %v2614_v11 = vsel %vm5595_vm7, %v2612_v34, %v2613_v20  ;;  %v3550_v46 = vshll.u32 %v5027_v15, 16  ;;  %v3538_v4 = vrot.slane %v3537_v43, 4 }
 0x249   : > { %v3101_v48 = vadd.f32 %v3037_v63, %v2815_v25  ;;  %v2647_v47 = vunpack.c.l.b16 %v2614_v11  ;;  %v3998_v26 = vpack.c.b16 %v3981_v32, %v3980_v57  ;;  %v3548_v63 = vrot.slane %v3547_v60, 4 }
 0x24a   : > { %v4245_v27 = vadd.f32 %v4244_v16, %v4150_v28  ;;  %v4284_v0 = vmul.f32 %v4150_v28, %v4150_v28  ;;  %v2611_v16 = vsel %vm5595_vm7, %v4851_v59, %v2610_v23  ;;  %v3552_v3 = vrot.slane %v3550_v46, 5 }
 0x24b   : > { %v2646_v51 = vunpack.c.l.b16 %v2611_v16  ;;  %v3948_v39 = vrot.slane %v3946_v42, 4  ;;  %v3949_v55 = vrot.slane %v5027_v15, 5 }
 0x24c   : > { %v4315_v56 = vadd.f32 %v4314_v1, %v4284_v0  ;;  %v4087_v38 = vpop.f32.mrf.mxu0  ;;  %v3553_v35 = vsel %vm5421_vm3, %v3548_v63, %v3552_v3 }
 0x24d   : > { %v3690_v24 = vpop.f32.mrf.mxu3  ;;  %4978 = vmatmul.msk.bf16.gmra.mxu2 %vm754_vm4, %v5141_v30  ;;  %v2756_v44 = vpop.f32.mrf.mxu1  ;;  %v2663_v59 = vpack.c.b16 %v2647_v47, %v2646_v51  ;;  %v3950_v43 = vsel %vm5595_vm7, %v3948_v39, %v3949_v55 }
 0x24e   : > { %v3754_v1 = vadd.f32 %v3690_v24, %v3101_v48  ;;  %v2817_v48 = vadd.f32 %v2756_v44, %v6063_v21  ;;  %v3983_v57 = vunpack.c.l.b16 %v3950_v43 }
 0x250   : > { %v4151_v12 = vadd.f32 %v4087_v38, %v3754_v1  ;;  %v3040_v54 = vpop.f32.mrf.mxu2 }
 0x251   : > { %v3102_v25 = vadd.f32 %v3040_v54, %v2816_v13 }
 0x252   : > { %v5171_v23 = vpack.c.bf16 %v4151_v12, %v4150_v28  ;;  %v4246_v6 = vadd.f32 %v4245_v27, %v4151_v12  ;;  %v4285_v33 = vmul.f32 %v4151_v12, %v4151_v12  ;;  %5042 = vmatmul.msk.bf16.gmra.mxu3 %vm754_vm4, %v3601_v31  ;;  %v3543_v28 = vsel %vm5421_vm3, %v3538_v4, %v3542_v49 }
 0x253   : > { %v5075_v27 = vrot.slane %v5059_v52, 9  ;;  %v3585_v38 = vunpack.c.l.b16 %v3543_v28  ;;  %v3586_v49 = vunpack.c.l.b16 %v3553_v35 }
 0x254   : > { %5227 = vst [vmem:[%s6477_s22 + $0x28] sm:$0xff] %v5171_v23   ;;  %v4316_v7 = vadd.f32 %v4315_v56, %v4285_v33  ;;  %v4090_v30 = vpop.f32.mrf.mxu0  ;;  %v5142_v56 = vld [vmem:[%s5409_s6 + $0xcc] sm:$0xff] }
 0x255   : > { %v3693_v34 = vpop.f32.mrf.mxu3  ;;  %v2759_v10 = vpop.f32.mrf.mxu1  ;;  %v3947_v36 = vsel %vm5595_vm7, %v5075_v27, %v3946_v42  ;;  %v3602_v1 = vpack.c.b16 %v3586_v49, %v3585_v38 }
 0x256   : > { %v3755_v20 = vadd.f32 %v3693_v34, %v3102_v25  ;;  %v3982_v31 = vunpack.c.l.b16 %v3947_v36  ;;  %v2818_v60 = vadd.f32 %v2759_v10, %v6082_v29 }
 0x257   : > { %5090 = vmatmul.msk.bf16.gmra.mxu0 %vm754_vm4, %v3998_v26  ;;  %v6746_v26 = vld [vmem:[#allocation3_spill] sm:$0xff] }
 0x258   : > { %v4152_v0 = vadd.f32 %v4090_v30, %v3755_v20  ;;  %v3042_v62 = vpop.f32.mrf.mxu2  ;;  %4867 = vmatmul.msk.bf16.gmra.mxu1 %vm754_vm4, %v2663_v59  ;;  %v3999_v51 = vpack.c.b16 %v3983_v57, %v3982_v31 }
 0x259   : > { %v3103_v24 = vadd.f32 %v3042_v62, %v2817_v48 }
 0x25a   : > { %v4247_v61 = vadd.f32 %v4246_v6, %v4152_v0  ;;  %v4286_v41 = vmul.f32 %v4152_v0, %v4152_v0 }
 0x25c   : > { %v4317_v16 = vadd.f32 %v4316_v7, %v4286_v41  ;;  %v4092_v11 = vpop.f32.mrf.mxu0 }
 0x25d   : > { %v3695_v21 = vpop.f32.mrf.mxu3  ;;  %4979 = vmatmul.msk.bf16.gmra.mxu2 %vm754_vm4, %v5142_v56  ;;  %v2761_v44 = vpop.f32.mrf.mxu1 }
 0x25e   : > { %v3756_v15 = vadd.f32 %v3695_v21, %v3103_v24  ;;  %v2819_v63 = vadd.f32 %v2761_v44, %v6746_v26 }
 0x260   : > { %v4153_v32 = vadd.f32 %v4092_v11, %v3756_v15  ;;  %v3045_v46 = vpop.f32.mrf.mxu2 }
 0x261   : > { %v3104_v18 = vadd.f32 %v3045_v46, %v2818_v60 }
 0x262   : > { %v5176_v12 = vpack.c.bf16 %v4153_v32, %v4152_v0  ;;  %v4248_v13 = vadd.f32 %v4247_v61, %v4153_v32  ;;  %v4287_v54 = vmul.f32 %v4153_v32, %v4153_v32  ;;  %5043 = vmatmul.msk.bf16.gmra.mxu3 %vm754_vm4, %v3602_v1 }
 0x264   : > { %5228 = vst [vmem:[%s6477_s22 + $0x30] sm:$0xff] %v5176_v12   ;;  %v4318_v47 = vadd.f32 %v4317_v16, %v4287_v54  ;;  %v4095_v4 = vpop.f32.mrf.mxu0 }
 0x265   : > { %v3698_v23 = vpop.f32.mrf.mxu3  ;;  %v2764_v6 = vpop.f32.mrf.mxu1 }
 0x266   : > { %v3757_v33 = vadd.f32 %v3698_v23, %v3104_v18  ;;  %v2820_v28 = vadd.f32 %v2764_v6, %v6125_v5 }
 0x267   : > { %5091 = vmatmul.msk.bf16.gmra.mxu0 %vm754_vm4, %v3999_v51 }
 0x268   : > { %v4154_v25 = vadd.f32 %v4095_v4, %v3757_v33  ;;  %v3047_v29 = vpop.f32.mrf.mxu2 }
 0x269   : > { %v3105_v30 = vadd.f32 %v3047_v29, %v2819_v63 }
 0x26a   : > { %v4249_v3 = vadd.f32 %v4248_v13, %v4154_v25  ;;  %v4288_v7 = vmul.f32 %v4154_v25, %v4154_v25 }
 0x26c   : > { %v4319_v59 = vadd.f32 %v4318_v47, %v4288_v7  ;;  %v4097_v52 = vpop.f32.mrf.mxu0 }
 0x26d   : > { %v3700_v42 = vpop.f32.mrf.mxu3  ;;  %v2766_v34 = vpop.f32.mrf.mxu1 }
 0x26e   : > { %v3758_v10 = vadd.f32 %v3700_v42, %v3105_v30  ;;  %v2821_v24 = vadd.f32 %v2766_v34, %v6149_v22 }
 0x270   : > { %v4155_v20 = vadd.f32 %v4097_v52, %v3758_v10  ;;  %v3050_v35 = vpop.f32.mrf.mxu2 }
 0x271   : > { %v3106_v62 = vadd.f32 %v3050_v35, %v2820_v28 }
 0x272   : > { %v5181_v27 = vpack.c.bf16 %v4155_v20, %v4154_v25  ;;  %v4250_v0 = vadd.f32 %v4249_v3, %v4155_v20  ;;  %v4289_v48 = vmul.f32 %v4155_v20, %v4155_v20 }
 0x274   : > { %5229 = vst [vmem:[%s6477_s22 + $0x38] sm:$0xff] %v5181_v27   ;;  %v4320_v39 = vadd.f32 %v4319_v59, %v4289_v48  ;;  %v4100_v55 = vpop.f32.mrf.mxu0 }
 0x275   : > { %v3703_v56 = vpop.f32.mrf.mxu3  ;;  %v2769_v38 = vpop.f32.mrf.mxu1 }
 0x276   : > { %v3759_v61 = vadd.f32 %v3703_v56, %v3106_v62  ;;  %v2822_v31 = vadd.f32 %v2769_v38, %v6168_v19 }
 0x278   : > { %v4156_v41 = vadd.f32 %v4100_v55, %v3759_v61  ;;  %v3052_v49 = vpop.f32.mrf.mxu2 }
 0x279   : > { %v3107_v36 = vadd.f32 %v3052_v49, %v2821_v24 }
 0x27a   : > { %v4251_v16 = vadd.f32 %v4250_v0, %v4156_v41  ;;  %v4290_v11 = vmul.f32 %v4156_v41, %v4156_v41 }
 0x27c   : > { %v4321_v5 = vadd.f32 %v4320_v39, %v4290_v11  ;;  %v4102_v43 = vpop.f32.mrf.mxu0 }
 0x27d   : > { %v3705_v21 = vpop.f32.mrf.mxu3  ;;  %v2771_v44 = vpop.f32.mrf.mxu1 }
 0x27e   : > { %v3760_v15 = vadd.f32 %v3705_v21, %v3107_v36  ;;  %v2823_v4 = vadd.f32 %v2771_v44, %v6192_v53 }
 0x280   : > { %v4157_v1 = vadd.f32 %v4102_v43, %v3760_v15  ;;  %v3055_v57 = vpop.f32.mrf.mxu2 }
 0x281   : > { %v3108_v12 = vadd.f32 %v3055_v57, %v2822_v31 }
 0x282   : > { %v5186_v32 = vpack.c.bf16 %v4157_v1, %v4156_v41  ;;  %v4252_v60 = vadd.f32 %v4251_v16, %v4157_v1  ;;  %v4291_v46 = vmul.f32 %v4157_v1, %v4157_v1 }
 0x284   : > { %5230 = vst [vmem:[%s6477_s22 + $0x40] sm:$0xff] %v5186_v32   ;;  %v4322_v22 = vadd.f32 %v4321_v5, %v4291_v46  ;;  %v4105_v13 = vpop.f32.mrf.mxu0  ;;  %v6747_v32 = vld [vmem:[#allocation4_spill] sm:$0xff] }
 0x285   : > { %v3708_v54 = vpop.f32.mrf.mxu3  ;;  %v2774_v18 = vpop.f32.mrf.mxu1 }
 0x286   : > { %v3761_v51 = vadd.f32 %v3708_v54, %v3108_v12  ;;  %v2824_v30 = vadd.f32 %v2774_v18, %v6211_v2 }
 0x288   : > { %v4158_v47 = vadd.f32 %v4105_v13, %v3761_v51  ;;  %v3057_v23 = vpop.f32.mrf.mxu2 }
 0x289   : > { %v3109_v25 = vadd.f32 %v3057_v23, %v2823_v4 }
 0x28a   : > { %v4253_v6 = vadd.f32 %v4252_v60, %v4158_v47  ;;  %v4292_v33 = vmul.f32 %v4158_v47, %v4158_v47 }
 0x28c   : > { %v4323_v19 = vadd.f32 %v4322_v22, %v4292_v33  ;;  %v4107_v26 = vpop.f32.mrf.mxu0 }
 0x28d   : > { %v3710_v63 = vpop.f32.mrf.mxu3  ;;  %v2776_v29 = vpop.f32.mrf.mxu1 }
 0x28e   : > { %v3762_v3 = vadd.f32 %v3710_v63, %v3109_v25  ;;  %v2825_v48 = vadd.f32 %v2776_v29, %v6235_v40 }
 0x290   : > { %v4159_v7 = vadd.f32 %v4107_v26, %v3762_v3  ;;  %v3060_v59 = vpop.f32.mrf.mxu2 }
 0x291   : > { %v3110_v10 = vadd.f32 %v3060_v59, %v2824_v30 }
 0x292   : > { %v5191_v52 = vpack.c.bf16 %v4159_v7, %v4158_v47  ;;  %v4254_v42 = vadd.f32 %v4253_v6, %v4159_v7  ;;  %v4293_v34 = vmul.f32 %v4159_v7, %v4159_v7 }
 0x294   : > { %5231 = vst [vmem:[%s6477_s22 + $0x48] sm:$0xff] %v5191_v52   ;;  %v4324_v53 = vadd.f32 %v4323_v19, %v4293_v34  ;;  %v4110_v20 = vpop.f32.mrf.mxu0 }
 0x295   : > { %v3713_v28 = vpop.f32.mrf.mxu3  ;;  %v2779_v35 = vpop.f32.mrf.mxu1 }
 0x296   : > { %v3763_v27 = vadd.f32 %v3713_v28, %v3110_v10  ;;  %v2826_v16 = vadd.f32 %v2779_v35, %v6254_v8 }
 0x298   : > { %v4160_v0 = vadd.f32 %v4110_v20, %v3763_v27  ;;  %v3062_v62 = vpop.f32.mrf.mxu2 }
 0x299   : > { %v3111_v56 = vadd.f32 %v3062_v62, %v2825_v48 }
 0x29a   : > { %v4255_v39 = vadd.f32 %v4254_v42, %v4160_v0  ;;  %v4294_v55 = vmul.f32 %v4160_v0, %v4160_v0 }
 0x29c   : > { %v4325_v2 = vadd.f32 %v4324_v53, %v4294_v55  ;;  %v4112_v38 = vpop.f32.mrf.mxu0 }
 0x29d   : > { %v3715_v61 = vpop.f32.mrf.mxu3  ;;  %v2781_v41 = vpop.f32.mrf.mxu1 }
 0x29e   : > { %v3764_v24 = vadd.f32 %v3715_v61, %v3111_v56  ;;  %v2827_v60 = vadd.f32 %v2781_v41, %v6747_v32 }
 0x2a0   : > { %v4161_v49 = vadd.f32 %v4112_v38, %v3764_v24  ;;  %v3065_v11 = vpop.f32.mrf.mxu2 }
 0x2a1   : > { %v3112_v21 = vadd.f32 %v3065_v11, %v2826_v16 }
 0x2a2   : > { %v5196_v36 = vpack.c.bf16 %v4161_v49, %v4160_v0  ;;  %v4256_v5 = vadd.f32 %v4255_v39, %v4161_v49  ;;  %v4295_v43 = vmul.f32 %v4161_v49, %v4161_v49 }
 0x2a4   : > { %5232 = vst [vmem:[%s6477_s22 + $0x50] sm:$0xff] %v5196_v36   ;;  %v4326_v40 = vadd.f32 %v4325_v2, %v4295_v43  ;;  %v4115_v44 = vpop.f32.mrf.mxu0 }
 0x2a5   : > { %v3718_v15 = vpop.f32.mrf.mxu3  ;;  %v2784_v1 = vpop.f32.mrf.mxu1 }
 0x2a6   : > { %v3765_v31 = vadd.f32 %v3718_v15, %v3112_v21  ;;  %v2828_v23 = vadd.f32 %v2784_v1, %v6295_v17 }
 0x2a8   : > { %v4162_v57 = vadd.f32 %v4115_v44, %v3765_v31  ;;  %v3067_v46 = vpop.f32.mrf.mxu2 }
 0x2a9   : > { %v3113_v13 = vadd.f32 %v3067_v46, %v2827_v60 }
 0x2aa   : > { %v4257_v12 = vadd.f32 %v4256_v5, %v4162_v57  ;;  %v4296_v22 = vmul.f32 %v4162_v57, %v4162_v57 }
 0x2ac   : > { %v4327_v8 = vadd.f32 %v4326_v40, %v4296_v22  ;;  %v4117_v54 = vpop.f32.mrf.mxu0 }
 0x2ad   : > { %v3720_v18 = vpop.f32.mrf.mxu3  ;;  %v2786_v51 = vpop.f32.mrf.mxu1 }
 0x2ae   : > { %v3766_v47 = vadd.f32 %v3720_v18, %v3113_v13  ;;  %v2829_v52 = vadd.f32 %v2786_v51, %v6316_v50 }
 0x2b0   : > { %v4163_v4 = vadd.f32 %v4117_v54, %v3766_v47  ;;  %v3070_v6 = vpop.f32.mrf.mxu2 }
 0x2b1   : > { %v3114_v26 = vadd.f32 %v3070_v6, %v2828_v23 }
 0x2b2   : > { %v5201_v33 = vpack.c.bf16 %v4163_v4, %v4162_v57  ;;  %v4258_v25 = vadd.f32 %v4257_v12, %v4163_v4  ;;  %v4297_v19 = vmul.f32 %v4163_v4, %v4163_v4 }
 0x2b4   : > { %5233 = vst [vmem:[%s6477_s22 + $0x58] sm:$0xff] %v5201_v33   ;;  %v4328_v63 = vadd.f32 %v4327_v8, %v4297_v19  ;;  %v4120_v29 = vpop.f32.mrf.mxu0 }
 0x2b5   : > { %v3723_v3 = vpop.f32.mrf.mxu3  ;;  %v2789_v7 = vpop.f32.mrf.mxu1 }
 0x2b6   : > { %v3767_v30 = vadd.f32 %v3723_v3, %v3114_v26  ;;  %v2830_v48 = vadd.f32 %v2789_v7, %v6334_v9 }
 0x2b8   : > { %v4164_v59 = vadd.f32 %v4120_v29, %v3767_v30  ;;  %v3072_v42 = vpop.f32.mrf.mxu2 }
 0x2b9   : > { %v3115_v53 = vadd.f32 %v3072_v42, %v2829_v52 }
 0x2ba   : > { %v4259_v34 = vadd.f32 %v4258_v25, %v4164_v59  ;;  %v4298_v10 = vmul.f32 %v4164_v59, %v4164_v59 }
 0x2bc   : > { %v4329_v17 = vadd.f32 %v4328_v63, %v4298_v10  ;;  %v4122_v20 = vpop.f32.mrf.mxu0  ;;  %v6748_v63 = vld [vmem:[#allocation5_spill] sm:$0xff] }
 0x2bd   : > { %v3725_v28 = vpop.f32.mrf.mxu3  ;;  %v2791_v35 = vpop.f32.mrf.mxu1 }
 0x2be   : > { %v3768_v27 = vadd.f32 %v3725_v28, %v3115_v53  ;;  %v2831_v16 = vadd.f32 %v2791_v35, %v6357_v45 }
 0x2c0   : > { %v4165_v0 = vadd.f32 %v4122_v20, %v3768_v27  ;;  %v3075_v62 = vpop.f32.mrf.mxu2 }
 0x2c1   : > { %v3116_v2 = vadd.f32 %v3075_v62, %v2830_v48 }
 0x2c2   : > { %v5206_v39 = vpack.c.bf16 %v4165_v0, %v4164_v59  ;;  %v4260_v55 = vadd.f32 %v4259_v34, %v4165_v0  ;;  %v4299_v56 = vmul.f32 %v4165_v0, %v4165_v0 }
 0x2c4   : > { %5234 = vst [vmem:[%s6477_s22 + $0x60] sm:$0xff] %v5206_v39   ;;  %v4330_v50 = vadd.f32 %v4329_v17, %v4299_v56  ;;  %v4125_v38 = vpop.f32.mrf.mxu0 }
 0x2c5   : > { %v3728_v61 = vpop.f32.mrf.mxu3  ;;  %v2794_v24 = vpop.f32.mrf.mxu1 }
 0x2c6   : > { %v3769_v41 = vadd.f32 %v3728_v61, %v3116_v2  ;;  %v2832_v1 = vadd.f32 %v2794_v24, %v6377_v37 }
 0x2c8   : > { %v4166_v49 = vadd.f32 %v4125_v38, %v3769_v41  ;;  %v3077_v11 = vpop.f32.mrf.mxu2 }
 0x2c9   : > { %v3117_v43 = vadd.f32 %v3077_v11, %v2831_v16 }
 0x2ca   : > { %v4261_v36 = vadd.f32 %v4260_v55, %v4166_v49  ;;  %v4300_v5 = vmul.f32 %v4166_v49, %v4166_v49 }
 0x2cc   : > { %v4331_v9 = vadd.f32 %v4330_v50, %v4300_v5  ;;  %v4127_v21 = vpop.f32.mrf.mxu0 }
 0x2cd   : > { %v3730_v40 = vpop.f32.mrf.mxu3  ;;  %v2796_v57 = vpop.f32.mrf.mxu1 }
 0x2ce   : > { %v3770_v44 = vadd.f32 %v3730_v40, %v3117_v43  ;;  %v2833_v18 = vadd.f32 %v2796_v57, %v6400_v58 }
 0x2d0   : > { %v4167_v15 = vadd.f32 %v4127_v21, %v3770_v44  ;;  %v3080_v31 = vpop.f32.mrf.mxu2 }
 0x2d1   : > { %v3118_v12 = vadd.f32 %v3080_v31, %v2832_v1 }
 0x2d2   : > { %v5211_v32 = vpack.c.bf16 %v4167_v15, %v4166_v49  ;;  %v4262_v60 = vadd.f32 %v4261_v36, %v4167_v15  ;;  %v4301_v46 = vmul.f32 %v4167_v15, %v4167_v15 }
 0x2d4   : > { %5235 = vst [vmem:[%s6477_s22 + $0x68] sm:$0xff] %v5211_v32   ;;  %v4332_v45 = vadd.f32 %v4331_v9, %v4301_v46  ;;  %v4130_v22 = vpop.f32.mrf.mxu0 }
 0x2d5   : > { %v3733_v13 = vpop.f32.mrf.mxu3  ;;  %v2799_v37 = vpop.f32.mrf.mxu1 }
 0x2d6   : > { %v3771_v8 = vadd.f32 %v3733_v13, %v3118_v12  ;;  %v2834_v29 = vadd.f32 %v2799_v37, %v6748_v63 }
 0x2d8   : > { %v4168_v54 = vadd.f32 %v4130_v22, %v3771_v8  ;;  %v3082_v51 = vpop.f32.mrf.mxu2 }
 0x2d9   : > { %v3119_v23 = vadd.f32 %v3082_v51, %v2833_v18 }
 0x2da   : > { %v4263_v47 = vadd.f32 %v4262_v60, %v4168_v54  ;;  %v4302_v4 = vmul.f32 %v4168_v54, %v4168_v54 }
 0x2dc   : > { %v4333_v6 = vadd.f32 %v4332_v45, %v4302_v4  ;;  %v4132_v33 = vpop.f32.mrf.mxu0 }
 0x2dd   : > { %v3735_v25 = vpop.f32.mrf.mxu3  ;;  %v2801_v42 = vpop.f32.mrf.mxu1 }
 0x2de   : > { %v3772_v19 = vadd.f32 %v3735_v25, %v3119_v23  ;;  %v2835_v20 = vadd.f32 %v2801_v42, %v6439_v14 }
 0x2e0   : > { %v4169_v26 = vadd.f32 %v4132_v33, %v3772_v19  ;;  %v3085_v3 = vpop.f32.mrf.mxu2 }
 0x2e1   : > { %v3120_v52 = vadd.f32 %v3085_v3, %v2834_v29 }
 0x2e2   : > { %v5216_v7 = vpack.c.bf16 %v4169_v26, %v4168_v54  ;;  %v4264_v30 = vadd.f32 %v4263_v47, %v4169_v26  ;;  %v4303_v59 = vmul.f32 %v4169_v26, %v4169_v26 }
 0x2e4   : > { %5236 = vst [vmem:[%s6477_s22 + $0x70] sm:$0xff] %v5216_v7   ;;  %v4334_v58 = vadd.f32 %v4333_v6, %v4303_v59  ;;  %v4135_v34 = vpop.f32.mrf.mxu0 }
 0x2e5   : > { %v3738_v10 = vpop.f32.mrf.mxu3 }
 0x2e6   : > { %v3773_v53 = vadd.f32 %v3738_v10, %v3120_v52 }
 0x2e8   : > { %v4170_v17 = vadd.f32 %v4135_v34, %v3773_v53  ;;  %v3087_v28 = vpop.f32.mrf.mxu2 }
 0x2e9   : > { %v3121_v0 = vadd.f32 %v3087_v28, %v2835_v20 }
 0x2ea   : > { %v4265_v35 = vadd.f32 %v4264_v30, %v4170_v17  ;;  %v4304_v27 = vmul.f32 %v4170_v17, %v4170_v17 }
 0x2ec   : > { %v4335_v48 = vadd.f32 %v4334_v58, %v4304_v27  ;;  %v4137_v55 = vpop.f32.mrf.mxu0 }
 0x2ed   : > { %v3740_v62 = vpop.f32.mrf.mxu3 }
 0x2ee   : > { %v3774_v39 = vadd.f32 %v3740_v62, %v3121_v0 }
 0x2f0   : > { %v4171_v56 = vadd.f32 %v4137_v55, %v3774_v39 }
 0x2f2   : > { %v5221_v2 = vpack.c.bf16 %v4171_v56, %v4170_v17  ;;  %v4266_v50 = vadd.f32 %v4265_v35, %v4171_v56  ;;  %v4305_v38 = vmul.f32 %v4171_v56, %v4171_v56 }
 0x2f4   : > { %5237 = vst [vmem:[%s6477_s22 + $0x78] sm:$0xff] %v5221_v2   ;;  %v4267_v61 = vrot.slane %v4266_v50, 4  ;;  %v4336_v41 = vadd.f32 %v4335_v48, %v4305_v38 }
 0x2f6   : > { %v4268_v24 = vadd.f32 %v4267_v61, %v4266_v50  ;;  %v4337_v49 = vrot.slane %v4336_v41, 4 }
 0x2f8   : > { %v4269_v14 = vrot.slane %v4268_v24, 2  ;;  %v4338_v16 = vadd.f32 %v4337_v49, %v4336_v41 }
 0x2fa   : > { %v4270_v11 = vadd.f32 %v4269_v14, %v4268_v24  ;;  %v4339_v36 = vrot.slane %v4338_v16, 2 }
 0x2fc   : > { %v4271_v5 = vrot.slane %v4270_v11, 1  ;;  %v4340_v43 = vadd.f32 %v4339_v36, %v4338_v16 }
 0x2fe   : > { %v4272_v9 = vadd.f32 %v4271_v5, %v4270_v11  ;;  %v4341_v21 = vrot.slane %v4340_v43, 1 }
 0x300   : > { %4273 = vst [vmem:[%s261_s25] sm:$0x1] %v4272_v9  ;;  %v4342_v40 = vadd.f32 %v4341_v21, %v4340_v43 }
 0x302   : > { %4343 = vst [vmem:[%s267_s28] sm:$0x1] %v4342_v40 }
 0x303 PF: > { %s15_s17 = sadd.s32 1, %s5338_s17   ;;  %s6749_s15 = smov %s5334_s16 }
 0x304   : > { %p12_p5 = scmp.ge.s32.totalorder %s15_s17, 4   ;;  %s6750_s16 = smov %s6752_s18 }
 0x306   :  { %14 = sbr.rel (!%p12_p5) target bundleno = 2 (0x2), region = 87 }

</bundles_post_ra>
